<compile_context>
chip_gen: v5e
topology: v5e:2x2
jax: 0.10.0
libtpu: 0.0.40
codegen_flags: <defaults>
</compile_context>

<pallas_src>
import jax
import jax.numpy as jnp
from jax.experimental import pallas as pl
from jax.experimental.pallas import tpu as pltpu

# ------------------------------ synthetic config ------------------------------
EMBED_DIM = 128
PATCH = 8
TEMPLATE_SIZE = 16
SEARCH_SIZE = 32
NZ = (TEMPLATE_SIZE // PATCH) ** 2          # num_patches_z = 4
NX = (SEARCH_SIZE // PATCH) ** 2            # num_patches_x = 16
NUM_VIS = 1 + NZ + NX                       # cls + z + x = 21
VIS_PAD = 24                                # 21 padded to a sublane multiple of 8
L_TXT = 8
JOINT_PAD = VIS_PAD + L_TXT                 # 32 (29 padded)
VOCAB = 64
DEPTH = 4
FUSION_LAYER = (2, 3)
CONT_LOSS_LAYER = (1, 3)
NUM_CONT = len(CONT_LOSS_LAYER)
MLP_RATIO = 4
PATCH_DIM = 3 * PATCH * PATCH               # 192
PD_PAD = 256                                # patch vector padded to a lane multiple
NEG_INF = -1e9

VIT_KEYS = ('ln1_g', 'ln1_b', 'wqkv', 'bqkv', 'wo', 'bo',
            'ln2_g', 'ln2_b', 'w1', 'b1', 'w2', 'b2')
STAR_KEYS = ('w12', 'b12', 'wg', 'bg')


# ------------------------------ in-kernel helpers ------------------------------
def _ln(x, g, b, eps=1e-5):
    mu = jnp.mean(x, axis=-1, keepdims=True)
    var = jnp.mean(jnp.square(x - mu), axis=-1, keepdims=True)
    return (x - mu) * jax.lax.rsqrt(var + eps) * g + b


def _l2n(a):
    return a * jax.lax.rsqrt(jnp.sum(a * a, axis=-1, keepdims=True) + 1e-12)


def _star_mlp(x, w):
    # StarMLP: f1/f2 fused into a single (D, 2D) GEMM; clamp; x1*x2; g().
    # NOTE: matches the PyTorch reference, where act(x1)*x2 is overwritten by
    #       x1*x2, so the activation is effectively discarded.
    w12, b12, wg, bg = w
    bsz, n, d = x.shape
    h = jnp.dot(x.astype(jnp.bfloat16).reshape(bsz * n, d), w12[0],
                preferred_element_type=jnp.float32) + b12[0]
    h = jnp.clip(h, -1000.0, 1000.0)
    h = h[:, :d] * h[:, d:]
    out = jnp.dot(h.astype(jnp.bfloat16), wg[0],
                  preferred_element_type=jnp.float32) + bg[0]
    return out.reshape(bsz, n, d)


def _block(x, add_mask, w):
    # Pre-norm single-head transformer block (stand-in for external ViT/BERT blocks).
    # Weight GEMMs fold batch into the M dimension; attention stays batched.
    (ln1_g, ln1_b, wqkv, bqkv, wo, bo, ln2_g, ln2_b, w1, b1, w2, b2) = w
    bsz, n, d = x.shape
    h = _ln(x, ln1_g[0], ln1_b[0])
    qkv = (jnp.dot(h.astype(jnp.bfloat16).reshape(bsz * n, d), wqkv[0],
                   preferred_element_type=jnp.float32) + bqkv[0]).reshape(bsz, n, 3 * d)
    q = qkv[..., :d].astype(jnp.bfloat16)
    k = qkv[..., d:2 * d].astype(jnp.bfloat16)
    v = qkv[..., 2 * d:].astype(jnp.bfloat16)
    s = jnp.einsum('bqd,bkd->bqk', q, k, preferred_element_type=jnp.float32)
    s = s * (d ** -0.5) + add_mask                      # additive key mask (B, 1, N)
    s = s - jnp.max(s, axis=-1, keepdims=True)
    p = jnp.exp(s)
    p = p * pl.reciprocal(jnp.sum(p, axis=-1, keepdims=True), approx=True)
    attn = jnp.einsum('bqk,bkd->bqd', p.astype(jnp.bfloat16), v,
                      preferred_element_type=jnp.float32)
    attn = (jnp.dot(attn.reshape(bsz * n, d).astype(jnp.bfloat16), wo[0],
                    preferred_element_type=jnp.float32) + bo[0]).reshape(bsz, n, d)
    x = x + attn
    h2 = _ln(x, ln2_g[0], ln2_b[0])
    m1 = jnp.dot(h2.astype(jnp.bfloat16).reshape(bsz * n, d), w1[0],
                 preferred_element_type=jnp.float32) + b1[0]
    m1 = jax.nn.gelu(m1, approximate=True)
    m2 = (jnp.dot(m1.astype(jnp.bfloat16), w2[0],
                  preferred_element_type=jnp.float32) + b2[0]).reshape(bsz, n, d)
    return x + m2


def _contrastive(img, txt, tmask_b, scale):
    # img: (B, VIS_PAD, D) f32, txt: (B, L_TXT, D) f32, tmask_b: (B, L_TXT, D) 0/1.
    # Returns the full logits group (B, 3, VIS_PAD); flag gather + x-column slice
    # (padded / cls / z columns dropped) happen in plain JAX outside.
    vis_token = img[:, 0:1, :]
    num = jnp.sum(txt * tmask_b, axis=1, keepdims=True)
    den = jnp.maximum(jnp.sum(tmask_b, axis=1, keepdims=True), 1e-6)
    txt_token = num / den                               # 'mean' text token
    xn = _l2n(img)
    vn = _l2n(vis_token)
    tn = _l2n(txt_token)
    vl = scale * jnp.sum(xn * vn, axis=-1)              # (B, VIS_PAD)
    tl = scale * jnp.sum(xn * tn, axis=-1)
    av = 0.5 * (vl + tl)
    return jnp.concatenate([vl[:, None, :], tl[:, None, :], av[:, None, :]], axis=1)


# --------------------------------- fused kernel --------------------------------
def fused_kernel(*refs):
    (patches_ref, base_ref, txt_raw_ref, tln_g_ref, tln_b_ref,
     vis_add_ref, txt_add_ref, joint_add_ref, tmask_ref, scale_ref,
     patch_w_ref) = refs[:11]
    wrefs = refs[11:11 + 32]
    vit_w = wrefs[0:12]
    bert_w = wrefs[12:24]
    star_img_w = wrefs[24:28]
    star_txt_w = wrefs[28:32]
    img_ref, txt_ref, logits_ref = refs[-3:]

    i = pl.program_id(0)
    bsz = patches_ref.shape[0]

    # ---- layer-0 prologue: patch-embed GEMM + pos/cls, BERT-embedding layernorm ----
    @pl.when(i == 0)
    def _init():
        pp = patches_ref[...].astype(jnp.bfloat16).reshape(bsz * VIS_PAD, PD_PAD)
        proj = jnp.dot(pp, patch_w_ref[...],
                       preferred_element_type=jnp.float32
                       ).reshape(bsz, VIS_PAD, EMBED_DIM)
        img_ref[...] = base_ref[...] + proj    # base = cls+pos / pos+bias, pad rows 0
        txt_ref[...] = _ln(txt_raw_ref[...], tln_g_ref[...], tln_b_ref[...])
        logits_ref[...] = jnp.zeros_like(logits_ref)

    is_fusion = (i == FUSION_LAYER[0])
    for l in FUSION_LAYER[1:]:
        is_fusion = jnp.logical_or(is_fusion, i == l)

    # ---- non-fusion layer: StarMLP + ViT block (image), StarMLP + BERT layer (text)
    @pl.when(jnp.logical_not(is_fusion))
    def _separate():
        img = _star_mlp(img_ref[...], star_img_w)
        img_ref[...] = _block(img, vis_add_ref[...], vit_w)
        txt = _star_mlp(txt_ref[...], star_txt_w)
        txt_ref[...] = _block(txt, txt_add_ref[...], bert_w)

    # ---- fusion layer: joint attention over [visual ; text] tokens ----
    @pl.when(is_fusion)
    def _fusion():
        joint = jnp.concatenate([img_ref[...], txt_ref[...]], axis=1)
        joint = _block(joint, joint_add_ref[...], vit_w)
        img_ref[...] = joint[:, :VIS_PAD]
        txt_ref[...] = joint[:, VIS_PAD:]

    # ---- contrastive logits at CONT_LOSS_LAYER, written into resident output ----
    for slot, layer in enumerate(CONT_LOSS_LAYER):
        @pl.when(i == layer)
        def _cont(slot=slot):
            logits_ref[slot] = _contrastive(img_ref[...], txt_ref[...],
                                            tmask_ref[...], scale_ref[0])


# ------------------------------ pallas_call wrapper -----------------------------
def _const_spec(a):
    nd = a.ndim
    return pl.BlockSpec(a.shape, lambda i, nd=nd: (0,) * nd)


def _layer_spec(a):
    nd = a.ndim
    return pl.BlockSpec((1,) + a.shape[1:], lambda i, nd=nd: (i,) + (0,) * (nd - 1))


def fused_extractor(params, patches, base, txt_raw, vis_add, txt_add, joint_add,
                    tmask_b, scale):
    bsz = patches.shape[0]
    d = EMBED_DIM
    const_inputs = [patches, base, txt_raw, params['txt_ln_g'], params['txt_ln_b'],
                    vis_add, txt_add, joint_add, tmask_b]
    layer_ws = ([params['vit'][k] for k in VIT_KEYS]
                + [params['bert'][k] for k in VIT_KEYS]
                + [params['star_img'][k] for k in STAR_KEYS]
                + [params['star_txt'][k] for k in STAR_KEYS])

    in_specs = ([_const_spec(a) for a in const_inputs]
                + [pl.BlockSpec(memory_space=pltpu.MemorySpace.SMEM)]
                + [_const_spec(params['patch_w'])]
                + [_layer_spec(w) for w in layer_ws])
    out_specs = [pl.BlockSpec((bsz, VIS_PAD, d), lambda i: (0, 0, 0)),
                 pl.BlockSpec((bsz, L_TXT, d), lambda i: (0, 0, 0)),
                 pl.BlockSpec((NUM_CONT, bsz, 3, VIS_PAD), lambda i: (0, 0, 0, 0))]
    out_shape = [jax.ShapeDtypeStruct((bsz, VIS_PAD, d), jnp.float32),
                 jax.ShapeDtypeStruct((bsz, L_TXT, d), jnp.float32),
                 jax.ShapeDtypeStruct((NUM_CONT, bsz, 3, VIS_PAD), jnp.float32)]

    return pl.pallas_call(
        fused_kernel,
        grid=(DEPTH,),
        in_specs=in_specs,
        out_specs=out_specs,
        out_shape=out_shape,
        compiler_params=pltpu.CompilerParams(
            dimension_semantics=("arbitrary",)),   # layers carry state sequentially
    )(*const_inputs, scale, params['patch_w'], *layer_ws)


# ---------------------------------- JAX glue -------------------------------------
def to_patches(img, p):
    # NCHW -> (B, num_patches, C*p*p), row-major grid order (Conv2d patch-embed).
    b, c, h, w = img.shape
    x = img.reshape(b, c, h // p, p, w // p, p)
    x = x.transpose(0, 2, 4, 1, 3, 5)
    return x.reshape(b, (h // p) * (w // p), c * p * p)


def cat_mask(text_mask, flag):
    b = flag.shape[0]
    not1 = (flag != 1).astype(jnp.float32)                    # (B, 1)
    not0 = (flag != 0).astype(jnp.float32)
    x_mask = jnp.ones((b, NX), jnp.float32)
    z_mask = jnp.ones((b, NZ), jnp.float32) * not1
    c_mask = jnp.ones((b, 1), jnp.float32) * not1
    t_mask = text_mask * not0
    mask = ~(jnp.concatenate([c_mask, z_mask, x_mask, t_mask], axis=1).astype(bool))
    visual_mask = ~(jnp.concatenate([c_mask, z_mask, x_mask], axis=1).astype(bool))
    return mask, visual_mask


def generate_txt_token(txt_feat, text_mask):
    # txt_token_mode == 'mean'
    m = text_mask[..., None]
    return (txt_feat * m).sum(axis=1, keepdims=True) / m.sum(axis=1, keepdims=True)


def forward(params, template, search, text_ids, text_mask, flag):
    b = template.shape[0]
    d = EMBED_DIM

    # --- patch unfold, padded to (B, VIS_PAD, PD_PAD); row 0 (cls) & pad rows zero ---
    patches = jnp.concatenate([to_patches(template, PATCH),
                               to_patches(search, PATCH)], axis=1)    # (B, 20, 192)
    patches = jnp.pad(patches, ((0, 0), (1, VIS_PAD - NUM_VIS),
                                (0, PD_PAD - PATCH_DIM)))
    # base rows: cls + pos[0] ; pos[1:] + patch bias ; zeros for pad rows
    cls_row = params['cls_token'] + params['pos_embed'][:, :1]
    patch_rows = params['pos_embed'][:, 1:] + params['patch_b']
    pad_rows = jnp.zeros((1, VIS_PAD - NUM_VIS, d), jnp.float32)
    base = jnp.broadcast_to(
        jnp.concatenate([cls_row, patch_rows, pad_rows], axis=1), (b, VIS_PAD, d))

    # --- BERT token-embedding gather + positions (LN happens inside the kernel) ---
    txt_raw = jnp.take(params['tok_emb'], text_ids, axis=0) + params['txt_pos_emb'][None]

    # --- additive attention masks (pad rows always masked out) ---
    mask, visual_mask = cat_mask(text_mask, flag)
    pad_true = jnp.ones((b, VIS_PAD - NUM_VIS), bool)
    vis_mask_p = jnp.concatenate([visual_mask, pad_true], axis=1)
    joint_mask_p = jnp.concatenate([mask[:, :NUM_VIS], pad_true, mask[:, NUM_VIS:]],
                                   axis=1)
    vis_add = jnp.where(vis_mask_p, NEG_INF, 0.0).reshape(b, 1, VIS_PAD)
    joint_add = jnp.where(joint_mask_p, NEG_INF, 0.0).reshape(b, 1, JOINT_PAD)
    txt_add = ((1.0 - text_mask) * NEG_INF).reshape(b, 1, L_TXT)
    tmask_b = jnp.broadcast_to(text_mask[:, :, None], (b, L_TXT, d)).astype(jnp.float32)
    scale = jnp.exp(params['logit_scale']).reshape(1).astype(jnp.float32)

    img_full, txt_feat, logits_grp = fused_extractor(
        params, patches, base, txt_raw,
        vis_add.astype(jnp.float32), txt_add.astype(jnp.float32),
        joint_add.astype(jnp.float32), tmask_b, scale)

    img_feat = img_full[:, :NUM_VIS]
    vis_token = img_feat[:, :1]
    z = img_feat[:, 1:1 + NZ]
    x = img_feat[:, 1 + NZ:]
    side = int(NX ** 0.5)

    bid = jnp.arange(b)
    flag_flat = flag.reshape(-1)
    logits_list = []
    for s in range(NUM_CONT):
        grp = logits_grp[s][:, :, 1 + NZ:1 + NZ + NX]        # (B, 3, NX)
        logits_list.append(grp[bid, flag_flat][..., None])   # (B, NX, 1)

    return {
        'search': x,
        'template': z,
        'text': txt_feat,
        'vis_token': vis_token,
        'txt_token': generate_txt_token(txt_feat, text_mask),
        'flag': flag_flat,
        'logits': jnp.stack(logits_list, axis=1).reshape(b, -1, side, side),
    }


# ------------------------------ parameter init ---------------------------------
def init_params(key):
    keys = iter(jax.random.split(key, 64))
    d = EMBED_DIM

    def nrm(shape, dtype=jnp.float32, scale=0.02):
        return (scale * jax.random.normal(next(keys), shape, jnp.float32)).astype(dtype)

    def stacked_block():
        return {
            'ln1_g': jnp.ones((DEPTH, 1, d), jnp.float32),
            'ln1_b': jnp.zeros((DEPTH, 1, d), jnp.float32),
            'wqkv': nrm((DEPTH, d, 3 * d), jnp.bfloat16),
            'bqkv': jnp.zeros((DEPTH, 1, 3 * d), jnp.float32),
            'wo': nrm((DEPTH, d, d), jnp.bfloat16),
            'bo': jnp.zeros((DEPTH, 1, d), jnp.float32),
            'ln2_g': jnp.ones((DEPTH, 1, d), jnp.float32),
            'ln2_b': jnp.zeros((DEPTH, 1, d), jnp.float32),
            'w1': nrm((DEPTH, d, MLP_RATIO * d), jnp.bfloat16),
            'b1': jnp.zeros((DEPTH, 1, MLP_RATIO * d), jnp.float32),
            'w2': nrm((DEPTH, MLP_RATIO * d, d), jnp.bfloat16),
            'b2': jnp.zeros((DEPTH, 1, d), jnp.float32),
        }

    def stacked_star():
        # width_factor = 1; f1/f2 fused into one (D, 2D) weight; output_dim kept at D
        return {'w12': nrm((DEPTH, d, 2 * d), jnp.bfloat16),
                'b12': jnp.zeros((DEPTH, 1, 2 * d), jnp.float32),
                'wg': nrm((DEPTH, d, d), jnp.bfloat16),
                'bg': jnp.zeros((DEPTH, 1, d), jnp.float32)}

    # patch_w rows >= PATCH_DIM only ever multiply zero-padded patch lanes.
    return {
        'logit_scale': jnp.asarray(jnp.log(1.0 / 0.07), jnp.float32),
        'patch_w': nrm((PD_PAD, d), jnp.bfloat16),
        'patch_b': jnp.zeros((1, d), jnp.float32),
        'cls_token': nrm((1, 1, d)),
        'pos_embed': nrm((1, NUM_VIS, d)),
        'tok_emb': nrm((VOCAB, d)),
        'txt_pos_emb': nrm((L_TXT, d)),
        'txt_ln_g': jnp.ones((1, d), jnp.float32),
        'txt_ln_b': jnp.zeros((1, d), jnp.float32),
        'vit': stacked_block(),
        # bert layers >= min(FUSION_LAYER) are never used at runtime (inert padding)
        'bert': stacked_block(),
        'star_img': stacked_star(),
        'star_txt': stacked_star(),
    }


# ----------------------------------- main ---------------------------------------
if __name__ == "__main__":
    B = 2
    key = jax.random.PRNGKey(0)
    pkey, k1, k2, k3 = jax.random.split(key, 4)
    params = init_params(pkey)

    template = jax.random.normal(k1, (B, 3, TEMPLATE_SIZE, TEMPLATE_SIZE), jnp.float32)
    search = jax.random.normal(k2, (B, 3, SEARCH_SIZE, SEARCH_SIZE), jnp.float32)
    text_ids = jax.random.randint(k3, (B, L_TXT), 0, VOCAB, dtype=jnp.int32)
    text_mask = jnp.array([[1, 1, 1, 1, 1, 0, 0, 0],
                           [1, 1, 1, 1, 1, 1, 1, 0]], jnp.float32)
    flag = jnp.array([[2], [0]], jnp.int32)

    fwd = jax.jit(forward)
    out = fwd(params, template, search, text_ids, text_mask, flag)
    out = jax.block_until_ready(out)

    assert out['search'].shape == (B, NX, EMBED_DIM)
    assert out['template'].shape == (B, NZ, EMBED_DIM)
    assert out['text'].shape == (B, L_TXT, EMBED_DIM)
    assert out['vis_token'].shape == (B, 1, EMBED_DIM)
    assert out['txt_token'].shape == (B, 1, EMBED_DIM)
    assert out['flag'].shape == (B,)
    assert out['logits'].shape == (B, NUM_CONT, 4, 4)
    assert bool(jnp.all(jnp.isfinite(out['logits'])))
    print("KERNEL_OK")
</pallas_src>

<mosaic_0001>
module attributes {stable_mosaic.version = 11 : i64} {
  func.func @fused_kernel(%arg0: i32, %arg1: memref<2x24x256xf32, #tpu.memory_space<vmem>>, %arg2: memref<2x24x128xf32, #tpu.memory_space<vmem>>, %arg3: memref<2x8x128xf32, #tpu.memory_space<vmem>>, %arg4: memref<1x128xf32, #tpu.memory_space<vmem>>, %arg5: memref<1x128xf32, #tpu.memory_space<vmem>>, %arg6: memref<2x1x24xf32, #tpu.memory_space<vmem>>, %arg7: memref<2x1x8xf32, #tpu.memory_space<vmem>>, %arg8: memref<2x1x32xf32, #tpu.memory_space<vmem>>, %arg9: memref<2x8x128xf32, #tpu.memory_space<vmem>>, %arg10: memref<1xf32, #tpu.memory_space<smem>>, %arg11: memref<256x128xbf16, #tpu.memory_space<vmem>>, %arg12: memref<1x1x128xf32, #tpu.memory_space<vmem>>, %arg13: memref<1x1x128xf32, #tpu.memory_space<vmem>>, %arg14: memref<1x128x384xbf16, #tpu.memory_space<vmem>>, %arg15: memref<1x1x384xf32, #tpu.memory_space<vmem>>, %arg16: memref<1x128x128xbf16, #tpu.memory_space<vmem>>, %arg17: memref<1x1x128xf32, #tpu.memory_space<vmem>>, %arg18: memref<1x1x128xf32, #tpu.memory_space<vmem>>, %arg19: memref<1x1x128xf32, #tpu.memory_space<vmem>>, %arg20: memref<1x128x512xbf16, #tpu.memory_space<vmem>>, %arg21: memref<1x1x512xf32, #tpu.memory_space<vmem>>, %arg22: memref<1x512x128xbf16, #tpu.memory_space<vmem>>, %arg23: memref<1x1x128xf32, #tpu.memory_space<vmem>>, %arg24: memref<1x1x128xf32, #tpu.memory_space<vmem>>, %arg25: memref<1x1x128xf32, #tpu.memory_space<vmem>>, %arg26: memref<1x128x384xbf16, #tpu.memory_space<vmem>>, %arg27: memref<1x1x384xf32, #tpu.memory_space<vmem>>, %arg28: memref<1x128x128xbf16, #tpu.memory_space<vmem>>, %arg29: memref<1x1x128xf32, #tpu.memory_space<vmem>>, %arg30: memref<1x1x128xf32, #tpu.memory_space<vmem>>, %arg31: memref<1x1x128xf32, #tpu.memory_space<vmem>>, %arg32: memref<1x128x512xbf16, #tpu.memory_space<vmem>>, %arg33: memref<1x1x512xf32, #tpu.memory_space<vmem>>, %arg34: memref<1x512x128xbf16, #tpu.memory_space<vmem>>, %arg35: memref<1x1x128xf32, #tpu.memory_space<vmem>>, %arg36: memref<1x128x256xbf16, #tpu.memory_space<vmem>>, %arg37: memref<1x1x256xf32, #tpu.memory_space<vmem>>, %arg38: memref<1x128x128xbf16, #tpu.memory_space<vmem>>, %arg39: memref<1x1x128xf32, #tpu.memory_space<vmem>>, %arg40: memref<1x128x256xbf16, #tpu.memory_space<vmem>>, %arg41: memref<1x1x256xf32, #tpu.memory_space<vmem>>, %arg42: memref<1x128x128xbf16, #tpu.memory_space<vmem>>, %arg43: memref<1x1x128xf32, #tpu.memory_space<vmem>>, %arg44: memref<2x24x128xf32, #tpu.memory_space<vmem>>, %arg45: memref<2x8x128xf32, #tpu.memory_space<vmem>>, %arg46: memref<2x2x3x24xf32, #tpu.memory_space<vmem>>) attributes {dimension_semantics = [#tpu.dimension_semantics<arbitrary>], iteration_bounds = array<i64: 4>, scalar_prefetch = 0 : i64, scratch_operands = 0 : i64, tpu.core_type = #tpu.core_type<tc>, window_params = [{pipeline_mode = #tpu.pipeline_mode<synchronous>, transform_indices = @transform_0, window_bounds = array<i64: 2, 24, 256>}, {pipeline_mode = #tpu.pipeline_mode<synchronous>, transform_indices = @transform_1, window_bounds = array<i64: 2, 24, 128>}, {pipeline_mode = #tpu.pipeline_mode<synchronous>, transform_indices = @transform_2, window_bounds = array<i64: 2, 8, 128>}, {pipeline_mode = #tpu.pipeline_mode<synchronous>, transform_indices = @transform_3, window_bounds = array<i64: 1, 128>}, {pipeline_mode = #tpu.pipeline_mode<synchronous>, transform_indices = @transform_4, window_bounds = array<i64: 1, 128>}, {pipeline_mode = #tpu.pipeline_mode<synchronous>, transform_indices = @transform_5, window_bounds = array<i64: 2, 1, 24>}, {pipeline_mode = #tpu.pipeline_mode<synchronous>, transform_indices = @transform_6, window_bounds = array<i64: 2, 1, 8>}, {pipeline_mode = #tpu.pipeline_mode<synchronous>, transform_indices = @transform_7, window_bounds = array<i64: 2, 1, 32>}, {pipeline_mode = #tpu.pipeline_mode<synchronous>, transform_indices = @transform_8, window_bounds = array<i64: 2, 8, 128>}, {transform_indices = @transform_9, window_bounds = array<i64: 1>}, {pipeline_mode = #tpu.pipeline_mode<synchronous>, transform_indices = @transform_10, window_bounds = array<i64: 256, 128>}, {transform_indices = @transform_11, window_bounds = array<i64: 1, 1, 128>}, {transform_indices = @transform_12, window_bounds = array<i64: 1, 1, 128>}, {transform_indices = @transform_13, window_bounds = array<i64: 1, 128, 384>}, {transform_indices = @transform_14, window_bounds = array<i64: 1, 1, 384>}, {transform_indices = @transform_15, window_bounds = array<i64: 1, 128, 128>}, {transform_indices = @transform_16, window_bounds = array<i64: 1, 1, 128>}, {transform_indices = @transform_17, window_bounds = array<i64: 1, 1, 128>}, {transform_indices = @transform_18, window_bounds = array<i64: 1, 1, 128>}, {transform_indices = @transform_19, window_bounds = array<i64: 1, 128, 512>}, {transform_indices = @transform_20, window_bounds = array<i64: 1, 1, 512>}, {transform_indices = @transform_21, window_bounds = array<i64: 1, 512, 128>}, {transform_indices = @transform_22, window_bounds = array<i64: 1, 1, 128>}, {transform_indices = @transform_23, window_bounds = array<i64: 1, 1, 128>}, {transform_indices = @transform_24, window_bounds = array<i64: 1, 1, 128>}, {transform_indices = @transform_25, window_bounds = array<i64: 1, 128, 384>}, {transform_indices = @transform_26, window_bounds = array<i64: 1, 1, 384>}, {transform_indices = @transform_27, window_bounds = array<i64: 1, 128, 128>}, {transform_indices = @transform_28, window_bounds = array<i64: 1, 1, 128>}, {transform_indices = @transform_29, window_bounds = array<i64: 1, 1, 128>}, {transform_indices = @transform_30, window_bounds = array<i64: 1, 1, 128>}, {transform_indices = @transform_31, window_bounds = array<i64: 1, 128, 512>}, {transform_indices = @transform_32, window_bounds = array<i64: 1, 1, 512>}, {transform_indices = @transform_33, window_bounds = array<i64: 1, 512, 128>}, {transform_indices = @transform_34, window_bounds = array<i64: 1, 1, 128>}, {transform_indices = @transform_35, window_bounds = array<i64: 1, 128, 256>}, {transform_indices = @transform_36, window_bounds = array<i64: 1, 1, 256>}, {transform_indices = @transform_37, window_bounds = array<i64: 1, 128, 128>}, {transform_indices = @transform_38, window_bounds = array<i64: 1, 1, 128>}, {transform_indices = @transform_39, window_bounds = array<i64: 1, 128, 256>}, {transform_indices = @transform_40, window_bounds = array<i64: 1, 1, 256>}, {transform_indices = @transform_41, window_bounds = array<i64: 1, 128, 128>}, {transform_indices = @transform_42, window_bounds = array<i64: 1, 1, 128>}, {pipeline_mode = #tpu.pipeline_mode<synchronous>, transform_indices = @transform_43, window_bounds = array<i64: 2, 24, 128>}, {pipeline_mode = #tpu.pipeline_mode<synchronous>, transform_indices = @transform_44, window_bounds = array<i64: 2, 8, 128>}, {pipeline_mode = #tpu.pipeline_mode<synchronous>, transform_indices = @transform_45, window_bounds = array<i64: 2, 2, 3, 24>}]} {
    %c0_i32 = arith.constant 0 : i32
    %0 = arith.cmpi eq, %arg0, %c0_i32 : i32
    %1 = arith.extui %0 : i1 to i32
    %c0_i32_0 = arith.constant 0 : i32
    %2 = arith.cmpi ne, %1, %c0_i32_0 : i32
    scf.if %2 {
      %c0 = arith.constant 0 : index
      %c0_6 = arith.constant 0 : index
      %c0_7 = arith.constant 0 : index
      %17 = vector.load %arg1[%c0, %c0_6, %c0_7] : memref<2x24x256xf32, #tpu.memory_space<vmem>>, vector<2x24x256xf32>
      %18 = arith.truncf %17 : vector<2x24x256xf32> to vector<2x24x256xbf16>
      %19 = vector.shape_cast %18 : vector<2x24x256xbf16> to vector<48x256xbf16>
      %c0_8 = arith.constant 0 : index
      %c0_9 = arith.constant 0 : index
      %20 = vector.load %arg11[%c0_8, %c0_9] : memref<256x128xbf16, #tpu.memory_space<vmem>>, vector<256x128xbf16>
      %cst = arith.constant dense<0.000000e+00> : vector<48x128xf32>
      %21 = tpu.matmul %19, %20, %cst {dimension_numbers = #tpu.dot_dimension_numbers<[1], [0], [0], [1], [0, 0, 1, 1], [], []>} : vector<48x256xbf16>, vector<256x128xbf16>, vector<48x128xf32> -> vector<48x128xf32>
      %22 = vector.shape_cast %21 : vector<48x128xf32> to vector<2x24x128xf32>
      %c0_10 = arith.constant 0 : index
      %c0_11 = arith.constant 0 : index
      %c0_12 = arith.constant 0 : index
      %23 = vector.load %arg2[%c0_10, %c0_11, %c0_12] : memref<2x24x128xf32, #tpu.memory_space<vmem>>, vector<2x24x128xf32>
      %24 = arith.addf %23, %22 : vector<2x24x128xf32>
      %c0_13 = arith.constant 0 : index
      %c0_14 = arith.constant 0 : index
      %c0_15 = arith.constant 0 : index
      %25 = vector.load %arg44[%c0_13, %c0_14, %c0_15] : memref<2x24x128xf32, #tpu.memory_space<vmem>>, vector<2x24x128xf32>
      tpu.vector_store %arg44[%c0_13, %c0_14, %c0_15], %24 {strides = array<i32>} : memref<2x24x128xf32, #tpu.memory_space<vmem>>, vector<2x24x128xf32>,
      %c0_16 = arith.constant 0 : index
      %c0_17 = arith.constant 0 : index
      %c0_18 = arith.constant 0 : index
      %26 = vector.load %arg3[%c0_16, %c0_17, %c0_18] : memref<2x8x128xf32, #tpu.memory_space<vmem>>, vector<2x8x128xf32>
      %c0_19 = arith.constant 0 : index
      %c0_20 = arith.constant 0 : index
      %27 = vector.load %arg4[%c0_19, %c0_20] : memref<1x128xf32, #tpu.memory_space<vmem>>, vector<1x128xf32>
      %c0_21 = arith.constant 0 : index
      %c0_22 = arith.constant 0 : index
      %28 = vector.load %arg5[%c0_21, %c0_22] : memref<1x128xf32, #tpu.memory_space<vmem>>, vector<1x128xf32>
      %cst_23 = arith.constant dense<0.000000e+00> : vector<2x8xf32>
      %29 = vector.multi_reduction <add>, %26, %cst_23 [2] : vector<2x8x128xf32> to vector<2x8xf32>
      %30 = vector.shape_cast %29 : vector<2x8xf32> to vector<2x8x1xf32>
      %cst_24 = arith.constant 1.280000e+02 : f32
      %31 = vector.broadcast %cst_24 : f32 to vector<2x8x1xf32>
      %32 = arith.divf %30, %31 : vector<2x8x1xf32>
      %33 = vector.broadcast %32 : vector<2x8x1xf32> to vector<2x8x128xf32>
      %34 = arith.subf %26, %33 : vector<2x8x128xf32>
      %35 = arith.mulf %34, %34 : vector<2x8x128xf32>
      %cst_25 = arith.constant dense<0.000000e+00> : vector<2x8xf32>
      %36 = vector.multi_reduction <add>, %35, %cst_25 [2] : vector<2x8x128xf32> to vector<2x8xf32>
      %37 = vector.shape_cast %36 : vector<2x8xf32> to vector<2x8x1xf32>
      %cst_26 = arith.constant 1.280000e+02 : f32
      %38 = vector.broadcast %cst_26 : f32 to vector<2x8x1xf32>
      %39 = arith.divf %37, %38 : vector<2x8x1xf32>
      %40 = vector.broadcast %32 : vector<2x8x1xf32> to vector<2x8x128xf32>
      %41 = arith.subf %26, %40 : vector<2x8x128xf32>
      %cst_27 = arith.constant 9.99999974E-6 : f32
      %42 = vector.broadcast %cst_27 : f32 to vector<2x8x1xf32>
      %43 = arith.addf %39, %42 : vector<2x8x1xf32>
      %44 = math.rsqrt %43 : vector<2x8x1xf32>
      %45 = vector.broadcast %44 : vector<2x8x1xf32> to vector<2x8x128xf32>
      %46 = arith.mulf %41, %45 : vector<2x8x128xf32>
      %47 = vector.shape_cast %27 : vector<1x128xf32> to vector<1x1x128xf32>
      %48 = vector.broadcast %47 : vector<1x1x128xf32> to vector<2x8x128xf32>
      %49 = arith.mulf %46, %48 : vector<2x8x128xf32>
      %50 = vector.shape_cast %28 : vector<1x128xf32> to vector<1x1x128xf32>
      %51 = vector.broadcast %50 : vector<1x1x128xf32> to vector<2x8x128xf32>
      %52 = arith.addf %49, %51 : vector<2x8x128xf32>
      %c0_28 = arith.constant 0 : index
      %c0_29 = arith.constant 0 : index
      %c0_30 = arith.constant 0 : index
      %53 = vector.load %arg45[%c0_28, %c0_29, %c0_30] : memref<2x8x128xf32, #tpu.memory_space<vmem>>, vector<2x8x128xf32>
      tpu.vector_store %arg45[%c0_28, %c0_29, %c0_30], %52 {strides = array<i32>} : memref<2x8x128xf32, #tpu.memory_space<vmem>>, vector<2x8x128xf32>,
      %cst_31 = arith.constant 0.000000e+00 : f32
      %54 = vector.broadcast %cst_31 : f32 to vector<2x2x3x24xf32>
      %c0_32 = arith.constant 0 : index
      %c0_33 = arith.constant 0 : index
      %c0_34 = arith.constant 0 : index
      %c0_35 = arith.constant 0 : index
      %55 = vector.load %arg46[%c0_32, %c0_33, %c0_34, %c0_35] : memref<2x2x3x24xf32, #tpu.memory_space<vmem>>, vector<2x2x3x24xf32>
      tpu.vector_store %arg46[%c0_32, %c0_33, %c0_34, %c0_35], %54 {strides = array<i32>} : memref<2x2x3x24xf32, #tpu.memory_space<vmem>>, vector<2x2x3x24xf32>,
    } else {
    }
    %c2_i32 = arith.constant 2 : i32
    %3 = arith.cmpi eq, %arg0, %c2_i32 : i32
    %c3_i32 = arith.constant 3 : i32
    %4 = arith.cmpi eq, %arg0, %c3_i32 : i32
    %5 = arith.ori %3, %4 : i1
    %true = arith.constant true
    %6 = arith.xori %5, %true : i1
    %7 = arith.extui %6 : i1 to i32
    %c0_i32_1 = arith.constant 0 : i32
    %8 = arith.cmpi ne, %7, %c0_i32_1 : i32
    scf.if %8 {
      %c0 = arith.constant 0 : index
      %c0_6 = arith.constant 0 : index
      %c0_7 = arith.constant 0 : index
      %17 = vector.load %arg44[%c0, %c0_6, %c0_7] : memref<2x24x128xf32, #tpu.memory_space<vmem>>, vector<2x24x128xf32>
      %18 = arith.truncf %17 : vector<2x24x128xf32> to vector<2x24x128xbf16>
      %19 = vector.shape_cast %18 : vector<2x24x128xbf16> to vector<48x128xbf16>
      %c0_8 = arith.constant 0 : index
      %c0_9 = arith.constant 0 : index
      %c0_10 = arith.constant 0 : index
      %20 = vector.load %arg36[%c0_8, %c0_9, %c0_10] : memref<1x128x256xbf16, #tpu.memory_space<vmem>>, vector<1x128x256xbf16>
      %21 = vector.shape_cast %20 : vector<1x128x256xbf16> to vector<128x256xbf16>
      %cst = arith.constant dense<0.000000e+00> : vector<48x256xf32>
      %22 = tpu.matmul %19, %21, %cst {dimension_numbers = #tpu.dot_dimension_numbers<[1], [0], [0], [1], [0, 0, 1, 1], [], []>} : vector<48x128xbf16>, vector<128x256xbf16>, vector<48x256xf32> -> vector<48x256xf32>
      %c0_11 = arith.constant 0 : index
      %c0_12 = arith.constant 0 : index
      %c0_13 = arith.constant 0 : index
      %23 = vector.load %arg37[%c0_11, %c0_12, %c0_13] : memref<1x1x256xf32, #tpu.memory_space<vmem>>, vector<1x1x256xf32>
      %24 = vector.shape_cast %23 : vector<1x1x256xf32> to vector<1x256xf32>
      %25 = vector.broadcast %24 : vector<1x256xf32> to vector<48x256xf32>
      %26 = arith.addf %22, %25 : vector<48x256xf32>
      %cst_14 = arith.constant -1.000000e+03 : f32
      %cst_15 = arith.constant 1.000000e+03 : f32
      %27 = vector.broadcast %cst_14 : f32 to vector<48x256xf32>
      %28 = arith.maximumf %27, %26 : vector<48x256xf32>
      %29 = vector.broadcast %cst_15 : f32 to vector<48x256xf32>
      %30 = arith.minimumf %29, %28 : vector<48x256xf32>
      %31 = vector.extract_strided_slice %30 {offsets = [0, 0], sizes = [48, 128], strides = [1, 1]} : vector<48x256xf32> to vector<48x128xf32>
      %32 = vector.extract_strided_slice %30 {offsets = [0, 128], sizes = [48, 128], strides = [1, 1]} : vector<48x256xf32> to vector<48x128xf32>
      %33 = arith.mulf %31, %32 : vector<48x128xf32>
      %34 = arith.truncf %33 : vector<48x128xf32> to vector<48x128xbf16>
      %c0_16 = arith.constant 0 : index
      %c0_17 = arith.constant 0 : index
      %c0_18 = arith.constant 0 : index
      %35 = vector.load %arg38[%c0_16, %c0_17, %c0_18] : memref<1x128x128xbf16, #tpu.memory_space<vmem>>, vector<1x128x128xbf16>
      %36 = vector.shape_cast %35 : vector<1x128x128xbf16> to vector<128x128xbf16>
      %cst_19 = arith.constant dense<0.000000e+00> : vector<48x128xf32>
      %37 = tpu.matmul %34, %36, %cst_19 {dimension_numbers = #tpu.dot_dimension_numbers<[1], [0], [0], [1], [0, 0, 1, 1], [], []>} : vector<48x128xbf16>, vector<128x128xbf16>, vector<48x128xf32> -> vector<48x128xf32>
      %c0_20 = arith.constant 0 : index
      %c0_21 = arith.constant 0 : index
      %c0_22 = arith.constant 0 : index
      %38 = vector.load %arg39[%c0_20, %c0_21, %c0_22] : memref<1x1x128xf32, #tpu.memory_space<vmem>>, vector<1x1x128xf32>
      %39 = vector.shape_cast %38 : vector<1x1x128xf32> to vector<1x128xf32>
      %40 = vector.broadcast %39 : vector<1x128xf32> to vector<48x128xf32>
      %41 = arith.addf %37, %40 : vector<48x128xf32>
      %42 = vector.shape_cast %41 : vector<48x128xf32> to vector<2x24x128xf32>
      %c0_23 = arith.constant 0 : index
      %c0_24 = arith.constant 0 : index
      %c0_25 = arith.constant 0 : index
      %43 = vector.load %arg6[%c0_23, %c0_24, %c0_25] : memref<2x1x24xf32, #tpu.memory_space<vmem>>, vector<2x1x24xf32>
      %c0_26 = arith.constant 0 : index
      %c0_27 = arith.constant 0 : index
      %c0_28 = arith.constant 0 : index
      %44 = vector.load %arg12[%c0_26, %c0_27, %c0_28] : memref<1x1x128xf32, #tpu.memory_space<vmem>>, vector<1x1x128xf32>
      %45 = vector.shape_cast %44 : vector<1x1x128xf32> to vector<1x128xf32>
      %c0_29 = arith.constant 0 : index
      %c0_30 = arith.constant 0 : index
      %c0_31 = arith.constant 0 : index
      %46 = vector.load %arg13[%c0_29, %c0_30, %c0_31] : memref<1x1x128xf32, #tpu.memory_space<vmem>>, vector<1x1x128xf32>
      %47 = vector.shape_cast %46 : vector<1x1x128xf32> to vector<1x128xf32>
      %cst_32 = arith.constant dense<0.000000e+00> : vector<2x24xf32>
      %48 = vector.multi_reduction <add>, %42, %cst_32 [2] : vector<2x24x128xf32> to vector<2x24xf32>
      %49 = vector.shape_cast %48 : vector<2x24xf32> to vector<2x24x1xf32>
      %cst_33 = arith.constant 1.280000e+02 : f32
      %50 = vector.broadcast %cst_33 : f32 to vector<2x24x1xf32>
      %51 = arith.divf %49, %50 : vector<2x24x1xf32>
      %52 = vector.broadcast %51 : vector<2x24x1xf32> to vector<2x24x128xf32>
      %53 = arith.subf %42, %52 : vector<2x24x128xf32>
      %54 = arith.mulf %53, %53 : vector<2x24x128xf32>
      %cst_34 = arith.constant dense<0.000000e+00> : vector<2x24xf32>
      %55 = vector.multi_reduction <add>, %54, %cst_34 [2] : vector<2x24x128xf32> to vector<2x24xf32>
      %56 = vector.shape_cast %55 : vector<2x24xf32> to vector<2x24x1xf32>
      %cst_35 = arith.constant 1.280000e+02 : f32
      %57 = vector.broadcast %cst_35 : f32 to vector<2x24x1xf32>
      %58 = arith.divf %56, %57 : vector<2x24x1xf32>
      %59 = vector.broadcast %51 : vector<2x24x1xf32> to vector<2x24x128xf32>
      %60 = arith.subf %42, %59 : vector<2x24x128xf32>
      %cst_36 = arith.constant 9.99999974E-6 : f32
      %61 = vector.broadcast %cst_36 : f32 to vector<2x24x1xf32>
      %62 = arith.addf %58, %61 : vector<2x24x1xf32>
      %63 = math.rsqrt %62 : vector<2x24x1xf32>
      %64 = vector.broadcast %63 : vector<2x24x1xf32> to vector<2x24x128xf32>
      %65 = arith.mulf %60, %64 : vector<2x24x128xf32>
      %66 = vector.shape_cast %45 : vector<1x128xf32> to vector<1x1x128xf32>
      %67 = vector.broadcast %66 : vector<1x1x128xf32> to vector<2x24x128xf32>
      %68 = arith.mulf %65, %67 : vector<2x24x128xf32>
      %69 = vector.shape_cast %47 : vector<1x128xf32> to vector<1x1x128xf32>
      %70 = vector.broadcast %69 : vector<1x1x128xf32> to vector<2x24x128xf32>
      %71 = arith.addf %68, %70 : vector<2x24x128xf32>
      %72 = arith.truncf %71 : vector<2x24x128xf32> to vector<2x24x128xbf16>
      %73 = vector.shape_cast %72 : vector<2x24x128xbf16> to vector<48x128xbf16>
      %c0_37 = arith.constant 0 : index
      %c0_38 = arith.constant 0 : index
      %c0_39 = arith.constant 0 : index
      %74 = vector.load %arg14[%c0_37, %c0_38, %c0_39] : memref<1x128x384xbf16, #tpu.memory_space<vmem>>, vector<1x128x384xbf16>
      %75 = vector.shape_cast %74 : vector<1x128x384xbf16> to vector<128x384xbf16>
      %cst_40 = arith.constant dense<0.000000e+00> : vector<48x384xf32>
      %76 = tpu.matmul %73, %75, %cst_40 {dimension_numbers = #tpu.dot_dimension_numbers<[1], [0], [0], [1], [0, 0, 1, 1], [], []>} : vector<48x128xbf16>, vector<128x384xbf16>, vector<48x384xf32> -> vector<48x384xf32>
      %c0_41 = arith.constant 0 : index
      %c0_42 = arith.constant 0 : index
      %c0_43 = arith.constant 0 : index
      %77 = vector.load %arg15[%c0_41, %c0_42, %c0_43] : memref<1x1x384xf32, #tpu.memory_space<vmem>>, vector<1x1x384xf32>
      %78 = vector.shape_cast %77 : vector<1x1x384xf32> to vector<1x384xf32>
      %79 = vector.broadcast %78 : vector<1x384xf32> to vector<48x384xf32>
      %80 = arith.addf %76, %79 : vector<48x384xf32>
      %81 = vector.shape_cast %80 : vector<48x384xf32> to vector<2x24x384xf32>
      %82 = vector.extract_strided_slice %81 {offsets = [0, 0, 0], sizes = [2, 24, 128], strides = [1, 1, 1]} : vector<2x24x384xf32> to vector<2x24x128xf32>
      %83 = arith.truncf %82 : vector<2x24x128xf32> to vector<2x24x128xbf16>
      %84 = vector.extract_strided_slice %81 {offsets = [0, 0, 128], sizes = [2, 24, 128], strides = [1, 1, 1]} : vector<2x24x384xf32> to vector<2x24x128xf32>
      %85 = arith.truncf %84 : vector<2x24x128xf32> to vector<2x24x128xbf16>
      %86 = vector.extract_strided_slice %81 {offsets = [0, 0, 256], sizes = [2, 24, 128], strides = [1, 1, 1]} : vector<2x24x384xf32> to vector<2x24x128xf32>
      %87 = arith.truncf %86 : vector<2x24x128xf32> to vector<2x24x128xbf16>
      "tpu.trace_start"() <{level = 10 : i32, message = "bqd,bkd->bqk"}> : () -> ()
      %cst_44 = arith.constant dense<0.000000e+00> : vector<2x24x24xf32>
      %88 = tpu.matmul %83, %85, %cst_44 {dimension_numbers = #tpu.dot_dimension_numbers<[2], [2], [1], [1], [0, 0, 0, 1, 1, 1], [0], [0]>} : vector<2x24x128xbf16>, vector<2x24x128xbf16>, vector<2x24x24xf32> -> vector<2x24x24xf32>
      "tpu.trace_stop"() : () -> ()
      %cst_45 = arith.constant 0.0883883461 : f32
      %89 = vector.broadcast %cst_45 : f32 to vector<2x24x24xf32>
      %90 = arith.mulf %88, %89 : vector<2x24x24xf32>
      %91 = vector.broadcast %43 : vector<2x1x24xf32> to vector<2x24x24xf32>
      %92 = arith.addf %90, %91 : vector<2x24x24xf32>
      %cst_46 = arith.constant dense<0xFF800000> : vector<2x24xf32>
      %93 = vector.multi_reduction <maximumf>, %92, %cst_46 [2] : vector<2x24x24xf32> to vector<2x24xf32>
      %94 = vector.shape_cast %93 : vector<2x24xf32> to vector<2x24x1xf32>
      %95 = vector.broadcast %94 : vector<2x24x1xf32> to vector<2x24x24xf32>
      %96 = arith.subf %92, %95 : vector<2x24x24xf32>
      %97 = math.exp %96 : vector<2x24x24xf32>
      %cst_47 = arith.constant dense<0.000000e+00> : vector<2x24xf32>
      %98 = vector.multi_reduction <add>, %97, %cst_47 [2] : vector<2x24x24xf32> to vector<2x24xf32>
      %99 = vector.shape_cast %98 : vector<2x24xf32> to vector<2x24x1xf32>
      %100 = tpu.reciprocal %99 {approx = true} : vector<2x24x1xf32> -> vector<2x24x1xf32>
      %101 = vector.broadcast %100 : vector<2x24x1xf32> to vector<2x24x24xf32>
      %102 = arith.mulf %97, %101 : vector<2x24x24xf32>
      %103 = arith.truncf %102 : vector<2x24x24xf32> to vector<2x24x24xbf16>
      "tpu.trace_start"() <{level = 10 : i32, message = "bqk,bkd->bqd"}> : () -> ()
      %cst_48 = arith.constant dense<0.000000e+00> : vector<2x24x128xf32>
      %104 = tpu.matmul %103, %87, %cst_48 {dimension_numbers = #tpu.dot_dimension_numbers<[2], [1], [1], [2], [0, 0, 0, 1, 1, 2], [0], [0]>} : vector<2x24x24xbf16>, vector<2x24x128xbf16>, vector<2x24x128xf32> -> vector<2x24x128xf32>
      "tpu.trace_stop"() : () -> ()
      %105 = vector.shape_cast %104 : vector<2x24x128xf32> to vector<48x128xf32>
      %106 = arith.truncf %105 : vector<48x128xf32> to vector<48x128xbf16>
      %c0_49 = arith.constant 0 : index
      %c0_50 = arith.constant 0 : index
      %c0_51 = arith.constant 0 : index
      %107 = vector.load %arg16[%c0_49, %c0_50, %c0_51] : memref<1x128x128xbf16, #tpu.memory_space<vmem>>, vector<1x128x128xbf16>
      %108 = vector.shape_cast %107 : vector<1x128x128xbf16> to vector<128x128xbf16>
      %cst_52 = arith.constant dense<0.000000e+00> : vector<48x128xf32>
      %109 = tpu.matmul %106, %108, %cst_52 {dimension_numbers = #tpu.dot_dimension_numbers<[1], [0], [0], [1], [0, 0, 1, 1], [], []>} : vector<48x128xbf16>, vector<128x128xbf16>, vector<48x128xf32> -> vector<48x128xf32>
      %c0_53 = arith.constant 0 : index
      %c0_54 = arith.constant 0 : index
      %c0_55 = arith.constant 0 : index
      %110 = vector.load %arg17[%c0_53, %c0_54, %c0_55] : memref<1x1x128xf32, #tpu.memory_space<vmem>>, vector<1x1x128xf32>
      %111 = vector.shape_cast %110 : vector<1x1x128xf32> to vector<1x128xf32>
      %112 = vector.broadcast %111 : vector<1x128xf32> to vector<48x128xf32>
      %113 = arith.addf %109, %112 : vector<48x128xf32>
      %114 = vector.shape_cast %113 : vector<48x128xf32> to vector<2x24x128xf32>
      %115 = arith.addf %42, %114 : vector<2x24x128xf32>
      %c0_56 = arith.constant 0 : index
      %c0_57 = arith.constant 0 : index
      %c0_58 = arith.constant 0 : index
      %116 = vector.load %arg18[%c0_56, %c0_57, %c0_58] : memref<1x1x128xf32, #tpu.memory_space<vmem>>, vector<1x1x128xf32>
      %117 = vector.shape_cast %116 : vector<1x1x128xf32> to vector<1x128xf32>
      %c0_59 = arith.constant 0 : index
      %c0_60 = arith.constant 0 : index
      %c0_61 = arith.constant 0 : index
      %118 = vector.load %arg19[%c0_59, %c0_60, %c0_61] : memref<1x1x128xf32, #tpu.memory_space<vmem>>, vector<1x1x128xf32>
      %119 = vector.shape_cast %118 : vector<1x1x128xf32> to vector<1x128xf32>
      %cst_62 = arith.constant dense<0.000000e+00> : vector<2x24xf32>
      %120 = vector.multi_reduction <add>, %115, %cst_62 [2] : vector<2x24x128xf32> to vector<2x24xf32>
      %121 = vector.shape_cast %120 : vector<2x24xf32> to vector<2x24x1xf32>
      %cst_63 = arith.constant 1.280000e+02 : f32
      %122 = vector.broadcast %cst_63 : f32 to vector<2x24x1xf32>
      %123 = arith.divf %121, %122 : vector<2x24x1xf32>
      %124 = vector.broadcast %123 : vector<2x24x1xf32> to vector<2x24x128xf32>
      %125 = arith.subf %115, %124 : vector<2x24x128xf32>
      %126 = arith.mulf %125, %125 : vector<2x24x128xf32>
      %cst_64 = arith.constant dense<0.000000e+00> : vector<2x24xf32>
      %127 = vector.multi_reduction <add>, %126, %cst_64 [2] : vector<2x24x128xf32> to vector<2x24xf32>
      %128 = vector.shape_cast %127 : vector<2x24xf32> to vector<2x24x1xf32>
      %cst_65 = arith.constant 1.280000e+02 : f32
      %129 = vector.broadcast %cst_65 : f32 to vector<2x24x1xf32>
      %130 = arith.divf %128, %129 : vector<2x24x1xf32>
      %131 = vector.broadcast %123 : vector<2x24x1xf32> to vector<2x24x128xf32>
      %132 = arith.subf %115, %131 : vector<2x24x128xf32>
      %cst_66 = arith.constant 9.99999974E-6 : f32
      %133 = vector.broadcast %cst_66 : f32 to vector<2x24x1xf32>
      %134 = arith.addf %130, %133 : vector<2x24x1xf32>
      %135 = math.rsqrt %134 : vector<2x24x1xf32>
      %136 = vector.broadcast %135 : vector<2x24x1xf32> to vector<2x24x128xf32>
      %137 = arith.mulf %132, %136 : vector<2x24x128xf32>
      %138 = vector.shape_cast %117 : vector<1x128xf32> to vector<1x1x128xf32>
      %139 = vector.broadcast %138 : vector<1x1x128xf32> to vector<2x24x128xf32>
      %140 = arith.mulf %137, %139 : vector<2x24x128xf32>
      %141 = vector.shape_cast %119 : vector<1x128xf32> to vector<1x1x128xf32>
      %142 = vector.broadcast %141 : vector<1x1x128xf32> to vector<2x24x128xf32>
      %143 = arith.addf %140, %142 : vector<2x24x128xf32>
      %144 = arith.truncf %143 : vector<2x24x128xf32> to vector<2x24x128xbf16>
      %145 = vector.shape_cast %144 : vector<2x24x128xbf16> to vector<48x128xbf16>
      %c0_67 = arith.constant 0 : index
      %c0_68 = arith.constant 0 : index
      %c0_69 = arith.constant 0 : index
      %146 = vector.load %arg20[%c0_67, %c0_68, %c0_69] : memref<1x128x512xbf16, #tpu.memory_space<vmem>>, vector<1x128x512xbf16>
      %147 = vector.shape_cast %146 : vector<1x128x512xbf16> to vector<128x512xbf16>
      %cst_70 = arith.constant dense<0.000000e+00> : vector<48x512xf32>
      %148 = tpu.matmul %145, %147, %cst_70 {dimension_numbers = #tpu.dot_dimension_numbers<[1], [0], [0], [1], [0, 0, 1, 1], [], []>} : vector<48x128xbf16>, vector<128x512xbf16>, vector<48x512xf32> -> vector<48x512xf32>
      %c0_71 = arith.constant 0 : index
      %c0_72 = arith.constant 0 : index
      %c0_73 = arith.constant 0 : index
      %149 = vector.load %arg21[%c0_71, %c0_72, %c0_73] : memref<1x1x512xf32, #tpu.memory_space<vmem>>, vector<1x1x512xf32>
      %150 = vector.shape_cast %149 : vector<1x1x512xf32> to vector<1x512xf32>
      %151 = vector.broadcast %150 : vector<1x512xf32> to vector<48x512xf32>
      %152 = arith.addf %148, %151 : vector<48x512xf32>
      %153 = arith.mulf %152, %152 : vector<48x512xf32>
      %154 = arith.mulf %152, %153 : vector<48x512xf32>
      %cst_74 = arith.constant 4.471500e-02 : f32
      %155 = vector.broadcast %cst_74 : f32 to vector<48x512xf32>
      %156 = arith.mulf %155, %154 : vector<48x512xf32>
      %157 = arith.addf %152, %156 : vector<48x512xf32>
      %cst_75 = arith.constant 0.797884583 : f32
      %158 = vector.broadcast %cst_75 : f32 to vector<48x512xf32>
      %159 = arith.mulf %158, %157 : vector<48x512xf32>
      %160 = math.tanh %159 : vector<48x512xf32>
      %cst_76 = arith.constant 1.000000e+00 : f32
      %161 = vector.broadcast %cst_76 : f32 to vector<48x512xf32>
      %162 = arith.addf %161, %160 : vector<48x512xf32>
      %cst_77 = arith.constant 5.000000e-01 : f32
      %163 = vector.broadcast %cst_77 : f32 to vector<48x512xf32>
      %164 = arith.mulf %163, %162 : vector<48x512xf32>
      %165 = arith.mulf %152, %164 : vector<48x512xf32>
      %166 = arith.truncf %165 : vector<48x512xf32> to vector<48x512xbf16>
      %c0_78 = arith.constant 0 : index
      %c0_79 = arith.constant 0 : index
      %c0_80 = arith.constant 0 : index
      %167 = vector.load %arg22[%c0_78, %c0_79, %c0_80] : memref<1x512x128xbf16, #tpu.memory_space<vmem>>, vector<1x512x128xbf16>
      %168 = vector.shape_cast %167 : vector<1x512x128xbf16> to vector<512x128xbf16>
      %cst_81 = arith.constant dense<0.000000e+00> : vector<48x128xf32>
      %169 = tpu.matmul %166, %168, %cst_81 {dimension_numbers = #tpu.dot_dimension_numbers<[1], [0], [0], [1], [0, 0, 1, 1], [], []>} : vector<48x512xbf16>, vector<512x128xbf16>, vector<48x128xf32> -> vector<48x128xf32>
      %c0_82 = arith.constant 0 : index
      %c0_83 = arith.constant 0 : index
      %c0_84 = arith.constant 0 : index
      %170 = vector.load %arg23[%c0_82, %c0_83, %c0_84] : memref<1x1x128xf32, #tpu.memory_space<vmem>>, vector<1x1x128xf32>
      %171 = vector.shape_cast %170 : vector<1x1x128xf32> to vector<1x128xf32>
      %172 = vector.broadcast %171 : vector<1x128xf32> to vector<48x128xf32>
      %173 = arith.addf %169, %172 : vector<48x128xf32>
      %174 = vector.shape_cast %173 : vector<48x128xf32> to vector<2x24x128xf32>
      %175 = arith.addf %115, %174 : vector<2x24x128xf32>
      %c0_85 = arith.constant 0 : index
      %c0_86 = arith.constant 0 : index
      %c0_87 = arith.constant 0 : index
      %176 = vector.load %arg44[%c0_85, %c0_86, %c0_87] : memref<2x24x128xf32, #tpu.memory_space<vmem>>, vector<2x24x128xf32>
      tpu.vector_store %arg44[%c0_85, %c0_86, %c0_87], %175 {strides = array<i32>} : memref<2x24x128xf32, #tpu.memory_space<vmem>>, vector<2x24x128xf32>,
      %c0_88 = arith.constant 0 : index
      %c0_89 = arith.constant 0 : index
      %c0_90 = arith.constant 0 : index
      %177 = vector.load %arg45[%c0_88, %c0_89, %c0_90] : memref<2x8x128xf32, #tpu.memory_space<vmem>>, vector<2x8x128xf32>
      %178 = arith.truncf %177 : vector<2x8x128xf32> to vector<2x8x128xbf16>
      %179 = vector.shape_cast %178 : vector<2x8x128xbf16> to vector<16x128xbf16>
      %c0_91 = arith.constant 0 : index
      %c0_92 = arith.constant 0 : index
      %c0_93 = arith.constant 0 : index
      %180 = vector.load %arg40[%c0_91, %c0_92, %c0_93] : memref<1x128x256xbf16, #tpu.memory_space<vmem>>, vector<1x128x256xbf16>
      %181 = vector.shape_cast %180 : vector<1x128x256xbf16> to vector<128x256xbf16>
      %cst_94 = arith.constant dense<0.000000e+00> : vector<16x256xf32>
      %182 = tpu.matmul %179, %181, %cst_94 {dimension_numbers = #tpu.dot_dimension_numbers<[1], [0], [0], [1], [0, 0, 1, 1], [], []>} : vector<16x128xbf16>, vector<128x256xbf16>, vector<16x256xf32> -> vector<16x256xf32>
      %c0_95 = arith.constant 0 : index
      %c0_96 = arith.constant 0 : index
      %c0_97 = arith.constant 0 : index
      %183 = vector.load %arg41[%c0_95, %c0_96, %c0_97] : memref<1x1x256xf32, #tpu.memory_space<vmem>>, vector<1x1x256xf32>
      %184 = vector.shape_cast %183 : vector<1x1x256xf32> to vector<1x256xf32>
      %185 = vector.broadcast %184 : vector<1x256xf32> to vector<16x256xf32>
      %186 = arith.addf %182, %185 : vector<16x256xf32>
      %cst_98 = arith.constant -1.000000e+03 : f32
      %cst_99 = arith.constant 1.000000e+03 : f32
      %187 = vector.broadcast %cst_98 : f32 to vector<16x256xf32>
      %188 = arith.maximumf %187, %186 : vector<16x256xf32>
      %189 = vector.broadcast %cst_99 : f32 to vector<16x256xf32>
      %190 = arith.minimumf %189, %188 : vector<16x256xf32>
      %191 = vector.extract_strided_slice %190 {offsets = [0, 0], sizes = [16, 128], strides = [1, 1]} : vector<16x256xf32> to vector<16x128xf32>
      %192 = vector.extract_strided_slice %190 {offsets = [0, 128], sizes = [16, 128], strides = [1, 1]} : vector<16x256xf32> to vector<16x128xf32>
      %193 = arith.mulf %191, %192 : vector<16x128xf32>
      %194 = arith.truncf %193 : vector<16x128xf32> to vector<16x128xbf16>
      %c0_100 = arith.constant 0 : index
      %c0_101 = arith.constant 0 : index
      %c0_102 = arith.constant 0 : index
      %195 = vector.load %arg42[%c0_100, %c0_101, %c0_102] : memref<1x128x128xbf16, #tpu.memory_space<vmem>>, vector<1x128x128xbf16>
      %196 = vector.shape_cast %195 : vector<1x128x128xbf16> to vector<128x128xbf16>
      %cst_103 = arith.constant dense<0.000000e+00> : vector<16x128xf32>
      %197 = tpu.matmul %194, %196, %cst_103 {dimension_numbers = #tpu.dot_dimension_numbers<[1], [0], [0], [1], [0, 0, 1, 1], [], []>} : vector<16x128xbf16>, vector<128x128xbf16>, vector<16x128xf32> -> vector<16x128xf32>
      %c0_104 = arith.constant 0 : index
      %c0_105 = arith.constant 0 : index
      %c0_106 = arith.constant 0 : index
      %198 = vector.load %arg43[%c0_104, %c0_105, %c0_106] : memref<1x1x128xf32, #tpu.memory_space<vmem>>, vector<1x1x128xf32>
      %199 = vector.shape_cast %198 : vector<1x1x128xf32> to vector<1x128xf32>
      %200 = vector.broadcast %199 : vector<1x128xf32> to vector<16x128xf32>
      %201 = arith.addf %197, %200 : vector<16x128xf32>
      %202 = vector.shape_cast %201 : vector<16x128xf32> to vector<2x8x128xf32>
      %c0_107 = arith.constant 0 : index
      %c0_108 = arith.constant 0 : index
      %c0_109 = arith.constant 0 : index
      %203 = vector.load %arg7[%c0_107, %c0_108, %c0_109] : memref<2x1x8xf32, #tpu.memory_space<vmem>>, vector<2x1x8xf32>
      %c0_110 = arith.constant 0 : index
      %c0_111 = arith.constant 0 : index
      %c0_112 = arith.constant 0 : index
      %204 = vector.load %arg24[%c0_110, %c0_111, %c0_112] : memref<1x1x128xf32, #tpu.memory_space<vmem>>, vector<1x1x128xf32>
      %205 = vector.shape_cast %204 : vector<1x1x128xf32> to vector<1x128xf32>
      %c0_113 = arith.constant 0 : index
      %c0_114 = arith.constant 0 : index
      %c0_115 = arith.constant 0 : index
      %206 = vector.load %arg25[%c0_113, %c0_114, %c0_115] : memref<1x1x128xf32, #tpu.memory_space<vmem>>, vector<1x1x128xf32>
      %207 = vector.shape_cast %206 : vector<1x1x128xf32> to vector<1x128xf32>
      %cst_116 = arith.constant dense<0.000000e+00> : vector<2x8xf32>
      %208 = vector.multi_reduction <add>, %202, %cst_116 [2] : vector<2x8x128xf32> to vector<2x8xf32>
      %209 = vector.shape_cast %208 : vector<2x8xf32> to vector<2x8x1xf32>
      %cst_117 = arith.constant 1.280000e+02 : f32
      %210 = vector.broadcast %cst_117 : f32 to vector<2x8x1xf32>
      %211 = arith.divf %209, %210 : vector<2x8x1xf32>
      %212 = vector.broadcast %211 : vector<2x8x1xf32> to vector<2x8x128xf32>
      %213 = arith.subf %202, %212 : vector<2x8x128xf32>
      %214 = arith.mulf %213, %213 : vector<2x8x128xf32>
      %cst_118 = arith.constant dense<0.000000e+00> : vector<2x8xf32>
      %215 = vector.multi_reduction <add>, %214, %cst_118 [2] : vector<2x8x128xf32> to vector<2x8xf32>
      %216 = vector.shape_cast %215 : vector<2x8xf32> to vector<2x8x1xf32>
      %cst_119 = arith.constant 1.280000e+02 : f32
      %217 = vector.broadcast %cst_119 : f32 to vector<2x8x1xf32>
      %218 = arith.divf %216, %217 : vector<2x8x1xf32>
      %219 = vector.broadcast %211 : vector<2x8x1xf32> to vector<2x8x128xf32>
      %220 = arith.subf %202, %219 : vector<2x8x128xf32>
      %cst_120 = arith.constant 9.99999974E-6 : f32
      %221 = vector.broadcast %cst_120 : f32 to vector<2x8x1xf32>
      %222 = arith.addf %218, %221 : vector<2x8x1xf32>
      %223 = math.rsqrt %222 : vector<2x8x1xf32>
      %224 = vector.broadcast %223 : vector<2x8x1xf32> to vector<2x8x128xf32>
      %225 = arith.mulf %220, %224 : vector<2x8x128xf32>
      %226 = vector.shape_cast %205 : vector<1x128xf32> to vector<1x1x128xf32>
      %227 = vector.broadcast %226 : vector<1x1x128xf32> to vector<2x8x128xf32>
      %228 = arith.mulf %225, %227 : vector<2x8x128xf32>
      %229 = vector.shape_cast %207 : vector<1x128xf32> to vector<1x1x128xf32>
      %230 = vector.broadcast %229 : vector<1x1x128xf32> to vector<2x8x128xf32>
      %231 = arith.addf %228, %230 : vector<2x8x128xf32>
      %232 = arith.truncf %231 : vector<2x8x128xf32> to vector<2x8x128xbf16>
      %233 = vector.shape_cast %232 : vector<2x8x128xbf16> to vector<16x128xbf16>
      %c0_121 = arith.constant 0 : index
      %c0_122 = arith.constant 0 : index
      %c0_123 = arith.constant 0 : index
      %234 = vector.load %arg26[%c0_121, %c0_122, %c0_123] : memref<1x128x384xbf16, #tpu.memory_space<vmem>>, vector<1x128x384xbf16>
      %235 = vector.shape_cast %234 : vector<1x128x384xbf16> to vector<128x384xbf16>
      %cst_124 = arith.constant dense<0.000000e+00> : vector<16x384xf32>
      %236 = tpu.matmul %233, %235, %cst_124 {dimension_numbers = #tpu.dot_dimension_numbers<[1], [0], [0], [1], [0, 0, 1, 1], [], []>} : vector<16x128xbf16>, vector<128x384xbf16>, vector<16x384xf32> -> vector<16x384xf32>
      %c0_125 = arith.constant 0 : index
      %c0_126 = arith.constant 0 : index
      %c0_127 = arith.constant 0 : index
      %237 = vector.load %arg27[%c0_125, %c0_126, %c0_127] : memref<1x1x384xf32, #tpu.memory_space<vmem>>, vector<1x1x384xf32>
      %238 = vector.shape_cast %237 : vector<1x1x384xf32> to vector<1x384xf32>
      %239 = vector.broadcast %238 : vector<1x384xf32> to vector<16x384xf32>
      %240 = arith.addf %236, %239 : vector<16x384xf32>
      %241 = vector.shape_cast %240 : vector<16x384xf32> to vector<2x8x384xf32>
      %242 = vector.extract_strided_slice %241 {offsets = [0, 0, 0], sizes = [2, 8, 128], strides = [1, 1, 1]} : vector<2x8x384xf32> to vector<2x8x128xf32>
      %243 = arith.truncf %242 : vector<2x8x128xf32> to vector<2x8x128xbf16>
      %244 = vector.extract_strided_slice %241 {offsets = [0, 0, 128], sizes = [2, 8, 128], strides = [1, 1, 1]} : vector<2x8x384xf32> to vector<2x8x128xf32>
      %245 = arith.truncf %244 : vector<2x8x128xf32> to vector<2x8x128xbf16>
      %246 = vector.extract_strided_slice %241 {offsets = [0, 0, 256], sizes = [2, 8, 128], strides = [1, 1, 1]} : vector<2x8x384xf32> to vector<2x8x128xf32>
      %247 = arith.truncf %246 : vector<2x8x128xf32> to vector<2x8x128xbf16>
      "tpu.trace_start"() <{level = 10 : i32, message = "bqd,bkd->bqk"}> : () -> ()
      %cst_128 = arith.constant dense<0.000000e+00> : vector<2x8x8xf32>
      %248 = tpu.matmul %243, %245, %cst_128 {dimension_numbers = #tpu.dot_dimension_numbers<[2], [2], [1], [1], [0, 0, 0, 1, 1, 1], [0], [0]>} : vector<2x8x128xbf16>, vector<2x8x128xbf16>, vector<2x8x8xf32> -> vector<2x8x8xf32>
      "tpu.trace_stop"() : () -> ()
      %cst_129 = arith.constant 0.0883883461 : f32
      %249 = vector.broadcast %cst_129 : f32 to vector<2x8x8xf32>
      %250 = arith.mulf %248, %249 : vector<2x8x8xf32>
      %251 = vector.broadcast %203 : vector<2x1x8xf32> to vector<2x8x8xf32>
      %252 = arith.addf %250, %251 : vector<2x8x8xf32>
      %cst_130 = arith.constant dense<0xFF800000> : vector<2x8xf32>
      %253 = vector.multi_reduction <maximumf>, %252, %cst_130 [2] : vector<2x8x8xf32> to vector<2x8xf32>
      %254 = vector.shape_cast %253 : vector<2x8xf32> to vector<2x8x1xf32>
      %255 = vector.broadcast %254 : vector<2x8x1xf32> to vector<2x8x8xf32>
      %256 = arith.subf %252, %255 : vector<2x8x8xf32>
      %257 = math.exp %256 : vector<2x8x8xf32>
      %cst_131 = arith.constant dense<0.000000e+00> : vector<2x8xf32>
      %258 = vector.multi_reduction <add>, %257, %cst_131 [2] : vector<2x8x8xf32> to vector<2x8xf32>
      %259 = vector.shape_cast %258 : vector<2x8xf32> to vector<2x8x1xf32>
      %260 = tpu.reciprocal %259 {approx = true} : vector<2x8x1xf32> -> vector<2x8x1xf32>
      %261 = vector.broadcast %260 : vector<2x8x1xf32> to vector<2x8x8xf32>
      %262 = arith.mulf %257, %261 : vector<2x8x8xf32>
      %263 = arith.truncf %262 : vector<2x8x8xf32> to vector<2x8x8xbf16>
      "tpu.trace_start"() <{level = 10 : i32, message = "bqk,bkd->bqd"}> : () -> ()
      %cst_132 = arith.constant dense<0.000000e+00> : vector<2x8x128xf32>
      %264 = tpu.matmul %263, %247, %cst_132 {dimension_numbers = #tpu.dot_dimension_numbers<[2], [1], [1], [2], [0, 0, 0, 1, 1, 2], [0], [0]>} : vector<2x8x8xbf16>, vector<2x8x128xbf16>, vector<2x8x128xf32> -> vector<2x8x128xf32>
      "tpu.trace_stop"() : () -> ()
      %265 = vector.shape_cast %264 : vector<2x8x128xf32> to vector<16x128xf32>
      %266 = arith.truncf %265 : vector<16x128xf32> to vector<16x128xbf16>
      %c0_133 = arith.constant 0 : index
      %c0_134 = arith.constant 0 : index
      %c0_135 = arith.constant 0 : index
      %267 = vector.load %arg28[%c0_133, %c0_134, %c0_135] : memref<1x128x128xbf16, #tpu.memory_space<vmem>>, vector<1x128x128xbf16>
      %268 = vector.shape_cast %267 : vector<1x128x128xbf16> to vector<128x128xbf16>
      %cst_136 = arith.constant dense<0.000000e+00> : vector<16x128xf32>
      %269 = tpu.matmul %266, %268, %cst_136 {dimension_numbers = #tpu.dot_dimension_numbers<[1], [0], [0], [1], [0, 0, 1, 1], [], []>} : vector<16x128xbf16>, vector<128x128xbf16>, vector<16x128xf32> -> vector<16x128xf32>
      %c0_137 = arith.constant 0 : index
      %c0_138 = arith.constant 0 : index
      %c0_139 = arith.constant 0 : index
      %270 = vector.load %arg29[%c0_137, %c0_138, %c0_139] : memref<1x1x128xf32, #tpu.memory_space<vmem>>, vector<1x1x128xf32>
      %271 = vector.shape_cast %270 : vector<1x1x128xf32> to vector<1x128xf32>
      %272 = vector.broadcast %271 : vector<1x128xf32> to vector<16x128xf32>
      %273 = arith.addf %269, %272 : vector<16x128xf32>
      %274 = vector.shape_cast %273 : vector<16x128xf32> to vector<2x8x128xf32>
      %275 = arith.addf %202, %274 : vector<2x8x128xf32>
      %c0_140 = arith.constant 0 : index
      %c0_141 = arith.constant 0 : index
      %c0_142 = arith.constant 0 : index
      %276 = vector.load %arg30[%c0_140, %c0_141, %c0_142] : memref<1x1x128xf32, #tpu.memory_space<vmem>>, vector<1x1x128xf32>
      %277 = vector.shape_cast %276 : vector<1x1x128xf32> to vector<1x128xf32>
      %c0_143 = arith.constant 0 : index
      %c0_144 = arith.constant 0 : index
      %c0_145 = arith.constant 0 : index
      %278 = vector.load %arg31[%c0_143, %c0_144, %c0_145] : memref<1x1x128xf32, #tpu.memory_space<vmem>>, vector<1x1x128xf32>
      %279 = vector.shape_cast %278 : vector<1x1x128xf32> to vector<1x128xf32>
      %cst_146 = arith.constant dense<0.000000e+00> : vector<2x8xf32>
      %280 = vector.multi_reduction <add>, %275, %cst_146 [2] : vector<2x8x128xf32> to vector<2x8xf32>
      %281 = vector.shape_cast %280 : vector<2x8xf32> to vector<2x8x1xf32>
      %cst_147 = arith.constant 1.280000e+02 : f32
      %282 = vector.broadcast %cst_147 : f32 to vector<2x8x1xf32>
      %283 = arith.divf %281, %282 : vector<2x8x1xf32>
      %284 = vector.broadcast %283 : vector<2x8x1xf32> to vector<2x8x128xf32>
      %285 = arith.subf %275, %284 : vector<2x8x128xf32>
      %286 = arith.mulf %285, %285 : vector<2x8x128xf32>
      %cst_148 = arith.constant dense<0.000000e+00> : vector<2x8xf32>
      %287 = vector.multi_reduction <add>, %286, %cst_148 [2] : vector<2x8x128xf32> to vector<2x8xf32>
      %288 = vector.shape_cast %287 : vector<2x8xf32> to vector<2x8x1xf32>
      %cst_149 = arith.constant 1.280000e+02 : f32
      %289 = vector.broadcast %cst_149 : f32 to vector<2x8x1xf32>
      %290 = arith.divf %288, %289 : vector<2x8x1xf32>
      %291 = vector.broadcast %283 : vector<2x8x1xf32> to vector<2x8x128xf32>
      %292 = arith.subf %275, %291 : vector<2x8x128xf32>
      %cst_150 = arith.constant 9.99999974E-6 : f32
      %293 = vector.broadcast %cst_150 : f32 to vector<2x8x1xf32>
      %294 = arith.addf %290, %293 : vector<2x8x1xf32>
      %295 = math.rsqrt %294 : vector<2x8x1xf32>
      %296 = vector.broadcast %295 : vector<2x8x1xf32> to vector<2x8x128xf32>
      %297 = arith.mulf %292, %296 : vector<2x8x128xf32>
      %298 = vector.shape_cast %277 : vector<1x128xf32> to vector<1x1x128xf32>
      %299 = vector.broadcast %298 : vector<1x1x128xf32> to vector<2x8x128xf32>
      %300 = arith.mulf %297, %299 : vector<2x8x128xf32>
      %301 = vector.shape_cast %279 : vector<1x128xf32> to vector<1x1x128xf32>
      %302 = vector.broadcast %301 : vector<1x1x128xf32> to vector<2x8x128xf32>
      %303 = arith.addf %300, %302 : vector<2x8x128xf32>
      %304 = arith.truncf %303 : vector<2x8x128xf32> to vector<2x8x128xbf16>
      %305 = vector.shape_cast %304 : vector<2x8x128xbf16> to vector<16x128xbf16>
      %c0_151 = arith.constant 0 : index
      %c0_152 = arith.constant 0 : index
      %c0_153 = arith.constant 0 : index
      %306 = vector.load %arg32[%c0_151, %c0_152, %c0_153] : memref<1x128x512xbf16, #tpu.memory_space<vmem>>, vector<1x128x512xbf16>
      %307 = vector.shape_cast %306 : vector<1x128x512xbf16> to vector<128x512xbf16>
      %cst_154 = arith.constant dense<0.000000e+00> : vector<16x512xf32>
      %308 = tpu.matmul %305, %307, %cst_154 {dimension_numbers = #tpu.dot_dimension_numbers<[1], [0], [0], [1], [0, 0, 1, 1], [], []>} : vector<16x128xbf16>, vector<128x512xbf16>, vector<16x512xf32> -> vector<16x512xf32>
      %c0_155 = arith.constant 0 : index
      %c0_156 = arith.constant 0 : index
      %c0_157 = arith.constant 0 : index
      %309 = vector.load %arg33[%c0_155, %c0_156, %c0_157] : memref<1x1x512xf32, #tpu.memory_space<vmem>>, vector<1x1x512xf32>
      %310 = vector.shape_cast %309 : vector<1x1x512xf32> to vector<1x512xf32>
      %311 = vector.broadcast %310 : vector<1x512xf32> to vector<16x512xf32>
      %312 = arith.addf %308, %311 : vector<16x512xf32>
      %313 = arith.mulf %312, %312 : vector<16x512xf32>
      %314 = arith.mulf %312, %313 : vector<16x512xf32>
      %cst_158 = arith.constant 4.471500e-02 : f32
      %315 = vector.broadcast %cst_158 : f32 to vector<16x512xf32>
      %316 = arith.mulf %315, %314 : vector<16x512xf32>
      %317 = arith.addf %312, %316 : vector<16x512xf32>
      %cst_159 = arith.constant 0.797884583 : f32
      %318 = vector.broadcast %cst_159 : f32 to vector<16x512xf32>
      %319 = arith.mulf %318, %317 : vector<16x512xf32>
      %320 = math.tanh %319 : vector<16x512xf32>
      %cst_160 = arith.constant 1.000000e+00 : f32
      %321 = vector.broadcast %cst_160 : f32 to vector<16x512xf32>
      %322 = arith.addf %321, %320 : vector<16x512xf32>
      %cst_161 = arith.constant 5.000000e-01 : f32
      %323 = vector.broadcast %cst_161 : f32 to vector<16x512xf32>
      %324 = arith.mulf %323, %322 : vector<16x512xf32>
      %325 = arith.mulf %312, %324 : vector<16x512xf32>
      %326 = arith.truncf %325 : vector<16x512xf32> to vector<16x512xbf16>
      %c0_162 = arith.constant 0 : index
      %c0_163 = arith.constant 0 : index
      %c0_164 = arith.constant 0 : index
      %327 = vector.load %arg34[%c0_162, %c0_163, %c0_164] : memref<1x512x128xbf16, #tpu.memory_space<vmem>>, vector<1x512x128xbf16>
      %328 = vector.shape_cast %327 : vector<1x512x128xbf16> to vector<512x128xbf16>
      %cst_165 = arith.constant dense<0.000000e+00> : vector<16x128xf32>
      %329 = tpu.matmul %326, %328, %cst_165 {dimension_numbers = #tpu.dot_dimension_numbers<[1], [0], [0], [1], [0, 0, 1, 1], [], []>} : vector<16x512xbf16>, vector<512x128xbf16>, vector<16x128xf32> -> vector<16x128xf32>
      %c0_166 = arith.constant 0 : index
      %c0_167 = arith.constant 0 : index
      %c0_168 = arith.constant 0 : index
      %330 = vector.load %arg35[%c0_166, %c0_167, %c0_168] : memref<1x1x128xf32, #tpu.memory_space<vmem>>, vector<1x1x128xf32>
      %331 = vector.shape_cast %330 : vector<1x1x128xf32> to vector<1x128xf32>
      %332 = vector.broadcast %331 : vector<1x128xf32> to vector<16x128xf32>
      %333 = arith.addf %329, %332 : vector<16x128xf32>
      %334 = vector.shape_cast %333 : vector<16x128xf32> to vector<2x8x128xf32>
      %335 = arith.addf %275, %334 : vector<2x8x128xf32>
      %c0_169 = arith.constant 0 : index
      %c0_170 = arith.constant 0 : index
      %c0_171 = arith.constant 0 : index
      %336 = vector.load %arg45[%c0_169, %c0_170, %c0_171] : memref<2x8x128xf32, #tpu.memory_space<vmem>>, vector<2x8x128xf32>
      tpu.vector_store %arg45[%c0_169, %c0_170, %c0_171], %335 {strides = array<i32>} : memref<2x8x128xf32, #tpu.memory_space<vmem>>, vector<2x8x128xf32>,
    } else {
    }
    %9 = arith.extui %5 : i1 to i32
    %c0_i32_2 = arith.constant 0 : i32
    %10 = arith.cmpi ne, %9, %c0_i32_2 : i32
    scf.if %10 {
      %c0 = arith.constant 0 : index
      %c0_6 = arith.constant 0 : index
      %c0_7 = arith.constant 0 : index
      %17 = vector.load %arg44[%c0, %c0_6, %c0_7] : memref<2x24x128xf32, #tpu.memory_space<vmem>>, vector<2x24x128xf32>
      %c0_8 = arith.constant 0 : index
      %c0_9 = arith.constant 0 : index
      %c0_10 = arith.constant 0 : index
      %18 = vector.load %arg45[%c0_8, %c0_9, %c0_10] : memref<2x8x128xf32, #tpu.memory_space<vmem>>, vector<2x8x128xf32>
      %19 = tpu.concatenate %17, %18 in 1 : vector<2x24x128xf32>, vector<2x8x128xf32> -> vector<2x32x128xf32>
      %c0_11 = arith.constant 0 : index
      %c0_12 = arith.constant 0 : index
      %c0_13 = arith.constant 0 : index
      %20 = vector.load %arg8[%c0_11, %c0_12, %c0_13] : memref<2x1x32xf32, #tpu.memory_space<vmem>>, vector<2x1x32xf32>
      %c0_14 = arith.constant 0 : index
      %c0_15 = arith.constant 0 : index
      %c0_16 = arith.constant 0 : index
      %21 = vector.load %arg12[%c0_14, %c0_15, %c0_16] : memref<1x1x128xf32, #tpu.memory_space<vmem>>, vector<1x1x128xf32>
      %22 = vector.shape_cast %21 : vector<1x1x128xf32> to vector<1x128xf32>
      %c0_17 = arith.constant 0 : index
      %c0_18 = arith.constant 0 : index
      %c0_19 = arith.constant 0 : index
      %23 = vector.load %arg13[%c0_17, %c0_18, %c0_19] : memref<1x1x128xf32, #tpu.memory_space<vmem>>, vector<1x1x128xf32>
      %24 = vector.shape_cast %23 : vector<1x1x128xf32> to vector<1x128xf32>
      %cst = arith.constant dense<0.000000e+00> : vector<2x32xf32>
      %25 = vector.multi_reduction <add>, %19, %cst [2] : vector<2x32x128xf32> to vector<2x32xf32>
      %26 = vector.shape_cast %25 : vector<2x32xf32> to vector<2x32x1xf32>
      %cst_20 = arith.constant 1.280000e+02 : f32
      %27 = vector.broadcast %cst_20 : f32 to vector<2x32x1xf32>
      %28 = arith.divf %26, %27 : vector<2x32x1xf32>
      %29 = vector.broadcast %28 : vector<2x32x1xf32> to vector<2x32x128xf32>
      %30 = arith.subf %19, %29 : vector<2x32x128xf32>
      %31 = arith.mulf %30, %30 : vector<2x32x128xf32>
      %cst_21 = arith.constant dense<0.000000e+00> : vector<2x32xf32>
      %32 = vector.multi_reduction <add>, %31, %cst_21 [2] : vector<2x32x128xf32> to vector<2x32xf32>
      %33 = vector.shape_cast %32 : vector<2x32xf32> to vector<2x32x1xf32>
      %cst_22 = arith.constant 1.280000e+02 : f32
      %34 = vector.broadcast %cst_22 : f32 to vector<2x32x1xf32>
      %35 = arith.divf %33, %34 : vector<2x32x1xf32>
      %36 = vector.broadcast %28 : vector<2x32x1xf32> to vector<2x32x128xf32>
      %37 = arith.subf %19, %36 : vector<2x32x128xf32>
      %cst_23 = arith.constant 9.99999974E-6 : f32
      %38 = vector.broadcast %cst_23 : f32 to vector<2x32x1xf32>
      %39 = arith.addf %35, %38 : vector<2x32x1xf32>
      %40 = math.rsqrt %39 : vector<2x32x1xf32>
      %41 = vector.broadcast %40 : vector<2x32x1xf32> to vector<2x32x128xf32>
      %42 = arith.mulf %37, %41 : vector<2x32x128xf32>
      %43 = vector.shape_cast %22 : vector<1x128xf32> to vector<1x1x128xf32>
      %44 = vector.broadcast %43 : vector<1x1x128xf32> to vector<2x32x128xf32>
      %45 = arith.mulf %42, %44 : vector<2x32x128xf32>
      %46 = vector.shape_cast %24 : vector<1x128xf32> to vector<1x1x128xf32>
      %47 = vector.broadcast %46 : vector<1x1x128xf32> to vector<2x32x128xf32>
      %48 = arith.addf %45, %47 : vector<2x32x128xf32>
      %49 = arith.truncf %48 : vector<2x32x128xf32> to vector<2x32x128xbf16>
      %50 = vector.shape_cast %49 : vector<2x32x128xbf16> to vector<64x128xbf16>
      %c0_24 = arith.constant 0 : index
      %c0_25 = arith.constant 0 : index
      %c0_26 = arith.constant 0 : index
      %51 = vector.load %arg14[%c0_24, %c0_25, %c0_26] : memref<1x128x384xbf16, #tpu.memory_space<vmem>>, vector<1x128x384xbf16>
      %52 = vector.shape_cast %51 : vector<1x128x384xbf16> to vector<128x384xbf16>
      %cst_27 = arith.constant dense<0.000000e+00> : vector<64x384xf32>
      %53 = tpu.matmul %50, %52, %cst_27 {dimension_numbers = #tpu.dot_dimension_numbers<[1], [0], [0], [1], [0, 0, 1, 1], [], []>} : vector<64x128xbf16>, vector<128x384xbf16>, vector<64x384xf32> -> vector<64x384xf32>
      %c0_28 = arith.constant 0 : index
      %c0_29 = arith.constant 0 : index
      %c0_30 = arith.constant 0 : index
      %54 = vector.load %arg15[%c0_28, %c0_29, %c0_30] : memref<1x1x384xf32, #tpu.memory_space<vmem>>, vector<1x1x384xf32>
      %55 = vector.shape_cast %54 : vector<1x1x384xf32> to vector<1x384xf32>
      %56 = vector.broadcast %55 : vector<1x384xf32> to vector<64x384xf32>
      %57 = arith.addf %53, %56 : vector<64x384xf32>
      %58 = vector.shape_cast %57 : vector<64x384xf32> to vector<2x32x384xf32>
      %59 = vector.extract_strided_slice %58 {offsets = [0, 0, 0], sizes = [2, 32, 128], strides = [1, 1, 1]} : vector<2x32x384xf32> to vector<2x32x128xf32>
      %60 = arith.truncf %59 : vector<2x32x128xf32> to vector<2x32x128xbf16>
      %61 = vector.extract_strided_slice %58 {offsets = [0, 0, 128], sizes = [2, 32, 128], strides = [1, 1, 1]} : vector<2x32x384xf32> to vector<2x32x128xf32>
      %62 = arith.truncf %61 : vector<2x32x128xf32> to vector<2x32x128xbf16>
      %63 = vector.extract_strided_slice %58 {offsets = [0, 0, 256], sizes = [2, 32, 128], strides = [1, 1, 1]} : vector<2x32x384xf32> to vector<2x32x128xf32>
      %64 = arith.truncf %63 : vector<2x32x128xf32> to vector<2x32x128xbf16>
      "tpu.trace_start"() <{level = 10 : i32, message = "bqd,bkd->bqk"}> : () -> ()
      %cst_31 = arith.constant dense<0.000000e+00> : vector<2x32x32xf32>
      %65 = tpu.matmul %60, %62, %cst_31 {dimension_numbers = #tpu.dot_dimension_numbers<[2], [2], [1], [1], [0, 0, 0, 1, 1, 1], [0], [0]>} : vector<2x32x128xbf16>, vector<2x32x128xbf16>, vector<2x32x32xf32> -> vector<2x32x32xf32>
      "tpu.trace_stop"() : () -> ()
      %cst_32 = arith.constant 0.0883883461 : f32
      %66 = vector.broadcast %cst_32 : f32 to vector<2x32x32xf32>
      %67 = arith.mulf %65, %66 : vector<2x32x32xf32>
      %68 = vector.broadcast %20 : vector<2x1x32xf32> to vector<2x32x32xf32>
      %69 = arith.addf %67, %68 : vector<2x32x32xf32>
      %cst_33 = arith.constant dense<0xFF800000> : vector<2x32xf32>
      %70 = vector.multi_reduction <maximumf>, %69, %cst_33 [2] : vector<2x32x32xf32> to vector<2x32xf32>
      %71 = vector.shape_cast %70 : vector<2x32xf32> to vector<2x32x1xf32>
      %72 = vector.broadcast %71 : vector<2x32x1xf32> to vector<2x32x32xf32>
      %73 = arith.subf %69, %72 : vector<2x32x32xf32>
      %74 = math.exp %73 : vector<2x32x32xf32>
      %cst_34 = arith.constant dense<0.000000e+00> : vector<2x32xf32>
      %75 = vector.multi_reduction <add>, %74, %cst_34 [2] : vector<2x32x32xf32> to vector<2x32xf32>
      %76 = vector.shape_cast %75 : vector<2x32xf32> to vector<2x32x1xf32>
      %77 = tpu.reciprocal %76 {approx = true} : vector<2x32x1xf32> -> vector<2x32x1xf32>
      %78 = vector.broadcast %77 : vector<2x32x1xf32> to vector<2x32x32xf32>
      %79 = arith.mulf %74, %78 : vector<2x32x32xf32>
      %80 = arith.truncf %79 : vector<2x32x32xf32> to vector<2x32x32xbf16>
      "tpu.trace_start"() <{level = 10 : i32, message = "bqk,bkd->bqd"}> : () -> ()
      %cst_35 = arith.constant dense<0.000000e+00> : vector<2x32x128xf32>
      %81 = tpu.matmul %80, %64, %cst_35 {dimension_numbers = #tpu.dot_dimension_numbers<[2], [1], [1], [2], [0, 0, 0, 1, 1, 2], [0], [0]>} : vector<2x32x32xbf16>, vector<2x32x128xbf16>, vector<2x32x128xf32> -> vector<2x32x128xf32>
      "tpu.trace_stop"() : () -> ()
      %82 = vector.shape_cast %81 : vector<2x32x128xf32> to vector<64x128xf32>
      %83 = arith.truncf %82 : vector<64x128xf32> to vector<64x128xbf16>
      %c0_36 = arith.constant 0 : index
      %c0_37 = arith.constant 0 : index
      %c0_38 = arith.constant 0 : index
      %84 = vector.load %arg16[%c0_36, %c0_37, %c0_38] : memref<1x128x128xbf16, #tpu.memory_space<vmem>>, vector<1x128x128xbf16>
      %85 = vector.shape_cast %84 : vector<1x128x128xbf16> to vector<128x128xbf16>
      %cst_39 = arith.constant dense<0.000000e+00> : vector<64x128xf32>
      %86 = tpu.matmul %83, %85, %cst_39 {dimension_numbers = #tpu.dot_dimension_numbers<[1], [0], [0], [1], [0, 0, 1, 1], [], []>} : vector<64x128xbf16>, vector<128x128xbf16>, vector<64x128xf32> -> vector<64x128xf32>
      %c0_40 = arith.constant 0 : index
      %c0_41 = arith.constant 0 : index
      %c0_42 = arith.constant 0 : index
      %87 = vector.load %arg17[%c0_40, %c0_41, %c0_42] : memref<1x1x128xf32, #tpu.memory_space<vmem>>, vector<1x1x128xf32>
      %88 = vector.shape_cast %87 : vector<1x1x128xf32> to vector<1x128xf32>
      %89 = vector.broadcast %88 : vector<1x128xf32> to vector<64x128xf32>
      %90 = arith.addf %86, %89 : vector<64x128xf32>
      %91 = vector.shape_cast %90 : vector<64x128xf32> to vector<2x32x128xf32>
      %92 = arith.addf %19, %91 : vector<2x32x128xf32>
      %c0_43 = arith.constant 0 : index
      %c0_44 = arith.constant 0 : index
      %c0_45 = arith.constant 0 : index
      %93 = vector.load %arg18[%c0_43, %c0_44, %c0_45] : memref<1x1x128xf32, #tpu.memory_space<vmem>>, vector<1x1x128xf32>
      %94 = vector.shape_cast %93 : vector<1x1x128xf32> to vector<1x128xf32>
      %c0_46 = arith.constant 0 : index
      %c0_47 = arith.constant 0 : index
      %c0_48 = arith.constant 0 : index
      %95 = vector.load %arg19[%c0_46, %c0_47, %c0_48] : memref<1x1x128xf32, #tpu.memory_space<vmem>>, vector<1x1x128xf32>
      %96 = vector.shape_cast %95 : vector<1x1x128xf32> to vector<1x128xf32>
      %cst_49 = arith.constant dense<0.000000e+00> : vector<2x32xf32>
      %97 = vector.multi_reduction <add>, %92, %cst_49 [2] : vector<2x32x128xf32> to vector<2x32xf32>
      %98 = vector.shape_cast %97 : vector<2x32xf32> to vector<2x32x1xf32>
      %cst_50 = arith.constant 1.280000e+02 : f32
      %99 = vector.broadcast %cst_50 : f32 to vector<2x32x1xf32>
      %100 = arith.divf %98, %99 : vector<2x32x1xf32>
      %101 = vector.broadcast %100 : vector<2x32x1xf32> to vector<2x32x128xf32>
      %102 = arith.subf %92, %101 : vector<2x32x128xf32>
      %103 = arith.mulf %102, %102 : vector<2x32x128xf32>
      %cst_51 = arith.constant dense<0.000000e+00> : vector<2x32xf32>
      %104 = vector.multi_reduction <add>, %103, %cst_51 [2] : vector<2x32x128xf32> to vector<2x32xf32>
      %105 = vector.shape_cast %104 : vector<2x32xf32> to vector<2x32x1xf32>
      %cst_52 = arith.constant 1.280000e+02 : f32
      %106 = vector.broadcast %cst_52 : f32 to vector<2x32x1xf32>
      %107 = arith.divf %105, %106 : vector<2x32x1xf32>
      %108 = vector.broadcast %100 : vector<2x32x1xf32> to vector<2x32x128xf32>
      %109 = arith.subf %92, %108 : vector<2x32x128xf32>
      %cst_53 = arith.constant 9.99999974E-6 : f32
      %110 = vector.broadcast %cst_53 : f32 to vector<2x32x1xf32>
      %111 = arith.addf %107, %110 : vector<2x32x1xf32>
      %112 = math.rsqrt %111 : vector<2x32x1xf32>
      %113 = vector.broadcast %112 : vector<2x32x1xf32> to vector<2x32x128xf32>
      %114 = arith.mulf %109, %113 : vector<2x32x128xf32>
      %115 = vector.shape_cast %94 : vector<1x128xf32> to vector<1x1x128xf32>
      %116 = vector.broadcast %115 : vector<1x1x128xf32> to vector<2x32x128xf32>
      %117 = arith.mulf %114, %116 : vector<2x32x128xf32>
      %118 = vector.shape_cast %96 : vector<1x128xf32> to vector<1x1x128xf32>
      %119 = vector.broadcast %118 : vector<1x1x128xf32> to vector<2x32x128xf32>
      %120 = arith.addf %117, %119 : vector<2x32x128xf32>
      %121 = arith.truncf %120 : vector<2x32x128xf32> to vector<2x32x128xbf16>
      %122 = vector.shape_cast %121 : vector<2x32x128xbf16> to vector<64x128xbf16>
      %c0_54 = arith.constant 0 : index
      %c0_55 = arith.constant 0 : index
      %c0_56 = arith.constant 0 : index
      %123 = vector.load %arg20[%c0_54, %c0_55, %c0_56] : memref<1x128x512xbf16, #tpu.memory_space<vmem>>, vector<1x128x512xbf16>
      %124 = vector.shape_cast %123 : vector<1x128x512xbf16> to vector<128x512xbf16>
      %cst_57 = arith.constant dense<0.000000e+00> : vector<64x512xf32>
      %125 = tpu.matmul %122, %124, %cst_57 {dimension_numbers = #tpu.dot_dimension_numbers<[1], [0], [0], [1], [0, 0, 1, 1], [], []>} : vector<64x128xbf16>, vector<128x512xbf16>, vector<64x512xf32> -> vector<64x512xf32>
      %c0_58 = arith.constant 0 : index
      %c0_59 = arith.constant 0 : index
      %c0_60 = arith.constant 0 : index
      %126 = vector.load %arg21[%c0_58, %c0_59, %c0_60] : memref<1x1x512xf32, #tpu.memory_space<vmem>>, vector<1x1x512xf32>
      %127 = vector.shape_cast %126 : vector<1x1x512xf32> to vector<1x512xf32>
      %128 = vector.broadcast %127 : vector<1x512xf32> to vector<64x512xf32>
      %129 = arith.addf %125, %128 : vector<64x512xf32>
      %130 = arith.mulf %129, %129 : vector<64x512xf32>
      %131 = arith.mulf %129, %130 : vector<64x512xf32>
      %cst_61 = arith.constant 4.471500e-02 : f32
      %132 = vector.broadcast %cst_61 : f32 to vector<64x512xf32>
      %133 = arith.mulf %132, %131 : vector<64x512xf32>
      %134 = arith.addf %129, %133 : vector<64x512xf32>
      %cst_62 = arith.constant 0.797884583 : f32
      %135 = vector.broadcast %cst_62 : f32 to vector<64x512xf32>
      %136 = arith.mulf %135, %134 : vector<64x512xf32>
      %137 = math.tanh %136 : vector<64x512xf32>
      %cst_63 = arith.constant 1.000000e+00 : f32
      %138 = vector.broadcast %cst_63 : f32 to vector<64x512xf32>
      %139 = arith.addf %138, %137 : vector<64x512xf32>
      %cst_64 = arith.constant 5.000000e-01 : f32
      %140 = vector.broadcast %cst_64 : f32 to vector<64x512xf32>
      %141 = arith.mulf %140, %139 : vector<64x512xf32>
      %142 = arith.mulf %129, %141 : vector<64x512xf32>
      %143 = arith.truncf %142 : vector<64x512xf32> to vector<64x512xbf16>
      %c0_65 = arith.constant 0 : index
      %c0_66 = arith.constant 0 : index
      %c0_67 = arith.constant 0 : index
      %144 = vector.load %arg22[%c0_65, %c0_66, %c0_67] : memref<1x512x128xbf16, #tpu.memory_space<vmem>>, vector<1x512x128xbf16>
      %145 = vector.shape_cast %144 : vector<1x512x128xbf16> to vector<512x128xbf16>
      %cst_68 = arith.constant dense<0.000000e+00> : vector<64x128xf32>
      %146 = tpu.matmul %143, %145, %cst_68 {dimension_numbers = #tpu.dot_dimension_numbers<[1], [0], [0], [1], [0, 0, 1, 1], [], []>} : vector<64x512xbf16>, vector<512x128xbf16>, vector<64x128xf32> -> vector<64x128xf32>
      %c0_69 = arith.constant 0 : index
      %c0_70 = arith.constant 0 : index
      %c0_71 = arith.constant 0 : index
      %147 = vector.load %arg23[%c0_69, %c0_70, %c0_71] : memref<1x1x128xf32, #tpu.memory_space<vmem>>, vector<1x1x128xf32>
      %148 = vector.shape_cast %147 : vector<1x1x128xf32> to vector<1x128xf32>
      %149 = vector.broadcast %148 : vector<1x128xf32> to vector<64x128xf32>
      %150 = arith.addf %146, %149 : vector<64x128xf32>
      %151 = vector.shape_cast %150 : vector<64x128xf32> to vector<2x32x128xf32>
      %152 = arith.addf %92, %151 : vector<2x32x128xf32>
      %153 = vector.extract_strided_slice %152 {offsets = [0, 0, 0], sizes = [2, 24, 128], strides = [1, 1, 1]} : vector<2x32x128xf32> to vector<2x24x128xf32>
      %c0_72 = arith.constant 0 : index
      %c0_73 = arith.constant 0 : index
      %c0_74 = arith.constant 0 : index
      %154 = vector.load %arg44[%c0_72, %c0_73, %c0_74] : memref<2x24x128xf32, #tpu.memory_space<vmem>>, vector<2x24x128xf32>
      tpu.vector_store %arg44[%c0_72, %c0_73, %c0_74], %153 {strides = array<i32>} : memref<2x24x128xf32, #tpu.memory_space<vmem>>, vector<2x24x128xf32>,
      %155 = vector.extract_strided_slice %152 {offsets = [0, 24, 0], sizes = [2, 8, 128], strides = [1, 1, 1]} : vector<2x32x128xf32> to vector<2x8x128xf32>
      %c0_75 = arith.constant 0 : index
      %c0_76 = arith.constant 0 : index
      %c0_77 = arith.constant 0 : index
      %156 = vector.load %arg45[%c0_75, %c0_76, %c0_77] : memref<2x8x128xf32, #tpu.memory_space<vmem>>, vector<2x8x128xf32>
      tpu.vector_store %arg45[%c0_75, %c0_76, %c0_77], %155 {strides = array<i32>} : memref<2x8x128xf32, #tpu.memory_space<vmem>>, vector<2x8x128xf32>,
    } else {
    }
    %c1_i32 = arith.constant 1 : i32
    %11 = arith.cmpi eq, %arg0, %c1_i32 : i32
    %12 = arith.extui %11 : i1 to i32
    %c0_i32_3 = arith.constant 0 : i32
    %13 = arith.cmpi ne, %12, %c0_i32_3 : i32
    scf.if %13 {
      %c0 = arith.constant 0 : index
      %c0_6 = arith.constant 0 : index
      %c0_7 = arith.constant 0 : index
      %17 = vector.load %arg44[%c0, %c0_6, %c0_7] : memref<2x24x128xf32, #tpu.memory_space<vmem>>, vector<2x24x128xf32>
      %c0_8 = arith.constant 0 : index
      %c0_9 = arith.constant 0 : index
      %c0_10 = arith.constant 0 : index
      %18 = vector.load %arg45[%c0_8, %c0_9, %c0_10] : memref<2x8x128xf32, #tpu.memory_space<vmem>>, vector<2x8x128xf32>
      %c0_11 = arith.constant 0 : index
      %c0_12 = arith.constant 0 : index
      %c0_13 = arith.constant 0 : index
      %19 = vector.load %arg9[%c0_11, %c0_12, %c0_13] : memref<2x8x128xf32, #tpu.memory_space<vmem>>, vector<2x8x128xf32>
      %c0_14 = arith.constant 0 : index
      %20 = memref.load %arg10[%c0_14] : memref<1xf32, #tpu.memory_space<smem>>
      %21 = vector.extract_strided_slice %17 {offsets = [0, 0, 0], sizes = [2, 1, 128], strides = [1, 1, 1]} : vector<2x24x128xf32> to vector<2x1x128xf32>
      %22 = arith.mulf %18, %19 : vector<2x8x128xf32>
      %cst = arith.constant dense<0.000000e+00> : vector<2x128xf32>
      %23 = vector.multi_reduction <add>, %22, %cst [1] : vector<2x8x128xf32> to vector<2x128xf32>
      %24 = vector.shape_cast %23 : vector<2x128xf32> to vector<2x1x128xf32>
      %cst_15 = arith.constant dense<0.000000e+00> : vector<2x128xf32>
      %25 = vector.multi_reduction <add>, %19, %cst_15 [1] : vector<2x8x128xf32> to vector<2x128xf32>
      %26 = vector.shape_cast %25 : vector<2x128xf32> to vector<2x1x128xf32>
      %cst_16 = arith.constant 9.99999997E-7 : f32
      %27 = vector.broadcast %cst_16 : f32 to vector<2x1x128xf32>
      %28 = arith.maximumf %26, %27 : vector<2x1x128xf32>
      %29 = arith.divf %24, %28 : vector<2x1x128xf32>
      %30 = arith.mulf %17, %17 : vector<2x24x128xf32>
      %cst_17 = arith.constant dense<0.000000e+00> : vector<2x24xf32>
      %31 = vector.multi_reduction <add>, %30, %cst_17 [2] : vector<2x24x128xf32> to vector<2x24xf32>
      %32 = vector.shape_cast %31 : vector<2x24xf32> to vector<2x24x1xf32>
      %cst_18 = arith.constant 9.99999996E-13 : f32
      %33 = vector.broadcast %cst_18 : f32 to vector<2x24x1xf32>
      %34 = arith.addf %32, %33 : vector<2x24x1xf32>
      %35 = math.rsqrt %34 : vector<2x24x1xf32>
      %36 = vector.broadcast %35 : vector<2x24x1xf32> to vector<2x24x128xf32>
      %37 = arith.mulf %17, %36 : vector<2x24x128xf32>
      %38 = arith.mulf %21, %21 : vector<2x1x128xf32>
      %cst_19 = arith.constant dense<0.000000e+00> : vector<2x1xf32>
      %39 = vector.multi_reduction <add>, %38, %cst_19 [2] : vector<2x1x128xf32> to vector<2x1xf32>
      %40 = vector.shape_cast %39 : vector<2x1xf32> to vector<2x1x1xf32>
      %cst_20 = arith.constant 9.99999996E-13 : f32
      %41 = vector.broadcast %cst_20 : f32 to vector<2x1x1xf32>
      %42 = arith.addf %40, %41 : vector<2x1x1xf32>
      %43 = math.rsqrt %42 : vector<2x1x1xf32>
      %44 = vector.broadcast %43 : vector<2x1x1xf32> to vector<2x1x128xf32>
      %45 = arith.mulf %21, %44 : vector<2x1x128xf32>
      %46 = arith.mulf %29, %29 : vector<2x1x128xf32>
      %cst_21 = arith.constant dense<0.000000e+00> : vector<2x1xf32>
      %47 = vector.multi_reduction <add>, %46, %cst_21 [2] : vector<2x1x128xf32> to vector<2x1xf32>
      %48 = vector.shape_cast %47 : vector<2x1xf32> to vector<2x1x1xf32>
      %cst_22 = arith.constant 9.99999996E-13 : f32
      %49 = vector.broadcast %cst_22 : f32 to vector<2x1x1xf32>
      %50 = arith.addf %48, %49 : vector<2x1x1xf32>
      %51 = math.rsqrt %50 : vector<2x1x1xf32>
      %52 = vector.broadcast %51 : vector<2x1x1xf32> to vector<2x1x128xf32>
      %53 = arith.mulf %29, %52 : vector<2x1x128xf32>
      %54 = vector.broadcast %45 : vector<2x1x128xf32> to vector<2x24x128xf32>
      %55 = arith.mulf %37, %54 : vector<2x24x128xf32>
      %cst_23 = arith.constant dense<0.000000e+00> : vector<2x24xf32>
      %56 = vector.multi_reduction <add>, %55, %cst_23 [2] : vector<2x24x128xf32> to vector<2x24xf32>
      %57 = vector.broadcast %20 : f32 to vector<2x24xf32>
      %58 = arith.mulf %57, %56 : vector<2x24xf32>
      %59 = vector.broadcast %53 : vector<2x1x128xf32> to vector<2x24x128xf32>
      %60 = arith.mulf %37, %59 : vector<2x24x128xf32>
      %cst_24 = arith.constant dense<0.000000e+00> : vector<2x24xf32>
      %61 = vector.multi_reduction <add>, %60, %cst_24 [2] : vector<2x24x128xf32> to vector<2x24xf32>
      %62 = vector.broadcast %20 : f32 to vector<2x24xf32>
      %63 = arith.mulf %62, %61 : vector<2x24xf32>
      %64 = arith.addf %58, %63 : vector<2x24xf32>
      %cst_25 = arith.constant 5.000000e-01 : f32
      %65 = vector.broadcast %cst_25 : f32 to vector<2x24xf32>
      %66 = arith.mulf %65, %64 : vector<2x24xf32>
      %67 = vector.shape_cast %58 : vector<2x24xf32> to vector<2x1x24xf32>
      %68 = vector.shape_cast %63 : vector<2x24xf32> to vector<2x1x24xf32>
      %69 = vector.shape_cast %66 : vector<2x24xf32> to vector<2x1x24xf32>
      %70 = tpu.concatenate %67, %68, %69 in 1 : vector<2x1x24xf32>, vector<2x1x24xf32>, vector<2x1x24xf32> -> vector<2x3x24xf32>
      %c0_26 = arith.constant 0 : index
      %c0_27 = arith.constant 0 : index
      %c0_28 = arith.constant 0 : index
      %c0_29 = arith.constant 0 : index
      %71 = vector.load %arg46[%c0_26, %c0_27, %c0_28, %c0_29] : memref<2x2x3x24xf32, #tpu.memory_space<vmem>>, vector<1x2x3x24xf32>
      %72 = vector.shape_cast %71 : vector<1x2x3x24xf32> to vector<2x3x24xf32>
      %73 = vector.shape_cast %70 : vector<2x3x24xf32> to vector<1x2x3x24xf32>
      tpu.vector_store %arg46[%c0_26, %c0_27, %c0_28, %c0_29], %73 {strides = array<i32>} : memref<2x2x3x24xf32, #tpu.memory_space<vmem>>, vector<1x2x3x24xf32>,
    } else {
    }
    %c3_i32_4 = arith.constant 3 : i32
    %14 = arith.cmpi eq, %arg0, %c3_i32_4 : i32
    %15 = arith.extui %14 : i1 to i32
    %c0_i32_5 = arith.constant 0 : i32
    %16 = arith.cmpi ne, %15, %c0_i32_5 : i32
    scf.if %16 {
      %c0 = arith.constant 0 : index
      %c0_6 = arith.constant 0 : index
      %c0_7 = arith.constant 0 : index
      %17 = vector.load %arg44[%c0, %c0_6, %c0_7] : memref<2x24x128xf32, #tpu.memory_space<vmem>>, vector<2x24x128xf32>
      %c0_8 = arith.constant 0 : index
      %c0_9 = arith.constant 0 : index
      %c0_10 = arith.constant 0 : index
      %18 = vector.load %arg45[%c0_8, %c0_9, %c0_10] : memref<2x8x128xf32, #tpu.memory_space<vmem>>, vector<2x8x128xf32>
      %c0_11 = arith.constant 0 : index
      %c0_12 = arith.constant 0 : index
      %c0_13 = arith.constant 0 : index
      %19 = vector.load %arg9[%c0_11, %c0_12, %c0_13] : memref<2x8x128xf32, #tpu.memory_space<vmem>>, vector<2x8x128xf32>
      %c0_14 = arith.constant 0 : index
      %20 = memref.load %arg10[%c0_14] : memref<1xf32, #tpu.memory_space<smem>>
      %21 = vector.extract_strided_slice %17 {offsets = [0, 0, 0], sizes = [2, 1, 128], strides = [1, 1, 1]} : vector<2x24x128xf32> to vector<2x1x128xf32>
      %22 = arith.mulf %18, %19 : vector<2x8x128xf32>
      %cst = arith.constant dense<0.000000e+00> : vector<2x128xf32>
      %23 = vector.multi_reduction <add>, %22, %cst [1] : vector<2x8x128xf32> to vector<2x128xf32>
      %24 = vector.shape_cast %23 : vector<2x128xf32> to vector<2x1x128xf32>
      %cst_15 = arith.constant dense<0.000000e+00> : vector<2x128xf32>
      %25 = vector.multi_reduction <add>, %19, %cst_15 [1] : vector<2x8x128xf32> to vector<2x128xf32>
      %26 = vector.shape_cast %25 : vector<2x128xf32> to vector<2x1x128xf32>
      %cst_16 = arith.constant 9.99999997E-7 : f32
      %27 = vector.broadcast %cst_16 : f32 to vector<2x1x128xf32>
      %28 = arith.maximumf %26, %27 : vector<2x1x128xf32>
      %29 = arith.divf %24, %28 : vector<2x1x128xf32>
      %30 = arith.mulf %17, %17 : vector<2x24x128xf32>
      %cst_17 = arith.constant dense<0.000000e+00> : vector<2x24xf32>
      %31 = vector.multi_reduction <add>, %30, %cst_17 [2] : vector<2x24x128xf32> to vector<2x24xf32>
      %32 = vector.shape_cast %31 : vector<2x24xf32> to vector<2x24x1xf32>
      %cst_18 = arith.constant 9.99999996E-13 : f32
      %33 = vector.broadcast %cst_18 : f32 to vector<2x24x1xf32>
      %34 = arith.addf %32, %33 : vector<2x24x1xf32>
      %35 = math.rsqrt %34 : vector<2x24x1xf32>
      %36 = vector.broadcast %35 : vector<2x24x1xf32> to vector<2x24x128xf32>
      %37 = arith.mulf %17, %36 : vector<2x24x128xf32>
      %38 = arith.mulf %21, %21 : vector<2x1x128xf32>
      %cst_19 = arith.constant dense<0.000000e+00> : vector<2x1xf32>
      %39 = vector.multi_reduction <add>, %38, %cst_19 [2] : vector<2x1x128xf32> to vector<2x1xf32>
      %40 = vector.shape_cast %39 : vector<2x1xf32> to vector<2x1x1xf32>
      %cst_20 = arith.constant 9.99999996E-13 : f32
      %41 = vector.broadcast %cst_20 : f32 to vector<2x1x1xf32>
      %42 = arith.addf %40, %41 : vector<2x1x1xf32>
      %43 = math.rsqrt %42 : vector<2x1x1xf32>
      %44 = vector.broadcast %43 : vector<2x1x1xf32> to vector<2x1x128xf32>
      %45 = arith.mulf %21, %44 : vector<2x1x128xf32>
      %46 = arith.mulf %29, %29 : vector<2x1x128xf32>
      %cst_21 = arith.constant dense<0.000000e+00> : vector<2x1xf32>
      %47 = vector.multi_reduction <add>, %46, %cst_21 [2] : vector<2x1x128xf32> to vector<2x1xf32>
      %48 = vector.shape_cast %47 : vector<2x1xf32> to vector<2x1x1xf32>
      %cst_22 = arith.constant 9.99999996E-13 : f32
      %49 = vector.broadcast %cst_22 : f32 to vector<2x1x1xf32>
      %50 = arith.addf %48, %49 : vector<2x1x1xf32>
      %51 = math.rsqrt %50 : vector<2x1x1xf32>
      %52 = vector.broadcast %51 : vector<2x1x1xf32> to vector<2x1x128xf32>
      %53 = arith.mulf %29, %52 : vector<2x1x128xf32>
      %54 = vector.broadcast %45 : vector<2x1x128xf32> to vector<2x24x128xf32>
      %55 = arith.mulf %37, %54 : vector<2x24x128xf32>
      %cst_23 = arith.constant dense<0.000000e+00> : vector<2x24xf32>
      %56 = vector.multi_reduction <add>, %55, %cst_23 [2] : vector<2x24x128xf32> to vector<2x24xf32>
      %57 = vector.broadcast %20 : f32 to vector<2x24xf32>
      %58 = arith.mulf %57, %56 : vector<2x24xf32>
      %59 = vector.broadcast %53 : vector<2x1x128xf32> to vector<2x24x128xf32>
      %60 = arith.mulf %37, %59 : vector<2x24x128xf32>
      %cst_24 = arith.constant dense<0.000000e+00> : vector<2x24xf32>
      %61 = vector.multi_reduction <add>, %60, %cst_24 [2] : vector<2x24x128xf32> to vector<2x24xf32>
      %62 = vector.broadcast %20 : f32 to vector<2x24xf32>
      %63 = arith.mulf %62, %61 : vector<2x24xf32>
      %64 = arith.addf %58, %63 : vector<2x24xf32>
      %cst_25 = arith.constant 5.000000e-01 : f32
      %65 = vector.broadcast %cst_25 : f32 to vector<2x24xf32>
      %66 = arith.mulf %65, %64 : vector<2x24xf32>
      %67 = vector.shape_cast %58 : vector<2x24xf32> to vector<2x1x24xf32>
      %68 = vector.shape_cast %63 : vector<2x24xf32> to vector<2x1x24xf32>
      %69 = vector.shape_cast %66 : vector<2x24xf32> to vector<2x1x24xf32>
      %70 = tpu.concatenate %67, %68, %69 in 1 : vector<2x1x24xf32>, vector<2x1x24xf32>, vector<2x1x24xf32> -> vector<2x3x24xf32>
      %c1 = arith.constant 1 : index
      %c0_26 = arith.constant 0 : index
      %c0_27 = arith.constant 0 : index
      %c0_28 = arith.constant 0 : index
      %71 = vector.load %arg46[%c1, %c0_26, %c0_27, %c0_28] : memref<2x2x3x24xf32, #tpu.memory_space<vmem>>, vector<1x2x3x24xf32>
      %72 = vector.shape_cast %71 : vector<1x2x3x24xf32> to vector<2x3x24xf32>
      %73 = vector.shape_cast %70 : vector<2x3x24xf32> to vector<1x2x3x24xf32>
      tpu.vector_store %arg46[%c1, %c0_26, %c0_27, %c0_28], %73 {strides = array<i32>} : memref<2x2x3x24xf32, #tpu.memory_space<vmem>>, vector<1x2x3x24xf32>,
    } else {
    }
    return
  }
  func.func @transform_0(%arg0: i32) -> (i32, i32, i32) {
    %c0_i32 = arith.constant 0 : i32
    %c0_i32_0 = arith.constant 0 : i32
    %c0_i32_1 = arith.constant 0 : i32
    %c0_i32_2 = arith.constant 0 : i32
    return %c0_i32, %c0_i32_0, %c0_i32_1 : i32, i32, i32
  }
  func.func @transform_1(%arg0: i32) -> (i32, i32, i32) {
    %c0_i32 = arith.constant 0 : i32
    %c0_i32_0 = arith.constant 0 : i32
    %c0_i32_1 = arith.constant 0 : i32
    %c0_i32_2 = arith.constant 0 : i32
    return %c0_i32, %c0_i32_0, %c0_i32_1 : i32, i32, i32
  }
  func.func @transform_2(%arg0: i32) -> (i32, i32, i32) {
    %c0_i32 = arith.constant 0 : i32
    %c0_i32_0 = arith.constant 0 : i32
    %c0_i32_1 = arith.constant 0 : i32
    %c0_i32_2 = arith.constant 0 : i32
    return %c0_i32, %c0_i32_0, %c0_i32_1 : i32, i32, i32
  }
  func.func @transform_3(%arg0: i32) -> (i32, i32) {
    %c0_i32 = arith.constant 0 : i32
    %c0_i32_0 = arith.constant 0 : i32
    %c0_i32_1 = arith.constant 0 : i32
    return %c0_i32, %c0_i32_0 : i32, i32
  }
  func.func @transform_4(%arg0: i32) -> (i32, i32) {
    %c0_i32 = arith.constant 0 : i32
    %c0_i32_0 = arith.constant 0 : i32
    %c0_i32_1 = arith.constant 0 : i32
    return %c0_i32, %c0_i32_0 : i32, i32
  }
  func.func @transform_5(%arg0: i32) -> (i32, i32, i32) {
    %c0_i32 = arith.constant 0 : i32
    %c0_i32_0 = arith.constant 0 : i32
    %c0_i32_1 = arith.constant 0 : i32
    %c0_i32_2 = arith.constant 0 : i32
    return %c0_i32, %c0_i32_0, %c0_i32_1 : i32, i32, i32
  }
  func.func @transform_6(%arg0: i32) -> (i32, i32, i32) {
    %c0_i32 = arith.constant 0 : i32
    %c0_i32_0 = arith.constant 0 : i32
    %c0_i32_1 = arith.constant 0 : i32
    %c0_i32_2 = arith.constant 0 : i32
    return %c0_i32, %c0_i32_0, %c0_i32_1 : i32, i32, i32
  }
  func.func @transform_7(%arg0: i32) -> (i32, i32, i32) {
    %c0_i32 = arith.constant 0 : i32
    %c0_i32_0 = arith.constant 0 : i32
    %c0_i32_1 = arith.constant 0 : i32
    %c0_i32_2 = arith.constant 0 : i32
    return %c0_i32, %c0_i32_0, %c0_i32_1 : i32, i32, i32
  }
  func.func @transform_8(%arg0: i32) -> (i32, i32, i32) {
    %c0_i32 = arith.constant 0 : i32
    %c0_i32_0 = arith.constant 0 : i32
    %c0_i32_1 = arith.constant 0 : i32
    %c0_i32_2 = arith.constant 0 : i32
    return %c0_i32, %c0_i32_0, %c0_i32_1 : i32, i32, i32
  }
  func.func @transform_9(%arg0: i32) -> i32 {
    %c0_i32 = arith.constant 0 : i32
    %c0_i32_0 = arith.constant 0 : i32
    return %c0_i32 : i32
  }
  func.func @transform_10(%arg0: i32) -> (i32, i32) {
    %c0_i32 = arith.constant 0 : i32
    %c0_i32_0 = arith.constant 0 : i32
    %c0_i32_1 = arith.constant 0 : i32
    return %c0_i32, %c0_i32_0 : i32, i32
  }
  func.func @transform_11(%arg0: i32) -> (i32, i32, i32) {
    %c0_i32 = arith.constant 0 : i32
    %c0_i32_0 = arith.constant 0 : i32
    %c0_i32_1 = arith.constant 0 : i32
    return %arg0, %c0_i32, %c0_i32_0 : i32, i32, i32
  }
  func.func @transform_12(%arg0: i32) -> (i32, i32, i32) {
    %c0_i32 = arith.constant 0 : i32
    %c0_i32_0 = arith.constant 0 : i32
    %c0_i32_1 = arith.constant 0 : i32
    return %arg0, %c0_i32, %c0_i32_0 : i32, i32, i32
  }
  func.func @transform_13(%arg0: i32) -> (i32, i32, i32) {
    %c0_i32 = arith.constant 0 : i32
    %c0_i32_0 = arith.constant 0 : i32
    %c0_i32_1 = arith.constant 0 : i32
    return %arg0, %c0_i32, %c0_i32_0 : i32, i32, i32
  }
  func.func @transform_14(%arg0: i32) -> (i32, i32, i32) {
    %c0_i32 = arith.constant 0 : i32
    %c0_i32_0 = arith.constant 0 : i32
    %c0_i32_1 = arith.constant 0 : i32
    return %arg0, %c0_i32, %c0_i32_0 : i32, i32, i32
  }
  func.func @transform_15(%arg0: i32) -> (i32, i32, i32) {
    %c0_i32 = arith.constant 0 : i32
    %c0_i32_0 = arith.constant 0 : i32
    %c0_i32_1 = arith.constant 0 : i32
    return %arg0, %c0_i32, %c0_i32_0 : i32, i32, i32
  }
  func.func @transform_16(%arg0: i32) -> (i32, i32, i32) {
    %c0_i32 = arith.constant 0 : i32
    %c0_i32_0 = arith.constant 0 : i32
    %c0_i32_1 = arith.constant 0 : i32
    return %arg0, %c0_i32, %c0_i32_0 : i32, i32, i32
  }
  func.func @transform_17(%arg0: i32) -> (i32, i32, i32) {
    %c0_i32 = arith.constant 0 : i32
    %c0_i32_0 = arith.constant 0 : i32
    %c0_i32_1 = arith.constant 0 : i32
    return %arg0, %c0_i32, %c0_i32_0 : i32, i32, i32
  }
  func.func @transform_18(%arg0: i32) -> (i32, i32, i32) {
    %c0_i32 = arith.constant 0 : i32
    %c0_i32_0 = arith.constant 0 : i32
    %c0_i32_1 = arith.constant 0 : i32
    return %arg0, %c0_i32, %c0_i32_0 : i32, i32, i32
  }
  func.func @transform_19(%arg0: i32) -> (i32, i32, i32) {
    %c0_i32 = arith.constant 0 : i32
    %c0_i32_0 = arith.constant 0 : i32
    %c0_i32_1 = arith.constant 0 : i32
    return %arg0, %c0_i32, %c0_i32_0 : i32, i32, i32
  }
  func.func @transform_20(%arg0: i32) -> (i32, i32, i32) {
    %c0_i32 = arith.constant 0 : i32
    %c0_i32_0 = arith.constant 0 : i32
    %c0_i32_1 = arith.constant 0 : i32
    return %arg0, %c0_i32, %c0_i32_0 : i32, i32, i32
  }
  func.func @transform_21(%arg0: i32) -> (i32, i32, i32) {
    %c0_i32 = arith.constant 0 : i32
    %c0_i32_0 = arith.constant 0 : i32
    %c0_i32_1 = arith.constant 0 : i32
    return %arg0, %c0_i32, %c0_i32_0 : i32, i32, i32
  }
  func.func @transform_22(%arg0: i32) -> (i32, i32, i32) {
    %c0_i32 = arith.constant 0 : i32
    %c0_i32_0 = arith.constant 0 : i32
    %c0_i32_1 = arith.constant 0 : i32
    return %arg0, %c0_i32, %c0_i32_0 : i32, i32, i32
  }
  func.func @transform_23(%arg0: i32) -> (i32, i32, i32) {
    %c0_i32 = arith.constant 0 : i32
    %c0_i32_0 = arith.constant 0 : i32
    %c0_i32_1 = arith.constant 0 : i32
    return %arg0, %c0_i32, %c0_i32_0 : i32, i32, i32
  }
  func.func @transform_24(%arg0: i32) -> (i32, i32, i32) {
    %c0_i32 = arith.constant 0 : i32
    %c0_i32_0 = arith.constant 0 : i32
    %c0_i32_1 = arith.constant 0 : i32
    return %arg0, %c0_i32, %c0_i32_0 : i32, i32, i32
  }
  func.func @transform_25(%arg0: i32) -> (i32, i32, i32) {
    %c0_i32 = arith.constant 0 : i32
    %c0_i32_0 = arith.constant 0 : i32
    %c0_i32_1 = arith.constant 0 : i32
    return %arg0, %c0_i32, %c0_i32_0 : i32, i32, i32
  }
  func.func @transform_26(%arg0: i32) -> (i32, i32, i32) {
    %c0_i32 = arith.constant 0 : i32
    %c0_i32_0 = arith.constant 0 : i32
    %c0_i32_1 = arith.constant 0 : i32
    return %arg0, %c0_i32, %c0_i32_0 : i32, i32, i32
  }
  func.func @transform_27(%arg0: i32) -> (i32, i32, i32) {
    %c0_i32 = arith.constant 0 : i32
    %c0_i32_0 = arith.constant 0 : i32
    %c0_i32_1 = arith.constant 0 : i32
    return %arg0, %c0_i32, %c0_i32_0 : i32, i32, i32
  }
  func.func @transform_28(%arg0: i32) -> (i32, i32, i32) {
    %c0_i32 = arith.constant 0 : i32
    %c0_i32_0 = arith.constant 0 : i32
    %c0_i32_1 = arith.constant 0 : i32
    return %arg0, %c0_i32, %c0_i32_0 : i32, i32, i32
  }
  func.func @transform_29(%arg0: i32) -> (i32, i32, i32) {
    %c0_i32 = arith.constant 0 : i32
    %c0_i32_0 = arith.constant 0 : i32
    %c0_i32_1 = arith.constant 0 : i32
    return %arg0, %c0_i32, %c0_i32_0 : i32, i32, i32
  }
  func.func @transform_30(%arg0: i32) -> (i32, i32, i32) {
    %c0_i32 = arith.constant 0 : i32
    %c0_i32_0 = arith.constant 0 : i32
    %c0_i32_1 = arith.constant 0 : i32
    return %arg0, %c0_i32, %c0_i32_0 : i32, i32, i32
  }
  func.func @transform_31(%arg0: i32) -> (i32, i32, i32) {
    %c0_i32 = arith.constant 0 : i32
    %c0_i32_0 = arith.constant 0 : i32
    %c0_i32_1 = arith.constant 0 : i32
    return %arg0, %c0_i32, %c0_i32_0 : i32, i32, i32
  }
  func.func @transform_32(%arg0: i32) -> (i32, i32, i32) {
    %c0_i32 = arith.constant 0 : i32
    %c0_i32_0 = arith.constant 0 : i32
    %c0_i32_1 = arith.constant 0 : i32
    return %arg0, %c0_i32, %c0_i32_0 : i32, i32, i32
  }
  func.func @transform_33(%arg0: i32) -> (i32, i32, i32) {
    %c0_i32 = arith.constant 0 : i32
    %c0_i32_0 = arith.constant 0 : i32
    %c0_i32_1 = arith.constant 0 : i32
    return %arg0, %c0_i32, %c0_i32_0 : i32, i32, i32
  }
  func.func @transform_34(%arg0: i32) -> (i32, i32, i32) {
    %c0_i32 = arith.constant 0 : i32
    %c0_i32_0 = arith.constant 0 : i32
    %c0_i32_1 = arith.constant 0 : i32
    return %arg0, %c0_i32, %c0_i32_0 : i32, i32, i32
  }
  func.func @transform_35(%arg0: i32) -> (i32, i32, i32) {
    %c0_i32 = arith.constant 0 : i32
    %c0_i32_0 = arith.constant 0 : i32
    %c0_i32_1 = arith.constant 0 : i32
    return %arg0, %c0_i32, %c0_i32_0 : i32, i32, i32
  }
  func.func @transform_36(%arg0: i32) -> (i32, i32, i32) {
    %c0_i32 = arith.constant 0 : i32
    %c0_i32_0 = arith.constant 0 : i32
    %c0_i32_1 = arith.constant 0 : i32
    return %arg0, %c0_i32, %c0_i32_0 : i32, i32, i32
  }
  func.func @transform_37(%arg0: i32) -> (i32, i32, i32) {
    %c0_i32 = arith.constant 0 : i32
    %c0_i32_0 = arith.constant 0 : i32
    %c0_i32_1 = arith.constant 0 : i32
    return %arg0, %c0_i32, %c0_i32_0 : i32, i32, i32
  }
  func.func @transform_38(%arg0: i32) -> (i32, i32, i32) {
    %c0_i32 = arith.constant 0 : i32
    %c0_i32_0 = arith.constant 0 : i32
    %c0_i32_1 = arith.constant 0 : i32
    return %arg0, %c0_i32, %c0_i32_0 : i32, i32, i32
  }
  func.func @transform_39(%arg0: i32) -> (i32, i32, i32) {
    %c0_i32 = arith.constant 0 : i32
    %c0_i32_0 = arith.constant 0 : i32
    %c0_i32_1 = arith.constant 0 : i32
    return %arg0, %c0_i32, %c0_i32_0 : i32, i32, i32
  }
  func.func @transform_40(%arg0: i32) -> (i32, i32, i32) {
    %c0_i32 = arith.constant 0 : i32
    %c0_i32_0 = arith.constant 0 : i32
    %c0_i32_1 = arith.constant 0 : i32
    return %arg0, %c0_i32, %c0_i32_0 : i32, i32, i32
  }
  func.func @transform_41(%arg0: i32) -> (i32, i32, i32) {
    %c0_i32 = arith.constant 0 : i32
    %c0_i32_0 = arith.constant 0 : i32
    %c0_i32_1 = arith.constant 0 : i32
    return %arg0, %c0_i32, %c0_i32_0 : i32, i32, i32
  }
  func.func @transform_42(%arg0: i32) -> (i32, i32, i32) {
    %c0_i32 = arith.constant 0 : i32
    %c0_i32_0 = arith.constant 0 : i32
    %c0_i32_1 = arith.constant 0 : i32
    return %arg0, %c0_i32, %c0_i32_0 : i32, i32, i32
  }
  func.func @transform_43(%arg0: i32) -> (i32, i32, i32) {
    %c0_i32 = arith.constant 0 : i32
    %c0_i32_0 = arith.constant 0 : i32
    %c0_i32_1 = arith.constant 0 : i32
    %c0_i32_2 = arith.constant 0 : i32
    return %c0_i32, %c0_i32_0, %c0_i32_1 : i32, i32, i32
  }
  func.func @transform_44(%arg0: i32) -> (i32, i32, i32) {
    %c0_i32 = arith.constant 0 : i32
    %c0_i32_0 = arith.constant 0 : i32
    %c0_i32_1 = arith.constant 0 : i32
    %c0_i32_2 = arith.constant 0 : i32
    return %c0_i32, %c0_i32_0, %c0_i32_1 : i32, i32, i32
  }
  func.func @transform_45(%arg0: i32) -> (i32, i32, i32, i32) {
    %c0_i32 = arith.constant 0 : i32
    %c0_i32_0 = arith.constant 0 : i32
    %c0_i32_1 = arith.constant 0 : i32
    %c0_i32_2 = arith.constant 0 : i32
    %c0_i32_3 = arith.constant 0 : i32
    return %c0_i32, %c0_i32_0, %c0_i32_1, %c0_i32_2 : i32, i32, i32, i32
  }
}

</mosaic_0001>

<bundles_post_ra>
// kernel: mul.14
= control target key start
LH: loop header
LB: loop body
LE: loop exit
PB: predicated region body
PF: predicated region fallthrough
CT: control target
= control target key end

     0   :  { %v5_v0 = vlaneseq  ;;  %s29_s0 = inlined_call_operand.vmem [shape: f32[2], index: 0, kind: input, shape index: {}]   ;;  %s30_s1 = inlined_call_operand.vmem [shape: f32[2,4], index: 1, kind: output, shape index: {}]  }
   0x1   :  { %v4_v2 = vld [vmem:[%s29_s0] ss:$0 sm:$0xff] }
   0x2   :  { %v6_v1 = vshrl.u32 %v5_v0, 7 }
   0x4   :  { %12 = vset.pattern.permute.xlu0 %v6_v1 }
   0xc   :  { %9 = vperm.xlu0 %12, %v4_v2  }
  0x7e   :  { %v10_v3 = vpop.permute.xlu0 %9 }
  0x7f   :  { %11 = vst [vmem:[%s30_s1] sm:$0x3] %v10_v3 }

// kernel: forward.1
= control target key start
LH: loop header
LB: loop body
LE: loop exit
PB: predicated region body
PF: predicated region fallthrough
CT: control target
= control target key end

     0   :  { %s11909_s6 = smov 1   ;;  %s11910_s10 = smov 2   ;;  %s14653_s0 = inlined_call_operand.smem [shape: u32[46], index: -1, kind: input, shape index: {}] }
   0x1   :  { %s11972_s5 = sld [smem:[%s14653_s0]]   ;;  %s11911_s14 = smov 3  }
   0x2   :  { %s11977_s9 = sld [smem:[%s14653_s0 + %s11909_s6]]   ;;  %s11912_s18 = smov 4  }
   0x3   :  { %s11982_s13 = sld [smem:[%s14653_s0 + %s11910_s10]]   ;;  %s11913_s22 = smov 5  }
   0x4   :  { %s11987_s17 = sld [smem:[%s14653_s0 + %s11911_s14]]   ;;  %s11914_s26 = smov 6  }
   0x5   :  { %s11992_s21 = sld [smem:[%s14653_s0 + %s11912_s18]]   ;;  %s11915_s30 = smov 7  }
   0x6   :  { %s11997_s25 = sld [smem:[%s14653_s0 + %s11913_s22]]   ;;  %s11916_s4 = smov 8  }
   0x7   :  { %14708 = sst [smem:[#allocation21_spill]] %s11972_s5  ;;  %s11917_s10 = smov 9  }
   0x8   :  { %14709 = sst [smem:[#allocation22_spill]] %s11977_s9  ;;  %s11918_s15 = smov 10  }
   0x9   :  { %14710 = sst [smem:[#allocation23_spill]] %s11982_s13  ;;  %s11919_s20 = smov 11  }
   0xa   :  { %14711 = sst [smem:[#allocation24_spill]] %s11987_s17  ;;  %s11921_s1 = smov 13  }
   0xb   :  { %14712 = sst [smem:[#allocation25_spill]] %s11992_s21  ;;  %s11922_s7 = smov 14  }
   0xc   :  { %14713 = sst [smem:[#allocation26_spill]] %s11997_s25  ;;  %s11924_s22 = smov 16  }
   0xd   :  { %s12002_s29 = sld [smem:[%s14653_s0 + %s11914_s26]]   ;;  %s11920_s26 = smov 12  }
   0xe   :  { %s12007_s3 = sld [smem:[%s14653_s0 + %s11915_s30]]   ;;  %s11925_s28 = smov 17  }
   0xf   :  { %s12012_s8 = sld [smem:[%s14653_s0 + %s11916_s4]]  }
  0x10   :  { %s12017_s14 = sld [smem:[%s14653_s0 + %s11917_s10]]  }
  0x11   :  { %s12022_s19 = sld [smem:[%s14653_s0 + %s11918_s15]]   ;;  %s11923_s15 = smov 15  }
  0x12   :  { %s12027_s24 = sld [smem:[%s14653_s0 + %s11919_s20]]  }
  0x13   :  { %14714 = sst [smem:[#allocation27_spill]] %s12002_s29 }
  0x14   :  { %14715 = sst [smem:[#allocation28_spill]] %s12007_s3 }
  0x15   :  { %14716 = sst [smem:[#allocation29_spill]] %s12012_s8 }
  0x16   :  { %s12032_s30 = sld [smem:[%s14653_s0 + %s11920_s26]]  }
  0x17   :  { %14717 = sst [smem:[#allocation30_spill]] %s12022_s19 }
  0x18   :  { %14718 = sst [smem:[#allocation31_spill]] %s12027_s24 }
  0x19   :  { %s12037_s6 = sld [smem:[%s14653_s0 + %s11921_s1]]  }
  0x1a   :  { %s12042_s12 = sld [smem:[%s14653_s0 + %s11922_s7]]   ;;  %s11926_s7 = smov 18  }
  0x1b   :  { %s12047_s20 = sld [smem:[%s14653_s0 + %s11923_s15]]   ;;  %s11927_s15 = smov 19  }
  0x1c   :  { %14719 = sst [smem:[#allocation32_spill]] %s12032_s30 }
  0x1d   :  { %s12052_s27 = sld [smem:[%s14653_s0 + %s11924_s22]]   ;;  %s11928_s22 = smov 20  }
  0x1e   :  { %s12057_s4 = sld [smem:[%s14653_s0 + %s11925_s28]]   ;;  %s11929_s28 = smov 21  }
  0x1f   :  { %14720 = sst [smem:[#allocation33_spill]] %s12037_s6 }
  0x20   :  { %14721 = sst [smem:[#allocation34_spill]] %s12042_s12 }
  0x21   :  { %14722 = sst [smem:[#allocation35_spill]] %s12047_s20 }
  0x22   :  { %s12062_s8 = sld [smem:[%s14653_s0 + %s11926_s7]]   ;;  %s11930_s7 = smov 22  }
  0x23   :  { %14723 = sst [smem:[#allocation36_spill]] %s12052_s27 }
  0x24   :  { %14724 = sst [smem:[#allocation37_spill]] %s12057_s4 }
  0x25   :  { %s12067_s29 = sld [smem:[%s14653_s0 + %s11927_s15]]   ;;  %s11931_s15 = smov 23  }
  0x26   :  { %s12072_s25 = sld [smem:[%s14653_s0 + %s11928_s22]]   ;;  %s11932_s22 = smov 24  }
  0x27   :  { %s12077_s3 = sld [smem:[%s14653_s0 + %s11929_s28]]   ;;  %s11933_s28 = smov 25  }
  0x28   :  { %14725 = sst [smem:[#allocation38_spill]] %s12062_s8 }
  0x29   :  { %s12082_s21 = sld [smem:[%s14653_s0 + %s11930_s7]]   ;;  %s11934_s7 = smov 26  }
  0x2a   :  { %s12087_s17 = sld [smem:[%s14653_s0 + %s11931_s15]]   ;;  %s11935_s15 = smov 27  }
  0x2b   :  { %14726 = sst [smem:[#allocation39_spill]] %s12067_s29 }
  0x2c   :  { %14727 = sst [smem:[#allocation40_spill]] %s12072_s25 }
  0x2d   :  { %14728 = sst [smem:[#allocation41_spill]] %s12077_s3  ;;  %s11953_s3 = smov 45  }
  0x2e   :  { %s12092_s9 = sld [smem:[%s14653_s0 + %s11932_s22]]   ;;  %s11936_s22 = smov 28  }
  0x2f   :  { %14729 = sst [smem:[#allocation42_spill]] %s12082_s21 }
  0x30   :  { %14730 = sst [smem:[#allocation43_spill]] %s12087_s17 }
  0x31   :  { %s12097_s5 = sld [smem:[%s14653_s0 + %s11933_s28]]   ;;  %s11937_s28 = smov 29  }
  0x32   :  { %s12102_s19 = sld [smem:[%s14653_s0 + %s11934_s7]]   ;;  %s11938_s7 = smov 30  }
  0x33   :  { %s12107_s13 = sld [smem:[%s14653_s0 + %s11935_s15]]   ;;  %s11939_s15 = smov 31  }
  0x34   :  { %14731 = sst [smem:[#allocation44_spill]] %s12092_s9 }
  0x35   :  { %s12112_s9 = sld [smem:[%s14653_s0 + %s11936_s22]]   ;;  %s11940_s22 = smov 32  }
  0x36   :  { %s12117_s17 = sld [smem:[%s14653_s0 + %s11937_s28]]   ;;  %s11941_s28 = smov 33  }
  0x37   :  { %14732 = sst [smem:[#allocation45_spill]] %s12097_s5 }
  0x38   :  { %14733 = sst [smem:[#allocation46_spill]] %s12102_s19 }
  0x39   :  { %14734 = sst [smem:[#allocation47_spill]] %s12107_s13 }
  0x3a   :  { %s12122_s19 = sld [smem:[%s14653_s0 + %s11938_s7]]   ;;  %s11942_s7 = smov 34  }
  0x3b   :  { %14735 = sst [smem:[#allocation48_spill]] %s12112_s9 }
  0x3c   :  { %14736 = sst [smem:[#allocation49_spill]] %s12117_s17 }
  0x3d   :  { %s12127_s21 = sld [smem:[%s14653_s0 + %s11939_s15]]   ;;  %s11943_s15 = smov 35  }
  0x3e   :  { %s12132_s9 = sld [smem:[%s14653_s0 + %s11940_s22]]   ;;  %s11944_s22 = smov 36  }
  0x3f   :  { %s12137_s17 = sld [smem:[%s14653_s0 + %s11941_s28]]   ;;  %s11945_s28 = smov 37  }
  0x40   :  { %14737 = sst [smem:[#allocation50_spill]] %s12122_s19 }
  0x41   :  { %s12142_s19 = sld [smem:[%s14653_s0 + %s11942_s7]]   ;;  %s11946_s7 = smov 38  }
  0x42   :  { %s12162_s16 = sld [smem:[%s14653_s0 + %s11946_s7]]   ;;  %s11950_s7 = smov 42  }
  0x43   :  { %14738 = sst [smem:[#allocation51_spill]] %s12127_s21 }
  0x44   :  { %14739 = sst [smem:[#allocation52_spill]] %s12132_s9 }
  0x45   :  { %14740 = sst [smem:[#allocation53_spill]] %s12137_s17 }
  0x46   :  { %s12147_s21 = sld [smem:[%s14653_s0 + %s11943_s15]]   ;;  %s11947_s15 = smov 39  }
  0x47   :  { %14741 = sst [smem:[#allocation54_spill]] %s12142_s19  ;;  %s11951_s19 = smov 43  }
  0x48   :  { %s12152_s9 = sld [smem:[%s14653_s0 + %s11944_s22]]   ;;  %s11948_s22 = smov 40  }
  0x49   :  { %s12157_s17 = sld [smem:[%s14653_s0 + %s11945_s28]]   ;;  %s11949_s28 = smov 41  }
  0x4a   :  { %14745 = sst [smem:[#allocation58_spill]] %s12162_s16 }
  0x4b   :  { %s12167_s23 = sld [smem:[%s14653_s0 + %s11947_s15]]  }
  0x4c   :  { %14742 = sst [smem:[#allocation55_spill]] %s12147_s21 }
  0x4d   :  { %s12172_s1 = sld [smem:[%s14653_s0 + %s11948_s22]]  }
  0x4e   :  { %14743 = sst [smem:[#allocation56_spill]] %s12152_s9  ;;  %s11952_s9 = smov 44  }
  0x4f   :  { %14744 = sst [smem:[#allocation57_spill]] %s12157_s17 }
  0x50   :  { %s12177_s10 = sld [smem:[%s14653_s0 + %s11949_s28]]  }
  0x51   :  { %14746 = sst [smem:[#allocation59_spill]] %s12167_s23 }
  0x52   :  { %s12182_s25 = sld [smem:[%s14653_s0 + %s11950_s7]]  }
  0x53   :  { %14747 = sst [smem:[#allocation60_spill]] %s12172_s1 }
  0x54   :  { %s12187_s29 = sld [smem:[%s14653_s0 + %s11951_s19]]  }
  0x55   :  { %s12192_s1 = sld [smem:[%s14653_s0 + %s11952_s9]]  }
  0x56   :  { %14748 = sst [smem:[#allocation61_spill]] %s12177_s10 }
  0x57   :  { %s12197_s12 = sld [smem:[%s14653_s0 + %s11953_s3]]  }
  0x58   :  { %14749 = sst [smem:[#allocation62_spill]] %s12182_s25 }
  0x59   :  { %97 = sst [smem:[#allocation2]] %s12017_s14 }
  0x5a   :  { %14750 = sst [smem:[#allocation63_spill]] %s12187_s29 }
  0x5b   :  { %14751 = sst [smem:[#allocation64_spill]] %s12192_s1 }
  0x5d   :  { %14752 = sst [smem:[#allocation65_spill]] %s12197_s12 }
  0x5e   :  { %98 = vsyncpa [#allocation4], 0 }
  0x5f   :  { %100 = vsyncpa [#allocation4 + $0x1], 0 }
  0x60   :  { %101 = vsyncpa [#allocation6], 0 }
  0x61   :  { %103 = vsyncpa [#allocation6 + $0x1], 0 }
  0x62   :  { %104 = vsyncpa [#allocation9], 0 }
  0x63   :  { %106 = vsyncpa [#allocation9 + $0x1], 0 }
  0x64   :  { %107 = vsyncpa [#allocation12], 0 }
  0x65   :  { %109 = vsyncpa [#allocation12 + $0x1], 0 }
  0x66   :  { %110 = vsyncpa [#allocation15], 0 }
  0x67   :  { %112 = vsyncpa [#allocation15 + $0x1], 0  ;;  %s12200_s16 = smov 0   ;;  %s12202_s7 = smov 0  }
  0x68   :  { %s12204_s11 = smov 0   ;;  %s12206_s19 = smov 0  }
  0x69 LB: > { %s14753_s23 = sld [smem:[#allocation59_spill]]  ;;  %s12219_s0 = sadd.s32 4294967295, %s11907_s19   ;;  %s11907_s19 = sphi %s12206_s19, %s14911_s19   ;;  %s11903_s11 = sphi %s12204_s11, %s14914_s11   ;;  %s11899_s7 = sphi %s12202_s7, %s14913_s7   ;;  %s11895_s16 = sphi %s12200_s16, %s14912_s16  }
  0x6a   : > { %s14754_s21 = sld [smem:[#allocation55_spill]]  ;;  %s12222_s14 = sadd.s32 1, %s11907_s19  }
  0x6b   : > { %s14755_s10 = sld [smem:[#allocation61_spill]]  ;;  %s405_s15 = ssub.s32 %s11907_s19, %s12222_s14 }
  0x6c   : > { %s14756_s6 = sld [smem:[#allocation33_spill]]  ;;  %s408_s18 = sadd.s32 1, %s11903_s11 }
  0x6d   : > { %s14757_s5 = sld [smem:[#allocation45_spill]]  ;;  %p406_p0 = scmp.eq.s32.totalorder %s405_s15, 0 }
  0x6e   : > { %s14758_s17 = sld [smem:[#allocation57_spill]]  ;;  %p415_p1 = scmp.ne.s32.totalorder %s11903_s11, %s11899_s7 }
  0x6f   : > { %s14759_s13 = sld [smem:[#allocation47_spill]]  ;;  %p416_p2 = scmp.eq.s32.totalorder %s11907_s19, 0 }
  0x70   : > { %s14760_s20 = sld [smem:[#allocation35_spill]]  ;;  %p421_p3 = scmp.ne.s32.totalorder %s11899_s7, %s11895_s16 }
  0x71   : > { %14761 = sst [smem:[#allocation66_spill]] %s11899_s7  ;;  %p417_p4 = por %p416_p2, %p415_p1 }
  0x72   : > { %14762 = sst [smem:[#allocation67_spill]] %s11903_s11  ;;  %p422_p5 = scmp.eq.s32.totalorder %s12219_s0, 0 }
  0x73   : > { %14763 = sst [smem:[#allocation68_spill]] %s12219_s0  ;;  %p11179_p6 = scmp.lt.s32.totalorder %s11907_s19, 4 }
  0x74   : > { %14764 = sst [smem:[#allocation69_spill]] %s12222_s14  ;;  %p12236_p7 = por %p422_p5, %p421_p3 }
  0x75   : > { %s12232_s9 = scalar_select %p406_p0, %s11903_s11, %s408_s18  }
  0x76   : > { %s12241_s26 = sand.u32 1, %s11903_s11   ;;  %p12243_p8 = pnand %p11179_p6, %p417_p4 }
  0x77   : > { %14765 = sst [smem:[#allocation70_spill]] %s12232_s9  ;;  %s12248_s28 = sand.u32 1, %s11907_s19  }
  0x78   : > { %s12251_s2 = sshll.u32 %s12241_s26, 6  ;;  %s12254_s16 = sshll.u32 %s11907_s19, 6 }
  0x79   : > { %s1340_s15 = scalar_lea.vmem [#allocation5], %s12251_s2  ;;  %s1345_s9 = scalar_lea.hbm %s14760_s20, %s12254_s16 }
  0x7a   : > { %s1348_s18 = sshll.u32 %s1340_s15, 4  ;;  %s1346_s11 = sshll.u32 %s1345_s9, 4  ;;  %s1349_s18 = int_to_ptr.vmem [resolvable:$true] %s1348_s18  ;;  %s1347_s11 = int_to_ptr.hbm [resolvable:$true] %s1346_s11 }
  0x7b   : > { %s14680_s14 = scalar_lea.sflag [#allocation6], %s12248_s28  ;;  %s11617_s1 = sshra.s32 %s1347_s11, 4  ;;  %s11618_s1 = int_to_ptr.hbm [resolvable:$true] %s11617_s1 }
  0x7c   : > { %s11619_s12 = scalar_lea.hbm %s11618_s1, 64  ;;  %p12262_p10 = pneg %p12243_p8 }
  0x7d   : > { %p11620_p9 = scmp.ne.s32.totalorder %s11618_s1, %s11619_s12  ;;  %s11624_s25 = scalar_lea.hbm %s14760_s20, 256 }
  0x7e   : > { %p11625_p13 = scmp.lt.s32.totalorder %s11618_s1, %s14760_s20  ;;  %p11626_p0 = scmp.lt.s32.totalorder %s11624_s25, %s11619_s12 }
  0x7f   : > { %p11622_p11 = pnand %p12262_p10, %p11620_p9 }
  0x80   : > { %p11627_p1 = por %p11626_p0, %p11625_p13 }
  0x81   : > { %p11623_p12 = pneg %p11622_p11 }
  0x83   : > { %p11628_p2 = pnand %p11627_p1, %p11623_p12 }
  0x85   : > { %11631 = shalt.err (!%p11628_p2)
}
  0x86   : > { %s14684_s9 = smov 64   ;;  %s14685_s15 = smov 4  }
  0x87   : > { %11160 = dma.hbm_to_vmem [thread:$0]  (!%p12243_p8), %s1347_s11, 1024, %s1349_s18, %s14680_s14, %s14684_s9, %s14684_s9, %s14685_s15  }
  0x88   : > { %p9278_p3 = scmp.ge.s32.totalorder %s11907_s19, 1  ;;  %p1627_p4 = scmp.lt.s32.totalorder %s11907_s19, 5 }
  0x89   : > { %s1455_s12 = scalar_lea.hbm %s14759_s13, %s12254_s16  ;;  %s1450_s20 = scalar_lea.vmem [#allocation8], %s12251_s2 }
  0x8a   : > { %p12279_p5 = pnand %p9278_p3, %p1627_p4  ;;  %s1456_s1 = sshll.u32 %s1455_s12, 4  ;;  %s1457_s1 = int_to_ptr.hbm [resolvable:$true] %s1456_s1 }
  0x8b   : > { %s1458_s8 = sshll.u32 %s1450_s20, 4  ;;  %s14682_s4 = scalar_lea.sflag [#allocation9], %s12248_s28  ;;  %s1459_s8 = int_to_ptr.vmem [resolvable:$true] %s1458_s8 }
  0x8c   : > { %s11647_s27 = sshra.s32 %s1457_s1, 4  ;;  %s11654_s11 = scalar_lea.hbm %s14759_s13, 256  ;;  %s11648_s27 = int_to_ptr.hbm [resolvable:$true] %s11647_s27 }
  0x8d   : > { %s11649_s30 = scalar_lea.hbm %s11648_s27, 64  ;;  %p11655_p12 = scmp.lt.s32.totalorder %s11648_s27, %s14759_s13 }
  0x8e   : > { %p11650_p6 = scmp.ne.s32.totalorder %s11648_s27, %s11649_s30  ;;  %p11656_p13 = scmp.lt.s32.totalorder %s11654_s11, %s11649_s30 }
  0x90   : > { %p11652_p9 = pnand %p11650_p6, %p12262_p10  ;;  %p11657_p0 = por %p11656_p13, %p11655_p12 }
  0x92   : > { %p11653_p11 = pneg %p11652_p9 }
  0x94   : > { %p11658_p1 = pnand %p11657_p0, %p11653_p11 }
  0x96   : > { %11661 = shalt.err (!%p11658_p1)
}
  0x97   : > { %11166 = dma.hbm_to_vmem [thread:$0]  (!%p12243_p8), %s1457_s1, 1024, %s1459_s8, %s14682_s4, %s14684_s9, %s14684_s9, %s14685_s15  }
  0x98   : > { %s1553_s20 = scalar_lea.hbm %s14758_s17, %s12254_s16  ;;  %s1548_s30 = scalar_lea.vmem [#allocation11], %s12251_s2 }
  0x99   : > { %s1556_s27 = sshll.u32 %s1548_s30, 4  ;;  %s1554_s18 = sshll.u32 %s1553_s20, 4  ;;  %s1557_s27 = int_to_ptr.vmem [resolvable:$true] %s1556_s27  ;;  %s1555_s18 = int_to_ptr.hbm [resolvable:$true] %s1554_s18 }
  0x9a   : > { %s1545_s12 = scalar_lea.sflag [#allocation12], %s12248_s28  ;;  %s11677_s11 = sshra.s32 %s1555_s18, 4  ;;  %s11678_s11 = int_to_ptr.hbm [resolvable:$true] %s11677_s11 }
  0x9b   : > { %s11679_s14 = scalar_lea.hbm %s11678_s11, 64  ;;  %s11684_s13 = scalar_lea.hbm %s14758_s17, 256 }
  0x9c   : > { %p11680_p2 = scmp.ne.s32.totalorder %s11678_s11, %s11679_s14  ;;  %p11685_p6 = scmp.lt.s32.totalorder %s11678_s11, %s14758_s17 }
  0x9d   : > { %p11686_p9 = scmp.lt.s32.totalorder %s11684_s13, %s11679_s14 }
  0x9e   : > { %p11682_p3 = pnand %p11680_p2, %p12262_p10 }
  0x9f   : > { %p11687_p11 = por %p11686_p9, %p11685_p6 }
  0xa0   : > { %p11683_p4 = pneg %p11682_p3 }
  0xa2   : > { %p11688_p12 = pnand %p11687_p11, %p11683_p4 }
  0xa4   : > { %11691 = shalt.err (!%p11688_p12)
}
  0xa5   : > { %11172 = dma.hbm_to_vmem [thread:$0]  (!%p12243_p8), %s1555_s18, 1024, %s1557_s27, %s1545_s12, %s14684_s9, %s14684_s9, %s14685_s15  }
  0xa6   : > { %s11132_s8 = smul.u32 192, %s12241_s26  ;;  %s1308_s4 = scalar_lea.sflag [#allocation4], %s12241_s26 }
  0xa7   : > { %s11133_s13 = smul.u32 192, %s11907_s19  ;;  %s11714_s27 = scalar_lea.hbm %s14756_s6, 768 }
  0xa8   : > { %s1311_s1 = scalar_lea.vmem [#allocation3], %s11132_s8 }
  0xa9   : > { %s1316_s14 = scalar_lea.hbm %s14756_s6, %s11133_s13  ;;  %s1319_s20 = sshll.u32 %s1311_s1, 4  ;;  %s1320_s20 = int_to_ptr.vmem [resolvable:$true] %s1319_s20 }
  0xaa   : > { %s1317_s30 = sshll.u32 %s1316_s14, 4  ;;  %s1426_s11 = scalar_lea.hbm %s14757_s5, %s11133_s13  ;;  %s1318_s30 = int_to_ptr.hbm [resolvable:$true] %s1317_s30 }
  0xab   : > { %s11707_s17 = sshra.s32 %s1318_s30, 4  ;;  %s11708_s17 = int_to_ptr.hbm [resolvable:$true] %s11707_s17 }
  0xac   : > { %s11709_s24 = scalar_lea.hbm %s11708_s17, 192  ;;  %p11715_p2 = scmp.lt.s32.totalorder %s11708_s17, %s14756_s6 }
  0xad   : > { %p11710_p13 = scmp.ne.s32.totalorder %s11708_s17, %s11709_s24  ;;  %p11716_p3 = scmp.lt.s32.totalorder %s11714_s27, %s11709_s24 }
  0xaf   : > { %p11712_p0 = pnand %p11710_p13, %p12262_p10  ;;  %p11717_p4 = por %p11716_p3, %p11715_p2 }
  0xb1   : > { %p11713_p1 = pneg %p11712_p0 }
  0xb3   : > { %p11718_p6 = pnand %p11717_p4, %p11713_p1 }
  0xb5   : > { %11721 = shalt.err (!%p11718_p6)
}
  0xb6   : > { %s11956_s18 = smov 192   ;;  %s11957_s13 = smov 12  }
  0xb7   : > { %11157 = dma.hbm_to_vmem [thread:$0]  (!%p12243_p8), %s1318_s30, 3072, %s1320_s20, %s1308_s4, %s11956_s18, %s11956_s18, %s11957_s13  }
  0xb8   : > { %s1427_s14 = sshll.u32 %s1426_s11, 4  ;;  %s1421_s1 = scalar_lea.vmem [#allocation7], %s11132_s8  ;;  %s1428_s14 = int_to_ptr.hbm [resolvable:$true] %s1427_s14 }
  0xb9   : > { %s1429_s9 = sshll.u32 %s1421_s1, 4  ;;  %s11737_s17 = sshra.s32 %s1428_s14, 4  ;;  %s1430_s9 = int_to_ptr.vmem [resolvable:$true] %s1429_s9  ;;  %s11738_s17 = int_to_ptr.hbm [resolvable:$true] %s11737_s17 }
  0xba   : > { %s11739_s24 = scalar_lea.hbm %s11738_s17, 192  ;;  %s11744_s27 = scalar_lea.hbm %s14757_s5, 768 }
  0xbb   : > { %p11740_p9 = scmp.ne.s32.totalorder %s11738_s17, %s11739_s24  ;;  %p11745_p13 = scmp.lt.s32.totalorder %s11738_s17, %s14757_s5 }
  0xbc   : > { %p11746_p0 = scmp.lt.s32.totalorder %s11744_s27, %s11739_s24 }
  0xbd   : > { %p11742_p11 = pnand %p11740_p9, %p12262_p10 }
  0xbe   : > { %p11747_p1 = por %p11746_p0, %p11745_p13 }
  0xbf   : > { %p11743_p12 = pneg %p11742_p11 }
  0xc1   : > { %p11748_p2 = pnand %p11747_p1, %p11743_p12 }
  0xc3   : > { %11751 = shalt.err (!%p11748_p2)
}
  0xc4   : > { %s14770_s4 = scalar_lea.sflag [#allocation6], %s12248_s28  ;;  %s9266_s8 = sshll.u32 %s12241_s26, 7 }
  0xc5   : > { %11163 = dma.hbm_to_vmem [thread:$0]  (!%p12243_p8), %s1428_s14, 3072, %s1430_s9, %s14770_s4, %s11956_s18, %s11956_s18, %s11957_s13  }
  0xc6   : > { %s10740_s20 = sshll.u32 %s11907_s19, 7  ;;  %s1519_s1 = scalar_lea.vmem [#allocation10], %s9266_s8 }
  0xc7   : > { %s1524_s30 = scalar_lea.hbm %s14754_s21, %s10740_s20  ;;  %s1527_s17 = sshll.u32 %s1519_s1, 4  ;;  %s1528_s17 = int_to_ptr.vmem [resolvable:$true] %s1527_s17 }
  0xc8   : > { %s1525_s11 = sshll.u32 %s1524_s30, 4  ;;  %s11774_s15 = scalar_lea.hbm %s14754_s21, 512  ;;  %s1526_s11 = int_to_ptr.hbm [resolvable:$true] %s1525_s11 }
  0xc9   : > { %s11767_s24 = sshra.s32 %s1526_s11, 4  ;;  %s11768_s24 = int_to_ptr.hbm [resolvable:$true] %s11767_s24 }
  0xca   : > { %s11769_s27 = scalar_lea.hbm %s11768_s24, 128  ;;  %p11775_p9 = scmp.lt.s32.totalorder %s11768_s24, %s14754_s21 }
  0xcb   : > { %p11770_p3 = scmp.ne.s32.totalorder %s11768_s24, %s11769_s27  ;;  %p11776_p11 = scmp.lt.s32.totalorder %s11774_s15, %s11769_s27 }
  0xcd   : > { %p11772_p4 = pnand %p11770_p3, %p12262_p10  ;;  %p11777_p12 = por %p11776_p11, %p11775_p9 }
  0xcf   : > { %p11773_p6 = pneg %p11772_p4 }
  0xd1   : > { %p11778_p13 = pnand %p11777_p12, %p11773_p6 }
  0xd3   : > { %11781 = shalt.err (!%p11778_p13)
}
  0xd4   : > { %s11958_s19 = smov 128   ;;  %s11959_s9 = smov 8  }
  0xd5   : > { %s14771_s18 = scalar_lea.sflag [#allocation9], %s12248_s28  ;;  %s1581_s13 = scalar_lea.hbm %s14753_s23, %s10740_s20 }
  0xd6   : > { %11169 = dma.hbm_to_vmem [thread:$0]  (!%p12243_p8), %s1526_s11, 2048, %s1528_s17, %s14771_s18, %s11958_s19, %s11958_s19, %s11959_s9  }
  0xd7   : > { %s1582_s14 = sshll.u32 %s1581_s13, 4  ;;  %s1576_s4 = scalar_lea.vmem [#allocation13], %s9266_s8  ;;  %s1583_s14 = int_to_ptr.hbm [resolvable:$true] %s1582_s14 }
  0xd8   : > { %s1584_s30 = sshll.u32 %s1576_s4, 4  ;;  %s11797_s15 = sshra.s32 %s1583_s14, 4  ;;  %s1585_s30 = int_to_ptr.vmem [resolvable:$true] %s1584_s30  ;;  %s11798_s15 = int_to_ptr.hbm [resolvable:$true] %s11797_s15 }
  0xd9   : > { %s11799_s1 = scalar_lea.hbm %s11798_s15, 128  ;;  %s11804_s24 = scalar_lea.hbm %s14753_s23, 512 }
  0xda   : > { %p11800_p0 = scmp.ne.s32.totalorder %s11798_s15, %s11799_s1  ;;  %p11805_p3 = scmp.lt.s32.totalorder %s11798_s15, %s14753_s23 }
  0xdb   : > { %p11806_p4 = scmp.lt.s32.totalorder %s11804_s24, %s11799_s1 }
  0xdc   : > { %p11802_p1 = pnand %p11800_p0, %p12262_p10 }
  0xdd   : > { %p11807_p6 = por %p11806_p4, %p11805_p3 }
  0xde   : > { %p11803_p2 = pneg %p11802_p1 }
  0xe0   : > { %p11808_p9 = pnand %p11807_p6, %p11803_p2 }
  0xe2   : > { %11811 = shalt.err (!%p11808_p9)
}
  0xe3   : > { %11175 = dma.hbm_to_vmem [thread:$0]  (!%p12243_p8), %s1583_s14, 2048, %s1585_s30, %s1545_s12, %s11958_s19, %s11958_s19, %s11959_s9  }
  0xe4   : > { %s1610_s8 = scalar_lea.hbm %s14755_s10, %s12254_s16  ;;  %s1605_s20 = scalar_lea.vmem [#allocation14], %s12251_s2 }
  0xe5   : > { %s1613_s11 = sshll.u32 %s1605_s20, 4  ;;  %s1611_s17 = sshll.u32 %s1610_s8, 4  ;;  %s1614_s11 = int_to_ptr.vmem [resolvable:$true] %s1613_s11  ;;  %s1612_s17 = int_to_ptr.hbm [resolvable:$true] %s1611_s17 }
  0xe6   : > { %s1602_s27 = scalar_lea.sflag [#allocation15], %s12241_s26  ;;  %s11827_s18 = sshra.s32 %s1612_s17, 4  ;;  %s11828_s18 = int_to_ptr.hbm [resolvable:$true] %s11827_s18 }
  0xe7   : > { %s11829_s13 = scalar_lea.hbm %s11828_s18, 64  ;;  %s11834_s28 = scalar_lea.hbm %s14755_s10, 256 }
  0xe8   : > { %p11830_p11 = scmp.ne.s32.totalorder %s11828_s18, %s11829_s13  ;;  %p11835_p0 = scmp.lt.s32.totalorder %s11828_s18, %s14755_s10 }
  0xe9   : > { %p11836_p1 = scmp.lt.s32.totalorder %s11834_s28, %s11829_s13 }
  0xea   : > { %p11832_p12 = pnand %p11830_p11, %p12262_p10 }
  0xeb   : > { %p11837_p2 = por %p11836_p1, %p11835_p0 }
  0xec   : > { %p11833_p13 = pneg %p11832_p12 }
  0xee   : > { %p11838_p3 = pnand %p11837_p2, %p11833_p13 }
  0xf0   : > { %11841 = shalt.err (!%p11838_p3)
}
  0xf1   : > { %s14772_s2 = smov 4   ;;  %s14773_s16 = smov 64  }
  0xf2   : > { %11178 = dma.hbm_to_vmem [thread:$0]  (!%p12243_p8), %s1612_s17, 1024, %s1614_s11, %s1602_s27, %s14773_s16, %s14773_s16, %s14772_s2  }
  0xf3   : > { %1631 = sbr.rel (%p12279_p5) target bundleno = 7027 (0x1b73), region = 192 }
  0xf8   : > { %s1633_s29 = sand.u32 1, %s11899_s7  }
  0xf9   : > { %s11136_s26 = smul.u32 192, %s1633_s29  ;;  %s1634_s12 = scalar_lea.sflag [#allocation4], %s1633_s29 }
  0xfb   : > { %s12372_s19 = scalar_lea.vmem [#allocation3], %s11136_s26 }
  0xfc   : > { %14774 = sst [smem:[#allocation71_spill]] %s12372_s19 }
  0xfd   : > { %11874 = dma.done.wait (%p12236_p7), %s1634_s12, 3072  }
  0xfe   : > { %11876 = vsyncadd (%p12236_p7), %s1634_s12, 4294964224  ;;  %s1643_s3 = sand.u32 1, %s12219_s0   ;;  %s9279_s9 = sshll.u32 %s1633_s29, 6 }
  0xff   : > { %s1644_s14 = scalar_lea.sflag [#allocation6], %s1643_s3  ;;  %s12379_s4 = scalar_lea.vmem [#allocation5], %s9279_s9 }
 0x100   : > { %14775 = sst [smem:[#allocation72_spill]] %s12379_s4 }
 0x101   : > { %11878 = dma.done.wait (%p12236_p7), %s1644_s14, 4096  }
 0x102   : > { %11880 = vsyncadd (%p12236_p7), %s1644_s14, 4294963200  ;;  %s12385_s25 = scalar_lea.vmem [#allocation7], %s11136_s26  ;;  %s1664_s30 = scalar_lea.sflag [#allocation9], %s1643_s3 }
 0x103   : > { %14776 = sst [smem:[#allocation73_spill]] %s12385_s25  ;;  %s12387_s15 = scalar_lea.vmem [#allocation8], %s9279_s9 }
 0x104   : > { %14777 = sst [smem:[#allocation74_spill]] %s12387_s15 }
 0x105   : > { %11882 = dma.done.wait (%p12236_p7), %s1664_s30, 3072  }
 0x106   : > { %11884 = vsyncadd (%p12236_p7), %s1664_s30, 4294964224  ;;  %s9281_s1 = sshll.u32 %s1633_s29, 7  ;;  %s1684_s8 = scalar_lea.sflag [#allocation12], %s1643_s3 }
 0x107   : > { %s12393_s24 = scalar_lea.vmem [#allocation10], %s9281_s1  ;;  %s12395_s20 = scalar_lea.vmem [#allocation11], %s9279_s9 }
 0x108   : > { %14778 = sst [smem:[#allocation75_spill]] %s12393_s24 }
 0x109   : > { %14779 = sst [smem:[#allocation76_spill]] %s12395_s20 }
 0x10a   : > { %11886 = dma.done.wait (%p12236_p7), %s1684_s8, 3072  }
 0x10b   : > { %11888 = vsyncadd (%p12236_p7), %s1684_s8, 4294964224  ;;  %s12401_s11 = scalar_lea.vmem [#allocation13], %s9281_s1  ;;  %s1704_s17 = scalar_lea.sflag [#allocation15], %s1633_s29 }
 0x10c   : > { %14780 = sst [smem:[#allocation77_spill]] %s12401_s11  ;;  %s12403_s27 = scalar_lea.vmem [#allocation14], %s9279_s9 }
 0x10d   : > { %14781 = sst [smem:[#allocation78_spill]] %s12403_s27 }
 0x10e   : > { %11890 = dma.done.wait (%p12236_p7), %s1704_s17, 1024  }
 0x10f   : > { %11892 = vsyncadd (%p12236_p7), %s1704_s17, 4294966272  ;;  %s14782_s18 = sld [smem:[#allocation31_spill]]  ;;  %p1931_p8 = scmp.lt.s32.totalorder %s12219_s0, 3 }
 0x110   : > { %s14783_s13 = sld [smem:[#allocation32_spill]] }
 0x111   : > { %s14784_s28 = sld [smem:[#allocation36_spill]] }
 0x112   : > { %s14785_s2 = sld [smem:[#allocation37_spill]] }
 0x113   : > { %s14786_s16 = sld [smem:[#allocation38_spill]] }
 0x114   : > { %s14787_s26 = sld [smem:[#allocation34_spill]] }
 0x115   : > { %s14788_s12 = sld [smem:[#allocation39_spill]] }
 0x116   : > { %s14789_s3 = sld [smem:[#allocation40_spill]] }
 0x117   : > { %s14790_s14 = sld [smem:[#allocation41_spill]] }
 0x118   : > { %s14791_s30 = sld [smem:[#allocation42_spill]] }
 0x119   : > { %s14793_s9 = sld [smem:[#allocation44_spill]] }
 0x11a   : > { %s12411_s1 = scalar_select %p1931_p8, %s12219_s0, 3 }
 0x11b   : > { %s14794_s22 = sld [smem:[#allocation46_spill]] }
 0x11c   : > { %s12415_s8 = scalar_lea.vmem %s14782_s18, %s12411_s1  ;;  %s14796_s17 = sld [smem:[#allocation48_spill]] }
 0x11d   : > { %14795 = sst [smem:[#allocation79_spill]] %s12415_s8  ;;  %s12419_s5 = scalar_lea.vmem %s14783_s13, %s12411_s1 }
 0x11e   : > { %14797 = sst [smem:[#allocation80_spill]] %s12419_s5  ;;  %s11137_s10 = smul.u32 3, %s12411_s1 }
 0x11f   : > { %s14798_s6 = sld [smem:[#allocation49_spill]]  ;;  %s12424_s23 = scalar_lea.vmem %s14784_s28, %s12411_s1 }
 0x120   : > { %s14799_s21 = sld [smem:[#allocation50_spill]]  ;;  %s12428_s15 = scalar_lea.vmem %s14785_s2, %s12411_s1 }
 0x121   : > { %14800 = sst [smem:[#allocation81_spill]] %s12424_s23  ;;  %s12432_s27 = scalar_lea.vmem %s14786_s16, %s12411_s1 }
 0x122   : > { %s14801_s7 = sld [smem:[#allocation51_spill]]  ;;  %s12435_s18 = scalar_lea.vmem %s14787_s26, %s11137_s10 }
 0x123   : > { %14802 = sst [smem:[#allocation82_spill]] %s12428_s15  ;;  %s10744_s13 = sshll.u32 %s12411_s1, 8 }
 0x124   : > { %s14803_s25 = sld [smem:[#allocation52_spill]]  ;;  %s12439_s24 = scalar_lea.vmem %s14788_s12, %s10744_s13 }
 0x125   : > { %14804 = sst [smem:[#allocation83_spill]] %s12432_s27  ;;  %s9287_s5 = sshll.u32 %s12411_s1, 2 }
 0x126   : > { %s14805_s11 = sld [smem:[#allocation53_spill]]  ;;  %s12443_s23 = scalar_lea.vmem %s14789_s3, %s9287_s5 }
 0x127   : > { %14806 = sst [smem:[#allocation84_spill]] %s12435_s18  ;;  %s12446_s15 = scalar_lea.vmem %s14790_s14, %s10744_s13 }
 0x128   : > { %s14807_s20 = sld [smem:[#allocation54_spill]]  ;;  %s12450_s27 = scalar_lea.vmem %s14791_s30, %s12411_s1 }
 0x129   : > { %14808 = sst [smem:[#allocation85_spill]] %s12439_s24  ;;  %s1972_s18 = scalar_lea.vmem %s14793_s9, %s12411_s1 }
 0x12a   : > { %s14809_s4 = sld [smem:[#allocation56_spill]]  ;;  %s12457_s8 = scalar_lea.vmem %s14794_s22, %s11137_s10 }
 0x12b   : > { %s14810_s28 = sld [smem:[#allocation58_spill]]  ;;  %s1979_s19 = scalar_lea.vmem %s14796_s17, %s12411_s1 }
 0x12c   : > { %14811 = sst [smem:[#allocation86_spill]] %s12443_s23  ;;  %s1982_s12 = scalar_lea.vmem %s14798_s6, %s12411_s1 }
 0x12d   : > { %s14812_s2 = sld [smem:[#allocation60_spill]]  ;;  %s1985_s24 = scalar_lea.vmem %s14799_s21, %s12411_s1 }
 0x12e   : > { %14813 = sst [smem:[#allocation87_spill]] %s12446_s15  ;;  %s12466_s0 = scalar_lea.vmem %s14801_s7, %s10744_s13 }
 0x12f   : > { %s14814_s16 = sld [smem:[#allocation62_spill]]  ;;  %s12469_s3 = scalar_lea.vmem %s14803_s25, %s9287_s5 }
 0x130   : > { %14815 = sst [smem:[#allocation88_spill]] %s12450_s27  ;;  %s12472_s23 = scalar_lea.vmem %s14805_s11, %s10744_s13 }
 0x131   : > { %s2002_s14 = scalar_lea.vmem %s14807_s20, %s12411_s1  ;;  %s9295_s15 = sshll.u32 %s12411_s1, 1 }
 0x132   : > { %s12478_s30 = scalar_lea.vmem %s14809_s4, %s9295_s15  ;;  %s2009_s27 = scalar_lea.vmem %s14810_s28, %s12411_s1 }
 0x133   : > { %s12483_s26 = scalar_lea.vmem %s14812_s2, %s9295_s15  ;;  %s14816_s9 = sld [smem:[#allocation68_spill]] }
 0x135   : > { %s2016_s29 = scalar_lea.vmem %s14814_s16, %s12411_s1 }
 0x139   : > { %p9297_p7 = scmp.ne.s32.totalorder %s14816_s9, 0 }
 0x13a   : > { %s14817_s10 = sld [smem:[#allocation23_spill]] (!%p9297_p7) }
 0x13b   : > { %2021 = sbr.rel (%p9297_p7) target bundleno = 596 (0x254), region = 228  ;;  %s14818_s6 = sld [smem:[#allocation30_spill]] (!%p9297_p7) }
 0x13c   : > { %s14819_s5 = sld [smem:[#allocation21_spill]] (!%p9297_p7) }
 0x13d   : > { %s14820_s21 = sld [smem:[#allocation22_spill]] (!%p9297_p7) }
 0x13e   : > { %s14821_s7 = sld [smem:[#allocation63_spill]] (!%p9297_p7) }
 0x13f   : > { %s14822_s4 = sld [smem:[#allocation65_spill]] (!%p9297_p7) }
 0x140   : > { %v12489_v0 = vld [vmem:[%s14817_s10] sm:$0xff]  ;;  %v12497_v5 = vld [vmem:[%s14817_s10 + $0x8] sm:$0xff]  ;;  %v11960_v40 = vmov 128.0   ;;  %vm2327_vm1 = vcmask 190464   ;;  %s14823_s25 = sld [smem:[#allocation24_spill]] }
 0x141   : > { %v10755_v1 = vld [vmem:[%s14818_s6 + $0x38] sm:$0xff]  ;;  %2268 = vadd.xlane.f32.xlu0 %v12489_v0  ;;  %v10754_v3 = vld [vmem:[%s14818_s6 + $0x30] sm:$0xff]  ;;  %v10753_v6 = vld [vmem:[%s14818_s6 + $0x28] sm:$0xff]  ;;  %11269 = vrcp.f32 %v11960_v40  ;;  %s14824_s15 = sld [smem:[#allocation25_spill]] }
 0x142   : > { %v10763_v2 = vld [vmem:[%s14818_s6 + $0x78] sm:$0xff]  ;;  %11100 = vmatpush.bf16.msra.mxu2 %v10755_v1  ;;  %2198 = vmatpush.bf16.msra.mxu0 %v10755_v1  ;;  %v10762_v4 = vld [vmem:[%s14818_s6 + $0x70] sm:$0xff]  ;;  %v10761_v7 = vld [vmem:[%s14818_s6 + $0x68] sm:$0xff]  ;;  %s14825_s20 = sld [smem:[#allocation64_spill]] }
 0x143   : > { %11108 = vmatpush.bf16.msra.mxu3 %v10763_v2  ;;  %2222 = vmatpush.bf16.msra.mxu1 %v10763_v2  ;;  %v10752_v8 = vld [vmem:[%s14818_s6 + $0x20] sm:$0xff]  ;;  %v10751_v10 = vld [vmem:[%s14818_s6 + $0x18] sm:$0xff]  ;;  %v10750_v12 = vld [vmem:[%s14818_s6 + $0x10] sm:$0xff] }
 0x144   : > { %v10760_v9 = vld [vmem:[%s14818_s6 + $0x60] sm:$0xff]  ;;  %v10759_v11 = vld [vmem:[%s14818_s6 + $0x58] sm:$0xff]  ;;  %v2027_v14 = vld [vmem:[%s14819_s5 + $0x28] sm:$0xff] }
 0x145   : > { %v2026_v13 = vld [vmem:[%s14819_s5 + $0x20] sm:$0xff]  ;;  %v2028_v15 = vld [vmem:[%s14819_s5 + $0x30] sm:$0xff]  ;;  %v2029_v16 = vld [vmem:[%s14819_s5 + $0x38] sm:$0xff] }
 0x146   : > { %11101 = vmatpush.bf16.msra.mxu2 %v10754_v3  ;;  %2199 = vmatpush.bf16.msra.mxu0 %v10754_v3  ;;  %v10758_v17 = vld [vmem:[%s14818_s6 + $0x50] sm:$0xff]  ;;  %v2036_v18 = vpack.c.bf16 %v2027_v14, %v2026_v13  ;;  %v2037_v19 = vpack.c.bf16 %v2029_v16, %v2028_v15  ;;  %v10749_v20 = vld [vmem:[%s14818_s6 + $0x8] sm:$0xff]  ;;  %v10748_v24 = vld [vmem:[%s14818_s6] sm:$0xff] }
 0x147   : > { %11109 = vmatpush.bf16.msra.mxu3 %v10762_v4  ;;  %2223 = vmatpush.bf16.msra.mxu1 %v10762_v4  ;;  %v10757_v21 = vld [vmem:[%s14818_s6 + $0x48] sm:$0xff]  ;;  %v10756_v27 = vld [vmem:[%s14818_s6 + $0x40] sm:$0xff]  ;;  %v2032_v32 = vld [vmem:[%s14819_s5 + $0x50] sm:$0xff]  ;;  %v11270_v53 = vpop.eup %11269 }
 0x148   : > { %v2082_v22 = vunpack.c.l.b16 %v2036_v18  ;;  %v2084_v23 = vunpack.c.l.b16 %v2037_v19  ;;  %v2083_v25 = vunpack.c.h.b16 %v2036_v18  ;;  %v2085_v26 = vunpack.c.h.b16 %v2037_v19  ;;  %v2030_v30 = vld [vmem:[%s14819_s5 + $0x40] sm:$0xff]  ;;  %v2031_v31 = vld [vmem:[%s14819_s5 + $0x48] sm:$0xff]  ;;  %v2033_v33 = vld [vmem:[%s14819_s5 + $0x58] sm:$0xff] }
 0x149   : > { %2270 = vadd.xlane.f32.xlu0 %v12497_v5  ;;  %v2038_v34 = vpack.c.bf16 %v2031_v31, %v2030_v30  ;;  %v2039_v35 = vpack.c.bf16 %v2033_v33, %v2032_v32  ;;  %v2022_v43 = vld [vmem:[%s14819_s5] sm:$0xff]  ;;  %v2023_v44 = vld [vmem:[%s14819_s5 + $0x8] sm:$0xff]  ;;  %v2024_v45 = vld [vmem:[%s14819_s5 + $0x10] sm:$0xff]  ;;  %v2273_v56 = vmul.f32 128.0, %v11270_v53  ;;  %vm2277_vm0 = vweird.f32 %v11270_v53 }
 0x14a   : > { %11102 = vmatpush.bf16.msra.mxu2 %v10753_v6  ;;  %2200 = vmatpush.bf16.msra.mxu0 %v10753_v6  ;;  %v2092_v28 = vpack.c.b16 %v2084_v23, %v2082_v22  ;;  %v2093_v29 = vpack.c.b16 %v2085_v26, %v2083_v25  ;;  %v2025_v46 = vld [vmem:[%s14819_s5 + $0x18] sm:$0xff]  ;;  %v2034_v47 = vpack.c.bf16 %v2023_v44, %v2022_v43  ;;  %v2246_v23 = vld [vmem:[%s14820_s21] sm:$0xff]  ;;  %v2247_v26 = vld [vmem:[%s14820_s21 + $0x8] sm:$0xff] }
 0x14b   : > { %11110 = vmatpush.bf16.msra.mxu3 %v10761_v7  ;;  %2224 = vmatpush.bf16.msra.mxu1 %v10761_v7  ;;  %v2086_v36 = vunpack.c.l.b16 %v2038_v34  ;;  %v2087_v37 = vunpack.c.h.b16 %v2038_v34  ;;  %v2088_v38 = vunpack.c.l.b16 %v2039_v35  ;;  %v2089_v39 = vunpack.c.h.b16 %v2039_v35  ;;  %v2249_v13 = vld [vmem:[%s14820_s21 + $0x18] sm:$0xff]  ;;  %v2251_v32 = vld [vmem:[%s14820_s21 + $0x28] sm:$0xff] }
 0x14c   : > { %v2035_v48 = vpack.c.bf16 %v2025_v46, %v2024_v45  ;;  %v2078_v49 = vunpack.c.l.b16 %v2034_v47  ;;  %v2079_v50 = vunpack.c.h.b16 %v2034_v47  ;;  %v2274_v57 = vsub.f32 1.0, %v2273_v56 }
 0x14d   : > { %v2094_v41 = vpack.c.b16 %v2088_v38, %v2086_v36  ;;  %v2095_v42 = vpack.c.b16 %v2089_v39, %v2087_v37  ;;  %v11961_v38 = vmov 0.0  }
 0x14e   : > { %11103 = vmatpush.bf16.msra.mxu2 %v10752_v8  ;;  %2201 = vmatpush.bf16.msra.mxu0 %v10752_v8  ;;  %v2080_v51 = vunpack.c.l.b16 %v2035_v48  ;;  %v2081_v52 = vunpack.c.h.b16 %v2035_v48  ;;  %v2275_v58 = vmul.f32 %v11270_v53, %v2274_v57  ;;  %2328 = vst.msk [vmem:[%s14822_s4] sm:$0x7] %vm2327_vm1, %v11961_v38 }
 0x14f   : > { %11111 = vmatpush.bf16.msra.mxu3 %v10760_v9  ;;  %2225 = vmatpush.bf16.msra.mxu1 %v10760_v9  ;;  %2329 = vst.msk [vmem:[%s14822_s4 + $0x4] sm:$0x7] %vm2327_vm1, %v11961_v38 }
 0x150   : > { %v2090_v54 = vpack.c.b16 %v2080_v51, %v2078_v49  ;;  %v2091_v55 = vpack.c.b16 %v2081_v52, %v2079_v50  ;;  %v2276_v59 = vadd.f32 %v11270_v53, %v2275_v58  ;;  %2330 = vst.msk [vmem:[%s14822_s4 + $0x8] sm:$0x7] %vm2327_vm1, %v11961_v38  ;;  %v11267_v50 = vld [vmem:[%s14823_s25] ss:$0 sm:$0xff] }
 0x151   : > { %2331 = vst.msk [vmem:[%s14822_s4 + $0xc] sm:$0x7] %vm2327_vm1, %v11961_v38 }
 0x152   : > { %11104 = vmatpush.bf16.msra.mxu2 %v10751_v10  ;;  %2202 = vmatpush.bf16.msra.mxu0 %v10751_v10  ;;  %v2278_v60 = vsel %vm2277_vm0, %v11270_v53, %v2276_v59  ;;  %v11268_v53 = vld [vmem:[%s14824_s15] ss:$0 sm:$0xff] }
 0x153   : > { %11112 = vmatpush.bf16.msra.mxu3 %v10759_v11  ;;  %2226 = vmatpush.bf16.msra.mxu1 %v10759_v11 }
 0x156   : > { %11105 = vmatpush.bf16.msra.mxu2 %v10750_v12  ;;  %2203 = vmatpush.bf16.msra.mxu0 %v10750_v12  ;;  %v2248_v12 = vld [vmem:[%s14820_s21 + $0x10] sm:$0xff] }
 0x157   : > { %11113 = vmatpush.bf16.msra.mxu3 %v10758_v17  ;;  %2227 = vmatpush.bf16.msra.mxu1 %v10758_v17 }
 0x15a   : > { %11106 = vmatpush.bf16.msra.mxu2 %v10749_v20  ;;  %2204 = vmatpush.bf16.msra.mxu0 %v10749_v20 }
 0x15b   : > { %11114 = vmatpush.bf16.msra.mxu3 %v10757_v21  ;;  %2228 = vmatpush.bf16.msra.mxu1 %v10757_v21 }
 0x15e   : > { %11107 = vmatpush.bf16.msra.mxu2 %v10748_v24  ;;  %2205 = vmatpush.bf16.msra.mxu0 %v10748_v24  ;;  %v2250_v24 = vld [vmem:[%s14820_s21 + $0x20] sm:$0xff] }
 0x15f   : > { %11115 = vmatpush.bf16.msra.mxu3 %v10756_v27  ;;  %2229 = vmatpush.bf16.msra.mxu1 %v10756_v27 }
 0x161   : > { %2211 = vmatmul.bf16.vlgmr.msra.gmra.mxu2 %v2092_v28  ;;  %2206 = vmatmul.bf16.vlgmr.msra.gmra.mxu0 %v2090_v54 }
 0x162   : > { %2235 = vmatmul.bf16.vlgmr.msra.gmra.mxu3 %v2093_v29  ;;  %2230 = vmatmul.bf16.vlgmr.msra.gmra.mxu1 %v2091_v55 }
 0x171   : > { %2216 = vmatmul.bf16.gmra.mxu2 %v2094_v41 }
 0x172   : > { %2240 = vmatmul.bf16.gmra.mxu3 %v2095_v42 }
 0x1b4   : > { %v2269_v61 = vpop.xlane.xlu0 %2268 }
 0x1b5   : > { %v2279_v62 = vmul.f32 %v2278_v60, %v2269_v61 }
 0x1b7   : > { %v12525_v63 = vsub.f32 %v12489_v0, %v2279_v62 }
 0x1b9   : > { %v2283_v1 = vmul.f32 %v12525_v63, %v12525_v63 }
 0x1bb   : > { %2285 = vadd.xlane.f32.xlu1 %v2283_v1 }
 0x1bc   : > { %v2271_v2 = vpop.xlane.xlu0 %2270 }
 0x1bd   : > { %v2280_v3 = vmul.f32 %v2278_v60, %v2271_v2 }
 0x1bf   : > { %v12530_v4 = vsub.f32 %v12497_v5, %v2280_v3 }
 0x1c1   : > { %v2284_v6 = vmul.f32 %v12530_v4, %v12530_v4 }
 0x1c3   : > { %2287 = vadd.xlane.f32.xlu1 %v2284_v6 }
 0x1de   : > { %v2207_v5 = vpop.f32.mrf.mxu0 }
 0x1df   : > { %v2231_v17 = vpop.f32.mrf.mxu1 }
 0x1e0   : > { %v2232_v19 = vadd.f32 %v2231_v17, %v2207_v5 }
 0x1e2   : > { %v2252_v28 = vadd.f32 %v2246_v23, %v2232_v19 }
 0x1e4   : > { %v2212_v7 = vpop.f32.mrf.mxu2  ;;  %2258 = vst [vmem:[%s14821_s7] sm:$0xff] %v2252_v28 }
 0x1e5   : > { %v2236_v8 = vpop.f32.mrf.mxu3 }
 0x1e6   : > { %v2237_v10 = vadd.f32 %v2236_v8, %v2212_v7  ;;  %v2209_v21 = vpop.f32.mrf.mxu0 }
 0x1e7   : > { %v2233_v25 = vpop.f32.mrf.mxu1 }
 0x1e8   : > { %v2254_v14 = vadd.f32 %v2248_v12, %v2237_v10  ;;  %v2234_v30 = vadd.f32 %v2233_v25, %v2209_v21 }
 0x1ea   : > { %2260 = vst [vmem:[%s14821_s7 + $0x10] sm:$0xff] %v2254_v14  ;;  %v2253_v33 = vadd.f32 %v2247_v26, %v2234_v30 }
 0x1ec   : > { %v2214_v9 = vpop.f32.mrf.mxu2  ;;  %2259 = vst [vmem:[%s14821_s7 + $0x8] sm:$0xff] %v2253_v33 }
 0x1ed   : > { %v2238_v0 = vpop.f32.mrf.mxu3 }
 0x1ee   : > { %v2239_v11 = vadd.f32 %v2238_v0, %v2214_v9 }
 0x1f0   : > { %v2255_v15 = vadd.f32 %v2249_v13, %v2239_v11 }
 0x1f2   : > { %2261 = vst [vmem:[%s14821_s7 + $0x18] sm:$0xff] %v2255_v15 }
 0x1f4   : > { %v2217_v16 = vpop.f32.mrf.mxu2 }
 0x1f5   : > { %v2241_v18 = vpop.f32.mrf.mxu3 }
 0x1f6   : > { %v2242_v20 = vadd.f32 %v2241_v18, %v2217_v16 }
 0x1f8   : > { %v2256_v29 = vadd.f32 %v2250_v24, %v2242_v20 }
 0x1fa   : > { %2262 = vst [vmem:[%s14821_s7 + $0x20] sm:$0xff] %v2256_v29 }
 0x1fc   : > { %v2219_v22 = vpop.f32.mrf.mxu2 }
 0x1fd   : > { %v2243_v27 = vpop.f32.mrf.mxu3 }
 0x1fe   : > { %v2244_v31 = vadd.f32 %v2243_v27, %v2219_v22 }
 0x200   : > { %v2257_v34 = vadd.f32 %v2251_v32, %v2244_v31 }
 0x202   : > { %2263 = vst [vmem:[%s14821_s7 + $0x28] sm:$0xff] %v2257_v34 }
 0x22e   : > { %v2286_v35 = vpop.xlane.xlu1 %2285 }
 0x22f   : > { %v2289_v36 = vmul.f32 %v2286_v35, %v2278_v60 }
 0x231   : > { %v2291_v37 = vadd.f32 1e-05, %v2289_v36 }
 0x233   : > { %11271 = vrsqrt.f32 %v2291_v37  ;;  %vm2299_vm3 = vweird.f32 %v2291_v37 }
 0x236   : > { %v2288_v39 = vpop.xlane.xlu1 %2287 }
 0x237   : > { %v2290_v40 = vmul.f32 %v2288_v39, %v2278_v60 }
 0x239   : > { %v11272_v41 = vpop.eup %11271  ;;  %v2292_v42 = vadd.f32 1e-05, %v2290_v40 }
 0x23a   : > { %v2294_v43 = vmul.f32 %v11272_v41, %v2291_v37  ;;  %vm2300_vm2 = vweird.f32 %v11272_v41 }
 0x23b   : > { %11273 = vrsqrt.f32 %v2292_v42  ;;  %vm2301_vm4 = vmor %vm2299_vm3, %vm2300_vm2  ;;  %vm2309_vm6 = vweird.f32 %v2292_v42 }
 0x23c   : > { %v2295_v44 = vmul.f32 %v11272_v41, %v2294_v43 }
 0x23e   : > { %v2296_v45 = vmul.f32 0.5, %v2295_v44 }
 0x240   : > { %v2297_v46 = vsub.f32 1.5, %v2296_v45 }
 0x241   : > { %v11274_v47 = vpop.eup %11273 }
 0x242   : > { %v2298_v48 = vmul.f32 %v11272_v41, %v2297_v46  ;;  %v2304_v49 = vmul.f32 %v11274_v47, %v2292_v42  ;;  %vm2310_vm5 = vweird.f32 %v11274_v47 }
 0x243   : > { %vm2311_vm7 = vmor %vm2309_vm6, %vm2310_vm5 }
 0x244   : > { %v2302_v51 = vsel %vm2301_vm4, %v11272_v41, %v2298_v48  ;;  %v2305_v52 = vmul.f32 %v11274_v47, %v2304_v49 }
 0x245   : > { %v2313_v54 = vmul.f32 %v2302_v51, %v12525_v63 }
 0x246   : > { %v2306_v55 = vmul.f32 0.5, %v2305_v52 }
 0x247   : > { %v2318_v56 = vmul.f32 %v11267_v50, %v2313_v54 }
 0x248   : > { %v2307_v57 = vsub.f32 1.5, %v2306_v55 }
 0x249   : > { %v2323_v58 = vadd.f32 %v11268_v53, %v2318_v56 }
 0x24a   : > { %v2308_v59 = vmul.f32 %v11274_v47, %v2307_v57 }
 0x24b   : > { %2325 = vst [vmem:[%s14825_s20] sm:$0xff] %v2323_v58 }
 0x24c   : > { %v2312_v60 = vsel %vm2311_vm7, %v11274_v47, %v2308_v59 }
 0x24d   : > { %v2314_v61 = vmul.f32 %v2312_v60, %v12530_v4 }
 0x24f   : > { %v2319_v62 = vmul.f32 %v11267_v50, %v2314_v61 }
 0x251   : > { %v2324_v1 = vadd.f32 %v11268_v53, %v2319_v62 }
 0x253   : > { %2326 = vst [vmem:[%s14825_s20 + $0x8] sm:$0xff] %v2324_v1 }
 0x254 PF: > { %s14826_s11 = sld [smem:[#allocation68_spill]] }
 0x25a   : > { %p2332_p10 = scmp.eq.s32.totalorder %s14826_s11, 2  ;;  %p2333_p5 = scmp.eq.s32.totalorder %s14826_s11, 3 }
 0x25c   : > { %p12558_p4 = por %p2333_p5, %p2332_p10 }
 0x25d   : > { %s14828_s17 = sld [smem:[#allocation63_spill]] (%p12558_p4)  ;;  %v11962_v9 = vmov (%p12558_p4), 128.0  }
 0x25e   : > { %2337 = sbr.rel (!%p12558_p4) target bundleno = 2466 (0x9a2), region = 232  ;;  %s14829_s13 = sld [smem:[#allocation64_spill]] (%p12558_p4)  ;;  %11283 = vrcp.f32 (%p12558_p4), %v11962_v9 }
 0x25f   : > { %s14830_s28 = sld [smem:[#allocation71_spill]] (%p12558_p4) }
 0x260   : > { %s14831_s2 = sld [smem:[#allocation79_spill]] (%p12558_p4) }
 0x261   : > { %s14832_s16 = sld [smem:[#allocation80_spill]] (%p12558_p4) }
 0x262   : > { %s14835_s9 = sld [smem:[#allocation84_spill]] (%p12558_p4) }
 0x263   : > { %v2341_v63 = vld [vmem:[%s14828_s17 + $0x18] sm:$0xff]  ;;  %v2340_v2 = vld [vmem:[%s14828_s17 + $0x10] sm:$0xff]  ;;  %v2338_v3 = vld [vmem:[%s14828_s17] sm:$0xff]  ;;  %s14836_s7 = sld [smem:[#allocation28_spill]] }
 0x264   : > { %2358 = vadd.xlane.f32.xlu2 %v2341_v63  ;;  %2354 = vadd.xlane.f32.xlu1 %v2340_v2  ;;  %v2342_v4 = vld [vmem:[%s14828_s17 + $0x20] sm:$0xff]  ;;  %v2339_v7 = vld [vmem:[%s14828_s17 + $0x8] sm:$0xff]  ;;  %v11284_v0 = vpop.eup %11283  ;;  %s14838_s25 = sld [smem:[#allocation72_spill]] }
 0x265   : > { %2350 = vadd.xlane.f32.xlu0 %v2338_v3  ;;  %v2344_v6 = vld [vmem:[%s14829_s13] sm:$0xff]  ;;  %v2343_v8 = vld [vmem:[%s14828_s17 + $0x28] sm:$0xff]  ;;  %v2367_v10 = vmul.f32 128.0, %v11284_v0  ;;  %vm2371_vm8 = vweird.f32 %v11284_v0  ;;  %v10786_v44 = vld [vmem:[%s14830_s28 + $0xb0] sm:$0xf0]  ;;  %s14839_s15 = sld [smem:[#allocation81_spill]] }
 0x266   : > { %v12589_v30 = vld [vmem:[%s14829_s13 + $0x8] sm:$0xff]  ;;  %v9450_v47 = vld [vmem:[%s14830_s28 + $0xb4] sm:$0xf0]  ;;  %v9436_v49 = vld [vmem:[%s14830_s28 + $0x90] sm:$0xf]  ;;  %s14840_s20 = sld [smem:[#allocation85_spill]] }
 0x267   : > { %v2368_v11 = vsub.f32 1.0, %v2367_v10  ;;  %v9448_v43 = vld [vmem:[%s14830_s28 + $0xa8] sm:$0xf]  ;;  %v10785_v45 = vld [vmem:[%s14830_s28 + $0xac] sm:$0xf]  ;;  %s14841_s11 = sld [smem:[#allocation82_spill]] }
 0x268   : > { %v9449_v46 = vor.u32 %v10786_v44, %v9448_v43  ;;  %v9453_v48 = vor.u32 %v10785_v45, %v9450_v47  ;;  %v10783_v50 = vld [vmem:[%s14830_s28 + $0x98] sm:$0xf0]  ;;  %v10782_v51 = vld [vmem:[%s14830_s28 + $0x94] sm:$0xf]  ;;  %v9438_v53 = vld [vmem:[%s14830_s28 + $0x9c] sm:$0xf0] }
 0x269   : > { %v2369_v12 = vmul.f32 %v11284_v0, %v2368_v11  ;;  %v9437_v52 = vor.u32 %v10783_v50, %v9436_v49  ;;  %v9441_v54 = vor.u32 %v10782_v51, %v9438_v53  ;;  %v9424_v55 = vld [vmem:[%s14830_s28 + $0x78] sm:$0xf]  ;;  %v10780_v56 = vld [vmem:[%s14830_s28 + $0x80] sm:$0xf0]  ;;  %v10779_v57 = vld [vmem:[%s14830_s28 + $0x7c] sm:$0xf]  ;;  %s14837_s4 = smov %s14836_s7 }
 0x26a   : > { %2739 = vmatpush.bf16.msra.mxu0 %v9449_v46  ;;  %2768 = vmatpush.bf16.msra.mxu1 %v9453_v48  ;;  %v9425_v58 = vor.u32 %v10780_v56, %v9424_v55  ;;  %v9426_v59 = vld [vmem:[%s14830_s28 + $0x84] sm:$0xf0]  ;;  %v9412_v61 = vld [vmem:[%s14830_s28 + $0x60] sm:$0xf]  ;;  %v10777_v62 = vld [vmem:[%s14830_s28 + $0x68] sm:$0xf0] }
 0x26b   : > { %v2370_v13 = vadd.f32 %v11284_v0, %v2369_v12  ;;  %11116 = vmatpush.bf16.msra.mxu2 %v9453_v48  ;;  %v9429_v60 = vor.u32 %v10779_v57, %v9426_v59  ;;  %v10776_v1 = vld [vmem:[%s14830_s28 + $0x64] sm:$0xf]  ;;  %v9402_v9 = vld [vmem:[%s14830_s28 + $0x54] sm:$0xf0]  ;;  %v9388_v10 = vld [vmem:[%s14830_s28 + $0x30] sm:$0xf] }
 0x26c   : > { %2360 = vadd.xlane.f32.xlu2 %v2342_v4  ;;  %2356 = vadd.xlane.f32.xlu1 %v2344_v6  ;;  %v10771_v11 = vld [vmem:[%s14830_s28 + $0x38] sm:$0xf0]  ;;  %v10770_v12 = vld [vmem:[%s14830_s28 + $0x34] sm:$0xf] }
 0x26d   : > { %2352 = vadd.xlane.f32.xlu0 %v2339_v7  ;;  %v12571_v14 = vsel %vm2371_vm8, %v11284_v0, %v2370_v13  ;;  %v9389_v13 = vor.u32 %v10771_v11, %v9388_v10 }
 0x26e   : > { %2740 = vmatpush.bf16.msra.mxu0 %v9437_v52  ;;  %2769 = vmatpush.bf16.msra.mxu1 %v9441_v54 }
 0x26f   : > { %11117 = vmatpush.bf16.msra.mxu2 %v9441_v54 }
 0x272   : > { %2741 = vmatpush.bf16.msra.mxu0 %v9425_v58  ;;  %2770 = vmatpush.bf16.msra.mxu1 %v9429_v60 }
 0x273   : > { %11118 = vmatpush.bf16.msra.mxu2 %v9429_v60 }
 0x274   : > { %2362 = vadd.xlane.f32.xlu2 %v2343_v8 }
 0x2d7   : > { %v2359_v15 = vpop.xlane.xlu2 %2358  ;;  %v2355_v5 = vpop.xlane.xlu1 %2354 }
 0x2d8   : > { %v2351_v16 = vpop.xlane.xlu0 %2350  ;;  %v2377_v26 = vmul.f32 %v12571_v14, %v2359_v15  ;;  %v2375_v27 = vmul.f32 %v12571_v14, %v2355_v5  ;;  %v9390_v15 = vld [vmem:[%s14830_s28 + $0x3c] sm:$0xf0] }
 0x2d9   : > { %v2373_v17 = vmul.f32 %v12571_v14, %v2351_v16  ;;  %v9393_v16 = vor.u32 %v10770_v12, %v9390_v15 }
 0x2da   : > { %v12593_v32 = vsub.f32 %v2341_v63, %v2377_v26  ;;  %v12595_v33 = vsub.f32 %v2340_v2, %v2375_v27  ;;  %v9413_v63 = vor.u32 %v10777_v62, %v9412_v61  ;;  %v9414_v2 = vld [vmem:[%s14830_s28 + $0x6c] sm:$0xf0]  ;;  %v9364_v27 = vld [vmem:[%s14830_s28] sm:$0xf] }
 0x2db   : > { %v12574_v18 = vsub.f32 %v2338_v3, %v2373_v17  ;;  %v9417_v3 = vor.u32 %v10776_v1, %v9414_v2 }
 0x2dc   : > { %v2393_v38 = vmul.f32 %v12593_v32, %v12593_v32  ;;  %v2391_v39 = vmul.f32 %v12595_v33, %v12595_v33  ;;  %2742 = vmatpush.bf16.msra.mxu0 %v9413_v63 }
 0x2dd   : > { %v2389_v19 = vmul.f32 %v12574_v18, %v12574_v18  ;;  %2771 = vmatpush.bf16.msra.mxu1 %v9417_v3  ;;  %11119 = vmatpush.bf16.msra.mxu2 %v9417_v3 }
 0x2df   : > { %2397 = vadd.xlane.f32.xlu0 %v2389_v19  ;;  %v2361_v20 = vpop.xlane.xlu2 %2360  ;;  %v2357_v21 = vpop.xlane.xlu1 %2356  ;;  %v9376_v19 = vld [vmem:[%s14830_s28 + $0x18] sm:$0xf] }
 0x2e0   : > { %v2376_v22 = vmul.f32 %v12571_v14, %v2357_v21  ;;  %v2353_v23 = vpop.xlane.xlu0 %2352  ;;  %v2378_v37 = vmul.f32 %v12571_v14, %v2361_v20  ;;  %v10768_v20 = vld [vmem:[%s14830_s28 + $0x20] sm:$0xf0]  ;;  %v10767_v21 = vld [vmem:[%s14830_s28 + $0x1c] sm:$0xf] }
 0x2e1   : > { %v2374_v24 = vmul.f32 %v12571_v14, %v2353_v23  ;;  %v9377_v23 = vor.u32 %v10768_v20, %v9376_v19 }
 0x2e2   : > { %v12580_v25 = vsub.f32 %v2344_v6, %v2376_v22  ;;  %v12608_v41 = vsub.f32 %v2342_v4, %v2378_v37  ;;  %v9400_v4 = vld [vmem:[%s14830_s28 + $0x48] sm:$0xf]  ;;  %v10774_v6 = vld [vmem:[%s14830_s28 + $0x50] sm:$0xf0]  ;;  %v9366_v37 = vld [vmem:[%s14830_s28 + $0xc] sm:$0xf0] }
 0x2e3   : > { %v12584_v28 = vsub.f32 %v2339_v7, %v2374_v24  ;;  %v10773_v7 = vld [vmem:[%s14830_s28 + $0x4c] sm:$0xf]  ;;  %v9378_v24 = vld [vmem:[%s14830_s28 + $0x24] sm:$0xf0] }
 0x2e4   : > { %v2392_v29 = vmul.f32 %v12580_v25, %v12580_v25  ;;  %v2394_v42 = vmul.f32 %v12608_v41, %v12608_v41  ;;  %v9405_v0 = vor.u32 %v10773_v7, %v9402_v9  ;;  %v9381_v26 = vor.u32 %v10767_v21, %v9378_v24 }
 0x2e5   : > { %v2390_v31 = vmul.f32 %v12584_v28, %v12584_v28 }
 0x2e6   : > { %2403 = vadd.xlane.f32.xlu2 %v2392_v29  ;;  %2772 = vmatpush.bf16.msra.mxu1 %v9405_v0  ;;  %v10765_v29 = vld [vmem:[%s14830_s28 + $0x8] sm:$0xf0] }
 0x2e7   : > { %2364 = vadd.xlane.f32.xlu0 %v12589_v30  ;;  %2399 = vadd.xlane.f32.xlu1 %v2390_v31  ;;  %v2363_v34 = vpop.xlane.xlu2 %2362  ;;  %v10764_v31 = vld [vmem:[%s14830_s28 + $0x4] sm:$0xf] }
 0x2e8   : > { %v2379_v35 = vmul.f32 %v12571_v14, %v2363_v34  ;;  %11120 = vmatpush.bf16.msra.mxu2 %v9405_v0 }
 0x2ea   : > { %v12599_v36 = vsub.f32 %v2343_v8, %v2379_v35  ;;  %v9401_v8 = vor.u32 %v10774_v6, %v9400_v4  ;;  %2773 = vmatpush.bf16.msra.mxu1 %v9393_v16  ;;  %v9365_v35 = vor.u32 %v10765_v29, %v9364_v27 }
 0x2ec   : > { %v2395_v40 = vmul.f32 %v12599_v36, %v12599_v36  ;;  %2743 = vmatpush.bf16.msra.mxu0 %v9401_v8  ;;  %11121 = vmatpush.bf16.msra.mxu2 %v9393_v16  ;;  %v12665_v8 = vld [vmem:[%s14831_s2] ss:$0 sm:$0xff]  ;;  %s14843_s2 = sld [smem:[#allocation87_spill]] }
 0x2ee   : > { %2409 = vadd.xlane.f32.xlu2 %v2395_v40  ;;  %2774 = vmatpush.bf16.msra.mxu1 %v9381_v26 }
 0x2ef   : > { %2405 = vadd.xlane.f32.xlu0 %v2393_v38  ;;  %2401 = vadd.xlane.f32.xlu1 %v2391_v39 }
 0x2f0   : > { %2744 = vmatpush.bf16.msra.mxu0 %v9389_v13  ;;  %11122 = vmatpush.bf16.msra.mxu2 %v9381_v26 }
 0x2f4   : > { %2745 = vmatpush.bf16.msra.mxu0 %v9377_v23 }
 0x2f7   : > { %2407 = vadd.xlane.f32.xlu1 %v2394_v42  ;;  %v9369_v42 = vor.u32 %v10764_v31, %v9366_v37 }
 0x2f8   : > { %2746 = vmatpush.bf16.msra.mxu0 %v9365_v35 }
 0x2f9   : > { %2775 = vmatpush.bf16.msra.mxu1 %v9369_v42  ;;  %11123 = vmatpush.bf16.msra.mxu2 %v9369_v42 }
 0x352   : > { %v2398_v5 = vpop.xlane.xlu0 %2397 }
 0x353   : > { %v2413_v17 = vmul.f32 %v2398_v5, %v12571_v14 }
 0x355   : > { %v2421_v22 = vadd.f32 1e-05, %v2413_v17  ;;  %v12670_v17 = vld [vmem:[%s14832_s16] ss:$0 sm:$0xff]  ;;  %s14844_s16 = sld [smem:[#allocation86_spill]] }
 0x357   : > { %11285 = vrsqrt.f32 %v2421_v22  ;;  %vm2435_vm10 = vweird.f32 %v2421_v22 }
 0x359   : > { %v2404_v34 = vpop.xlane.xlu2 %2403 }
 0x35a   : > { %v2416_v38 = vmul.f32 %v2404_v34, %v12571_v14  ;;  %v2400_v39 = vpop.xlane.xlu1 %2399  ;;  %v2365_v40 = vpop.xlane.xlu0 %2364  ;;  %v10778_v34 = vld [vmem:[%s14830_s28 + $0x70] sm:$0xf0] }
 0x35b   : > { %v2414_v43 = vmul.f32 %v2400_v39, %v12571_v14  ;;  %v2380_v44 = vmul.f32 %v12571_v14, %v2365_v40 }
 0x35c   : > { %v12648_v45 = vadd.f32 1e-05, %v2416_v38 }
 0x35d   : > { %v11286_v46 = vpop.eup %11285  ;;  %v2422_v47 = vadd.f32 1e-05, %v2414_v43  ;;  %v12651_v48 = vsub.f32 %v12589_v30, %v2380_v44 }
 0x35e   : > { %v2430_v49 = vmul.f32 %v11286_v46, %v2421_v22  ;;  %11287 = vrsqrt.f32 %v12648_v45  ;;  %vm2436_vm9 = vweird.f32 %v11286_v46  ;;  %vm2465_vm15 = vweird.f32 %v12648_v45 }
 0x35f   : > { %11289 = vrsqrt.f32 %v2422_v47  ;;  %v2396_v50 = vmul.f32 %v12651_v48, %v12651_v48  ;;  %vm2437_vm11 = vmor %vm2435_vm10, %vm2436_vm9  ;;  %vm2445_vm13 = vweird.f32 %v2422_v47 }
 0x360   : > { %v2431_v51 = vmul.f32 %v11286_v46, %v2430_v49 }
 0x361   : > { %2411 = vadd.xlane.f32.xlu0 %v2396_v50 }
 0x362   : > { %v2432_v52 = vmul.f32 0.5, %v2431_v51  ;;  %v2402_v53 = vpop.xlane.xlu1 %2401  ;;  %v2406_v54 = vpop.xlane.xlu0 %2405 }
 0x363   : > { %v2415_v55 = vmul.f32 %v2402_v53, %v12571_v14  ;;  %v2417_v56 = vmul.f32 %v2406_v54, %v12571_v14 }
 0x364   : > { %v12658_v57 = vpop.eup %11287  ;;  %v2433_v30 = vsub.f32 1.5, %v2432_v52 }
 0x365   : > { %v11290_v58 = vpop.eup %11289  ;;  %v2460_v59 = vmul.f32 %v12658_v57, %v12648_v45  ;;  %v2423_v60 = vadd.f32 1e-05, %v2415_v55  ;;  %v2425_v61 = vadd.f32 1e-05, %v2417_v56  ;;  %vm2466_vm0 = vweird.f32 %v12658_v57 }
 0x366   : > { %v2434_v62 = vmul.f32 %v11286_v46, %v2433_v30  ;;  %v2440_v1 = vmul.f32 %v11290_v58, %v2422_v47  ;;  %vm2446_vm12 = vweird.f32 %v11290_v58  ;;  %vm12678_vm3 = vmor %vm2465_vm15, %vm2466_vm0 }
 0x367   : > { %v2461_v63 = vmul.f32 %v12658_v57, %v2460_v59  ;;  %11291 = vrsqrt.f32 %v2423_v60  ;;  %vm2447_vm14 = vmor %vm2445_vm13, %vm2446_vm12  ;;  %vm2475_vm1 = vweird.f32 %v2425_v61  ;;  %vm2455_vm5 = vweird.f32 %v2423_v60 }
 0x368   : > { %v2438_v2 = vsel %vm2437_vm11, %v11286_v46, %v2434_v62  ;;  %v2441_v3 = vmul.f32 %v11290_v58, %v2440_v1  ;;  %11293 = vrsqrt.f32 %v2425_v61 }
 0x369   : > { %v2509_v4 = vmul.f32 %v2438_v2, %v12574_v18  ;;  %v2462_v9 = vmul.f32 0.5, %v2461_v63 }
 0x36a   : > { %v2442_v6 = vmul.f32 0.5, %v2441_v3  ;;  %v2408_v7 = vpop.xlane.xlu1 %2407 }
 0x36b   : > { %v2418_v0 = vmul.f32 %v2408_v7, %v12571_v14  ;;  %v2520_v16 = vmul.f32 %v12665_v8, %v2509_v4  ;;  %v2463_v18 = vsub.f32 1.5, %v2462_v9 }
 0x36c   : > { %v2443_v10 = vsub.f32 1.5, %v2442_v6 }
 0x36d   : > { %v11292_v11 = vpop.eup %11291  ;;  %v2426_v12 = vadd.f32 1e-05, %v2418_v0  ;;  %v2531_v26 = vadd.f32 %v12670_v17, %v2520_v16  ;;  %v2464_v27 = vmul.f32 %v12658_v57, %v2463_v18  ;;  %v10787_v16 = vld [vmem:[%s14830_s28 + $0xb8] sm:$0xf0] }
 0x36e   : > { %v11294_v13 = vpop.eup %11293  ;;  %v2444_v15 = vmul.f32 %v11290_v58, %v2443_v10  ;;  %v2450_v5 = vmul.f32 %v11292_v11, %v2423_v60  ;;  %vm2456_vm4 = vweird.f32 %v11292_v11 }
 0x36f   : > { %v2470_v19 = vmul.f32 %v11294_v13, %v2425_v61  ;;  %11295 = vrsqrt.f32 %v2426_v12  ;;  %vm2476_vm2 = vweird.f32 %v11294_v13  ;;  %v2539_v40 = vpack.c.bf16 %v2531_v26, %v2531_v26  ;;  %vm2457_vm7 = vmor %vm2455_vm5, %vm2456_vm4  ;;  %v10781_v26 = vld [vmem:[%s14830_s28 + $0x88] sm:$0xf0] }
 0x370   : > { %v2448_v20 = vsel %vm2447_vm14, %v11290_v58, %v2444_v15  ;;  %v2451_v21 = vmul.f32 %v11292_v11, %v2450_v5  ;;  %vm2477_vm6 = vmor %vm2475_vm1, %vm2476_vm2  ;;  %v2468_v42 = vsel %vm12678_vm3, %v12658_v57, %v2464_v27  ;;  %vm2485_vm8 = vweird.f32 %v2426_v12  ;;  %v9456_v5 = vld [vmem:[%s14830_s28 + $0xb0] sm:$0xf] }
 0x371   : > { %v2510_v22 = vmul.f32 %v2448_v20, %v12584_v28  ;;  %v2471_v23 = vmul.f32 %v11294_v13, %v2470_v19  ;;  %v2512_v51 = vmul.f32 %v2468_v42, %v12580_v25  ;;  %v2595_v53 = vunpack.c.l.b16 %v2539_v40  ;;  %v9444_v20 = vld [vmem:[%s14830_s28 + $0x98] sm:$0xf]  ;;  %v9408_v40 = vld [vmem:[%s14830_s28 + $0x50] sm:$0xf]  ;;  %v10775_v42 = vld [vmem:[%s14830_s28 + $0x58] sm:$0xf0] }
 0x372   : > { %v2452_v24 = vmul.f32 0.5, %v2451_v21  ;;  %v9457_v19 = vor.u32 %v10787_v16, %v9456_v5  ;;  %v10784_v21 = vld [vmem:[%s14830_s28 + $0xa0] sm:$0xf0]  ;;  %vm2958_vm1 = vcmask 261120  }
 0x373   : > { %v2472_v29 = vmul.f32 0.5, %v2471_v23  ;;  %v2521_v31 = vmul.f32 %v12665_v8, %v2510_v22  ;;  %v9445_v23 = vor.u32 %v10784_v21, %v9444_v20 }
 0x374   : > { %v2453_v35 = vsub.f32 1.5, %v2452_v24  ;;  %2797 = vmatpush.bf16.msrb.mxu2 %v9457_v19  ;;  %v9432_v24 = vld [vmem:[%s14830_s28 + $0x80] sm:$0xf] }
 0x375   : > { %v2473_v37 = vsub.f32 1.5, %v2472_v29  ;;  %v2532_v28 = vadd.f32 %v12670_v17, %v2521_v31  ;;  %v11296_v38 = vpop.eup %11295  ;;  %v9433_v27 = vor.u32 %v10781_v26, %v9432_v24  ;;  %v9420_v31 = vld [vmem:[%s14830_s28 + $0x68] sm:$0xf] }
 0x376   : > { %v2454_v39 = vmul.f32 %v11292_v11, %v2453_v35  ;;  %v2480_v44 = vmul.f32 %v11296_v38, %v2426_v12  ;;  %vm2486_vm9 = vweird.f32 %v11296_v38  ;;  %v2410_v12 = vpop.xlane.xlu2 %2409  ;;  %v9421_v35 = vor.u32 %v10778_v34, %v9420_v31 }
 0x377   : > { %v2474_v43 = vmul.f32 %v11294_v13, %v2473_v37  ;;  %v2540_v46 = vpack.c.bf16 %v2532_v28, %v2532_v28  ;;  %vm2487_vm10 = vmor %vm2485_vm8, %vm2486_vm9 }
 0x378   : > { %v2458_v45 = vsel %vm2457_vm7, %v11292_v11, %v2454_v39  ;;  %v2481_v50 = vmul.f32 %v11296_v38, %v2480_v44  ;;  %2798 = vmatpush.bf16.msrb.mxu2 %v9445_v23  ;;  %v9409_v44 = vor.u32 %v10775_v42, %v9408_v40 }
 0x379   : > { %v2511_v47 = vmul.f32 %v2458_v45, %v12595_v33  ;;  %v2478_v49 = vsel %vm2477_vm6, %v11294_v13, %v2474_v43  ;;  %v2596_v54 = vunpack.c.l.b16 %v2540_v46  ;;  %v2523_v33 = vmul.f32 %v12665_v8, %v2512_v51  ;;  %v9396_v46 = vld [vmem:[%s14830_s28 + $0x38] sm:$0xf] }
 0x37a   : > { %v2513_v52 = vmul.f32 %v2478_v49, %v12593_v32  ;;  %v2482_v55 = vmul.f32 0.5, %v2481_v50  ;;  %v2419_v13 = vmul.f32 %v2410_v12, %v12571_v14  ;;  %v12736_v12 = vld [vmem:[%s14835_s9] sm:$0x7]  ;;  %s14845_s9 = sld [smem:[#allocation88_spill]] }
 0x37b   : > { %v12689_v56 = vpack.c.b16 %v2596_v54, %v2595_v53  ;;  %v2522_v57 = vmul.f32 %v12665_v8, %v2511_v47  ;;  %v2534_v61 = vadd.f32 %v12670_v17, %v2523_v33  ;;  %v10772_v47 = vld [vmem:[%s14830_s28 + $0x40] sm:$0xf0]  ;;  %v9384_v53 = vld [vmem:[%s14830_s28 + $0x20] sm:$0xf]  ;;  %v10769_v54 = vld [vmem:[%s14830_s28 + $0x28] sm:$0xf0] }
 0x37c   : > { %v2483_v30 = vsub.f32 1.5, %v2482_v55  ;;  %v2524_v25 = vmul.f32 %v12665_v8, %v2513_v52  ;;  %v2427_v15 = vadd.f32 1e-05, %v2419_v13  ;;  %2799 = vmatpush.bf16.msrb.mxu2 %v9433_v27  ;;  %v9397_v49 = vor.u32 %v10772_v47, %v9396_v46 }
 0x37d   : > { %2747 = vmatmul.bf16.vlgmr.msra.gmra.mxu0 %v12689_v56  ;;  %2776 = vmatmul.bf16.vlgmr.msra.gmra.mxu1 %v12689_v56  ;;  %v2533_v58 = vadd.f32 %v12670_v17, %v2522_v57  ;;  %v2542_v2 = vpack.c.bf16 %v2534_v61, %v2534_v61  ;;  %v9385_v55 = vor.u32 %v10769_v54, %v9384_v53  ;;  %v12741_v26 = vperm.slane %v12736_v12, 0 }
 0x37e   : > { %v2484_v32 = vmul.f32 %v11296_v38, %v2483_v30  ;;  %v2535_v62 = vadd.f32 %v12670_v17, %v2524_v25  ;;  %11297 = vrsqrt.f32 %v2427_v15  ;;  %vm2495_vm11 = vweird.f32 %v2427_v15  ;;  %v9372_v25 = vld [vmem:[%s14830_s28 + $0x8] sm:$0xf] }
 0x37f   : > { %v2541_v1 = vpack.c.bf16 %v2533_v58, %v2533_v58  ;;  %v2598_v9 = vunpack.c.l.b16 %v2542_v2 }
 0x380   : > { %v2488_v59 = vsel %vm2487_vm10, %v11296_v38, %v2484_v32  ;;  %v2543_v4 = vpack.c.bf16 %v2535_v62, %v2535_v62  ;;  %2800 = vmatpush.bf16.msrb.mxu2 %v9421_v35  ;;  %v10766_v32 = vld [vmem:[%s14830_s28 + $0x10] sm:$0xf0]  ;;  %s14842_s28 = sld [smem:[#allocation83_spill]] }
 0x381   : > { %v2514_v60 = vmul.f32 %v2488_v59, %v12608_v41  ;;  %v2597_v6 = vunpack.c.l.b16 %v2541_v1  ;;  %v9373_v58 = vor.u32 %v10766_v32, %v9372_v25 }
 0x382   : > { %v2599_v0 = vunpack.c.l.b16 %v2543_v4 }
 0x383   : > { %v2525_v63 = vmul.f32 %v12665_v8, %v2514_v60  ;;  %v12702_v41 = vpack.c.b16 %v2598_v9, %v2597_v6 }
 0x384   : > { %v11298_v18 = vpop.eup %11297  ;;  %2801 = vmatpush.bf16.msrb.mxu2 %v9409_v44 }
 0x385   : > { %v2536_v3 = vadd.f32 %v12670_v17, %v2525_v63  ;;  %v2490_v22 = vmul.f32 %v11298_v18, %v2427_v15  ;;  %vm2496_vm12 = vweird.f32 %v11298_v18  ;;  %v2582_v15 = vperm.slane %v12736_v12, 1 }
 0x386   : > { %vm2497_vm13 = vmor %vm2495_vm11, %vm2496_vm12 }
 0x387   : > { %v2544_v7 = vpack.c.bf16 %v2536_v3, %v2536_v3  ;;  %v2491_v29 = vmul.f32 %v11298_v18, %v2490_v22 }
 0x388   : > { %2802 = vmatpush.bf16.msrb.mxu2 %v9397_v49 }
 0x389   : > { %v2600_v10 = vunpack.c.l.b16 %v2544_v7  ;;  %v2492_v37 = vmul.f32 0.5, %v2491_v29 }
 0x38b   : > { %v12704_v11 = vpack.c.b16 %v2600_v10, %v2599_v0  ;;  %v2493_v43 = vsub.f32 1.5, %v2492_v37 }
 0x38c   : > { %2803 = vmatpush.bf16.msrb.mxu2 %v9385_v55 }
 0x38d   : > { %2752 = vmatmul.bf16.gmra.mxu0 %v12702_v41  ;;  %2781 = vmatmul.bf16.gmra.mxu1 %v12702_v41  ;;  %v2494_v45 = vmul.f32 %v11298_v18, %v2493_v43 }
 0x38e   : > { %2786 = vmatmul.bf16.vlgmr.msra.gmra.mxu2 %v12704_v11 }
 0x38f   : > { %v2498_v51 = vsel %vm2497_vm13, %v11298_v18, %v2494_v45 }
 0x390   : > { %v2515_v30 = vmul.f32 %v2498_v51, %v12599_v36  ;;  %2804 = vmatpush.bf16.msrb.mxu2 %v9373_v58 }
 0x392   : > { %v2526_v60 = vmul.f32 %v12665_v8, %v2515_v30 }
 0x394   : > { %v2537_v63 = vadd.f32 %v12670_v17, %v2526_v60 }
 0x396   : > { %v2545_v3 = vpack.c.bf16 %v2537_v63, %v2537_v63 }
 0x398   : > { %v2601_v6 = vunpack.c.l.b16 %v2545_v3 }
 0x39d   : > { %2757 = vmatmul.bf16.gmra.mxu0 %v12704_v11 }
 0x3d4   : > { %v2412_v28 = vpop.xlane.xlu0 %2411 }
 0x3d5   : > { %v2420_v38 = vmul.f32 %v2412_v28, %v12571_v14 }
 0x3d7   : > { %v2428_v39 = vadd.f32 1e-05, %v2420_v38 }
 0x3d9   : > { %11299 = vrsqrt.f32 %v2428_v39  ;;  %vm2505_vm15 = vweird.f32 %v2428_v39 }
 0x3df   : > { %v11300_v50 = vpop.eup %11299 }
 0x3e0   : > { %v2500_v52 = vmul.f32 %v11300_v50, %v2428_v39  ;;  %vm2506_vm14 = vweird.f32 %v11300_v50 }
 0x3e1   : > { %vm2507_vm0 = vmor %vm2505_vm15, %vm2506_vm14 }
 0x3e2   : > { %v2501_v57 = vmul.f32 %v11300_v50, %v2500_v52 }
 0x3e4   : > { %v2502_v33 = vmul.f32 0.5, %v2501_v57 }
 0x3e6   : > { %v2503_v59 = vsub.f32 1.5, %v2502_v33 }
 0x3e8   : > { %v2504_v61 = vmul.f32 %v11300_v50, %v2503_v59 }
 0x3ea   : > { %v2508_v62 = vsel %vm2507_vm0, %v11300_v50, %v2504_v61 }
 0x3eb   : > { %v2516_v1 = vmul.f32 %v2508_v62, %v12651_v48 }
 0x3ed   : > { %v2527_v36 = vmul.f32 %v12665_v8, %v2516_v1 }
 0x3ef   : > { %v2538_v2 = vadd.f32 %v12670_v17, %v2527_v36 }
 0x3f1   : > { %v2546_v4 = vpack.c.bf16 %v2538_v2, %v2538_v2 }
 0x3f3   : > { %v2602_v7 = vunpack.c.l.b16 %v2546_v4 }
 0x3f5   : > { %v2606_v9 = vpack.c.b16 %v2602_v7, %v2601_v6 }
 0x3f7   : > { %2762 = vmatmul.bf16.gmra.mxu0 %v2606_v9  ;;  %2791 = vmatmul.bf16.gmra.mxu2 %v2606_v9 }
 0x3fa   : > { %v2777_v0 = vpop.f32.mrf.mxu1  ;;  %v2748_v13 = vpop.f32.mrf.mxu0 }
 0x3fb   : > { %v2778_v21 = vadd.f32 %v2777_v0, %v2582_v15  ;;  %v2749_v34 = vadd.f32 %v2748_v13, %v12741_v26 }
 0x3fd   : > { %v2834_v27 = vpack.c.bf16 %v2778_v21, %v2778_v21 }
 0x3ff   : > { %v2866_v35 = vunpack.c.l.b16 %v2834_v27 }
 0x402   : > { %v2779_v10 = vpop.f32.mrf.mxu1  ;;  %v2750_v18 = vpop.f32.mrf.mxu0 }
 0x403   : > { %v2780_v19 = vadd.f32 %v2779_v10, %v2582_v15  ;;  %v2751_v29 = vadd.f32 %v2750_v18, %v12741_v26  ;;  %v2583_v18 = vperm.slane %v12736_v12, 2 }
 0x405   : > { %v2835_v24 = vpack.c.bf16 %v2780_v19, %v2780_v19  ;;  %v2827_v28 = vpack.c.bf16 %v2751_v29, %v2751_v29 }
 0x407   : > { %2805 = vmatmul.bf16.vlgmr.msrb.gmra.mxu2 %v12689_v56  ;;  %v2867_v31 = vunpack.c.l.b16 %v2835_v24  ;;  %v2855_v39 = vunpack.c.l.b16 %v2827_v28 }
 0x409   : > { %v2870_v38 = vpack.c.b16 %v2867_v31, %v2866_v35 }
 0x40a   : > { %v2782_v48 = vpop.f32.mrf.mxu1  ;;  %v2753_v37 = vpop.f32.mrf.mxu0 }
 0x40b   : > { %v2783_v8 = vadd.f32 %v2782_v48, %v2582_v15  ;;  %v2754_v45 = vadd.f32 %v2753_v37, %v12741_v26 }
 0x40d   : > { %v2836_v17 = vpack.c.bf16 %v2783_v8, %v2783_v8  ;;  %v2828_v47 = vpack.c.bf16 %v2754_v45, %v2754_v45 }
 0x40f   : > { %v2868_v22 = vunpack.c.l.b16 %v2836_v17  ;;  %v2856_v50 = vunpack.c.l.b16 %v2828_v47 }
 0x411   : > { %v2787_v52 = vpop.f32.mrf.mxu2 }
 0x412   : > { %v2784_v5 = vpop.f32.mrf.mxu1  ;;  %v2755_v43 = vpop.f32.mrf.mxu0  ;;  %v2788_v58 = vadd.f32 %v2787_v52, %v2582_v15 }
 0x413   : > { %v2785_v16 = vadd.f32 %v2784_v5, %v2582_v15  ;;  %v2756_v44 = vadd.f32 %v2755_v43, %v12741_v26 }
 0x414   : > { %v2838_v36 = vpack.c.bf16 %v2788_v58, %v2788_v58 }
 0x415   : > { %v2837_v20 = vpack.c.bf16 %v2785_v16, %v2785_v16  ;;  %v2829_v46 = vpack.c.bf16 %v2756_v44, %v2756_v44  ;;  %v11277_v44 = vld [vmem:[%s14836_s7] ss:$0 sm:$0xff] }
 0x416   : > { %v2909_v6 = vunpack.c.l.b16 %v2838_v36 }
 0x417   : > { %2810 = vmatmul.bf16.gmra.mxu2 %v12702_v41  ;;  %v2869_v23 = vunpack.c.l.b16 %v2837_v20  ;;  %v2826_v41 = vpack.c.bf16 %v2749_v34, %v2749_v34  ;;  %v2857_v49 = vunpack.c.l.b16 %v2829_v46 }
 0x419   : > { %v2871_v56 = vpack.c.b16 %v2869_v23, %v2868_v22  ;;  %v2854_v40 = vunpack.c.l.b16 %v2826_v41  ;;  %v2859_v51 = vpack.c.b16 %v2857_v49, %v2856_v50  ;;  %v2789_v53 = vpop.f32.mrf.mxu2 }
 0x41a   : > { %v2758_v55 = vpop.f32.mrf.mxu0  ;;  %v2790_v25 = vadd.f32 %v2789_v53, %v2582_v15 }
 0x41b   : > { %2880 = vmatpush.bf16.xpose.msra.mxu3 %v2871_v56  ;;  %v2858_v42 = vpack.c.b16 %v2855_v39, %v2854_v40  ;;  %v2759_v4 = vadd.f32 %v2758_v55, %v12741_v26 }
 0x41c   : > { %v2839_v62 = vpack.c.bf16 %v2790_v25, %v2790_v25 }
 0x41d   : > { %v2830_v10 = vpack.c.bf16 %v2759_v4, %v2759_v4 }
 0x41e   : > { %v2910_v3 = vunpack.c.l.b16 %v2839_v62 }
 0x420   : > { %v2913_v0 = vpack.c.b16 %v2910_v3, %v2909_v6 }
 0x422   : > { %v2760_v59 = vpop.f32.mrf.mxu0 }
 0x423   : > { %2881 = vmatpush.bf16.xpose.msra.mxu3 %v2870_v38  ;;  %v2761_v2 = vadd.f32 %v2760_v59, %v12741_v26 }
 0x427   : > { %2815 = vmatmul.bf16.gmra.mxu2 %v12704_v11 }
 0x42a   : > { %2882 = vmatmul.bf16.vlgmr.msra.gmra.mxu3 %v2858_v42 }
 0x437   : > { %2820 = vmatmul.bf16.gmra.mxu2 %v2606_v9  ;;  %v2831_v9 = vpack.c.bf16 %v2761_v2, %v2761_v2 }
 0x439   : > { %v2898_v13 = vunpack.c.l.b16 %v2831_v9 }
 0x43a   : > { %2887 = vmatmul.bf16.gmra.mxu3 %v2859_v51 }
 0x474   : > { %v2763_v7 = vpop.f32.mrf.mxu0 }
 0x475   : > { %v2764_v19 = vadd.f32 %v2763_v7, %v12741_v26 }
 0x477   : > { %v2832_v23 = vpack.c.bf16 %v2764_v19, %v2764_v19 }
 0x479   : > { %v2899_v37 = vunpack.c.l.b16 %v2832_v23 }
 0x47a   : > { %v2792_v54 = vpop.f32.mrf.mxu2 }
 0x47b   : > { %v2793_v57 = vadd.f32 %v2792_v54, %v2582_v15 }
 0x47c   : > { %v2765_v5 = vpop.f32.mrf.mxu0 }
 0x47d   : > { %v2840_v30 = vpack.c.bf16 %v2793_v57, %v2793_v57  ;;  %v2766_v16 = vadd.f32 %v2765_v5, %v12741_v26 }
 0x47f   : > { %v2911_v60 = vunpack.c.l.b16 %v2840_v30  ;;  %v2833_v21 = vpack.c.bf16 %v2766_v16, %v2766_v16 }
 0x481   : > { %v2900_v31 = vunpack.c.l.b16 %v2833_v21 }
 0x482   : > { %v2794_v11 = vpop.f32.mrf.mxu2 }
 0x483   : > { %v2795_v33 = vadd.f32 %v2794_v11, %v2582_v15  ;;  %v2897_v15 = vunpack.c.l.b16 %v2830_v10  ;;  %v2902_v39 = vpack.c.b16 %v2900_v31, %v2899_v37 }
 0x485   : > { %v2841_v32 = vpack.c.bf16 %v2795_v33, %v2795_v33  ;;  %v2901_v8 = vpack.c.b16 %v2898_v13, %v2897_v15  ;;  %v11278_v13 = vld [vmem:[%s14837_s4 + $0x1] ss:$0 sm:$0xff] }
 0x487   : > { %v2912_v61 = vunpack.c.l.b16 %v2841_v32 }
 0x489   : > { %v2914_v1 = vpack.c.b16 %v2912_v61, %v2911_v60 }
 0x48a   : > { %v2806_v63 = vpop.f32.mrf.mxu2 }
 0x48b   : > { %2923 = vmatpush.bf16.xpose.msrb.mxu3 %v2914_v1  ;;  %v2807_v56 = vadd.f32 %v2806_v63, %v2583_v18 }
 0x48d   : > { %v2842_v28 = vpack.c.bf16 %v2807_v56, %v2807_v56 }
 0x48f   : > { %v3069_v42 = vunpack.c.l.b16 %v2842_v28 }
 0x492   : > { %v2808_v48 = vpop.f32.mrf.mxu2 }
 0x493   : > { %2924 = vmatpush.bf16.xpose.msrb.mxu3 %v2913_v0  ;;  %v2809_v22 = vadd.f32 %v2808_v48, %v2583_v18 }
 0x495   : > { %v2843_v34 = vpack.c.bf16 %v2809_v22, %v2809_v22 }
 0x497   : > { %v3070_v12 = vunpack.c.l.b16 %v2843_v34 }
 0x499   : > { %v3073_v43 = vpack.c.b16 %v3070_v12, %v3069_v42 }
 0x49a   : > { %v2811_v17 = vpop.f32.mrf.mxu2  ;;  %2925 = vmatmul.bf16.vlgmr.msrb.gmra.mxu3 %v2901_v8 }
 0x49b   : > { %v2812_v20 = vadd.f32 %v2811_v17, %v2583_v18 }
 0x49d   : > { %v2844_v27 = vpack.c.bf16 %v2812_v20, %v2812_v20 }
 0x49f   : > { %v3071_v38 = vunpack.c.l.b16 %v2844_v27 }
 0x4a2   : > { %v2813_v24 = vpop.f32.mrf.mxu2 }
 0x4a3   : > { %v2814_v29 = vadd.f32 %v2813_v24, %v2583_v18 }
 0x4a5   : > { %v2845_v35 = vpack.c.bf16 %v2814_v29, %v2814_v29 }
 0x4a7   : > { %v3072_v41 = vunpack.c.l.b16 %v2845_v35 }
 0x4a9   : > { %v3074_v40 = vpack.c.b16 %v3072_v41, %v3071_v38 }
 0x4aa   : > { %v2816_v26 = vpop.f32.mrf.mxu2  ;;  %2930 = vmatmul.bf16.gmra.mxu3 %v2902_v39 }
 0x4ab   : > { %3089 = vmatpush.bf16.msra.mxu3 %v3074_v40  ;;  %v2817_v58 = vadd.f32 %v2816_v26, %v2583_v18 }
 0x4ad   : > { %v2883_v45 = vpop.f32.mrf.mxu3  ;;  %v2846_v36 = vpack.c.bf16 %v2817_v58, %v2817_v58 }
 0x4ae   : > { %v2936_v46 = vmul.f32 0.088388346, %v2883_v45 }
 0x4af   : > { %3090 = vmatpush.bf16.msra.mxu3 %v3073_v43  ;;  %v3116_v0 = vunpack.c.l.b16 %v2846_v36 }
 0x4b0   : > { %v2950_v47 = vadd.f32 %v11277_v44, %v2936_v46 }
 0x4b2   : > { %v2818_v49 = vpop.f32.mrf.mxu2  ;;  %v2959_v50 = vsel %vm2958_vm1, %v2950_v47, -inf }
 0x4b3   : > { %2960 = vmax.xlane.f32.xlu1 %v2959_v50  ;;  %v2819_v33 = vadd.f32 %v2818_v49, %v2583_v18 }
 0x4b5   : > { %v2885_v51 = vpop.f32.mrf.mxu3  ;;  %v2847_v62 = vpack.c.bf16 %v2819_v33, %v2819_v33 }
 0x4b6   : > { %v2937_v52 = vmul.f32 0.088388346, %v2885_v51 }
 0x4b7   : > { %v3117_v6 = vunpack.c.l.b16 %v2847_v62 }
 0x4b8   : > { %v2951_v53 = vadd.f32 %v11277_v44, %v2937_v52 }
 0x4b9   : > { %v3120_v48 = vpack.c.b16 %v3117_v6, %v3116_v0 }
 0x4ba   : > { %v2821_v54 = vpop.f32.mrf.mxu2  ;;  %v2962_v55 = vsel %vm2958_vm1, %v2951_v53, -inf }
 0x4bb   : > { %2963 = vmax.xlane.f32.xlu2 %v2962_v55  ;;  %v2822_v11 = vadd.f32 %v2821_v54, %v2583_v18 }
 0x4bd   : > { %v2888_v57 = vpop.f32.mrf.mxu3  ;;  %v2848_v59 = vpack.c.bf16 %v2822_v11, %v2822_v11 }
 0x4be   : > { %v2938_v30 = vmul.f32 0.088388346, %v2888_v57 }
 0x4bf   : > { %v3118_v2 = vunpack.c.l.b16 %v2848_v59 }
 0x4c0   : > { %v2952_v25 = vadd.f32 %v11277_v44, %v2938_v30 }
 0x4c2   : > { %v2823_v32 = vpop.f32.mrf.mxu2  ;;  %v2965_v61 = vsel %vm2958_vm1, %v2952_v25, -inf }
 0x4c3   : > { %v2824_v60 = vadd.f32 %v2823_v32, %v2583_v18  ;;  %2966 = vmax.xlane.f32.xlu0 %v2965_v61 }
 0x4c5   : > { %v2849_v1 = vpack.c.bf16 %v2824_v60, %v2824_v60  ;;  %v2890_v63 = vpop.f32.mrf.mxu3 }
 0x4c6   : > { %v2939_v4 = vmul.f32 0.088388346, %v2890_v63 }
 0x4c7   : > { %v3119_v3 = vunpack.c.l.b16 %v2849_v1 }
 0x4c8   : > { %v2953_v7 = vadd.f32 %v11277_v44, %v2939_v4 }
 0x4c9   : > { %v3121_v9 = vpack.c.b16 %v3119_v3, %v3118_v2 }
 0x4ca   : > { %v2968_v10 = vsel %vm2958_vm1, %v2953_v7, -inf }
 0x4cb   : > { %3136 = vmatpush.bf16.msrb.mxu0 %v3121_v9  ;;  %2969 = vmax.xlane.f32.xlu1 %v2968_v10 }
 0x4cf   : > { %3137 = vmatpush.bf16.msrb.mxu0 %v3120_v48 }
 0x51d   : > { %v2926_v15 = vpop.f32.mrf.mxu3 }
 0x51e   : > { %v2940_v8 = vmul.f32 0.088388346, %v2926_v15 }
 0x520   : > { %v2954_v5 = vadd.f32 %v11278_v13, %v2940_v8 }
 0x522   : > { %v2971_v17 = vsel %vm2958_vm1, %v2954_v5, -inf }
 0x523   : > { %2972 = vmax.xlane.f32.xlu2 %v2971_v17 }
 0x525   : > { %v2928_v16 = vpop.f32.mrf.mxu3 }
 0x526   : > { %v2941_v18 = vmul.f32 0.088388346, %v2928_v16  ;;  %v2961_v19 = vpop.xlane.xlu1 %2960 }
 0x527   : > { %v2983_v20 = vsub.f32 %v2950_v47, %v2961_v19 }
 0x528   : > { %v2955_v21 = vadd.f32 %v11278_v13, %v2941_v18 }
 0x529   : > { %v2991_v22 = vmul.f32 1.442695, %v2983_v20 }
 0x52a   : > { %v2974_v23 = vsel %vm2958_vm1, %v2955_v21, -inf }
 0x52b   : > { %2975 = vmax.xlane.f32.xlu0 %v2974_v23  ;;  %11301 = vpow2.f32 %v2991_v22 }
 0x52d   : > { %v2931_v24 = vpop.f32.mrf.mxu3 }
 0x52e   : > { %v2942_v56 = vmul.f32 0.088388346, %v2931_v24  ;;  %v2964_v27 = vpop.xlane.xlu2 %2963 }
 0x52f   : > { %v2984_v29 = vsub.f32 %v2951_v53, %v2964_v27 }
 0x530   : > { %v2956_v31 = vadd.f32 %v11278_v13, %v2942_v56 }
 0x531   : > { %v11302_v34 = vpop.eup %11301  ;;  %v2993_v35 = vmul.f32 1.442695, %v2984_v29 }
 0x532   : > { %v2977_v37 = vsel %vm2958_vm1, %v2956_v31, -inf  ;;  %v3007_v28 = vsel %vm2958_vm1, %v11302_v34, 0.0 }
 0x533   : > { %2978 = vmax.xlane.f32.xlu0 %v2977_v37  ;;  %11303 = vpow2.f32 %v2993_v35  ;;  %3008 = vadd.xlane.f32.xlu1 %v3007_v28  ;;  %v10793_v35 = vld [vmem:[%s14838_s25 + $0x28] sm:$0xff]  ;;  %v10792_v28 = vld [vmem:[%s14838_s25 + $0x20] sm:$0xff] }
 0x535   : > { %v2933_v38 = vpop.f32.mrf.mxu3 }
 0x536   : > { %v2943_v41 = vmul.f32 0.088388346, %v2933_v38  ;;  %v2967_v39 = vpop.xlane.xlu0 %2966  ;;  %v10791_v38 = vld [vmem:[%s14838_s25 + $0x18] sm:$0xff] }
 0x537   : > { %v2985_v12 = vsub.f32 %v2952_v25, %v2967_v39 }
 0x538   : > { %v2957_v40 = vadd.f32 %v11278_v13, %v2943_v41 }
 0x539   : > { %v11304_v26 = vpop.eup %11303  ;;  %v2995_v42 = vmul.f32 1.442695, %v2985_v12 }
 0x53a   : > { %v2980_v43 = vsel %vm2958_vm1, %v2957_v40, -inf  ;;  %v3010_v44 = vsel %vm2958_vm1, %v11304_v26, 0.0 }
 0x53b   : > { %11305 = vpow2.f32 %v2995_v42  ;;  %3011 = vadd.xlane.f32.xlu2 %v3010_v44  ;;  %2981 = vmax.xlane.f32.xlu1 %v2980_v43 }
 0x53e   : > { %v2970_v45 = vpop.xlane.xlu1 %2969 }
 0x53f   : > { %v2986_v46 = vsub.f32 %v2953_v7, %v2970_v45 }
 0x541   : > { %v11306_v47 = vpop.eup %11305  ;;  %v2997_v49 = vmul.f32 1.442695, %v2986_v46 }
 0x542   : > { %v3013_v50 = vsel %vm2958_vm1, %v11306_v47, 0.0 }
 0x543   : > { %11307 = vpow2.f32 %v2997_v49  ;;  %3014 = vadd.xlane.f32.xlu2 %v3013_v50  ;;  %v10788_v50 = vld [vmem:[%s14838_s25] sm:$0xff] }
 0x549   : > { %v11308_v51 = vpop.eup %11307 }
 0x54a   : > { %v3016_v52 = vsel %vm2958_vm1, %v11308_v51, 0.0 }
 0x54b   : > { %3017 = vadd.xlane.f32.xlu0 %v3016_v52 }
 0x596   : > { %v2973_v53 = vpop.xlane.xlu2 %2972 }
 0x597   : > { %v2987_v54 = vsub.f32 %v2954_v5, %v2973_v53 }
 0x599   : > { %v2999_v55 = vmul.f32 1.442695, %v2987_v54 }
 0x59b   : > { %11309 = vpow2.f32 %v2999_v55 }
 0x59e   : > { %v2976_v57 = vpop.xlane.xlu0 %2975 }
 0x59f   : > { %v2988_v11 = vsub.f32 %v2955_v21, %v2976_v57 }
 0x5a1   : > { %v12767_v30 = vpop.eup %11309  ;;  %v3001_v33 = vmul.f32 1.442695, %v2988_v11 }
 0x5a2   : > { %v3019_v25 = vsel %vm2958_vm1, %v12767_v30, 0.0 }
 0x5a3   : > { %11311 = vpow2.f32 %v3001_v33  ;;  %3020 = vadd.xlane.f32.xlu1 %v3019_v25 }
 0x5a6   : > { %v2979_v32 = vpop.xlane.xlu0 %2978  ;;  %v3009_v58 = vpop.xlane.xlu1 %3008 }
 0x5a7   : > { %v2989_v59 = vsub.f32 %v2956_v31, %v2979_v32  ;;  %11313 = vrcp.f32 %v3009_v58  ;;  %v10795_v31 = vld [vmem:[%s14838_s25 + $0x38] sm:$0xff] }
 0x5a8   : > { %3221 = vmatpush.bf16.msrb.mxu1 %v10795_v31 }
 0x5a9   : > { %v12771_v60 = vpop.eup %11311  ;;  %v3003_v61 = vmul.f32 1.442695, %v2989_v59 }
 0x5aa   : > { %v3022_v62 = vsel %vm2958_vm1, %v12771_v60, 0.0 }
 0x5ab   : > { %11315 = vpow2.f32 %v3003_v61  ;;  %3023 = vadd.xlane.f32.xlu2 %v3022_v62 }
 0x5ad   : > { %v11314_v36 = vpop.eup %11313 }
 0x5ae   : > { %v3012_v1 = vpop.xlane.xlu2 %3011  ;;  %v2982_v63 = vpop.xlane.xlu1 %2981  ;;  %v3039_v7 = vmul.f32 %v11314_v36, %v11302_v34  ;;  %v10794_v34 = vld [vmem:[%s14838_s25 + $0x30] sm:$0xff] }
 0x5af   : > { %11317 = vrcp.f32 %v3012_v1  ;;  %v2990_v2 = vsub.f32 %v2957_v40, %v2982_v63  ;;  %3222 = vmatpush.bf16.msrb.mxu1 %v10794_v34  ;;  %v10790_v40 = vld [vmem:[%s14838_s25 + $0x10] sm:$0xff] }
 0x5b0   : > { %v3047_v0 = vpack.c.bf16 %v3039_v7, %v3039_v7  ;;  %v11279_v7 = vld [vmem:[%s14839_s15] ss:$0 sm:$0xff] }
 0x5b1   : > { %v12775_v3 = vpop.eup %11315  ;;  %v3005_v4 = vmul.f32 1.442695, %v2990_v2 }
 0x5b2   : > { %v3025_v6 = vsel %vm2958_vm1, %v12775_v3, 0.0  ;;  %v3059_v8 = vunpack.c.l.b16 %v3047_v0 }
 0x5b3   : > { %3026 = vadd.xlane.f32.xlu0 %v3025_v6  ;;  %11319 = vpow2.f32 %v3005_v4  ;;  %3223 = vmatpush.bf16.msrb.mxu1 %v10793_v35  ;;  %v11418_v35 = vld [vmem:[%s14828_s17 + $0x20] sm:$0xff] }
 0x5b5   : > { %v11318_v9 = vpop.eup %11317 }
 0x5b6   : > { %v3040_v10 = vmul.f32 %v11318_v9, %v11304_v26  ;;  %v3015_v48 = vpop.xlane.xlu2 %3014  ;;  %v10789_v26 = vld [vmem:[%s14838_s25 + $0x8] sm:$0xff] }
 0x5b7   : > { %11321 = vrcp.f32 %v3015_v48  ;;  %3224 = vmatpush.bf16.msrb.mxu1 %v10792_v28 }
 0x5b8   : > { %v3048_v13 = vpack.c.bf16 %v3040_v10, %v3040_v10  ;;  %v11413_v10 = vld [vmem:[%s14828_s17] sm:$0xff] }
 0x5b9   : > { %v11320_v15 = vpop.eup %11319 }
 0x5ba   : > { %v3060_v5 = vunpack.c.l.b16 %v3048_v13  ;;  %v3028_v17 = vsel %vm2958_vm1, %v11320_v15, 0.0 }
 0x5bb   : > { %3029 = vadd.xlane.f32.xlu1 %v3028_v17  ;;  %3225 = vmatpush.bf16.msrb.mxu1 %v10791_v38 }
 0x5bc   : > { %v3063_v16 = vpack.c.b16 %v3060_v5, %v3059_v8  ;;  %v11414_v8 = vld [vmem:[%s14828_s17 + $0x8] sm:$0xff] }
 0x5bd   : > { %v11322_v19 = vpop.eup %11321 }
 0x5be   : > { %9458 = vmatmul.msk.bf16.vlgmr.msra.gmra.mxu3 %vm2958_vm1, %v3063_v16  ;;  %v3018_v18 = vpop.xlane.xlu0 %3017  ;;  %v3041_v20 = vmul.f32 %v11322_v19, %v11306_v47 }
 0x5bf   : > { %11323 = vrcp.f32 %v3018_v18  ;;  %3226 = vmatpush.bf16.msrb.mxu1 %v10790_v40  ;;  %v11415_v18 = vld [vmem:[%s14828_s17 + $0x10] sm:$0xff]  ;;  %v11419_v40 = vld [vmem:[%s14828_s17 + $0x28] sm:$0xff] }
 0x5c0   : > { %v3049_v23 = vpack.c.bf16 %v3041_v20, %v3041_v20 }
 0x5c2   : > { %v3061_v56 = vunpack.c.l.b16 %v3049_v23 }
 0x5c3   : > { %3227 = vmatpush.bf16.msrb.mxu1 %v10789_v26 }
 0x5c5   : > { %v11324_v21 = vpop.eup %11323 }
 0x5c6   : > { %v3042_v22 = vmul.f32 %v11324_v21, %v11308_v51 }
 0x5c7   : > { %3228 = vmatpush.bf16.msrb.mxu1 %v10788_v50 }
 0x5c8   : > { %v3050_v24 = vpack.c.bf16 %v3042_v22, %v3042_v22  ;;  %v11416_v22 = vld [vmem:[%s14829_s13] sm:$0xff] }
 0x5ca   : > { %v3062_v27 = vunpack.c.l.b16 %v3050_v24 }
 0x5cc   : > { %v3064_v29 = vpack.c.b16 %v3062_v27, %v3061_v56  ;;  %v11417_v27 = vld [vmem:[%s14828_s17 + $0x18] sm:$0xff] }
 0x5ce   : > { %9459 = vmatmul.msk.bf16.gmra.mxu3 %vm2958_vm1, %v3064_v29 }
 0x616   : > { %v3021_v37 = vpop.xlane.xlu1 %3020 }
 0x617   : > { %11325 = vrcp.f32 %v3021_v37 }
 0x61d   : > { %v11326_v39 = vpop.eup %11325 }
 0x61e   : > { %v3024_v41 = vpop.xlane.xlu2 %3023  ;;  %v3043_v12 = vmul.f32 %v11326_v39, %v12767_v30 }
 0x61f   : > { %11327 = vrcp.f32 %v3024_v41 }
 0x620   : > { %v3051_v43 = vpack.c.bf16 %v3043_v12, %v3043_v12 }
 0x622   : > { %v3106_v47 = vunpack.c.l.b16 %v3051_v43 }
 0x625   : > { %v11328_v42 = vpop.eup %11327 }
 0x626   : > { %v3044_v44 = vmul.f32 %v11328_v42, %v12771_v60  ;;  %v3027_v45 = vpop.xlane.xlu0 %3026 }
 0x627   : > { %11329 = vrcp.f32 %v3027_v45 }
 0x628   : > { %v3052_v46 = vpack.c.bf16 %v3044_v44, %v3044_v44 }
 0x62a   : > { %v3107_v49 = vunpack.c.l.b16 %v3052_v46 }
 0x62c   : > { %v3110_v51 = vpack.c.b16 %v3107_v49, %v3106_v47  ;;  %v11420_v49 = vld [vmem:[%s14829_s13 + $0x8] sm:$0xff] }
 0x62d   : > { %v11330_v53 = vpop.eup %11329 }
 0x62e   : > { %9460 = vmatmul.msk.bf16.vlgmr.msrb.gmra.mxu0 %vm2958_vm1, %v3110_v51  ;;  %v3030_v52 = vpop.xlane.xlu1 %3029  ;;  %v3045_v54 = vmul.f32 %v11330_v53, %v12775_v3 }
 0x62f   : > { %11331 = vrcp.f32 %v3030_v52 }
 0x630   : > { %v3053_v11 = vpack.c.bf16 %v3045_v54, %v3045_v54 }
 0x632   : > { %v3108_v33 = vunpack.c.l.b16 %v3053_v11 }
 0x635   : > { %v11332_v55 = vpop.eup %11331 }
 0x636   : > { %v3046_v57 = vmul.f32 %v11332_v55, %v11320_v15 }
 0x638   : > { %v3054_v30 = vpack.c.bf16 %v3046_v57, %v3046_v57 }
 0x63a   : > { %v3109_v25 = vunpack.c.l.b16 %v3054_v30 }
 0x63c   : > { %v3111_v32 = vpack.c.b16 %v3109_v25, %v3108_v33  ;;  %v9608_v25 = vld [vmem:[%s14840_s20 + $0xe0] sm:$0xf] }
 0x63e   : > { %9461 = vmatmul.msk.bf16.gmra.mxu0 %vm2958_vm1, %v3111_v32  ;;  %v10826_v32 = vld [vmem:[%s14840_s20 + $0xec] sm:$0xf0] }
 0x641   : > { %v3092_v58 = vpop.f32.mrf.mxu3 }
 0x649   : > { %v3094_v59 = vpop.f32.mrf.mxu3 }
 0x64a   : > { %v3149_v60 = vpack.c.bf16 %v3094_v59, %v3092_v58  ;;  %v10824_v58 = vld [vmem:[%s14840_s20 + $0xe4] sm:$0xf]  ;;  %v9609_v59 = vor.u32 %v10826_v32, %v9608_v25  ;;  %v10813_v25 = vld [vmem:[%s14840_s20 + $0x8c] sm:$0xf]  ;;  %v9570_v32 = vld [vmem:[%s14840_s20 + $0x98] sm:$0xf0] }
 0x64c   : > { %3229 = vmatmul.bf16.vlgmr.msrb.gmra.mxu1 %v3149_v60  ;;  %v9610_v60 = vld [vmem:[%s14840_s20 + $0xf0] sm:$0xf0]  ;;  %3676 = vmatpush.bf16.msra.mxu2 %v9609_v59  ;;  %v9573_v59 = vor.u32 %v10813_v25, %v9570_v32  ;;  %v10796_v25 = vld [vmem:[%s14840_s20 + $0x4] sm:$0xf] }
 0x651   : > { %v3097_v61 = vpop.f32.mrf.mxu3 }
 0x659   : > { %v3099_v62 = vpop.f32.mrf.mxu3 }
 0x65a   : > { %v3150_v1 = vpack.c.bf16 %v3099_v62, %v3097_v61  ;;  %v9616_v61 = vld [vmem:[%s14840_s20 + $0xe8] sm:$0xf]  ;;  %v10827_v62 = vld [vmem:[%s14840_s20 + $0xf4] sm:$0xf0] }
 0x65c   : > { %3234 = vmatmul.bf16.gmra.mxu1 %v3150_v1  ;;  %v9613_v1 = vor.u32 %v10824_v58, %v9610_v60  ;;  %v9544_v60 = vld [vmem:[%s14840_s20 + $0x60] sm:$0xf] }
 0x65e   : > { %3705 = vmatpush.bf16.msrb.mxu3 %v9613_v1 }
 0x6ab   : > { %v3139_v63 = vpop.f32.mrf.mxu0 }
 0x6b3   : > { %v3141_v36 = vpop.f32.mrf.mxu0 }
 0x6b4   : > { %v3151_v2 = vpack.c.bf16 %v3141_v36, %v3139_v63  ;;  %v9617_v63 = vor.u32 %v10827_v62, %v9616_v61  ;;  %v10825_v36 = vld [vmem:[%s14840_s20 + $0xec] sm:$0xf]  ;;  %v10810_v61 = vld [vmem:[%s14840_s20 + $0x6c] sm:$0xf0]  ;;  %v10808_v62 = vld [vmem:[%s14840_s20 + $0x64] sm:$0xf] }
 0x6b6   : > { %3239 = vmatmul.bf16.gmra.mxu1 %v3151_v2  ;;  %v9618_v2 = vld [vmem:[%s14840_s20 + $0xf8] sm:$0xf0]  ;;  %3734 = vmatpush.bf16.msra.mxu0 %v9617_v63  ;;  %v9545_v63 = vor.u32 %v10810_v61, %v9544_v60  ;;  %v9498_v61 = vld [vmem:[%s14840_s20 + $0x10] sm:$0xf0] }
 0x6bb   : > { %v3144_v3 = vpop.f32.mrf.mxu0 }
 0x6c3   : > { %v3146_v4 = vpop.f32.mrf.mxu0 }
 0x6c4   : > { %v3152_v6 = vpack.c.bf16 %v3146_v4, %v3144_v3  ;;  %v9621_v3 = vor.u32 %v10825_v36, %v9618_v2  ;;  %v9546_v36 = vld [vmem:[%s14840_s20 + $0x70] sm:$0xf0]  ;;  %v9552_v2 = vld [vmem:[%s14840_s20 + $0x68] sm:$0xf] }
 0x6c6   : > { %3244 = vmatmul.bf16.gmra.mxu1 %v3152_v6  ;;  %v9592_v6 = vld [vmem:[%s14840_s20 + $0xc0] sm:$0xf] }
 0x6c7   : > { %3763 = vmatpush.bf16.msra.mxu1 %v9621_v3  ;;  %v10811_v3 = vld [vmem:[%s14840_s20 + $0x74] sm:$0xf0] }
 0x6c9   : > { %v3230_v9 = vpop.f32.mrf.mxu1 }
 0x6ca   : > { %v3231_v0 = vadd.f32 %v11279_v7, %v3230_v9  ;;  %v10820_v9 = vld [vmem:[%s14840_s20 + $0xc4] sm:$0xf] }
 0x6cc   : > { %v12797_v48 = vadd.f32 %v11413_v10, %v3231_v0 }
 0x6ce   : > { %3260 = vadd.xlane.f32.xlu2 %v12797_v48 }
 0x6d1   : > { %v3232_v13 = vpop.f32.mrf.mxu1 }
 0x6d2   : > { %v3233_v15 = vadd.f32 %v11279_v7, %v3232_v13  ;;  %v9594_v13 = vld [vmem:[%s14840_s20 + $0xd0] sm:$0xf0] }
 0x6d4   : > { %v12801_v5 = vadd.f32 %v11414_v8, %v3233_v15  ;;  %v9600_v15 = vld [vmem:[%s14840_s20 + $0xc8] sm:$0xf]  ;;  %v10823_v8 = vld [vmem:[%s14840_s20 + $0xd4] sm:$0xf0] }
 0x6d6   : > { %3262 = vadd.xlane.f32.xlu0 %v12801_v5 }
 0x6d9   : > { %v3235_v17 = vpop.f32.mrf.mxu1 }
 0x6da   : > { %v3236_v16 = vadd.f32 %v11279_v7, %v3235_v17  ;;  %v9597_v17 = vor.u32 %v10820_v9, %v9594_v13  ;;  %v9554_v9 = vld [vmem:[%s14840_s20 + $0x78] sm:$0xf0]  ;;  %v10806_v13 = vld [vmem:[%s14840_s20 + $0x4c] sm:$0xf0] }
 0x6dc   : > { %v12805_v19 = vadd.f32 %v11415_v18, %v3236_v16  ;;  %v9601_v16 = vor.u32 %v10823_v8, %v9600_v15  ;;  %v10821_v18 = vld [vmem:[%s14840_s20 + $0xcc] sm:$0xf]  ;;  %3706 = vmatpush.bf16.msrb.mxu3 %v9597_v17  ;;  %v10804_v15 = vld [vmem:[%s14840_s20 + $0x44] sm:$0xf] }
 0x6de   : > { %3264 = vadd.xlane.f32.xlu1 %v12805_v19  ;;  %3735 = vmatpush.bf16.msra.mxu0 %v9601_v16 }
 0x6e1   : > { %v3237_v20 = vpop.f32.mrf.mxu1 }
 0x6e2   : > { %v3238_v21 = vadd.f32 %v11279_v7, %v3237_v20  ;;  %v9602_v20 = vld [vmem:[%s14840_s20 + $0xd8] sm:$0xf0] }
 0x6e4   : > { %v12809_v23 = vadd.f32 %v11416_v22, %v3238_v21  ;;  %v9605_v22 = vor.u32 %v10821_v18, %v9602_v20  ;;  %v9530_v18 = vld [vmem:[%s14840_s20 + $0x50] sm:$0xf0]  ;;  %v9536_v20 = vld [vmem:[%s14840_s20 + $0x48] sm:$0xf] }
 0x6e6   : > { %3266 = vadd.xlane.f32.xlu2 %v12809_v23  ;;  %3764 = vmatpush.bf16.msra.mxu1 %v9605_v22  ;;  %v10807_v22 = vld [vmem:[%s14840_s20 + $0x54] sm:$0xf0] }
 0x733   : > { %v3240_v24 = vpop.f32.mrf.mxu1 }
 0x734   : > { %v3241_v56 = vadd.f32 %v11279_v7, %v3240_v24  ;;  %v9576_v24 = vld [vmem:[%s14840_s20 + $0xa0] sm:$0xf] }
 0x736   : > { %v12813_v29 = vadd.f32 %v11417_v27, %v3241_v56  ;;  %v10818_v56 = vld [vmem:[%s14840_s20 + $0xac] sm:$0xf0]  ;;  %v10816_v27 = vld [vmem:[%s14840_s20 + $0xa4] sm:$0xf] }
 0x738   : > { %3268 = vadd.xlane.f32.xlu0 %v12813_v29 }
 0x73b   : > { %v3242_v31 = vpop.f32.mrf.mxu1 }
 0x73c   : > { %v3243_v34 = vadd.f32 %v11279_v7, %v3242_v31 }
 0x73e   : > { %v12817_v37 = vadd.f32 %v11418_v35, %v3243_v34  ;;  %v9577_v34 = vor.u32 %v10818_v56, %v9576_v24  ;;  %v9578_v35 = vld [vmem:[%s14840_s20 + $0xb0] sm:$0xf0] }
 0x740   : > { %3270 = vadd.xlane.f32.xlu1 %v12817_v37 }
 0x741   : > { %v3261_v28 = vpop.xlane.xlu2 %3260 }
 0x742   : > { %v3276_v38 = vmul.f32 %v3261_v28, %v12571_v14  ;;  %v9584_v28 = vld [vmem:[%s14840_s20 + $0xa8] sm:$0xf] }
 0x743   : > { %v3245_v41 = vpop.f32.mrf.mxu1 }
 0x744   : > { %v12822_v39 = vsub.f32 %v12797_v48, %v3276_v38  ;;  %v3246_v12 = vadd.f32 %v11279_v7, %v3245_v41  ;;  %v10819_v38 = vld [vmem:[%s14840_s20 + $0xb4] sm:$0xf0]  ;;  %v9581_v41 = vor.u32 %v10816_v27, %v9578_v35  ;;  %v9533_v27 = vor.u32 %v10804_v15, %v9530_v18  ;;  %v9538_v35 = vld [vmem:[%s14840_s20 + $0x58] sm:$0xf0] }
 0x746   : > { %v12825_v26 = vadd.f32 %v11419_v40, %v3246_v12  ;;  %v3292_v42 = vmul.f32 %v12822_v39, %v12822_v39  ;;  %v9585_v12 = vor.u32 %v10819_v38, %v9584_v28  ;;  %v10817_v40 = vld [vmem:[%s14840_s20 + $0xac] sm:$0xf]  ;;  %3707 = vmatpush.bf16.msrb.mxu3 %v9581_v41 }
 0x748   : > { %3300 = vadd.xlane.f32.xlu2 %v3292_v42  ;;  %3272 = vadd.xlane.f32.xlu1 %v12825_v26  ;;  %v9586_v42 = vld [vmem:[%s14840_s20 + $0xb8] sm:$0xf0] }
 0x749   : > { %v3263_v43 = vpop.xlane.xlu0 %3262  ;;  %3736 = vmatpush.bf16.msra.mxu0 %v9585_v12  ;;  %v9512_v12 = vld [vmem:[%s14840_s20 + $0x20] sm:$0xf] }
 0x74a   : > { %v3277_v44 = vmul.f32 %v3263_v43, %v12571_v14  ;;  %v9589_v43 = vor.u32 %v10817_v40, %v9586_v42  ;;  %v10802_v40 = vld [vmem:[%s14840_s20 + $0x2c] sm:$0xf0] }
 0x74b   : > { %v3247_v45 = vpop.f32.mrf.mxu1  ;;  %v9513_v42 = vor.u32 %v10802_v40, %v9512_v12 }
 0x74c   : > { %v12832_v46 = vsub.f32 %v12801_v5, %v3277_v44  ;;  %v3248_v47 = vadd.f32 %v11279_v7, %v3247_v45  ;;  %v10822_v7 = vld [vmem:[%s14840_s20 + $0xcc] sm:$0xf0]  ;;  %v9560_v45 = vld [vmem:[%s14840_s20 + $0x80] sm:$0xf]  ;;  %3765 = vmatpush.bf16.msra.mxu1 %v9589_v43  ;;  %v10800_v43 = vld [vmem:[%s14840_s20 + $0x24] sm:$0xf] }
 0x74d   : > { %v9593_v10 = vor.u32 %v10822_v7, %v9592_v6  ;;  %v9553_v6 = vor.u32 %v10811_v3, %v9552_v2  ;;  %v10809_v7 = vld [vmem:[%s14840_s20 + $0x6c] sm:$0xf]  ;;  %v9501_v2 = vor.u32 %v10796_v25, %v9498_v61 }
 0x74e   : > { %v12835_v50 = vadd.f32 %v11420_v49, %v3248_v47  ;;  %v3293_v51 = vmul.f32 %v12832_v46, %v12832_v46  ;;  %v10814_v47 = vld [vmem:[%s14840_s20 + $0x8c] sm:$0xf0]  ;;  %v10812_v49 = vld [vmem:[%s14840_s20 + $0x84] sm:$0xf] }
 0x74f   : > { %3677 = vmatpush.bf16.msra.mxu2 %v9593_v10  ;;  %v9528_v10 = vld [vmem:[%s14840_s20 + $0x40] sm:$0xf] }
 0x750   : > { %3274 = vadd.xlane.f32.xlu2 %v12835_v50  ;;  %3302 = vadd.xlane.f32.xlu0 %v3293_v51  ;;  %v9529_v16 = vor.u32 %v10806_v13, %v9528_v10 }
 0x751   : > { %v3265_v52 = vpop.xlane.xlu1 %3264  ;;  %3766 = vmatpush.bf16.msra.mxu1 %v9573_v59 }
 0x752   : > { %v3278_v53 = vmul.f32 %v3265_v52, %v12571_v14  ;;  %v9561_v52 = vor.u32 %v10814_v47, %v9560_v45  ;;  %v9520_v45 = vld [vmem:[%s14840_s20 + $0x28] sm:$0xf] }
 0x753   : > { %3678 = vmatpush.bf16.msra.mxu2 %v9577_v34  ;;  %v10805_v34 = vld [vmem:[%s14840_s20 + $0x4c] sm:$0xf] }
 0x754   : > { %v12842_v54 = vsub.f32 %v12805_v19, %v3278_v53  ;;  %v9562_v53 = vld [vmem:[%s14840_s20 + $0x90] sm:$0xf0]  ;;  %v9541_v28 = vor.u32 %v10805_v34, %v9538_v35  ;;  %v12944_v35 = vld [vmem:[%s14841_s11] ss:$0 sm:$0xff] }
 0x756   : > { %v3294_v55 = vmul.f32 %v12842_v54, %v12842_v54 }
 0x757   : > { %3679 = vmatpush.bf16.msra.mxu2 %v9561_v52  ;;  %v10801_v52 = vld [vmem:[%s14840_s20 + $0x2c] sm:$0xf] }
 0x758   : > { %3304 = vadd.xlane.f32.xlu0 %v3294_v55  ;;  %v9568_v55 = vld [vmem:[%s14840_s20 + $0x88] sm:$0xf] }
 0x759   : > { %v3267_v57 = vpop.xlane.xlu2 %3266 }
 0x75a   : > { %v3279_v11 = vmul.f32 %v3267_v57, %v12571_v14  ;;  %v10815_v57 = vld [vmem:[%s14840_s20 + $0x94] sm:$0xf0] }
 0x75b   : > { %3680 = vmatpush.bf16.msra.mxu2 %v9545_v63 }
 0x75c   : > { %v12848_v30 = vsub.f32 %v12809_v23, %v3279_v11  ;;  %v9565_v11 = vor.u32 %v10812_v49, %v9562_v53  ;;  %v9522_v53 = vld [vmem:[%s14840_s20 + $0x38] sm:$0xf0] }
 0x75e   : > { %v3295_v33 = vmul.f32 %v12848_v30, %v12848_v30  ;;  %3708 = vmatpush.bf16.msrb.mxu3 %v9565_v11  ;;  %v9496_v11 = vld [vmem:[%s14840_s20] sm:$0xf] }
 0x75f   : > { %3681 = vmatpush.bf16.msra.mxu2 %v9529_v16 }
 0x760   : > { %3306 = vadd.xlane.f32.xlu1 %v3295_v33  ;;  %v9569_v33 = vor.u32 %v10815_v57, %v9568_v55  ;;  %v9525_v57 = vor.u32 %v10801_v52, %v9522_v53 }
 0x762   : > { %3737 = vmatpush.bf16.msra.mxu0 %v9569_v33  ;;  %v10798_v33 = vld [vmem:[%s14840_s20 + $0xc] sm:$0xf0] }
 0x763   : > { %3682 = vmatpush.bf16.msra.mxu2 %v9513_v42  ;;  %v9497_v60 = vor.u32 %v10798_v33, %v9496_v11 }
 0x766   : > { %3738 = vmatpush.bf16.msra.mxu0 %v9553_v6  ;;  %v9506_v6 = vld [vmem:[%s14840_s20 + $0x18] sm:$0xf0] }
 0x767   : > { %3683 = vmatpush.bf16.msra.mxu2 %v9497_v60 }
 0x7ab   : > { %v3269_v4 = vpop.xlane.xlu0 %3268 }
 0x7ac   : > { %v3280_v0 = vmul.f32 %v3269_v4, %v12571_v14  ;;  %v9549_v4 = vor.u32 %v10808_v62, %v9546_v36  ;;  %v9504_v62 = vld [vmem:[%s14840_s20 + $0x8] sm:$0xf] }
 0x7ae   : > { %v12870_v21 = vsub.f32 %v12813_v29, %v3280_v0  ;;  %v9557_v0 = vor.u32 %v10809_v7, %v9554_v9  ;;  %3709 = vmatpush.bf16.msrb.mxu3 %v9549_v4  ;;  %v10797_v4 = vld [vmem:[%s14840_s20 + $0xc] sm:$0xf] }
 0x7af   : > { %v9509_v7 = vor.u32 %v10797_v4, %v9506_v6 }
 0x7b0   : > { %v3296_v31 = vmul.f32 %v12870_v21, %v12870_v21  ;;  %3767 = vmatpush.bf16.msra.mxu1 %v9557_v0 }
 0x7b2   : > { %3308 = vadd.xlane.f32.xlu2 %v3296_v31  ;;  %v9537_v31 = vor.u32 %v10807_v22, %v9536_v20  ;;  %3710 = vmatpush.bf16.msrb.mxu3 %v9533_v27 }
 0x7b3   : > { %v3271_v44 = vpop.xlane.xlu1 %3270 }
 0x7b4   : > { %v3281_v51 = vmul.f32 %v3271_v44, %v12571_v14  ;;  %3739 = vmatpush.bf16.msra.mxu0 %v9537_v31  ;;  %3768 = vmatpush.bf16.msra.mxu1 %v9541_v28  ;;  %v9514_v44 = vld [vmem:[%s14840_s20 + $0x30] sm:$0xf0] }
 0x7b5   : > { %v9517_v49 = vor.u32 %v10800_v43, %v9514_v44 }
 0x7b6   : > { %v12892_v58 = vsub.f32 %v12817_v37, %v3281_v51  ;;  %v10803_v51 = vld [vmem:[%s14840_s20 + $0x34] sm:$0xf0] }
 0x7b7   : > { %v9521_v55 = vor.u32 %v10803_v51, %v9520_v45  ;;  %3711 = vmatpush.bf16.msrb.mxu3 %v9517_v49 }
 0x7b8   : > { %v3297_v1 = vmul.f32 %v12892_v58, %v12892_v58  ;;  %3769 = vmatpush.bf16.msra.mxu1 %v9525_v57 }
 0x7b9   : > { %3740 = vmatpush.bf16.msra.mxu0 %v9521_v55 }
 0x7ba   : > { %3310 = vadd.xlane.f32.xlu0 %v3297_v1  ;;  %v10799_v1 = vld [vmem:[%s14840_s20 + $0x14] sm:$0xf0] }
 0x7bb   : > { %v3301_v8 = vpop.xlane.xlu2 %3300  ;;  %v3273_v17 = vpop.xlane.xlu1 %3272  ;;  %v9505_v3 = vor.u32 %v10799_v1, %v9504_v62  ;;  %3712 = vmatpush.bf16.msrb.mxu3 %v9501_v2 }
 0x7bc   : > { %v3316_v24 = vmul.f32 %v3301_v8, %v12571_v14  ;;  %v3282_v56 = vmul.f32 %v3273_v17, %v12571_v14  ;;  %3770 = vmatpush.bf16.msra.mxu1 %v9509_v7 }
 0x7bd   : > { %3741 = vmatpush.bf16.msra.mxu0 %v9505_v3 }
 0x7be   : > { %v3324_v38 = vadd.f32 1e-05, %v3316_v24  ;;  %v12915_v41 = vsub.f32 %v12825_v26, %v3282_v56 }
 0x7c0   : > { %11333 = vrsqrt.f32 %v3324_v38  ;;  %v3298_v47 = vmul.f32 %v12915_v41, %v12915_v41  ;;  %vm3338_vm3 = vweird.f32 %v3324_v38 }
 0x7c2   : > { %3312 = vadd.xlane.f32.xlu1 %v3298_v47  ;;  %v12950_v47 = vld [vmem:[%s14842_s28] ss:$0 sm:$0xff] }
 0x7c3   : > { %v3275_v32 = vpop.xlane.xlu2 %3274  ;;  %v3303_v59 = vpop.xlane.xlu0 %3302 }
 0x7c4   : > { %v3283_v63 = vmul.f32 %v3275_v32, %v12571_v14  ;;  %v3317_v36 = vmul.f32 %v3303_v59, %v12571_v14 }
 0x7c6   : > { %v11334_v9 = vpop.eup %11333  ;;  %v12938_v0 = vsub.f32 %v12835_v50, %v3283_v63  ;;  %v3325_v10 = vadd.f32 1e-05, %v3317_v36 }
 0x7c7   : > { %v3333_v13 = vmul.f32 %v11334_v9, %v3324_v38  ;;  %vm3339_vm2 = vweird.f32 %v11334_v9 }
 0x7c8   : > { %11335 = vrsqrt.f32 %v3325_v10  ;;  %v3299_v15 = vmul.f32 %v12938_v0, %v12938_v0  ;;  %vm3340_vm4 = vmor %vm3338_vm3, %vm3339_vm2  ;;  %vm3348_vm6 = vweird.f32 %v3325_v10 }
 0x7c9   : > { %v3334_v8 = vmul.f32 %v11334_v9, %v3333_v13 }
 0x7ca   : > { %3314 = vadd.xlane.f32.xlu2 %v3299_v15 }
 0x7cb   : > { %v3335_v17 = vmul.f32 0.5, %v3334_v8  ;;  %v3305_v16 = vpop.xlane.xlu0 %3304 }
 0x7cc   : > { %v3318_v18 = vmul.f32 %v3305_v16, %v12571_v14 }
 0x7cd   : > { %v3336_v20 = vsub.f32 1.5, %v3335_v17 }
 0x7ce   : > { %v11336_v22 = vpop.eup %11335  ;;  %v3326_v24 = vadd.f32 1e-05, %v3318_v18 }
 0x7cf   : > { %v3337_v56 = vmul.f32 %v11334_v9, %v3336_v20  ;;  %v3343_v27 = vmul.f32 %v11336_v22, %v3325_v10  ;;  %vm3349_vm5 = vweird.f32 %v11336_v22 }
 0x7d0   : > { %11337 = vrsqrt.f32 %v3326_v24  ;;  %vm3350_vm7 = vmor %vm3348_vm6, %vm3349_vm5  ;;  %vm3358_vm9 = vweird.f32 %v3326_v24 }
 0x7d1   : > { %v3341_v31 = vsel %vm3340_vm4, %v11334_v9, %v3337_v56  ;;  %v3344_v34 = vmul.f32 %v11336_v22, %v3343_v27 }
 0x7d2   : > { %v3412_v28 = vmul.f32 %v3341_v31, %v12822_v39 }
 0x7d3   : > { %v3345_v12 = vmul.f32 0.5, %v3344_v34  ;;  %v3307_v40 = vpop.xlane.xlu1 %3306 }
 0x7d4   : > { %v3319_v42 = vmul.f32 %v3307_v40, %v12571_v14  ;;  %v3423_v45 = vmul.f32 %v12944_v35, %v3412_v28 }
 0x7d5   : > { %v3346_v43 = vsub.f32 1.5, %v3345_v12 }
 0x7d6   : > { %v11338_v44 = vpop.eup %11337  ;;  %v3327_v38 = vadd.f32 1e-05, %v3319_v42  ;;  %v3434_v55 = vadd.f32 %v12950_v47, %v3423_v45 }
 0x7d7   : > { %v3347_v49 = vmul.f32 %v11336_v22, %v3346_v43  ;;  %v3353_v51 = vmul.f32 %v11338_v44, %v3326_v24  ;;  %vm3359_vm8 = vweird.f32 %v11338_v44 }
 0x7d8   : > { %11339 = vrsqrt.f32 %v3327_v38  ;;  %v3442_v59 = vpack.c.bf16 %v3434_v55, %v3434_v55  ;;  %vm3360_vm10 = vmor %vm3358_vm9, %vm3359_vm8  ;;  %vm3368_vm12 = vweird.f32 %v3327_v38 }
 0x7d9   : > { %v3351_v52 = vsel %vm3350_vm7, %v11336_v22, %v3347_v49  ;;  %v3354_v53 = vmul.f32 %v11338_v44, %v3353_v51 }
 0x7da   : > { %v3413_v39 = vmul.f32 %v3351_v52, %v12832_v46  ;;  %v3500_v36 = vunpack.c.l.b16 %v3442_v59 }
 0x7db   : > { %v3355_v57 = vmul.f32 0.5, %v3354_v53 }
 0x7dc   : > { %v3424_v11 = vmul.f32 %v12944_v35, %v3413_v39 }
 0x7dd   : > { %v3356_v33 = vsub.f32 1.5, %v3355_v57 }
 0x7de   : > { %v11340_v25 = vpop.eup %11339  ;;  %v3435_v32 = vadd.f32 %v12950_v47, %v3424_v11 }
 0x7df   : > { %v3357_v60 = vmul.f32 %v11338_v44, %v3356_v33  ;;  %v3363_v61 = vmul.f32 %v11340_v25, %v3327_v38  ;;  %vm3369_vm11 = vweird.f32 %v11340_v25 }
 0x7e0   : > { %v3443_v62 = vpack.c.bf16 %v3435_v32, %v3435_v32  ;;  %vm3370_vm13 = vmor %vm3368_vm12, %vm3369_vm11 }
 0x7e1   : > { %v3361_v1 = vsel %vm3360_vm10, %v11338_v44, %v3357_v60  ;;  %v3364_v63 = vmul.f32 %v11340_v25, %v3363_v61 }
 0x7e2   : > { %v3414_v46 = vmul.f32 %v3361_v1, %v12842_v54  ;;  %v3501_v2 = vunpack.c.l.b16 %v3443_v62 }
 0x7e3   : > { %v3365_v3 = vmul.f32 0.5, %v3364_v63 }
 0x7e4   : > { %v3508_v4 = vpack.c.b16 %v3501_v2, %v3500_v36  ;;  %v3425_v7 = vmul.f32 %v12944_v35, %v3414_v46 }
 0x7e5   : > { %v3366_v6 = vsub.f32 1.5, %v3365_v3 }
 0x7e6   : > { %3684 = vmatmul.bf16.vlgmr.msra.gmra.mxu2 %v3508_v4  ;;  %3713 = vmatmul.bf16.vlgmr.msrb.gmra.mxu3 %v3508_v4  ;;  %v3436_v54 = vadd.f32 %v12950_v47, %v3425_v7  ;;  %v10851_v7 = vld [vmem:[%s14843_s2 + $0xb8] sm:$0xff] }
 0x7e7   : > { %v3367_v9 = vmul.f32 %v11340_v25, %v3366_v6  ;;  %3742 = vmatmul.bf16.vlgmr.msra.gmra.mxu0 %v3508_v4  ;;  %3771 = vmatmul.bf16.vlgmr.msra.gmra.mxu1 %v3508_v4 }
 0x7e8   : > { %v3444_v17 = vpack.c.bf16 %v3436_v54, %v3436_v54  ;;  %4414 = vmatpush.bf16.msrb.mxu0 %v10851_v7 }
 0x7e9   : > { %v3371_v10 = vsel %vm3370_vm13, %v11340_v25, %v3367_v9  ;;  %v10859_v9 = vld [vmem:[%s14843_s2 + $0xf8] sm:$0xff] }
 0x7ea   : > { %v3415_v13 = vmul.f32 %v3371_v10, %v12848_v30  ;;  %v3502_v18 = vunpack.c.l.b16 %v3444_v17  ;;  %4443 = vmatpush.bf16.msrb.mxu1 %v10859_v9 }
 0x7ec   : > { %v3426_v15 = vmul.f32 %v12944_v35, %v3415_v13 }
 0x7ee   : > { %v3437_v8 = vadd.f32 %v12950_v47, %v3426_v15 }
 0x7f0   : > { %v3445_v16 = vpack.c.bf16 %v3437_v8, %v3437_v8 }
 0x7f2   : > { %v3503_v20 = vunpack.c.l.b16 %v3445_v16 }
 0x7f4   : > { %v3509_v22 = vpack.c.b16 %v3503_v20, %v3502_v18  ;;  %v10850_v18 = vld [vmem:[%s14843_s2 + $0xb0] sm:$0xff] }
 0x7f5   : > { %v10858_v20 = vld [vmem:[%s14843_s2 + $0xf0] sm:$0xff]  ;;  %4415 = vmatpush.bf16.msrb.mxu0 %v10850_v18  ;;  %v10829_v18 = vld [vmem:[%s14843_s2 + $0x8] sm:$0xff] }
 0x7f6   : > { %3689 = vmatmul.bf16.gmra.mxu2 %v3509_v22  ;;  %3718 = vmatmul.bf16.gmra.mxu3 %v3509_v22 }
 0x7f7   : > { %3747 = vmatmul.bf16.gmra.mxu0 %v3509_v22  ;;  %3776 = vmatmul.bf16.gmra.mxu1 %v3509_v22 }
 0x7f8   : > { %4444 = vmatpush.bf16.msrb.mxu1 %v10858_v20  ;;  %v10837_v20 = vld [vmem:[%s14843_s2 + $0x48] sm:$0xff] }
 0x825   : > { %v3309_v24 = vpop.xlane.xlu2 %3308 }
 0x826   : > { %v3320_v56 = vmul.f32 %v3309_v24, %v12571_v14 }
 0x828   : > { %v3328_v27 = vadd.f32 1e-05, %v3320_v56  ;;  %v10835_v56 = vld [vmem:[%s14843_s2 + $0x38] sm:$0xff] }
 0x829   : > { %4356 = vmatpush.bf16.msrb.mxu2 %v10835_v56 }
 0x82a   : > { %11341 = vrsqrt.f32 %v3328_v27  ;;  %vm3378_vm15 = vweird.f32 %v3328_v27 }
 0x82d   : > { %v3311_v30 = vpop.xlane.xlu0 %3310 }
 0x82e   : > { %v3321_v31 = vmul.f32 %v3311_v30, %v12571_v14 }
 0x830   : > { %v11342_v34 = vpop.eup %11341  ;;  %v3329_v28 = vadd.f32 1e-05, %v3321_v31 }
 0x831   : > { %v3373_v12 = vmul.f32 %v11342_v34, %v3328_v27  ;;  %vm3379_vm14 = vweird.f32 %v11342_v34  ;;  %v10843_v27 = vld [vmem:[%s14843_s2 + $0x78] sm:$0xff] }
 0x832   : > { %11343 = vrsqrt.f32 %v3329_v28  ;;  %vm3380_vm0 = vmor %vm3378_vm15, %vm3379_vm14  ;;  %vm3388_vm2 = vweird.f32 %v3329_v28  ;;  %4385 = vmatpush.bf16.msra.mxu3 %v10843_v27 }
 0x833   : > { %v3374_v40 = vmul.f32 %v11342_v34, %v3373_v12  ;;  %v10834_v12 = vld [vmem:[%s14843_s2 + $0x30] sm:$0xff] }
 0x834   : > { %4357 = vmatpush.bf16.msrb.mxu2 %v10834_v12  ;;  %v10836_v12 = vld [vmem:[%s14843_s2 + $0x40] sm:$0xff] }
 0x835   : > { %v3375_v42 = vmul.f32 0.5, %v3374_v40  ;;  %v3313_v43 = vpop.xlane.xlu1 %3312  ;;  %v10842_v40 = vld [vmem:[%s14843_s2 + $0x70] sm:$0xff] }
 0x836   : > { %v3322_v45 = vmul.f32 %v3313_v43, %v12571_v14  ;;  %4386 = vmatpush.bf16.msra.mxu3 %v10842_v40 }
 0x837   : > { %v3376_v44 = vsub.f32 1.5, %v3375_v42 }
 0x838   : > { %v11344_v38 = vpop.eup %11343  ;;  %v3330_v52 = vadd.f32 1e-05, %v3322_v45  ;;  %v10848_v45 = vld [vmem:[%s14843_s2 + $0xa0] sm:$0xff] }
 0x839   : > { %v3377_v49 = vmul.f32 %v11342_v34, %v3376_v44  ;;  %v3383_v51 = vmul.f32 %v11344_v38, %v3329_v28  ;;  %vm3389_vm1 = vweird.f32 %v11344_v38 }
 0x83a   : > { %11345 = vrsqrt.f32 %v3330_v52  ;;  %vm3390_vm3 = vmor %vm3388_vm2, %vm3389_vm1  ;;  %vm3398_vm5 = vweird.f32 %v3330_v52 }
 0x83b   : > { %v3381_v53 = vsel %vm3380_vm0, %v11342_v34, %v3377_v49  ;;  %v3384_v39 = vmul.f32 %v11344_v38, %v3383_v51  ;;  %v10857_v34 = vld [vmem:[%s14843_s2 + $0xe8] sm:$0xff] }
 0x83c   : > { %v3416_v55 = vmul.f32 %v3381_v53, %v12870_v21  ;;  %4445 = vmatpush.bf16.msrb.mxu1 %v10857_v34  ;;  %v10833_v51 = vld [vmem:[%s14843_s2 + $0x28] sm:$0xff] }
 0x83d   : > { %v3385_v57 = vmul.f32 0.5, %v3384_v39  ;;  %v3315_v11 = vpop.xlane.xlu2 %3314  ;;  %4358 = vmatpush.bf16.msrb.mxu2 %v10833_v51 }
 0x83e   : > { %v3323_v25 = vmul.f32 %v3315_v11, %v12571_v14  ;;  %v3427_v32 = vmul.f32 %v12944_v35, %v3416_v55  ;;  %v10855_v55 = vld [vmem:[%s14843_s2 + $0xd8] sm:$0xff]  ;;  %v10832_v11 = vld [vmem:[%s14843_s2 + $0x20] sm:$0xff] }
 0x83f   : > { %v3386_v33 = vsub.f32 1.5, %v3385_v57 }
 0x840   : > { %v11346_v59 = vpop.eup %11345  ;;  %v3331_v61 = vadd.f32 1e-05, %v3323_v25  ;;  %v3438_v46 = vadd.f32 %v12950_v47, %v3427_v32  ;;  %v3482_v32 = vld [vmem:[%s14844_s16] sm:$0xf] }
 0x841   : > { %v3387_v60 = vmul.f32 %v11344_v38, %v3386_v33  ;;  %v3393_v62 = vmul.f32 %v11346_v59, %v3330_v52  ;;  %vm3399_vm4 = vweird.f32 %v11346_v59  ;;  %v10841_v52 = vld [vmem:[%s14843_s2 + $0x68] sm:$0xff]  ;;  %4359 = vmatpush.bf16.msrb.mxu2 %v10832_v11  ;;  %v13015_v7 = vperm.slane %v3482_v32, 0 }
 0x842   : > { %11347 = vrsqrt.f32 %v3331_v61  ;;  %v3446_v4 = vpack.c.bf16 %v3438_v46, %v3438_v46  ;;  %vm3400_vm6 = vmor %vm3398_vm5, %vm3399_vm4  ;;  %vm3408_vm8 = vweird.f32 %v3331_v61  ;;  %4387 = vmatpush.bf16.msra.mxu3 %v10841_v52  ;;  %v10853_v46 = vld [vmem:[%s14843_s2 + $0xc8] sm:$0xff]  ;;  %v13017_v9 = vperm.slane %v3482_v32, 1 }
 0x843   : > { %v3391_v1 = vsel %vm3390_vm3, %v11344_v38, %v3387_v60  ;;  %v3394_v63 = vmul.f32 %v11346_v59, %v3393_v62  ;;  %v10856_v38 = vld [vmem:[%s14843_s2 + $0xe0] sm:$0xff]  ;;  %v10854_v60 = vld [vmem:[%s14843_s2 + $0xd0] sm:$0xff]  ;;  %v13001_v62 = vperm.slane %v3482_v32, 3 }
 0x844   : > { %v3417_v21 = vmul.f32 %v3391_v1, %v12892_v58  ;;  %v3504_v8 = vunpack.c.l.b16 %v3446_v4  ;;  %4446 = vmatpush.bf16.msrb.mxu1 %v10856_v38  ;;  %v10831_v1 = vld [vmem:[%s14843_s2 + $0x18] sm:$0xff]  ;;  %v10830_v4 = vld [vmem:[%s14843_s2 + $0x10] sm:$0xff] }
 0x845   : > { %v3395_v14 = vmul.f32 0.5, %v3394_v63  ;;  %4360 = vmatpush.bf16.msrb.mxu2 %v10831_v1  ;;  %v10845_v63 = vld [vmem:[%s14843_s2 + $0x88] sm:$0xff] }
 0x846   : > { %v3428_v36 = vmul.f32 %v12944_v35, %v3417_v21  ;;  %v10839_v21 = vld [vmem:[%s14843_s2 + $0x58] sm:$0xff] }
 0x847   : > { %v3396_v2 = vsub.f32 1.5, %v3395_v14 }
 0x848   : > { %v3439_v3 = vadd.f32 %v12950_v47, %v3428_v36  ;;  %v11348_v6 = vpop.eup %11347  ;;  %4447 = vmatpush.bf16.msrb.mxu1 %v10855_v55 }
 0x849   : > { %v3397_v10 = vmul.f32 %v11346_v59, %v3396_v2  ;;  %v3403_v13 = vmul.f32 %v11348_v6, %v3331_v61  ;;  %vm3409_vm7 = vweird.f32 %v11348_v6  ;;  %v12999_v61 = vperm.slane %v3482_v32, 2  ;;  %4361 = vmatpush.bf16.msrb.mxu2 %v10830_v4 }
 0x84a   : > { %v3447_v58 = vpack.c.bf16 %v3439_v3, %v3439_v3  ;;  %vm3410_vm9 = vmor %vm3408_vm8, %vm3409_vm7 }
 0x84b   : > { %v3401_v54 = vsel %vm3400_vm6, %v11346_v59, %v3397_v10  ;;  %v3404_v15 = vmul.f32 %v11348_v6, %v3403_v13  ;;  %v10846_v59 = vld [vmem:[%s14843_s2 + $0x90] sm:$0xff] }
 0x84c   : > { %v3505_v17 = vunpack.c.l.b16 %v3447_v58  ;;  %v3418_v16 = vmul.f32 %v3401_v54, %v12915_v41  ;;  %v10849_v41 = vld [vmem:[%s14843_s2 + $0xa8] sm:$0xff]  ;;  %4448 = vmatpush.bf16.msrb.mxu1 %v10854_v60  ;;  %v10844_v58 = vld [vmem:[%s14843_s2 + $0x80] sm:$0xff] }
 0x84d   : > { %v3405_v22 = vmul.f32 0.5, %v3404_v15  ;;  %4416 = vmatpush.bf16.msrb.mxu0 %v10849_v41  ;;  %v10852_v54 = vld [vmem:[%s14843_s2 + $0xc0] sm:$0xff]  ;;  %4362 = vmatpush.bf16.msrb.mxu2 %v10829_v18 }
 0x84e   : > { %v3510_v24 = vpack.c.b16 %v3505_v17, %v3504_v8  ;;  %v3429_v31 = vmul.f32 %v12944_v35, %v3418_v16 }
 0x84f   : > { %v3406_v30 = vsub.f32 1.5, %v3405_v22 }
 0x850   : > { %3694 = vmatmul.bf16.gmra.mxu2 %v3510_v24  ;;  %3723 = vmatmul.bf16.gmra.mxu3 %v3510_v24  ;;  %v3440_v44 = vadd.f32 %v12950_v47, %v3429_v31 }
 0x851   : > { %3752 = vmatmul.bf16.gmra.mxu0 %v3510_v24  ;;  %3781 = vmatmul.bf16.gmra.mxu1 %v3510_v24  ;;  %v3407_v28 = vmul.f32 %v11348_v6, %v3406_v30 }
 0x852   : > { %4417 = vmatpush.bf16.msrb.mxu0 %v10848_v45  ;;  %v3448_v39 = vpack.c.bf16 %v3440_v44, %v3440_v44  ;;  %4449 = vmatpush.bf16.msrb.mxu1 %v10853_v46 }
 0x853   : > { %v3411_v42 = vsel %vm3410_vm9, %v11348_v6, %v3407_v28  ;;  %v10838_v6 = vld [vmem:[%s14843_s2 + $0x50] sm:$0xff]  ;;  %v10828_v28 = vld [vmem:[%s14843_s2] sm:$0xff] }
 0x854   : > { %v3419_v43 = vmul.f32 %v3411_v42, %v12938_v0  ;;  %v10847_v0 = vld [vmem:[%s14843_s2 + $0x98] sm:$0xff]  ;;  %v3506_v33 = vunpack.c.l.b16 %v3448_v39  ;;  %4363 = vmatpush.bf16.msrb.mxu2 %v10828_v28 }
 0x856   : > { %v3430_v49 = vmul.f32 %v12944_v35, %v3419_v43  ;;  %4418 = vmatpush.bf16.msrb.mxu0 %v10847_v0  ;;  %v10840_v35 = vld [vmem:[%s14843_s2 + $0x60] sm:$0xff]  ;;  %4450 = vmatpush.bf16.msrb.mxu1 %v10852_v54 }
 0x857   : > { %4388 = vmatpush.bf16.msra.mxu3 %v10840_v35 }
 0x858   : > { %v3441_v53 = vadd.f32 %v12950_v47, %v3430_v49 }
 0x85a   : > { %v3449_v57 = vpack.c.bf16 %v3441_v53, %v3441_v53  ;;  %4419 = vmatpush.bf16.msrb.mxu0 %v10846_v59 }
 0x85b   : > { %4389 = vmatpush.bf16.msra.mxu3 %v10839_v21 }
 0x85c   : > { %v3507_v25 = vunpack.c.l.b16 %v3449_v57 }
 0x85e   : > { %v3511_v47 = vpack.c.b16 %v3507_v25, %v3506_v33  ;;  %4420 = vmatpush.bf16.msrb.mxu0 %v10845_v63 }
 0x85f   : > { %4390 = vmatpush.bf16.msra.mxu3 %v10838_v6 }
 0x860   : > { %3699 = vmatmul.bf16.gmra.mxu2 %v3511_v47  ;;  %3728 = vmatmul.bf16.gmra.mxu3 %v3511_v47 }
 0x861   : > { %3757 = vmatmul.bf16.gmra.mxu0 %v3511_v47  ;;  %3786 = vmatmul.bf16.gmra.mxu1 %v3511_v47 }
 0x862   : > { %4421 = vmatpush.bf16.msrb.mxu0 %v10844_v58 }
 0x863   : > { %4391 = vmatpush.bf16.msra.mxu3 %v10837_v20 }
 0x864   : > { %v3743_v36 = vpop.f32.mrf.mxu0  ;;  %v3772_v14 = vpop.f32.mrf.mxu1 }
 0x865   : > { %v13008_v2 = vadd.f32 %v3743_v36, %v12999_v61  ;;  %v13011_v3 = vadd.f32 %v3772_v14, %v13001_v62 }
 0x867   : > { %v3794_v10 = vmul.f32 %v13008_v2, %v13008_v2  ;;  %v3795_v13 = vmul.f32 %v13011_v3, %v13011_v3  ;;  %4392 = vmatpush.bf16.msra.mxu3 %v10836_v12 }
 0x869   : > { %v3826_v15 = vmul.f32 %v3794_v10, %v13008_v2  ;;  %v3827_v8 = vmul.f32 %v3795_v13, %v13011_v3  ;;  %v3685_v17 = vpop.f32.mrf.mxu2  ;;  %v3714_v16 = vpop.f32.mrf.mxu3 }
 0x86a   : > { %v13030_v22 = vadd.f32 %v3685_v17, %v13015_v7  ;;  %v13033_v24 = vadd.f32 %v3714_v16, %v13017_v9 }
 0x86b   : > { %v3858_v56 = vmul.f32 0.044715, %v3826_v15  ;;  %v3859_v27 = vmul.f32 0.044715, %v3827_v8 }
 0x86c   : > { %v3792_v30 = vmul.f32 %v13030_v22, %v13030_v22  ;;  %v3793_v31 = vmul.f32 %v13033_v24, %v13033_v24  ;;  %v3745_v41 = vpop.f32.mrf.mxu0  ;;  %v3774_v34 = vpop.f32.mrf.mxu1 }
 0x86d   : > { %v3890_v40 = vadd.f32 %v3858_v56, %v13008_v2  ;;  %v3891_v42 = vadd.f32 %v3859_v27, %v13011_v3  ;;  %v13044_v43 = vadd.f32 %v3745_v41, %v12999_v61  ;;  %v13047_v44 = vadd.f32 %v3774_v34, %v13001_v62 }
 0x86e   : > { %v3824_v45 = vmul.f32 %v3792_v30, %v13030_v22  ;;  %v3825_v38 = vmul.f32 %v3793_v31, %v13033_v24 }
 0x86f   : > { %v3922_v49 = vmul.f32 0.7978846, %v3890_v40  ;;  %v3923_v51 = vmul.f32 0.7978846, %v3891_v42  ;;  %v3798_v52 = vmul.f32 %v13044_v43, %v13044_v43  ;;  %v3799_v53 = vmul.f32 %v13047_v44, %v13047_v44 }
 0x870   : > { %v3856_v39 = vmul.f32 0.044715, %v3824_v45  ;;  %v3857_v0 = vmul.f32 0.044715, %v3825_v38 }
 0x871   : > { %11349 = vtanh.f32 %v3922_v49  ;;  %v3830_v55 = vmul.f32 %v3798_v52, %v13044_v43  ;;  %v3831_v57 = vmul.f32 %v3799_v53, %v13047_v44  ;;  %v3687_v11 = vpop.f32.mrf.mxu2  ;;  %v3716_v35 = vpop.f32.mrf.mxu3 }
 0x872   : > { %11351 = vtanh.f32 %v3923_v51  ;;  %v3888_v33 = vadd.f32 %v3856_v39, %v13030_v22  ;;  %v3889_v25 = vadd.f32 %v3857_v0, %v13033_v24  ;;  %v13060_v47 = vadd.f32 %v3687_v11, %v13015_v7 }
 0x873   : > { %v3862_v32 = vmul.f32 0.044715, %v3830_v55  ;;  %v3863_v59 = vmul.f32 0.044715, %v3831_v57  ;;  %v13063_v60 = vadd.f32 %v3716_v35, %v13017_v9 }
 0x874   : > { %v3920_v1 = vmul.f32 0.7978846, %v3888_v33  ;;  %v3921_v21 = vmul.f32 0.7978846, %v3889_v25  ;;  %v3796_v63 = vmul.f32 %v13060_v47, %v13060_v47  ;;  %v3748_v46 = vpop.f32.mrf.mxu0  ;;  %v3777_v36 = vpop.f32.mrf.mxu1 }
 0x875   : > { %v3894_v14 = vadd.f32 %v3862_v32, %v13044_v43  ;;  %v3895_v4 = vadd.f32 %v3863_v59, %v13047_v44  ;;  %v3797_v6 = vmul.f32 %v13063_v60, %v13063_v60  ;;  %v13072_v10 = vadd.f32 %v3748_v46, %v12999_v61 }
 0x876   : > { %11353 = vtanh.f32 %v3920_v1  ;;  %v3828_v13 = vmul.f32 %v3796_v63, %v13060_v47  ;;  %v13076_v58 = vadd.f32 %v3777_v36, %v13001_v62 }
 0x877   : > { %v11350_v54 = vpop.eup %11349  ;;  %11355 = vtanh.f32 %v3921_v21  ;;  %v3926_v15 = vmul.f32 0.7978846, %v3894_v14  ;;  %v3927_v8 = vmul.f32 0.7978846, %v3895_v4  ;;  %v3829_v17 = vmul.f32 %v3797_v6, %v13063_v60 }
 0x878   : > { %v11352_v16 = vpop.eup %11351  ;;  %v3986_v18 = vadd.f32 1.0, %v11350_v54  ;;  %v3860_v20 = vmul.f32 0.044715, %v3828_v13  ;;  %v3802_v56 = vmul.f32 %v13072_v10, %v13072_v10  ;;  %v3803_v27 = vmul.f32 %v13076_v58, %v13076_v58 }
 0x879   : > { %v3987_v30 = vadd.f32 1.0, %v11352_v16  ;;  %11357 = vtanh.f32 %v3926_v15  ;;  %v3861_v31 = vmul.f32 0.044715, %v3829_v17  ;;  %v3690_v41 = vpop.f32.mrf.mxu2  ;;  %v3719_v34 = vpop.f32.mrf.mxu3 }
 0x87a   : > { %v4018_v28 = vmul.f32 0.5, %v3986_v18  ;;  %11359 = vtanh.f32 %v3927_v8  ;;  %v3892_v12 = vadd.f32 %v3860_v20, %v13060_v47  ;;  %v3834_v40 = vmul.f32 %v3802_v56, %v13072_v10 }
 0x87b   : > { %v4019_v42 = vmul.f32 0.5, %v3987_v30  ;;  %v3893_v45 = vadd.f32 %v3861_v31, %v13063_v60  ;;  %v3835_v38 = vmul.f32 %v3803_v27, %v13076_v58  ;;  %v13088_v49 = vadd.f32 %v3690_v41, %v13015_v7 }
 0x87c   : > { %v11354_v51 = vpop.eup %11353  ;;  %v13091_v52 = vmul.f32 %v4018_v28, %v13008_v2  ;;  %v3924_v53 = vmul.f32 0.7978846, %v3892_v12  ;;  %v3866_v39 = vmul.f32 0.044715, %v3834_v40  ;;  %v13094_v0 = vadd.f32 %v3719_v34, %v13017_v9  ;;  %v3750_v25 = vpop.f32.mrf.mxu0 }
 0x87d   : > { %v11356_v55 = vpop.eup %11355  ;;  %v4051_v57 = vmul.f32 %v4019_v42, %v13011_v3  ;;  %v3984_v11 = vadd.f32 1.0, %v11354_v51  ;;  %v3925_v35 = vmul.f32 0.7978846, %v3893_v45  ;;  %v3867_v33 = vmul.f32 0.044715, %v3835_v38  ;;  %v3779_v1 = vpop.f32.mrf.mxu1 }
 0x87e   : > { %v3985_v32 = vadd.f32 1.0, %v11356_v55  ;;  %11361 = vtanh.f32 %v3924_v53  ;;  %v3898_v59 = vadd.f32 %v3866_v39, %v13072_v10  ;;  %v3800_v2 = vmul.f32 %v13088_v49, %v13088_v49 }
 0x87f   : > { %v11358_v21 = vpop.eup %11357  ;;  %v4016_v63 = vmul.f32 0.5, %v3984_v11  ;;  %11363 = vtanh.f32 %v3925_v35  ;;  %v3899_v46 = vadd.f32 %v3867_v33, %v13076_v58  ;;  %v3801_v3 = vmul.f32 %v13094_v0, %v13094_v0 }
 0x880   : > { %v11360_v36 = vpop.eup %11359  ;;  %v4017_v14 = vmul.f32 0.5, %v3985_v32  ;;  %v3990_v4 = vadd.f32 1.0, %v11358_v21  ;;  %v3832_v6 = vmul.f32 %v3800_v2, %v13088_v49  ;;  %v13105_v13 = vadd.f32 %v3750_v25, %v12999_v61 }
 0x881   : > { %v4048_v54 = vmul.f32 %v4016_v63, %v13030_v22  ;;  %v3991_v15 = vadd.f32 1.0, %v11360_v36  ;;  %v3833_v8 = vmul.f32 %v3801_v3, %v13094_v0  ;;  %v13110_v17 = vadd.f32 %v3779_v1, %v13001_v62  ;;  %v3692_v16 = vpop.f32.mrf.mxu2  ;;  %v3721_v18 = vpop.f32.mrf.mxu3 }
 0x882   : > { %v4049_v20 = vmul.f32 %v4017_v14, %v13033_v24  ;;  %v4022_v56 = vmul.f32 0.5, %v3990_v4  ;;  %v3864_v27 = vmul.f32 0.044715, %v3832_v6  ;;  %v3806_v30 = vmul.f32 %v13105_v13, %v13105_v13 }
 0x883   : > { %v4023_v31 = vmul.f32 0.5, %v3991_v15  ;;  %v3865_v41 = vmul.f32 0.044715, %v3833_v8  ;;  %v3807_v22 = vmul.f32 %v13110_v17, %v13110_v17  ;;  %v13118_v34 = vadd.f32 %v3692_v16, %v13015_v7 }
 0x884   : > { %v11362_v28 = vpop.eup %11361  ;;  %v4054_v12 = vmul.f32 %v4022_v56, %v13044_v43  ;;  %v3896_v40 = vadd.f32 %v3864_v27, %v13088_v49  ;;  %v3838_v24 = vmul.f32 %v3806_v30, %v13105_v13  ;;  %v13124_v42 = vadd.f32 %v3721_v18, %v13017_v9 }
 0x885   : > { %v11364_v45 = vpop.eup %11363  ;;  %v4055_v38 = vmul.f32 %v4023_v31, %v13047_v44  ;;  %v3988_v51 = vadd.f32 1.0, %v11362_v28  ;;  %v3897_v53 = vadd.f32 %v3865_v41, %v13094_v0  ;;  %v3839_v39 = vmul.f32 %v3807_v22, %v13110_v17 }
 0x886   : > { %v3989_v55 = vadd.f32 1.0, %v11364_v45  ;;  %v3870_v11 = vmul.f32 0.044715, %v3838_v24  ;;  %v3804_v43 = vmul.f32 %v13118_v34, %v13118_v34  ;;  %v3805_v35 = vmul.f32 %v13124_v42, %v13124_v42 }
 0x887   : > { %v4020_v33 = vmul.f32 0.5, %v3988_v51  ;;  %v3871_v25 = vmul.f32 0.044715, %v3839_v39  ;;  %v4082_v32 = vpack.c.bf16 %v4054_v12, %v13091_v52  ;;  %v4083_v2 = vpack.c.bf16 %v4055_v38, %v4051_v57 }
 0x888   : > { %v4021_v1 = vmul.f32 0.5, %v3989_v55  ;;  %v3902_v44 = vadd.f32 %v3870_v11, %v13105_v13  ;;  %v3836_v21 = vmul.f32 %v3804_v43, %v13118_v34  ;;  %v3837_v63 = vmul.f32 %v3805_v35, %v13124_v42 }
 0x889   : > { %v4052_v3 = vmul.f32 %v4020_v33, %v13060_v47  ;;  %v3903_v36 = vadd.f32 %v3871_v25, %v13110_v17  ;;  %4422 = vmatmul.bf16.vlgmr.msrb.gmra.mxu0 %v4082_v32  ;;  %4451 = vmatmul.bf16.vlgmr.msrb.gmra.mxu1 %v4083_v2  ;;  %v3930_v14 = vmul.f32 0.7978846, %v3898_v59  ;;  %v3931_v4 = vmul.f32 0.7978846, %v3899_v46 }
 0x88a   : > { %v4053_v6 = vmul.f32 %v4021_v1, %v13063_v60  ;;  %v3868_v15 = vmul.f32 0.044715, %v3836_v21  ;;  %v3869_v52 = vmul.f32 0.044715, %v3837_v63  ;;  %v3934_v57 = vmul.f32 0.7978846, %v3902_v44 }
 0x88b   : > { %v4080_v8 = vpack.c.bf16 %v4052_v3, %v4048_v54  ;;  %11365 = vtanh.f32 %v3930_v14  ;;  %v3935_v16 = vmul.f32 0.7978846, %v3903_v36  ;;  %v3928_v18 = vmul.f32 0.7978846, %v3896_v40 }
 0x88c   : > { %v3900_v56 = vadd.f32 %v3868_v15, %v13118_v34  ;;  %v3901_v27 = vadd.f32 %v3869_v52, %v13124_v42  ;;  %v4081_v47 = vpack.c.bf16 %v4053_v6, %v4049_v20  ;;  %11367 = vtanh.f32 %v3934_v57 }
 0x88d   : > { %4364 = vmatmul.bf16.vlgmr.msrb.gmra.mxu2 %v4080_v8  ;;  %11369 = vtanh.f32 %v3931_v4  ;;  %v3929_v30 = vmul.f32 0.7978846, %v3897_v53 }
 0x88e   : > { %4393 = vmatmul.bf16.vlgmr.msra.gmra.mxu3 %v4081_v47  ;;  %11371 = vtanh.f32 %v3935_v16  ;;  %v3932_v59 = vmul.f32 0.7978846, %v3900_v56  ;;  %v3933_v60 = vmul.f32 0.7978846, %v3901_v27 }
 0x88f   : > { %11373 = vtanh.f32 %v3928_v18 }
 0x890   : > { %11375 = vtanh.f32 %v3932_v59 }
 0x891   : > { %v11366_v46 = vpop.eup %11365  ;;  %11377 = vtanh.f32 %v3929_v30 }
 0x892   : > { %v11368_v54 = vpop.eup %11367  ;;  %v3994_v31 = vadd.f32 1.0, %v11366_v46  ;;  %11379 = vtanh.f32 %v3933_v60 }
 0x893   : > { %v11370_v41 = vpop.eup %11369  ;;  %v3998_v22 = vadd.f32 1.0, %v11368_v54 }
 0x894   : > { %v11372_v28 = vpop.eup %11371  ;;  %v4026_v12 = vmul.f32 0.5, %v3994_v31  ;;  %v3995_v20 = vadd.f32 1.0, %v11370_v41 }
 0x895   : > { %v11374_v40 = vpop.eup %11373  ;;  %v4030_v24 = vmul.f32 0.5, %v3998_v22  ;;  %v3999_v45 = vadd.f32 1.0, %v11372_v28 }
 0x896   : > { %v11376_v38 = vpop.eup %11375  ;;  %v4027_v51 = vmul.f32 0.5, %v3995_v20  ;;  %v3992_v53 = vadd.f32 1.0, %v11374_v40  ;;  %v4058_v55 = vmul.f32 %v4026_v12, %v13072_v10 }
 0x897   : > { %v11378_v39 = vpop.eup %11377  ;;  %v4062_v11 = vmul.f32 %v4030_v24, %v13105_v13  ;;  %v4031_v43 = vmul.f32 0.5, %v3999_v45  ;;  %v3996_v35 = vadd.f32 1.0, %v11376_v38 }
 0x898   : > { %v11380_v33 = vpop.eup %11379  ;;  %v4059_v25 = vmul.f32 %v4027_v51, %v13076_v58  ;;  %v4024_v32 = vmul.f32 0.5, %v3992_v53  ;;  %v3993_v2 = vadd.f32 1.0, %v11378_v39 }
 0x899   : > { %v4086_v1 = vpack.c.bf16 %v4062_v11, %v4058_v55  ;;  %v4063_v44 = vmul.f32 %v4031_v43, %v13110_v17  ;;  %v4028_v21 = vmul.f32 0.5, %v3996_v35  ;;  %v3997_v63 = vadd.f32 1.0, %v11380_v33 }
 0x89a   : > { %v4025_v3 = vmul.f32 0.5, %v3993_v2  ;;  %v4056_v14 = vmul.f32 %v4024_v32, %v13088_v49 }
 0x89b   : > { %4427 = vmatmul.bf16.gmra.mxu0 %v4086_v1  ;;  %v4087_v36 = vpack.c.bf16 %v4063_v44, %v4059_v25  ;;  %v4060_v10 = vmul.f32 %v4028_v21, %v13118_v34  ;;  %v4029_v13 = vmul.f32 0.5, %v3997_v63 }
 0x89c   : > { %v4057_v6 = vmul.f32 %v4025_v3, %v13094_v0 }
 0x89d   : > { %4456 = vmatmul.bf16.gmra.mxu1 %v4087_v36  ;;  %v4084_v4 = vpack.c.bf16 %v4060_v10, %v4056_v14  ;;  %v4061_v58 = vmul.f32 %v4029_v13, %v13124_v42 }
 0x89f   : > { %4369 = vmatmul.bf16.gmra.mxu2 %v4084_v4  ;;  %v4085_v15 = vpack.c.bf16 %v4061_v58, %v4057_v6 }
 0x8a1   : > { %4398 = vmatmul.bf16.gmra.mxu3 %v4085_v15 }
 0x8ce   : > { %v3753_v17 = vpop.f32.mrf.mxu0  ;;  %v3782_v52 = vpop.f32.mrf.mxu1 }
 0x8cf   : > { %v13151_v57 = vadd.f32 %v3753_v17, %v12999_v61  ;;  %v13154_v8 = vadd.f32 %v3782_v52, %v13001_v62 }
 0x8d1   : > { %v3810_v49 = vmul.f32 %v13151_v57, %v13151_v57  ;;  %v3811_v34 = vmul.f32 %v13154_v8, %v13154_v8 }
 0x8d3   : > { %v3842_v0 = vmul.f32 %v3810_v49, %v13151_v57  ;;  %v3843_v42 = vmul.f32 %v3811_v34, %v13154_v8  ;;  %v3695_v16 = vpop.f32.mrf.mxu2  ;;  %v3724_v18 = vpop.f32.mrf.mxu3 }
 0x8d4   : > { %v13163_v56 = vadd.f32 %v3695_v16, %v13015_v7  ;;  %v13166_v27 = vadd.f32 %v3724_v18, %v13017_v9 }
 0x8d5   : > { %v3874_v47 = vmul.f32 0.044715, %v3842_v0  ;;  %v3875_v30 = vmul.f32 0.044715, %v3843_v42 }
 0x8d6   : > { %v3808_v59 = vmul.f32 %v13163_v56, %v13163_v56  ;;  %v3809_v60 = vmul.f32 %v13166_v27, %v13166_v27  ;;  %v3755_v46 = vpop.f32.mrf.mxu0  ;;  %v3784_v54 = vpop.f32.mrf.mxu1 }
 0x8d7   : > { %v3906_v31 = vadd.f32 %v3874_v47, %v13151_v57  ;;  %v3907_v41 = vadd.f32 %v3875_v30, %v13154_v8  ;;  %v13175_v22 = vadd.f32 %v3755_v46, %v12999_v61  ;;  %v13178_v28 = vadd.f32 %v3784_v54, %v13001_v62 }
 0x8d8   : > { %v3840_v12 = vmul.f32 %v3808_v59, %v13163_v56  ;;  %v3841_v20 = vmul.f32 %v3809_v60, %v13166_v27 }
 0x8d9   : > { %v3938_v40 = vmul.f32 0.7978846, %v3906_v31  ;;  %v3814_v24 = vmul.f32 %v13175_v22, %v13175_v22  ;;  %v3815_v45 = vmul.f32 %v13178_v28, %v13178_v28  ;;  %v3939_v38 = vmul.f32 0.7978846, %v3907_v41 }
 0x8da   : > { %v3872_v51 = vmul.f32 0.044715, %v3840_v12  ;;  %v3873_v53 = vmul.f32 0.044715, %v3841_v20 }
 0x8db   : > { %11381 = vtanh.f32 %v3938_v40  ;;  %v3846_v39 = vmul.f32 %v3814_v24, %v13175_v22  ;;  %v3847_v55 = vmul.f32 %v3815_v45, %v13178_v28  ;;  %v3697_v11 = vpop.f32.mrf.mxu2  ;;  %v3726_v43 = vpop.f32.mrf.mxu3 }
 0x8dc   : > { %v3904_v35 = vadd.f32 %v3872_v51, %v13163_v56  ;;  %v3905_v33 = vadd.f32 %v3873_v53, %v13166_v27  ;;  %v13191_v25 = vadd.f32 %v3697_v11, %v13015_v7  ;;  %v13194_v1 = vadd.f32 %v3726_v43, %v13017_v9 }
 0x8dd   : > { %v3878_v32 = vmul.f32 0.044715, %v3846_v39  ;;  %v3879_v2 = vmul.f32 0.044715, %v3847_v55  ;;  %11383 = vtanh.f32 %v3939_v38 }
 0x8de   : > { %v3936_v44 = vmul.f32 0.7978846, %v3904_v35  ;;  %v3812_v21 = vmul.f32 %v13191_v25, %v13191_v25  ;;  %v3813_v36 = vmul.f32 %v13194_v1, %v13194_v1  ;;  %v3758_v14 = vpop.f32.mrf.mxu0  ;;  %v3787_v10 = vpop.f32.mrf.mxu1  ;;  %v3937_v13 = vmul.f32 0.7978846, %v3905_v33 }
 0x8df   : > { %v3910_v63 = vadd.f32 %v3878_v32, %v13175_v22  ;;  %v3911_v3 = vadd.f32 %v3879_v2, %v13178_v28  ;;  %v13204_v6 = vadd.f32 %v3758_v14, %v12999_v61  ;;  %v13207_v58 = vadd.f32 %v3787_v10, %v13001_v62 }
 0x8e0   : > { %v3844_v4 = vmul.f32 %v3812_v21, %v13191_v25  ;;  %11385 = vtanh.f32 %v3936_v44  ;;  %v3845_v49 = vmul.f32 %v3813_v36, %v13194_v1 }
 0x8e1   : > { %v11382_v15 = vpop.eup %11381  ;;  %v3942_v17 = vmul.f32 0.7978846, %v3910_v63  ;;  %v3943_v52 = vmul.f32 0.7978846, %v3911_v3  ;;  %v3818_v0 = vmul.f32 %v13204_v6, %v13204_v6  ;;  %v3819_v42 = vmul.f32 %v13207_v58, %v13207_v58 }
 0x8e2   : > { %v3876_v34 = vmul.f32 0.044715, %v3844_v4  ;;  %v4002_v16 = vadd.f32 1.0, %v11382_v15  ;;  %v3877_v18 = vmul.f32 0.044715, %v3845_v49 }
 0x8e3   : > { %11387 = vtanh.f32 %v3942_v17  ;;  %v11384_v47 = vpop.eup %11383  ;;  %v3850_v59 = vmul.f32 %v3818_v0, %v13204_v6  ;;  %v3851_v60 = vmul.f32 %v3819_v42, %v13207_v58  ;;  %v3700_v46 = vpop.f32.mrf.mxu2 }
 0x8e4   : > { %11389 = vtanh.f32 %v3943_v52  ;;  %v3908_v30 = vadd.f32 %v3876_v34, %v13191_v25  ;;  %v3729_v54 = vpop.f32.mrf.mxu3  ;;  %v3909_v31 = vadd.f32 %v3877_v18, %v13194_v1  ;;  %v13219_v41 = vadd.f32 %v3700_v46, %v13015_v7 }
 0x8e5   : > { %v13222_v12 = vadd.f32 %v3729_v54, %v13017_v9  ;;  %v4034_v20 = vmul.f32 0.5, %v4002_v16  ;;  %11391 = vtanh.f32 %v3937_v13  ;;  %v3882_v24 = vmul.f32 0.044715, %v3850_v59 }
 0x8e6   : > { %v3940_v40 = vmul.f32 0.7978846, %v3908_v30  ;;  %v3883_v45 = vmul.f32 0.044715, %v3851_v60  ;;  %v11386_v38 = vpop.eup %11385  ;;  %v3941_v51 = vmul.f32 0.7978846, %v3909_v31  ;;  %v3816_v53 = vmul.f32 %v13219_v41, %v13219_v41  ;;  %v3760_v55 = vpop.f32.mrf.mxu0 }
 0x8e7   : > { %v3817_v39 = vmul.f32 %v13222_v12, %v13222_v12  ;;  %v3789_v11 = vpop.f32.mrf.mxu1  ;;  %v4003_v43 = vadd.f32 1.0, %v11384_v47  ;;  %v3914_v35 = vadd.f32 %v3882_v24, %v13204_v6  ;;  %v13231_v32 = vadd.f32 %v3760_v55, %v12999_v61 }
 0x8e8   : > { %v3915_v33 = vadd.f32 %v3883_v45, %v13207_v58  ;;  %v4066_v2 = vmul.f32 %v4034_v20, %v13151_v57  ;;  %11393 = vtanh.f32 %v3940_v40  ;;  %v3848_v21 = vmul.f32 %v3816_v53, %v13219_v41 }
 0x8e9   : > { %v11388_v44 = vpop.eup %11387  ;;  %v3849_v63 = vmul.f32 %v3817_v39, %v13222_v12  ;;  %v13237_v3 = vadd.f32 %v3789_v11, %v13001_v62  ;;  %11395 = vtanh.f32 %v3941_v51  ;;  %v3946_v14 = vmul.f32 0.7978846, %v3914_v35 }
 0x8ea   : > { %v11390_v36 = vpop.eup %11389  ;;  %v3822_v10 = vmul.f32 %v13231_v32, %v13231_v32  ;;  %v4006_v13 = vadd.f32 1.0, %v11388_v44  ;;  %v3947_v61 = vmul.f32 0.7978846, %v3915_v33  ;;  %v3880_v4 = vmul.f32 0.044715, %v3848_v21 }
 0x8eb   : > { %v3881_v15 = vmul.f32 0.044715, %v3849_v63  ;;  %v3823_v57 = vmul.f32 %v13237_v3, %v13237_v3  ;;  %v11392_v17 = vpop.eup %11391  ;;  %11397 = vtanh.f32 %v3946_v14  ;;  %v3702_v49 = vpop.f32.mrf.mxu2  ;;  %v4007_v0 = vadd.f32 1.0, %v11390_v36 }
 0x8ec   : > { %v3854_v52 = vmul.f32 %v3822_v10, %v13231_v32  ;;  %v3731_v62 = vpop.f32.mrf.mxu3  ;;  %v4038_v34 = vmul.f32 0.5, %v4006_v13  ;;  %v3912_v42 = vadd.f32 %v3880_v4, %v13219_v41  ;;  %v4035_v47 = vmul.f32 0.5, %v4003_v43 }
 0x8ed   : > { %v3913_v16 = vadd.f32 %v3881_v15, %v13222_v12  ;;  %v3855_v18 = vmul.f32 %v3823_v57, %v13237_v3  ;;  %v13248_v59 = vadd.f32 %v3702_v49, %v13015_v7  ;;  %v13251_v60 = vadd.f32 %v3731_v62, %v13017_v9 }
 0x8ee   : > { %v3886_v30 = vmul.f32 0.044715, %v3854_v52  ;;  %v4070_v46 = vmul.f32 %v4038_v34, %v13175_v22  ;;  %v11394_v54 = vpop.eup %11393  ;;  %11399 = vtanh.f32 %v3947_v61  ;;  %v3944_v31 = vmul.f32 0.7978846, %v3912_v42 }
 0x8ef   : > { %v3945_v20 = vmul.f32 0.7978846, %v3913_v16  ;;  %v3887_v40 = vmul.f32 0.044715, %v3855_v18  ;;  %v11396_v24 = vpop.eup %11395  ;;  %v3820_v51 = vmul.f32 %v13248_v59, %v13248_v59  ;;  %v3821_v7 = vmul.f32 %v13251_v60, %v13251_v60 }
 0x8f0   : > { %v3918_v45 = vadd.f32 %v3886_v30, %v13231_v32  ;;  %v4090_v53 = vpack.c.bf16 %v4070_v46, %v4066_v2  ;;  %v4039_v39 = vmul.f32 0.5, %v4007_v0  ;;  %v4067_v22 = vmul.f32 %v4035_v47, %v13154_v8 }
 0x8f1   : > { %v3919_v9 = vadd.f32 %v3887_v40, %v13237_v3  ;;  %v4000_v55 = vadd.f32 1.0, %v11386_v38  ;;  %v11398_v11 = vpop.eup %11397  ;;  %11401 = vtanh.f32 %v3944_v31  ;;  %v3852_v35 = vmul.f32 %v3820_v51, %v13248_v59 }
 0x8f2   : > { %v3950_v43 = vmul.f32 0.7978846, %v3918_v45  ;;  %v3853_v33 = vmul.f32 %v3821_v7, %v13251_v60  ;;  %4432 = vmatmul.bf16.gmra.mxu0 %v4090_v53  ;;  %v4071_v21 = vmul.f32 %v4039_v39, %v13178_v28  ;;  %v4004_v63 = vadd.f32 1.0, %v11394_v54 }
 0x8f3   : > { %v3951_v44 = vmul.f32 0.7978846, %v3919_v9  ;;  %v4032_v36 = vmul.f32 0.5, %v4000_v55  ;;  %v3884_v2 = vmul.f32 0.044715, %v3852_v35  ;;  %v4001_v10 = vadd.f32 1.0, %v11392_v17 }
 0x8f4   : > { %11403 = vtanh.f32 %v3950_v43  ;;  %v3885_v14 = vmul.f32 0.044715, %v3853_v33  ;;  %v11400_v13 = vpop.eup %11399  ;;  %v4091_v8 = vpack.c.bf16 %v4071_v21, %v4067_v22  ;;  %v4036_v38 = vmul.f32 0.5, %v4004_v63 }
 0x8f5   : > { %11405 = vtanh.f32 %v3951_v44  ;;  %v3916_v61 = vadd.f32 %v3884_v2, %v13248_v59  ;;  %v4005_v15 = vadd.f32 1.0, %v11396_v24  ;;  %v4033_v57 = vmul.f32 0.5, %v4001_v10 }
 0x8f6   : > { %v3917_v4 = vadd.f32 %v3885_v14, %v13251_v60  ;;  %11407 = vtanh.f32 %v3945_v20  ;;  %4461 = vmatmul.bf16.gmra.mxu1 %v4091_v8  ;;  %v4064_v28 = vmul.f32 %v4032_v36, %v13163_v56  ;;  %v4068_v52 = vmul.f32 %v4036_v38, %v13191_v25  ;;  %v13279_v14 = vld [vmem:[%s14845_s9] ss:$0 sm:$0xff] }
 0x8f7   : > { %v4010_v49 = vadd.f32 1.0, %v11398_v11  ;;  %v11402_v62 = vpop.eup %11401  ;;  %v3948_v34 = vmul.f32 0.7978846, %v3916_v61  ;;  %v4037_v0 = vmul.f32 0.5, %v4005_v15  ;;  %v4011_v16 = vadd.f32 1.0, %v11400_v13 }
 0x8f8   : > { %v3949_v17 = vmul.f32 0.7978846, %v3917_v4  ;;  %v4088_v42 = vpack.c.bf16 %v4068_v52, %v4064_v28  ;;  %v4065_v47 = vmul.f32 %v4033_v57, %v13166_v27  ;;  %v4008_v45 = vadd.f32 1.0, %v11402_v62 }
 0x8f9   : > { %11409 = vtanh.f32 %v3948_v34  ;;  %v4069_v30 = vmul.f32 %v4037_v0, %v13194_v1  ;;  %v4042_v56 = vmul.f32 0.5, %v4010_v49  ;;  %v4043_v24 = vmul.f32 0.5, %v4011_v16 }
 0x8fa   : > { %v11404_v18 = vpop.eup %11403  ;;  %11411 = vtanh.f32 %v3949_v17  ;;  %4374 = vmatmul.bf16.gmra.mxu2 %v4088_v42  ;;  %v4040_v43 = vmul.f32 0.5, %v4008_v45 }
 0x8fb   : > { %v11406_v46 = vpop.eup %11405  ;;  %v4014_v54 = vadd.f32 1.0, %v11404_v18  ;;  %v4089_v31 = vpack.c.bf16 %v4069_v30, %v4065_v47  ;;  %v4074_v7 = vmul.f32 %v4042_v56, %v13204_v6  ;;  %v4075_v55 = vmul.f32 %v4043_v24, %v13207_v58 }
 0x8fc   : > { %v4015_v25 = vadd.f32 1.0, %v11406_v46  ;;  %v11408_v20 = vpop.eup %11407  ;;  %v4072_v6 = vmul.f32 %v4040_v43, %v13219_v41 }
 0x8fd   : > { %v4046_v40 = vmul.f32 0.5, %v4014_v54  ;;  %4403 = vmatmul.bf16.gmra.mxu3 %v4089_v31  ;;  %v4009_v9 = vadd.f32 1.0, %v11408_v20 }
 0x8fe   : > { %v4047_v51 = vmul.f32 0.5, %v4015_v25 }
 0x8ff   : > { %v4078_v53 = vmul.f32 %v4046_v40, %v13231_v32  ;;  %v11410_v27 = vpop.eup %11409  ;;  %v4041_v21 = vmul.f32 0.5, %v4009_v9 }
 0x900   : > { %v4079_v1 = vmul.f32 %v4047_v51, %v13237_v3  ;;  %v11412_v39 = vpop.eup %11411  ;;  %v4012_v11 = vadd.f32 1.0, %v11410_v27 }
 0x901   : > { %v4094_v22 = vpack.c.bf16 %v4078_v53, %v4074_v7  ;;  %v4013_v35 = vadd.f32 1.0, %v11412_v39  ;;  %v4073_v2 = vmul.f32 %v4041_v21, %v13222_v12 }
 0x902   : > { %v4095_v33 = vpack.c.bf16 %v4079_v1, %v4075_v55  ;;  %v4044_v44 = vmul.f32 0.5, %v4012_v11 }
 0x903   : > { %4437 = vmatmul.bf16.gmra.mxu0 %v4094_v22  ;;  %v4045_v63 = vmul.f32 0.5, %v4013_v35 }
 0x904   : > { %v4076_v32 = vmul.f32 %v4044_v44, %v13248_v59 }
 0x905   : > { %v4077_v3 = vmul.f32 %v4045_v63, %v13251_v60 }
 0x906   : > { %4466 = vmatmul.bf16.gmra.mxu1 %v4095_v33  ;;  %v4092_v36 = vpack.c.bf16 %v4076_v32, %v4072_v6  ;;  %v4423_v10 = vpop.f32.mrf.mxu0  ;;  %v4452_v41 = vpop.f32.mrf.mxu1 }
 0x907   : > { %v4093_v58 = vpack.c.bf16 %v4077_v3, %v4073_v2 }
 0x90a   : > { %4379 = vmatmul.bf16.gmra.mxu2 %v4092_v36 }
 0x90d   : > { %4408 = vmatmul.bf16.gmra.mxu3 %v4093_v58 }
 0x90e   : > { %v4425_v57 = vpop.f32.mrf.mxu0  ;;  %v4454_v49 = vpop.f32.mrf.mxu1 }
 0x910   : > { %v4365_v13 = vpop.f32.mrf.mxu2 }
 0x911   : > { %v4366_v8 = vadd.f32 %v13279_v14, %v4365_v13  ;;  %v4394_v38 = vpop.f32.mrf.mxu3 }
 0x913   : > { %v4395_v59 = vadd.f32 %v4394_v38, %v4366_v8 }
 0x915   : > { %v4424_v61 = vadd.f32 %v4423_v10, %v4395_v59 }
 0x917   : > { %v4453_v60 = vadd.f32 %v4452_v41, %v4424_v61 }
 0x918   : > { %v4367_v4 = vpop.f32.mrf.mxu2  ;;  %v4428_v16 = vpop.f32.mrf.mxu0 }
 0x919   : > { %v4472_v15 = vadd.f32 %v4453_v60, %v12797_v48  ;;  %v4368_v12 = vadd.f32 %v13279_v14, %v4367_v4  ;;  %v4396_v28 = vpop.f32.mrf.mxu3 }
 0x91a   : > { %v4457_v47 = vpop.f32.mrf.mxu1 }
 0x91b   : > { %4480 = vst [vmem:[%s14828_s17] sm:$0xff] %v4472_v15  ;;  %v4397_v52 = vadd.f32 %v4396_v28, %v4368_v12 }
 0x91d   : > { %v4426_v62 = vadd.f32 %v4425_v57, %v4397_v52 }
 0x91f   : > { %v4455_v34 = vadd.f32 %v4454_v49, %v4426_v62 }
 0x921   : > { %v4473_v17 = vadd.f32 %v4455_v34, %v12801_v5  ;;  %v4430_v5 = vpop.f32.mrf.mxu0 }
 0x922   : > { %v4370_v0 = vpop.f32.mrf.mxu2  ;;  %v4459_v24 = vpop.f32.mrf.mxu1 }
 0x923   : > { %4481 = vst [vmem:[%s14828_s17 + $0x8] sm:$0xff] %v4473_v17  ;;  %v4371_v42 = vadd.f32 %v13279_v14, %v4370_v0 }
 0x924   : > { %v4399_v18 = vpop.f32.mrf.mxu3 }
 0x925   : > { %v4400_v48 = vadd.f32 %v4399_v18, %v4371_v42 }
 0x927   : > { %v4429_v30 = vadd.f32 %v4428_v16, %v4400_v48 }
 0x929   : > { %v4458_v46 = vadd.f32 %v4457_v47, %v4429_v30 }
 0x92a   : > { %v4372_v54 = vpop.f32.mrf.mxu2 }
 0x92b   : > { %v4474_v56 = vadd.f32 %v4458_v46, %v12805_v19  ;;  %v4373_v31 = vadd.f32 %v13279_v14, %v4372_v54 }
 0x92c   : > { %v4401_v25 = vpop.f32.mrf.mxu3 }
 0x92d   : > { %4482 = vst [vmem:[%s14828_s17 + $0x10] sm:$0xff] %v4474_v56  ;;  %v4402_v20 = vadd.f32 %v4401_v25, %v4373_v31 }
 0x92f   : > { %v4431_v40 = vadd.f32 %v4430_v5, %v4402_v20 }
 0x931   : > { %v4460_v45 = vadd.f32 %v4459_v24, %v4431_v40 }
 0x933   : > { %v4475_v51 = vadd.f32 %v4460_v45, %v12809_v23 }
 0x935   : > { %4486 = vst [vmem:[%s14829_s13] sm:$0xff] %v4475_v51 }
 0x96f   : > { %v4433_v7 = vpop.f32.mrf.mxu0 }
 0x973   : > { %v4462_v27 = vpop.f32.mrf.mxu1 }
 0x977   : > { %v4435_v11 = vpop.f32.mrf.mxu0 }
 0x97b   : > { %v4464_v33 = vpop.f32.mrf.mxu1 }
 0x97d   : > { %v4375_v53 = vpop.f32.mrf.mxu2 }
 0x97e   : > { %v4376_v1 = vadd.f32 %v13279_v14, %v4375_v53 }
 0x980   : > { %v4404_v9 = vpop.f32.mrf.mxu3  ;;  %v4438_v36 = vpop.f32.mrf.mxu0 }
 0x981   : > { %v4405_v19 = vadd.f32 %v4404_v9, %v4376_v1 }
 0x983   : > { %v4434_v39 = vadd.f32 %v4433_v7, %v4405_v19  ;;  %v4467_v10 = vpop.f32.mrf.mxu1 }
 0x985   : > { %v4463_v22 = vadd.f32 %v4462_v27, %v4434_v39  ;;  %v4377_v55 = vpop.f32.mrf.mxu2 }
 0x986   : > { %v4378_v43 = vadd.f32 %v13279_v14, %v4377_v55 }
 0x987   : > { %v4476_v35 = vadd.f32 %v4463_v22, %v12813_v29 }
 0x988   : > { %v4406_v23 = vpop.f32.mrf.mxu3  ;;  %v4440_v60 = vpop.f32.mrf.mxu0 }
 0x989   : > { %4483 = vst [vmem:[%s14828_s17 + $0x18] sm:$0xff] %v4476_v35  ;;  %v4407_v44 = vadd.f32 %v4406_v23, %v4378_v43 }
 0x98b   : > { %v4436_v21 = vadd.f32 %v4435_v11, %v4407_v44  ;;  %v4469_v15 = vpop.f32.mrf.mxu1 }
 0x98d   : > { %v4465_v63 = vadd.f32 %v4464_v33, %v4436_v21  ;;  %v4380_v6 = vpop.f32.mrf.mxu2 }
 0x98e   : > { %v4381_v32 = vadd.f32 %v13279_v14, %v4380_v6 }
 0x98f   : > { %v4477_v3 = vadd.f32 %v4465_v63, %v12817_v37 }
 0x990   : > { %v4409_v2 = vpop.f32.mrf.mxu3 }
 0x991   : > { %4484 = vst [vmem:[%s14828_s17 + $0x20] sm:$0xff] %v4477_v3  ;;  %v4410_v58 = vadd.f32 %v4409_v2, %v4381_v32 }
 0x993   : > { %v4439_v13 = vadd.f32 %v4438_v36, %v4410_v58 }
 0x995   : > { %v4468_v29 = vadd.f32 %v4467_v10, %v4439_v13  ;;  %v4382_v8 = vpop.f32.mrf.mxu2 }
 0x996   : > { %v4383_v38 = vadd.f32 %v13279_v14, %v4382_v8 }
 0x997   : > { %v4478_v41 = vadd.f32 %v4468_v29, %v12825_v26 }
 0x998   : > { %v4411_v59 = vpop.f32.mrf.mxu3 }
 0x999   : > { %4485 = vst [vmem:[%s14828_s17 + $0x28] sm:$0xff] %v4478_v41  ;;  %v4412_v61 = vadd.f32 %v4411_v59, %v4383_v38 }
 0x99b   : > { %v4441_v4 = vadd.f32 %v4440_v60, %v4412_v61 }
 0x99d   : > { %v4470_v37 = vadd.f32 %v4469_v15, %v4441_v4 }
 0x99f   : > { %v4479_v12 = vadd.f32 %v4470_v37, %v12835_v50 }
 0x9a1   : > { %4487 = vst [vmem:[%s14829_s13 + $0x8] sm:$0xff] %v4479_v12 }
 0x9a2 PF: > { %4490 = sbr.rel (%p12558_p4) target bundleno = 6357 (0x18d5), region = 236  ;;  %s14846_s7 = sld [smem:[#allocation75_spill]] (!%p12558_p4) }
 0x9a3   : > { %s14847_s22 = sld [smem:[#allocation63_spill]] (!%p12558_p4) }
 0x9a4   : > { %s14848_s17 = sld [smem:[#allocation76_spill]] (!%p12558_p4) }
 0x9a5   : > { %s14851_s13 = sld [smem:[#allocation79_spill]] (!%p12558_p4) }
 0x9a6   : > { %s14852_s25 = sld [smem:[#allocation80_spill]] (!%p12558_p4) }
 0x9a7   : > { %s14853_s15 = sld [smem:[#allocation84_spill]] }
 0x9a8   : > { %v9808_v26 = vld [vmem:[%s14846_s7 + $0x70] sm:$0xf]  ;;  %v10875_v14 = vld [vmem:[%s14846_s7 + $0x74] sm:$0xf0]  ;;  %v10874_v50 = vld [vmem:[%s14846_s7 + $0x74] sm:$0xf] }
 0x9a9   : > { %v9809_v57 = vor.u32 %v10875_v14, %v9808_v26  ;;  %v9810_v28 = vld [vmem:[%s14846_s7 + $0x78] sm:$0xf0]  ;;  %v9800_v52 = vld [vmem:[%s14846_s7 + $0x60] sm:$0xf]  ;;  %v10873_v49 = vld [vmem:[%s14846_s7 + $0x64] sm:$0xf0] }
 0x9aa   : > { %v9813_v62 = vor.u32 %v10874_v50, %v9810_v28  ;;  %v10872_v34 = vld [vmem:[%s14846_s7 + $0x64] sm:$0xf]  ;;  %v9802_v17 = vld [vmem:[%s14846_s7 + $0x68] sm:$0xf0]  ;;  %v9801_v0 = vor.u32 %v10873_v49, %v9800_v52  ;;  %v9792_v16 = vld [vmem:[%s14846_s7 + $0x50] sm:$0xf] }
 0x9ab   : > { %4623 = vmatpush.bf16.msra.mxu0 %v9809_v57  ;;  %v9805_v42 = vor.u32 %v10872_v34, %v9802_v17  ;;  %v10871_v18 = vld [vmem:[%s14846_s7 + $0x54] sm:$0xf0]  ;;  %v10870_v48 = vld [vmem:[%s14846_s7 + $0x54] sm:$0xf]  ;;  %v9794_v47 = vld [vmem:[%s14846_s7 + $0x58] sm:$0xf0] }
 0x9ac   : > { %4647 = vmatpush.bf16.msra.mxu1 %v9813_v62  ;;  %v9793_v30 = vor.u32 %v10871_v18, %v9792_v16  ;;  %v9797_v46 = vor.u32 %v10870_v48, %v9794_v47  ;;  %v9784_v54 = vld [vmem:[%s14846_s7 + $0x40] sm:$0xf]  ;;  %v10869_v56 = vld [vmem:[%s14846_s7 + $0x44] sm:$0xf0]  ;;  %v10868_v31 = vld [vmem:[%s14846_s7 + $0x44] sm:$0xf] }
 0x9ad   : > { %v9786_v25 = vld [vmem:[%s14846_s7 + $0x48] sm:$0xf0]  ;;  %v9776_v20 = vld [vmem:[%s14846_s7 + $0x30] sm:$0xf]  ;;  %v9785_v5 = vor.u32 %v10869_v56, %v9784_v54  ;;  %v10867_v40 = vld [vmem:[%s14846_s7 + $0x34] sm:$0xf0] }
 0x9ae   : > { %v10866_v24 = vld [vmem:[%s14846_s7 + $0x34] sm:$0xf]  ;;  %v9778_v45 = vld [vmem:[%s14846_s7 + $0x38] sm:$0xf0]  ;;  %v9789_v51 = vor.u32 %v10868_v31, %v9786_v25  ;;  %v9768_v7 = vld [vmem:[%s14846_s7 + $0x20] sm:$0xf]  ;;  %v9777_v27 = vor.u32 %v10867_v40, %v9776_v20 }
 0x9af   : > { %4624 = vmatpush.bf16.msra.mxu0 %v9801_v0  ;;  %v10865_v53 = vld [vmem:[%s14846_s7 + $0x24] sm:$0xf0]  ;;  %v10864_v1 = vld [vmem:[%s14846_s7 + $0x24] sm:$0xf]  ;;  %v9770_v9 = vld [vmem:[%s14846_s7 + $0x28] sm:$0xf0]  ;;  %v9781_v19 = vor.u32 %v10866_v24, %v9778_v45 }
 0x9b0   : > { %4648 = vmatpush.bf16.msra.mxu1 %v9805_v42  ;;  %v9769_v39 = vor.u32 %v10865_v53, %v9768_v7  ;;  %v4491_v22 = vld [vmem:[%s14847_s22] sm:$0xff]  ;;  %v4492_v55 = vld [vmem:[%s14847_s22 + $0x8] sm:$0xff]  ;;  %v9773_v11 = vor.u32 %v10864_v1, %v9770_v9  ;;  %v9760_v43 = vld [vmem:[%s14846_s7 + $0x10] sm:$0xf]  ;;  %s14854_s20 = sld [smem:[#allocation26_spill]] }
 0x9b1   : > { %v10863_v35 = vld [vmem:[%s14846_s7 + $0x14] sm:$0xf0]  ;;  %v10862_v33 = vld [vmem:[%s14846_s7 + $0x14] sm:$0xf]  ;;  %v9762_v23 = vld [vmem:[%s14846_s7 + $0x18] sm:$0xf0]  ;;  %v4497_v44 = vpack.c.bf16 %v4491_v22, %v4491_v22  ;;  %v4498_v21 = vpack.c.bf16 %v4492_v55, %v4492_v55 }
 0x9b2   : > { %v9761_v63 = vor.u32 %v10863_v35, %v9760_v43  ;;  %v9765_v6 = vor.u32 %v10862_v33, %v9762_v23  ;;  %v9752_v32 = vld [vmem:[%s14846_s7] sm:$0xf]  ;;  %v10861_v3 = vld [vmem:[%s14846_s7 + $0x4] sm:$0xf0]  ;;  %v10860_v36 = vld [vmem:[%s14846_s7 + $0x4] sm:$0xf] }
 0x9b3   : > { %4625 = vmatpush.bf16.msra.mxu0 %v9793_v30  ;;  %v9754_v2 = vld [vmem:[%s14846_s7 + $0x8] sm:$0xf0]  ;;  %v4531_v58 = vunpack.c.l.b16 %v4497_v44  ;;  %v4532_v10 = vunpack.c.l.b16 %v4498_v21  ;;  %v9753_v13 = vor.u32 %v10861_v3, %v9752_v32  ;;  %v4493_v38 = vld [vmem:[%s14847_s22 + $0x10] sm:$0xff]  ;;  %v4494_v41 = vld [vmem:[%s14847_s22 + $0x18] sm:$0xff]  ;;  %s14855_s11 = sld [smem:[#allocation72_spill]] }
 0x9b4   : > { %4649 = vmatpush.bf16.msra.mxu1 %v9797_v46  ;;  %v9757_v29 = vor.u32 %v10860_v36, %v9754_v2  ;;  %v10883_v59 = vld [vmem:[%s14848_s17 + $0x38] sm:$0xff]  ;;  %v10882_v61 = vld [vmem:[%s14848_s17 + $0x30] sm:$0xff]  ;;  %v4499_v60 = vpack.c.bf16 %v4493_v38, %v4493_v38  ;;  %v4500_v4 = vpack.c.bf16 %v4494_v41, %v4494_v41  ;;  %v10881_v15 = vld [vmem:[%s14848_s17 + $0x28] sm:$0xff]  ;;  %s14856_s28 = sld [smem:[#allocation81_spill]] }
 0x9b5   : > { %v4537_v8 = vpack.c.b16 %v4532_v10, %v4531_v58  ;;  %4772 = vmatpush.bf16.msra.mxu2 %v10883_v59  ;;  %v10880_v26 = vld [vmem:[%s14848_s17 + $0x20] sm:$0xff]  ;;  %v4496_v57 = vld [vmem:[%s14847_s22 + $0x28] sm:$0xff]  ;;  %v10879_v17 = vld [vmem:[%s14848_s17 + $0x18] sm:$0xff]  ;;  %s14857_s2 = sld [smem:[#allocation85_spill]] }
 0x9b6   : > { %v4533_v37 = vunpack.c.l.b16 %v4499_v60  ;;  %v4534_v12 = vunpack.c.l.b16 %v4500_v4  ;;  %v4495_v50 = vld [vmem:[%s14847_s22 + $0x20] sm:$0xff]  ;;  %v4502_v52 = vpack.c.bf16 %v4496_v57, %v4496_v57  ;;  %v10878_v0 = vld [vmem:[%s14848_s17 + $0x10] sm:$0xff]  ;;  %v10877_v42 = vld [vmem:[%s14848_s17 + $0x8] sm:$0xff]  ;;  %s14858_s16 = sld [smem:[#allocation82_spill]] }
 0x9b7   : > { %4626 = vmatpush.bf16.msra.mxu0 %v9785_v5  ;;  %v4501_v28 = vpack.c.bf16 %v4495_v50, %v4495_v50  ;;  %v10876_v16 = vld [vmem:[%s14848_s17] sm:$0xff]  ;;  %s14859_s9 = sld [smem:[#allocation83_spill]] }
 0x9b8   : > { %4650 = vmatpush.bf16.msra.mxu1 %v9789_v51  ;;  %v4538_v14 = vpack.c.b16 %v4534_v12, %v4533_v37  ;;  %v4536_v62 = vunpack.c.l.b16 %v4502_v52  ;;  %v4519_v18 = vld [vmem:[%s12478_s30] sm:$0x3]  ;;  %s14860_s7 = sld [smem:[#allocation87_spill]] }
 0x9b9   : > { %4773 = vmatpush.bf16.msra.mxu2 %v10882_v61  ;;  %v4535_v49 = vunpack.c.l.b16 %v4501_v28  ;;  %v4521_v30 = vperm.slane %v4519_v18, 0  ;;  %v4522_v46 = vperm.slane %v4519_v18, 1  ;;  %s14861_s17 = sld [smem:[#allocation86_spill]] }
 0x9ba   : > { %s14862_s30 = sld [smem:[#allocation77_spill]] }
 0x9bb   : > { %4627 = vmatpush.bf16.msra.mxu0 %v9777_v27  ;;  %v4539_v34 = vpack.c.b16 %v4536_v62, %v4535_v49 }
 0x9bc   : > { %4651 = vmatpush.bf16.msra.mxu1 %v9781_v19 }
 0x9bd   : > { %4774 = vmatpush.bf16.msra.mxu2 %v10881_v15  ;;  %v11421_v15 = vld [vmem:[%s2009_s27] ss:$0 sm:$0xff]  ;;  %s14850_s27 = sld [smem:[#allocation71_spill]] }
 0x9bf   : > { %4628 = vmatpush.bf16.msra.mxu0 %v9769_v39 }
 0x9c0   : > { %4652 = vmatpush.bf16.msra.mxu1 %v9773_v11 }
 0x9c1   : > { %4775 = vmatpush.bf16.msra.mxu2 %v10880_v26 }
 0x9c3   : > { %4629 = vmatpush.bf16.msra.mxu0 %v9761_v63 }
 0x9c4   : > { %4653 = vmatpush.bf16.msra.mxu1 %v9765_v6 }
 0x9c5   : > { %4776 = vmatpush.bf16.msra.mxu2 %v10879_v17 }
 0x9c7   : > { %4630 = vmatpush.bf16.msra.mxu0 %v9753_v13 }
 0x9c8   : > { %4654 = vmatpush.bf16.msra.mxu1 %v9757_v29 }
 0x9c9   : > { %4777 = vmatpush.bf16.msra.mxu2 %v10878_v0  ;;  %v11963_v0 = vmov 128.0  }
 0x9ca   : > { %4631 = vmatmul.bf16.vlgmr.msra.gmra.mxu0 %v4537_v8  ;;  %11439 = vrcp.f32 %v11963_v0  ;;  %v9908_v0 = vld [vmem:[%s14850_s27 + $0x60] sm:$0xf] }
 0x9cb   : > { %4655 = vmatmul.bf16.vlgmr.msra.gmra.mxu1 %v4537_v8 }
 0x9cd   : > { %4778 = vmatpush.bf16.msra.mxu2 %v10877_v42 }
 0x9d0   : > { %v11440_v42 = vpop.eup %11439 }
 0x9d1   : > { %4779 = vmatpush.bf16.msra.mxu2 %v10876_v16  ;;  %v4813_v16 = vmul.f32 128.0, %v11440_v42  ;;  %vm4817_vm10 = vweird.f32 %v11440_v42 }
 0x9d3   : > { %v4814_v18 = vsub.f32 1.0, %v4813_v16  ;;  %v10896_v16 = vld [vmem:[%s14850_s27 + $0x64] sm:$0xf] }
 0x9da   : > { %4636 = vmatmul.bf16.gmra.mxu0 %v4538_v14 }
 0x9db   : > { %4660 = vmatmul.bf16.gmra.mxu1 %v4538_v14 }
 0x9ea   : > { %4641 = vmatmul.bf16.gmra.mxu0 %v4539_v34 }
 0x9eb   : > { %4665 = vmatmul.bf16.gmra.mxu1 %v4539_v34 }
 0xa47   : > { %v4632_v48 = vpop.f32.mrf.mxu0 }
 0xa48   : > { %v4656_v47 = vpop.f32.mrf.mxu1  ;;  %v4633_v54 = vadd.f32 %v4632_v48, %v4521_v30  ;;  %v4815_v48 = vmul.f32 %v11440_v42, %v4814_v18 }
 0xa49   : > { %v4657_v56 = vadd.f32 %v4656_v47, %v4522_v46 }
 0xa4a   : > { %v9814_v5 = vclamps-f32 %v4633_v54, 1000.0  ;;  %v4816_v47 = vadd.f32 %v11440_v42, %v4815_v48  ;;  %v9910_v48 = vld [vmem:[%s14850_s27 + $0x6c] sm:$0xf0] }
 0xa4b   : > { %v9815_v40 = vclamps-f32 %v4657_v56, 1000.0 }
 0xa4d   : > { %v4695_v7 = vmul.f32 %v9815_v40, %v9814_v5 }
 0xa4f   : > { %v4634_v31 = vpop.f32.mrf.mxu0 }
 0xa50   : > { %v4635_v25 = vadd.f32 %v4634_v31, %v4521_v30  ;;  %v4658_v20 = vpop.f32.mrf.mxu1 }
 0xa51   : > { %v4659_v24 = vadd.f32 %v4658_v20, %v4522_v46 }
 0xa52   : > { %v9816_v45 = vclamps-f32 %v4635_v25, 1000.0 }
 0xa53   : > { %v9817_v51 = vclamps-f32 %v4659_v24, 1000.0 }
 0xa55   : > { %v4696_v53 = vmul.f32 %v9817_v51, %v9816_v45 }
 0xa57   : > { %v4637_v27 = vpop.f32.mrf.mxu0  ;;  %v4701_v1 = vpack.c.bf16 %v4696_v53, %v4695_v7 }
 0xa58   : > { %v4661_v9 = vpop.f32.mrf.mxu1  ;;  %v4638_v19 = vadd.f32 %v4637_v27, %v4521_v30 }
 0xa59   : > { %4780 = vmatmul.bf16.vlgmr.msra.gmra.mxu2 %v4701_v1  ;;  %v4662_v39 = vadd.f32 %v4661_v9, %v4522_v46 }
 0xa5a   : > { %v9818_v43 = vclamps-f32 %v4638_v19, 1000.0 }
 0xa5b   : > { %v9819_v35 = vclamps-f32 %v4662_v39, 1000.0 }
 0xa5d   : > { %v4697_v21 = vmul.f32 %v9819_v35, %v9818_v43 }
 0xa5f   : > { %v4639_v22 = vpop.f32.mrf.mxu0 }
 0xa60   : > { %v4640_v55 = vadd.f32 %v4639_v22, %v4521_v30  ;;  %v4663_v11 = vpop.f32.mrf.mxu1 }
 0xa61   : > { %v4664_v33 = vadd.f32 %v4663_v11, %v4522_v46 }
 0xa62   : > { %v9820_v23 = vclamps-f32 %v4640_v55, 1000.0 }
 0xa63   : > { %v9821_v44 = vclamps-f32 %v4664_v33, 1000.0 }
 0xa65   : > { %v4698_v63 = vmul.f32 %v9821_v44, %v9820_v23  ;;  %v9944_v23 = vld [vmem:[%s14850_s27 + $0xa8] sm:$0xf]  ;;  %v10906_v44 = vld [vmem:[%s14850_s27 + $0xb0] sm:$0xf0] }
 0xa67   : > { %v4642_v6 = vpop.f32.mrf.mxu0  ;;  %v4702_v32 = vpack.c.bf16 %v4698_v63, %v4697_v21  ;;  %v10905_v21 = vld [vmem:[%s14850_s27 + $0xac] sm:$0xf]  ;;  %v9945_v63 = vor.u32 %v10906_v44, %v9944_v23  ;;  %v10892_v23 = vld [vmem:[%s14850_s27 + $0x40] sm:$0xf0] }
 0xa68   : > { %v4666_v3 = vpop.f32.mrf.mxu1  ;;  %v4643_v36 = vadd.f32 %v4642_v6, %v4521_v30  ;;  %v9946_v6 = vld [vmem:[%s14850_s27 + $0xb4] sm:$0xf0] }
 0xa69   : > { %4785 = vmatmul.bf16.gmra.mxu2 %v4702_v32  ;;  %v4667_v2 = vadd.f32 %v4666_v3, %v4522_v46  ;;  %v9952_v32 = vld [vmem:[%s14850_s27 + $0xb0] sm:$0xf]  ;;  %v10907_v3 = vld [vmem:[%s14850_s27 + $0xb8] sm:$0xf0]  ;;  %5137 = vmatpush.bf16.msra.mxu3 %v9945_v63 }
 0xa6a   : > { %v9822_v29 = vclamps-f32 %v4643_v36, 1000.0  ;;  %v9949_v36 = vor.u32 %v10905_v21, %v9946_v6 }
 0xa6b   : > { %v9823_v8 = vclamps-f32 %v4667_v2, 1000.0  ;;  %v9953_v2 = vor.u32 %v10907_v3, %v9952_v32  ;;  %v9872_v32 = vld [vmem:[%s14850_s27 + $0x18] sm:$0xf]  ;;  %v10888_v3 = vld [vmem:[%s14850_s27 + $0x20] sm:$0xf0] }
 0xa6c   : > { %5161 = vmatpush.bf16.msrb.mxu0 %v9949_v36  ;;  %v10887_v36 = vld [vmem:[%s14850_s27 + $0x1c] sm:$0xf] }
 0xa6d   : > { %v4699_v61 = vmul.f32 %v9823_v8, %v9822_v29  ;;  %5185 = vmatpush.bf16.msrb.mxu1 %v9953_v2  ;;  %v9934_v8 = vld [vmem:[%s14850_s27 + $0x9c] sm:$0xf0]  ;;  %11124 = vmatpush.bf16.msrb.mxu2 %v9953_v2  ;;  %v9873_v2 = vor.u32 %v10888_v3, %v9872_v32 }
 0xa6f   : > { %v4644_v58 = vpop.f32.mrf.mxu0 }
 0xa70   : > { %v4645_v10 = vadd.f32 %v4644_v58, %v4521_v30  ;;  %v4668_v13 = vpop.f32.mrf.mxu1  ;;  %v13375_v30 = vsel %vm4817_vm10, %v11440_v42, %v4816_v47  ;;  %v9932_v58 = vld [vmem:[%s14850_s27 + $0x90] sm:$0xf]  ;;  %v10897_v42 = vld [vmem:[%s14850_s27 + $0x68] sm:$0xf0]  ;;  %v9916_v47 = vld [vmem:[%s14850_s27 + $0x68] sm:$0xf] }
 0xa71   : > { %v4669_v38 = vadd.f32 %v4668_v13, %v4522_v46  ;;  %v10902_v13 = vld [vmem:[%s14850_s27 + $0x94] sm:$0xf]  ;;  %v9909_v18 = vor.u32 %v10897_v42, %v9908_v0 }
 0xa72   : > { %v9824_v41 = vclamps-f32 %v4645_v10, 1000.0  ;;  %v10903_v10 = vld [vmem:[%s14850_s27 + $0x98] sm:$0xf0] }
 0xa73   : > { %v9825_v59 = vclamps-f32 %v4669_v38, 1000.0  ;;  %v9933_v29 = vor.u32 %v10903_v10, %v9932_v58  ;;  %v9940_v38 = vld [vmem:[%s14850_s27 + $0x98] sm:$0xf]  ;;  %v9874_v58 = vld [vmem:[%s14850_s27 + $0x24] sm:$0xf0] }
 0xa74   : > { %v9880_v10 = vld [vmem:[%s14850_s27 + $0x20] sm:$0xf] }
 0xa75   : > { %v4700_v60 = vmul.f32 %v9825_v59, %v9824_v41  ;;  %v10904_v41 = vld [vmem:[%s14850_s27 + $0xa0] sm:$0xf0]  ;;  %v9937_v59 = vor.u32 %v10902_v13, %v9934_v8  ;;  %5138 = vmatpush.bf16.msra.mxu3 %v9933_v29  ;;  %v10889_v13 = vld [vmem:[%s14850_s27 + $0x28] sm:$0xf0]  ;;  %v9877_v8 = vor.u32 %v10887_v36, %v9874_v58 }
 0xa77   : > { %v4703_v4 = vpack.c.bf16 %v4700_v60, %v4699_v61  ;;  %v9941_v61 = vor.u32 %v10904_v41, %v9940_v38  ;;  %5162 = vmatpush.bf16.msrb.mxu0 %v9937_v59  ;;  %v9920_v60 = vld [vmem:[%s14850_s27 + $0x78] sm:$0xf]  ;;  %v9881_v38 = vor.u32 %v10889_v13, %v9880_v10  ;;  %v9860_v41 = vld [vmem:[%s14850_s27] sm:$0xf]  ;;  %v10885_v59 = vld [vmem:[%s14850_s27 + $0x8] sm:$0xf0] }
 0xa79   : > { %4790 = vmatmul.bf16.gmra.mxu2 %v4703_v4  ;;  %5186 = vmatpush.bf16.msrb.mxu1 %v9941_v61  ;;  %v10900_v4 = vld [vmem:[%s14850_s27 + $0x80] sm:$0xf0] }
 0xa7a   : > { %11125 = vmatpush.bf16.msrb.mxu2 %v9941_v61  ;;  %v10884_v61 = vld [vmem:[%s14850_s27 + $0x4] sm:$0xf] }
 0xadc   : > { %v4781_v37 = vpop.f32.mrf.mxu2 }
 0xadd   : > { %v13357_v12 = vadd.f32 %v11421_v15, %v4781_v37  ;;  %v9921_v37 = vor.u32 %v10900_v4, %v9920_v60  ;;  %v9861_v60 = vor.u32 %v10885_v59, %v9860_v41  ;;  %v9862_v4 = vld [vmem:[%s14850_s27 + $0xc] sm:$0xf0] }
 0xadf   : > { %4800 = vadd.xlane.f32.xlu0 %v13357_v12  ;;  %5139 = vmatpush.bf16.msra.mxu3 %v9921_v37  ;;  %v10886_v37 = vld [vmem:[%s14850_s27 + $0x10] sm:$0xf0] }
 0xae3   : > { %5140 = vmatpush.bf16.msra.mxu3 %v9909_v18 }
 0xae4   : > { %v4783_v26 = vpop.f32.mrf.mxu2 }
 0xae5   : > { %v13360_v14 = vadd.f32 %v11421_v15, %v4783_v26  ;;  %v9922_v26 = vld [vmem:[%s14850_s27 + $0x84] sm:$0xf0] }
 0xae7   : > { %4802 = vadd.xlane.f32.xlu0 %v13360_v14 }
 0xaec   : > { %v4786_v50 = vpop.f32.mrf.mxu2 }
 0xaed   : > { %v13363_v57 = vadd.f32 %v11421_v15, %v4786_v50  ;;  %v9928_v50 = vld [vmem:[%s14850_s27 + $0x80] sm:$0xf] }
 0xaef   : > { %4804 = vadd.xlane.f32.xlu1 %v13363_v57 }
 0xaf4   : > { %v4788_v28 = vpop.f32.mrf.mxu2 }
 0xaf5   : > { %v13366_v52 = vadd.f32 %v11421_v15, %v4788_v28  ;;  %v10901_v28 = vld [vmem:[%s14850_s27 + $0x88] sm:$0xf0] }
 0xaf7   : > { %4806 = vadd.xlane.f32.xlu1 %v13366_v52 }
 0xafc   : > { %v4791_v49 = vpop.f32.mrf.mxu2 }
 0xafd   : > { %v13369_v62 = vadd.f32 %v11421_v15, %v4791_v49 }
 0xaff   : > { %4808 = vadd.xlane.f32.xlu2 %v13369_v62 }
 0xb04   : > { %v4793_v34 = vpop.f32.mrf.mxu2 }
 0xb05   : > { %v13372_v17 = vadd.f32 %v11421_v15, %v4793_v34  ;;  %v10899_v15 = vld [vmem:[%s14850_s27 + $0x7c] sm:$0xf]  ;;  %v9929_v34 = vor.u32 %v10901_v28, %v9928_v50 }
 0xb06   : > { %v9925_v49 = vor.u32 %v10899_v15, %v9922_v26  ;;  %v9868_v15 = vld [vmem:[%s14850_s27 + $0x8] sm:$0xf]  ;;  %v9865_v26 = vor.u32 %v10884_v61, %v9862_v4 }
 0xb07   : > { %4810 = vadd.xlane.f32.xlu2 %v13372_v17  ;;  %5187 = vmatpush.bf16.msrb.mxu1 %v9929_v34  ;;  %v9869_v50 = vor.u32 %v10886_v37, %v9868_v15 }
 0xb08   : > { %5163 = vmatpush.bf16.msrb.mxu0 %v9925_v49  ;;  %11126 = vmatpush.bf16.msrb.mxu2 %v9929_v34 }
 0xb52   : > { %v4801_v46 = vpop.xlane.xlu0 %4800 }
 0xb53   : > { %v4819_v54 = vmul.f32 %v13375_v30, %v4801_v46  ;;  %v10898_v46 = vld [vmem:[%s14850_s27 + $0x70] sm:$0xf0] }
 0xb55   : > { %v13379_v56 = vsub.f32 %v13357_v12, %v4819_v54  ;;  %v9913_v54 = vor.u32 %v10896_v16, %v9910_v48 }
 0xb57   : > { %v4831_v31 = vmul.f32 %v13379_v56, %v13379_v56  ;;  %5164 = vmatpush.bf16.msrb.mxu0 %v9913_v54 }
 0xb59   : > { %4837 = vadd.xlane.f32.xlu0 %v4831_v31  ;;  %v9917_v31 = vor.u32 %v10898_v46, %v9916_v47 }
 0xb5a   : > { %v4803_v25 = vpop.xlane.xlu0 %4802 }
 0xb5b   : > { %v4820_v20 = vmul.f32 %v13375_v30, %v4803_v25  ;;  %5188 = vmatpush.bf16.msrb.mxu1 %v9917_v31  ;;  %v9896_v25 = vld [vmem:[%s14850_s27 + $0x48] sm:$0xf]  ;;  %11127 = vmatpush.bf16.msrb.mxu2 %v9917_v31 }
 0xb5d   : > { %v13385_v5 = vsub.f32 %v13360_v14, %v4820_v20  ;;  %v10894_v20 = vld [vmem:[%s14850_s27 + $0x50] sm:$0xf0] }
 0xb5f   : > { %v4832_v40 = vmul.f32 %v13385_v5, %v13385_v5 }
 0xb61   : > { %4839 = vadd.xlane.f32.xlu1 %v4832_v40  ;;  %v10893_v40 = vld [vmem:[%s14850_s27 + $0x4c] sm:$0xf] }
 0xb62   : > { %v4805_v24 = vpop.xlane.xlu1 %4804 }
 0xb63   : > { %v4821_v45 = vmul.f32 %v13375_v30, %v4805_v24  ;;  %v9897_v24 = vor.u32 %v10894_v20, %v9896_v25 }
 0xb65   : > { %v13391_v51 = vsub.f32 %v13363_v57, %v4821_v45  ;;  %v9898_v45 = vld [vmem:[%s14850_s27 + $0x54] sm:$0xf0]  ;;  %5141 = vmatpush.bf16.msra.mxu3 %v9897_v24 }
 0xb67   : > { %v4833_v7 = vmul.f32 %v13391_v51, %v13391_v51 }
 0xb69   : > { %4841 = vadd.xlane.f32.xlu2 %v4833_v7  ;;  %v9904_v7 = vld [vmem:[%s14850_s27 + $0x50] sm:$0xf] }
 0xb6a   : > { %v4807_v53 = vpop.xlane.xlu1 %4806 }
 0xb6b   : > { %v4822_v27 = vmul.f32 %v13375_v30, %v4807_v53  ;;  %v10895_v53 = vld [vmem:[%s14850_s27 + $0x58] sm:$0xf0] }
 0xb6d   : > { %v13397_v1 = vsub.f32 %v13366_v52, %v4822_v27  ;;  %v9901_v27 = vor.u32 %v10893_v40, %v9898_v45 }
 0xb6f   : > { %v4834_v9 = vmul.f32 %v13397_v1, %v13397_v1  ;;  %5165 = vmatpush.bf16.msrb.mxu0 %v9901_v27 }
 0xb71   : > { %4843 = vadd.xlane.f32.xlu0 %v4834_v9  ;;  %v9905_v9 = vor.u32 %v10895_v53, %v9904_v7  ;;  %v13466_v7 = vld [vmem:[%s14851_s13] ss:$0 sm:$0xff]  ;;  %s14864_s13 = sld [smem:[#allocation88_spill]] }
 0xb72   : > { %v4809_v19 = vpop.xlane.xlu2 %4808 }
 0xb73   : > { %v4823_v39 = vmul.f32 %v13375_v30, %v4809_v19  ;;  %5189 = vmatpush.bf16.msrb.mxu1 %v9905_v9  ;;  %v9884_v19 = vld [vmem:[%s14850_s27 + $0x30] sm:$0xf]  ;;  %11128 = vmatpush.bf16.msrb.mxu2 %v9905_v9 }
 0xb75   : > { %v13403_v22 = vsub.f32 %v13369_v62, %v4823_v39  ;;  %v10891_v39 = vld [vmem:[%s14850_s27 + $0x38] sm:$0xf0] }
 0xb77   : > { %v4835_v55 = vmul.f32 %v13403_v22, %v13403_v22 }
 0xb79   : > { %4845 = vadd.xlane.f32.xlu1 %v4835_v55  ;;  %v10890_v55 = vld [vmem:[%s14850_s27 + $0x34] sm:$0xf] }
 0xb7a   : > { %v4811_v11 = vpop.xlane.xlu2 %4810 }
 0xb7b   : > { %v4824_v43 = vmul.f32 %v13375_v30, %v4811_v11  ;;  %v9885_v11 = vor.u32 %v10891_v39, %v9884_v19 }
 0xb7d   : > { %v13409_v35 = vsub.f32 %v13372_v17, %v4824_v43  ;;  %v9886_v43 = vld [vmem:[%s14850_s27 + $0x3c] sm:$0xf0]  ;;  %5142 = vmatpush.bf16.msra.mxu3 %v9885_v11 }
 0xb7e   : > { %v9889_v44 = vor.u32 %v10890_v55, %v9886_v43  ;;  %v13471_v43 = vld [vmem:[%s14852_s25] ss:$0 sm:$0xff]  ;;  %s14865_s25 = sld [smem:[#allocation78_spill]] }
 0xb7f   : > { %v4836_v33 = vmul.f32 %v13409_v35, %v13409_v35 }
 0xb80   : > { %5166 = vmatpush.bf16.msrb.mxu0 %v9889_v44 }
 0xb81   : > { %4847 = vadd.xlane.f32.xlu2 %v4836_v33  ;;  %v9892_v33 = vld [vmem:[%s14850_s27 + $0x38] sm:$0xf]  ;;  %5143 = vmatpush.bf16.msra.mxu3 %v9873_v2  ;;  %s14863_s27 = sld [smem:[#allocation64_spill]] }
 0xb82   : > { %v9893_v21 = vor.u32 %v10892_v23, %v9892_v33 }
 0xb84   : > { %5190 = vmatpush.bf16.msrb.mxu1 %v9893_v21  ;;  %11129 = vmatpush.bf16.msrb.mxu2 %v9893_v21 }
 0xb85   : > { %5167 = vmatpush.bf16.msrb.mxu0 %v9877_v8  ;;  %5144 = vmatpush.bf16.msra.mxu3 %v9861_v60 }
 0xb88   : > { %5191 = vmatpush.bf16.msrb.mxu1 %v9881_v38  ;;  %11130 = vmatpush.bf16.msrb.mxu2 %v9881_v38 }
 0xb89   : > { %5168 = vmatpush.bf16.msrb.mxu0 %v9865_v26 }
 0xb8c   : > { %5192 = vmatpush.bf16.msrb.mxu1 %v9869_v50  ;;  %11131 = vmatpush.bf16.msrb.mxu2 %v9869_v50 }
 0xbcc   : > { %v4838_v63 = vpop.xlane.xlu0 %4837 }
 0xbcd   : > { %v4849_v6 = vmul.f32 %v4838_v63, %v13375_v30 }
 0xbcf   : > { %v4855_v29 = vadd.f32 1e-05, %v4849_v6 }
 0xbd1   : > { %11441 = vrsqrt.f32 %v4855_v29  ;;  %vm4867_vm12 = vweird.f32 %v4855_v29 }
 0xbd4   : > { %v4840_v28 = vpop.xlane.xlu1 %4839 }
 0xbd5   : > { %v4850_v49 = vmul.f32 %v4840_v28, %v13375_v30 }
 0xbd7   : > { %v11442_v34 = vpop.eup %11441  ;;  %v4856_v0 = vadd.f32 1e-05, %v4850_v49 }
 0xbd8   : > { %v4862_v42 = vmul.f32 %v11442_v34, %v4855_v29  ;;  %vm4868_vm11 = vweird.f32 %v11442_v34 }
 0xbd9   : > { %11443 = vrsqrt.f32 %v4856_v0  ;;  %vm4869_vm13 = vmor %vm4867_vm12, %vm4868_vm11  ;;  %vm4877_vm15 = vweird.f32 %v4856_v0 }
 0xbda   : > { %v4863_v16 = vmul.f32 %v11442_v34, %v4862_v42 }
 0xbdc   : > { %v4864_v18 = vmul.f32 0.5, %v4863_v16  ;;  %v4842_v48 = vpop.xlane.xlu2 %4841 }
 0xbdd   : > { %v4851_v47 = vmul.f32 %v4842_v48, %v13375_v30 }
 0xbde   : > { %v4865_v46 = vsub.f32 1.5, %v4864_v18 }
 0xbdf   : > { %v11444_v54 = vpop.eup %11443  ;;  %v4857_v31 = vadd.f32 1e-05, %v4851_v47 }
 0xbe0   : > { %v4866_v25 = vmul.f32 %v11442_v34, %v4865_v46  ;;  %v4872_v20 = vmul.f32 %v11444_v54, %v4856_v0  ;;  %vm4878_vm14 = vweird.f32 %v11444_v54 }
 0xbe1   : > { %11445 = vrsqrt.f32 %v4857_v31  ;;  %vm4879_vm0 = vmor %vm4877_vm15, %vm4878_vm14  ;;  %vm4887_vm2 = vweird.f32 %v4857_v31  ;;  %vm5321_vm14 = vcmask 195584  }
 0xbe2   : > { %v4870_v40 = vsel %vm4869_vm13, %v11442_v34, %v4866_v25  ;;  %v4873_v24 = vmul.f32 %v11444_v54, %v4872_v20  ;;  %vm5417_vm13 = vcmask 1043456  }
 0xbe3   : > { %v4921_v45 = vmul.f32 %v4870_v40, %v13379_v56 }
 0xbe4   : > { %v4874_v53 = vmul.f32 0.5, %v4873_v24  ;;  %v4844_v27 = vpop.xlane.xlu0 %4843 }
 0xbe5   : > { %v4852_v9 = vmul.f32 %v4844_v27, %v13375_v30  ;;  %v4930_v11 = vmul.f32 %v13466_v7, %v4921_v45 }
 0xbe6   : > { %v4875_v19 = vsub.f32 1.5, %v4874_v53 }
 0xbe7   : > { %v11446_v39 = vpop.eup %11445  ;;  %v4858_v55 = vadd.f32 1e-05, %v4852_v9  ;;  %v4939_v63 = vadd.f32 %v13471_v43, %v4930_v11 }
 0xbe8   : > { %v4876_v33 = vmul.f32 %v11444_v54, %v4875_v19  ;;  %v4882_v23 = vmul.f32 %v11446_v39, %v4857_v31  ;;  %vm4888_vm1 = vweird.f32 %v11446_v39 }
 0xbe9   : > { %11447 = vrsqrt.f32 %v4858_v55  ;;  %v4945_v29 = vpack.c.bf16 %v4939_v63, %v4939_v63  ;;  %vm4889_vm3 = vmor %vm4887_vm2, %vm4888_vm1  ;;  %vm4897_vm5 = vweird.f32 %v4858_v55 }
 0xbea   : > { %v4880_v56 = vsel %vm4879_vm0, %v11444_v54, %v4876_v33  ;;  %v4883_v44 = vmul.f32 %v11446_v39, %v4882_v23 }
 0xbeb   : > { %v4922_v21 = vmul.f32 %v4880_v56, %v13385_v5  ;;  %v4997_v60 = vunpack.c.l.b16 %v4945_v29 }
 0xbec   : > { %v4884_v6 = vmul.f32 0.5, %v4883_v44  ;;  %v4846_v32 = vpop.xlane.xlu1 %4845 }
 0xbed   : > { %v4853_v3 = vmul.f32 %v4846_v32, %v13375_v30  ;;  %v4931_v36 = vmul.f32 %v13466_v7, %v4922_v21 }
 0xbee   : > { %v4885_v2 = vsub.f32 1.5, %v4884_v6 }
 0xbef   : > { %v11448_v58 = vpop.eup %11447  ;;  %v4859_v10 = vadd.f32 1e-05, %v4853_v3  ;;  %v4940_v13 = vadd.f32 %v13471_v43, %v4931_v36 }
 0xbf0   : > { %v4886_v8 = vmul.f32 %v11446_v39, %v4885_v2  ;;  %v4892_v38 = vmul.f32 %v11448_v58, %v4858_v55  ;;  %vm4898_vm4 = vweird.f32 %v11448_v58 }
 0xbf1   : > { %11449 = vrsqrt.f32 %v4859_v10  ;;  %v4946_v5 = vpack.c.bf16 %v4940_v13, %v4940_v13  ;;  %vm4899_vm6 = vmor %vm4897_vm5, %vm4898_vm4  ;;  %vm4907_vm8 = vweird.f32 %v4859_v10 }
 0xbf2   : > { %v4890_v41 = vsel %vm4889_vm3, %v11446_v39, %v4886_v8  ;;  %v4893_v59 = vmul.f32 %v11448_v58, %v4892_v38  ;;  %v4983_v38 = vld [vmem:[%s14853_s15] sm:$0x7] }
 0xbf3   : > { %v4923_v61 = vmul.f32 %v4890_v41, %v13391_v51  ;;  %v4998_v4 = vunpack.c.l.b16 %v4946_v5  ;;  %v4986_v5 = vperm.slane %v4983_v38, 1  ;;  %v13492_v41 = vperm.slane %v4983_v38, 2 }
 0xbf4   : > { %v4894_v15 = vmul.f32 0.5, %v4893_v59  ;;  %v4848_v37 = vpop.xlane.xlu2 %4847 }
 0xbf5   : > { %v4854_v26 = vmul.f32 %v4848_v37, %v13375_v30  ;;  %v5003_v50 = vpack.c.b16 %v4998_v4, %v4997_v60  ;;  %v4932_v0 = vmul.f32 %v13466_v7, %v4923_v61 }
 0xbf6   : > { %v4895_v28 = vsub.f32 1.5, %v4894_v15 }
 0xbf7   : > { %v11450_v49 = vpop.eup %11449  ;;  %v4860_v34 = vadd.f32 1e-05, %v4854_v26  ;;  %5145 = vmatmul.bf16.vlgmr.msra.gmra.mxu3 %v5003_v50  ;;  %5169 = vmatmul.bf16.vlgmr.msrb.gmra.mxu0 %v5003_v50  ;;  %v4941_v47 = vadd.f32 %v13471_v43, %v4932_v0 }
 0xbf8   : > { %v4896_v42 = vmul.f32 %v11448_v58, %v4895_v28  ;;  %v4902_v16 = vmul.f32 %v11450_v49, %v4859_v10  ;;  %5193 = vmatmul.bf16.vlgmr.msrb.gmra.mxu1 %v5003_v50  ;;  %vm4908_vm7 = vweird.f32 %v11450_v49 }
 0xbf9   : > { %11451 = vrsqrt.f32 %v4860_v34  ;;  %v4947_v40 = vpack.c.bf16 %v4941_v47, %v4941_v47  ;;  %vm4909_vm9 = vmor %vm4907_vm8, %vm4908_vm7  ;;  %vm4917_vm11 = vweird.f32 %v4860_v34 }
 0xbfa   : > { %v4900_v51 = vsel %vm4899_vm6, %v11448_v58, %v4896_v42  ;;  %v4903_v18 = vmul.f32 %v11450_v49, %v4902_v16 }
 0xbfb   : > { %v4924_v48 = vmul.f32 %v4900_v51, %v13397_v1  ;;  %v4999_v19 = vunpack.c.l.b16 %v4947_v40 }
 0xbfc   : > { %v4904_v46 = vmul.f32 0.5, %v4903_v18 }
 0xbfd   : > { %v4933_v54 = vmul.f32 %v13466_v7, %v4924_v48 }
 0xbfe   : > { %v4905_v31 = vsub.f32 1.5, %v4904_v46 }
 0xbff   : > { %v11452_v25 = vpop.eup %11451  ;;  %v4942_v20 = vadd.f32 %v13471_v43, %v4933_v54 }
 0xc00   : > { %v4906_v24 = vmul.f32 %v11450_v49, %v4905_v31  ;;  %v4912_v45 = vmul.f32 %v11452_v25, %v4860_v34  ;;  %vm4918_vm10 = vweird.f32 %v11452_v25  ;;  %v13495_v34 = vperm.slane %v4983_v38, 0 }
 0xc01   : > { %v4948_v53 = vpack.c.bf16 %v4942_v20, %v4942_v20  ;;  %vm4919_vm12 = vmor %vm4917_vm11, %vm4918_vm10 }
 0xc02   : > { %v4910_v27 = vsel %vm4909_vm9, %v11450_v49, %v4906_v24  ;;  %v4913_v9 = vmul.f32 %v11452_v25, %v4912_v45 }
 0xc03   : > { %v4925_v1 = vmul.f32 %v4910_v27, %v13403_v22  ;;  %v5000_v39 = vunpack.c.l.b16 %v4948_v53 }
 0xc04   : > { %v4914_v55 = vmul.f32 0.5, %v4913_v9 }
 0xc05   : > { %v5004_v11 = vpack.c.b16 %v5000_v39, %v4999_v19  ;;  %v4934_v23 = vmul.f32 %v13466_v7, %v4925_v1 }
 0xc06   : > { %v4915_v33 = vsub.f32 1.5, %v4914_v55 }
 0xc07   : > { %5150 = vmatmul.bf16.gmra.mxu3 %v5004_v11  ;;  %5174 = vmatmul.bf16.gmra.mxu0 %v5004_v11  ;;  %v4943_v63 = vadd.f32 %v13471_v43, %v4934_v23 }
 0xc08   : > { %v4916_v56 = vmul.f32 %v11452_v25, %v4915_v33  ;;  %5198 = vmatmul.bf16.gmra.mxu1 %v5004_v11 }
 0xc09   : > { %v4949_v32 = vpack.c.bf16 %v4943_v63, %v4943_v63 }
 0xc0a   : > { %v4920_v44 = vsel %vm4919_vm12, %v11452_v25, %v4916_v56 }
 0xc0b   : > { %v4926_v21 = vmul.f32 %v4920_v44, %v13409_v35  ;;  %v5001_v36 = vunpack.c.l.b16 %v4949_v32 }
 0xc0d   : > { %v4935_v22 = vmul.f32 %v13466_v7, %v4926_v21 }
 0xc0f   : > { %v4944_v6 = vadd.f32 %v13471_v43, %v4935_v22 }
 0xc11   : > { %v4950_v3 = vpack.c.bf16 %v4944_v6, %v4944_v6 }
 0xc13   : > { %v5002_v2 = vunpack.c.l.b16 %v4950_v3 }
 0xc15   : > { %v5005_v58 = vpack.c.b16 %v5002_v2, %v5001_v36 }
 0xc17   : > { %5155 = vmatmul.bf16.gmra.mxu3 %v5005_v58  ;;  %5179 = vmatmul.bf16.gmra.mxu0 %v5005_v58 }
 0xc18   : > { %5203 = vmatmul.bf16.vlgmr.msrb.gmra.mxu2 %v5005_v58 }
 0xc74   : > { %v5170_v10 = vpop.f32.mrf.mxu0 }
 0xc75   : > { %v5194_v13 = vpop.f32.mrf.mxu1  ;;  %v5171_v37 = vadd.f32 %v5170_v10, %v4986_v5 }
 0xc76   : > { %v5195_v18 = vadd.f32 %v5194_v13, %v13492_v41 }
 0xc77   : > { %v5215_v16 = vpack.c.bf16 %v5171_v37, %v5171_v37 }
 0xc78   : > { %v5221_v40 = vpack.c.bf16 %v5195_v18, %v5195_v18 }
 0xc79   : > { %v5240_v25 = vunpack.c.l.b16 %v5215_v16 }
 0xc7a   : > { %v5146_v29 = vpop.f32.mrf.mxu3  ;;  %v5405_v19 = vunpack.c.l.b16 %v5221_v40 }
 0xc7b   : > { %v5147_v54 = vadd.f32 %v5146_v29, %v13495_v34 }
 0xc7c   : > { %v5172_v8 = vpop.f32.mrf.mxu0 }
 0xc7d   : > { %v5196_v35 = vpop.f32.mrf.mxu1  ;;  %v5173_v4 = vadd.f32 %v5172_v8, %v4986_v5  ;;  %v5209_v53 = vpack.c.bf16 %v5147_v54, %v5147_v54 }
 0xc7e   : > { %v5197_v0 = vadd.f32 %v5196_v35, %v13492_v41 }
 0xc7f   : > { %v5216_v28 = vpack.c.bf16 %v5173_v4, %v5173_v4  ;;  %v5230_v55 = vunpack.c.l.b16 %v5209_v53 }
 0xc80   : > { %v5222_v31 = vpack.c.bf16 %v5197_v0, %v5197_v0 }
 0xc81   : > { %v5241_v47 = vunpack.c.l.b16 %v5216_v28 }
 0xc82   : > { %v5148_v59 = vpop.f32.mrf.mxu3  ;;  %v5406_v27 = vunpack.c.l.b16 %v5222_v31 }
 0xc83   : > { %v5149_v48 = vadd.f32 %v5148_v59, %v13495_v34  ;;  %v5243_v45 = vpack.c.b16 %v5241_v47, %v5240_v25 }
 0xc84   : > { %v5175_v7 = vpop.f32.mrf.mxu0  ;;  %v5408_v11 = vpack.c.b16 %v5406_v27, %v5405_v19 }
 0xc85   : > { %v5176_v43 = vadd.f32 %v5175_v7, %v4986_v5  ;;  %v5199_v61 = vpop.f32.mrf.mxu1  ;;  %v5210_v24 = vpack.c.bf16 %v5149_v48, %v5149_v48 }
 0xc86   : > { %v5200_v60 = vadd.f32 %v5199_v61, %v13492_v41 }
 0xc87   : > { %v5217_v15 = vpack.c.bf16 %v5176_v43, %v5176_v43  ;;  %v5231_v39 = vunpack.c.l.b16 %v5210_v24  ;;  %v11424_v24 = vld [vmem:[%s14854_s20] ss:$0 sm:$0xff] }
 0xc88   : > { %v5223_v50 = vpack.c.bf16 %v5200_v60, %v5200_v60 }
 0xc89   : > { %v5242_v26 = vunpack.c.l.b16 %v5217_v15  ;;  %v5233_v23 = vpack.c.b16 %v5231_v39, %v5230_v55 }
 0xc8a   : > { %v5407_v51 = vunpack.c.l.b16 %v5223_v50  ;;  %v5151_v46 = vpop.f32.mrf.mxu3 }
 0xc8b   : > { %v5244_v49 = vpack.c.b16 %v5242_v26, %v5242_v26  ;;  %v5152_v63 = vadd.f32 %v5151_v46, %v13495_v34 }
 0xc8c   : > { %v5177_v42 = vpop.f32.mrf.mxu0  ;;  %v5409_v20 = vpack.c.b16 %v5407_v51, %v5407_v51 }
 0xc8d   : > { %5253 = vmatpush.bf16.xpose.msra.mxu2 %v5244_v49  ;;  %v5178_v32 = vadd.f32 %v5177_v42, %v4986_v5  ;;  %v5211_v36 = vpack.c.bf16 %v5152_v63, %v5152_v63  ;;  %v5201_v2 = vpop.f32.mrf.mxu1 }
 0xc8e   : > { %v5419_v1 = vsel %vm5417_vm13, %v5409_v20, 0  ;;  %v5202_v59 = vadd.f32 %v5201_v2, %v13492_v41 }
 0xc8f   : > { %v5218_v38 = vpack.c.bf16 %v5178_v32, %v5178_v32  ;;  %v5232_v7 = vunpack.c.l.b16 %v5211_v36 }
 0xc90   : > { %v5224_v26 = vpack.c.bf16 %v5202_v59, %v5202_v59 }
 0xc91   : > { %v5278_v37 = vunpack.c.l.b16 %v5218_v38  ;;  %v5234_v49 = vpack.c.b16 %v5232_v7, %v5232_v7 }
 0xc92   : > { %v5153_v33 = vpop.f32.mrf.mxu3  ;;  %v5450_v51 = vunpack.c.l.b16 %v5224_v26 }
 0xc93   : > { %v5154_v60 = vadd.f32 %v5153_v33, %v13495_v34 }
 0xc94   : > { %v5180_v9 = vpop.f32.mrf.mxu0 }
 0xc95   : > { %5254 = vmatpush.bf16.xpose.msra.mxu2 %v5243_v45  ;;  %v5181_v22 = vadd.f32 %v5180_v9, %v4986_v5  ;;  %v5212_v42 = vpack.c.bf16 %v5154_v60, %v5154_v60 }
 0xc97   : > { %v5219_v58 = vpack.c.bf16 %v5181_v22, %v5181_v22  ;;  %v5268_v48 = vunpack.c.l.b16 %v5212_v42 }
 0xc9a   : > { %v5156_v10 = vpop.f32.mrf.mxu3 }
 0xc9b   : > { %v5204_v56 = vpop.f32.mrf.mxu2  ;;  %v5157_v43 = vadd.f32 %v5156_v10, %v13495_v34 }
 0xc9c   : > { %v5182_v44 = vpop.f32.mrf.mxu0  ;;  %5255 = vmatmul.bf16.vlgmr.msra.gmra.mxu2 %v5233_v23  ;;  %v5205_v8 = vadd.f32 %v5204_v56, %v13492_v41  ;;  %v11425_v56 = vld [vmem:[%s14854_s20 + $0x1] ss:$0 sm:$0xff] }
 0xc9d   : > { %5427 = vmatpush.bf16.msrb.mxu2 %v5419_v1  ;;  %v5183_v21 = vadd.f32 %v5182_v44, %v4986_v5  ;;  %v5279_v5 = vunpack.c.l.b16 %v5219_v58  ;;  %v5213_v50 = vpack.c.bf16 %v5157_v43, %v5157_v43 }
 0xc9e   : > { %v5225_v4 = vpack.c.bf16 %v5205_v8, %v5205_v8 }
 0xc9f   : > { %v5220_v6 = vpack.c.bf16 %v5183_v21, %v5183_v21  ;;  %v5281_v0 = vpack.c.b16 %v5279_v5, %v5278_v37  ;;  %v5269_v18 = vunpack.c.l.b16 %v5213_v50 }
 0xca0   : > { %v5451_v16 = vunpack.c.l.b16 %v5225_v4 }
 0xca1   : > { %5428 = vmatpush.bf16.msrb.mxu2 %v5408_v11  ;;  %v5280_v3 = vunpack.c.l.b16 %v5220_v6  ;;  %v5271_v46 = vpack.c.b16 %v5269_v18, %v5268_v48 }
 0xca2   : > { %v5453_v47 = vpack.c.b16 %v5451_v16, %v5450_v51  ;;  %v5158_v54 = vpop.f32.mrf.mxu3 }
 0xca3   : > { %v5206_v13 = vpop.f32.mrf.mxu2  ;;  %v5282_v29 = vpack.c.b16 %v5280_v3, %v5280_v3  ;;  %v5159_v31 = vadd.f32 %v5158_v54, %v13495_v34 }
 0xca4   : > { %v5207_v35 = vadd.f32 %v5206_v13, %v13492_v41 }
 0xca5   : > { %5291 = vmatpush.bf16.xpose.msrb.mxu3 %v5282_v29  ;;  %v5214_v25 = vpack.c.bf16 %v5159_v31, %v5159_v31 }
 0xca6   : > { %v5226_v61 = vpack.c.bf16 %v5207_v35, %v5207_v35 }
 0xca7   : > { %v5270_v20 = vunpack.c.l.b16 %v5214_v25 }
 0xca8   : > { %v5452_v15 = vunpack.c.l.b16 %v5226_v61 }
 0xca9   : > { %v5272_v40 = vpack.c.b16 %v5270_v20, %v5270_v20 }
 0xcaa   : > { %v5454_v28 = vpack.c.b16 %v5452_v15, %v5452_v15 }
 0xcac   : > { %5260 = vmatmul.bf16.gmra.mxu2 %v5234_v49  ;;  %v5463_v41 = vsel %vm5417_vm13, %v5454_v28, 0 }
 0xcad   : > { %5292 = vmatpush.bf16.xpose.msrb.mxu3 %v5281_v0 }
 0xcb4   : > { %5293 = vmatmul.bf16.vlgmr.msrb.gmra.mxu3 %v5271_v46 }
 0xcb5   : > { %5471 = vmatpush.bf16.msra.mxu3 %v5463_v41 }
 0xcb9   : > { %5472 = vmatpush.bf16.msra.mxu3 %v5453_v47 }
 0xcc4   : > { %5298 = vmatmul.bf16.gmra.mxu3 %v5272_v40 }
 0xd1f   : > { %v5256_v45 = vpop.f32.mrf.mxu2 }
 0xd20   : > { %v5303_v53 = vmul.f32 0.088388346, %v5256_v45 }
 0xd22   : > { %v5315_v27 = vadd.f32 %v11424_v24, %v5303_v53 }
 0xd24   : > { %v5322_v9 = vsel %vm5321_vm14, %v5315_v27, -inf }
 0xd25   : > { %5323 = vmax.xlane.f32.xlu0 %v5322_v9 }
 0xd27   : > { %v5258_v1 = vpop.f32.mrf.mxu2 }
 0xd28   : > { %v5304_v19 = vmul.f32 0.088388346, %v5258_v1 }
 0xd2a   : > { %v5316_v39 = vadd.f32 %v11424_v24, %v5304_v19 }
 0xd2c   : > { %v5325_v55 = vsel %vm5321_vm14, %v5316_v39, -inf }
 0xd2d   : > { %5326 = vmax.xlane.f32.xlu1 %v5325_v55 }
 0xd2f   : > { %v5261_v34 = vpop.f32.mrf.mxu2 }
 0xd30   : > { %v5305_v11 = vmul.f32 0.088388346, %v5261_v34 }
 0xd32   : > { %v5317_v33 = vadd.f32 %v11424_v24, %v5305_v11 }
 0xd34   : > { %v5328_v23 = vsel %vm5321_vm14, %v5317_v33, -inf }
 0xd35   : > { %5329 = vmax.xlane.f32.xlu2 %v5328_v23 }
 0xd37   : > { %v5263_v44 = vpop.f32.mrf.mxu2  ;;  %v5294_v21 = vpop.f32.mrf.mxu3 }
 0xd38   : > { %v5306_v63 = vmul.f32 0.088388346, %v5294_v21 }
 0xd3a   : > { %v5318_v22 = vadd.f32 %v11425_v56, %v5306_v63 }
 0xd3c   : > { %v5331_v6 = vsel %vm5321_vm14, %v5318_v22, -inf }
 0xd3d   : > { %5332 = vmax.xlane.f32.xlu0 %v5331_v6  ;;  %v10915_v6 = vld [vmem:[%s14855_s11 + $0x38] sm:$0xff] }
 0xd3e   : > { %5554 = vmatpush.bf16.msra.mxu0 %v10915_v6 }
 0xd3f   : > { %v5296_v32 = vpop.f32.mrf.mxu3 }
 0xd40   : > { %v5307_v3 = vmul.f32 0.088388346, %v5296_v32 }
 0xd42   : > { %v5319_v36 = vadd.f32 %v11425_v56, %v5307_v3 }
 0xd44   : > { %v5334_v2 = vsel %vm5321_vm14, %v5319_v36, -inf }
 0xd45   : > { %5335 = vmax.xlane.f32.xlu1 %v5334_v2 }
 0xd47   : > { %v5299_v58 = vpop.f32.mrf.mxu3 }
 0xd48   : > { %v5308_v10 = vmul.f32 0.088388346, %v5299_v58 }
 0xd4a   : > { %v5320_v13 = vadd.f32 %v11425_v56, %v5308_v10  ;;  %v10913_v10 = vld [vmem:[%s14855_s11 + $0x28] sm:$0xff] }
 0xd4c   : > { %v5337_v29 = vsel %vm5321_vm14, %v5320_v13, -inf }
 0xd4d   : > { %5338 = vmax.xlane.f32.xlu2 %v5337_v29 }
 0xd4f   : > { %v5301_v8 = vpop.f32.mrf.mxu3 }
 0xd98   : > { %v5324_v35 = vpop.xlane.xlu0 %5323 }
 0xd99   : > { %v5340_v38 = vsub.f32 %v5315_v27, %v5324_v35 }
 0xd9b   : > { %v5346_v7 = vmul.f32 1.442695, %v5340_v38 }
 0xd9d   : > { %11453 = vpow2.f32 %v5346_v7  ;;  %v10912_v7 = vld [vmem:[%s14855_s11 + $0x20] sm:$0xff] }
 0xda0   : > { %v5327_v59 = vpop.xlane.xlu1 %5326 }
 0xda1   : > { %v5341_v43 = vsub.f32 %v5316_v39, %v5327_v59 }
 0xda3   : > { %v11454_v61 = vpop.eup %11453  ;;  %v5348_v5 = vmul.f32 1.442695, %v5341_v43 }
 0xda4   : > { %v5358_v60 = vsel %vm5321_vm14, %v11454_v61, 0.0 }
 0xda5   : > { %11455 = vpow2.f32 %v5348_v5  ;;  %5359 = vadd.xlane.f32.xlu0 %v5358_v60  ;;  %v10911_v5 = vld [vmem:[%s14855_s11 + $0x18] sm:$0xff] }
 0xda8   : > { %v5330_v4 = vpop.xlane.xlu2 %5329 }
 0xda9   : > { %v5342_v15 = vsub.f32 %v5317_v33, %v5330_v4 }
 0xdab   : > { %v11456_v37 = vpop.eup %11455  ;;  %v5350_v26 = vmul.f32 1.442695, %v5342_v15 }
 0xdac   : > { %v5361_v50 = vsel %vm5321_vm14, %v11456_v37, 0.0 }
 0xdad   : > { %11457 = vpow2.f32 %v5350_v26  ;;  %5362 = vadd.xlane.f32.xlu1 %v5361_v50  ;;  %v10910_v50 = vld [vmem:[%s14855_s11 + $0x10] sm:$0xff] }
 0xdb0   : > { %v5333_v28 = vpop.xlane.xlu0 %5332 }
 0xdb1   : > { %v5343_v49 = vsub.f32 %v5318_v22, %v5333_v28  ;;  %v10909_v28 = vld [vmem:[%s14855_s11 + $0x8] sm:$0xff] }
 0xdb3   : > { %v11458_v0 = vpop.eup %11457  ;;  %v5352_v42 = vmul.f32 1.442695, %v5343_v49  ;;  %v10908_v49 = vld [vmem:[%s14855_s11] sm:$0xff] }
 0xdb4   : > { %v5364_v16 = vsel %vm5321_vm14, %v11458_v0, 0.0 }
 0xdb5   : > { %11459 = vpow2.f32 %v5352_v42  ;;  %5365 = vadd.xlane.f32.xlu2 %v5364_v16 }
 0xdb8   : > { %v5336_v41 = vpop.xlane.xlu1 %5335 }
 0xdb9   : > { %v5344_v51 = vsub.f32 %v5319_v36, %v5336_v41  ;;  %v10914_v36 = vld [vmem:[%s14855_s11 + $0x30] sm:$0xff] }
 0xdba   : > { %5555 = vmatpush.bf16.msra.mxu0 %v10914_v36 }
 0xdbb   : > { %v11460_v18 = vpop.eup %11459  ;;  %v5354_v48 = vmul.f32 1.442695, %v5344_v51 }
 0xdbc   : > { %v5367_v47 = vsel %vm5321_vm14, %v11460_v18, 0.0 }
 0xdbd   : > { %11461 = vpow2.f32 %v5354_v48  ;;  %5368 = vadd.xlane.f32.xlu0 %v5367_v47 }
 0xdbe   : > { %5556 = vmatpush.bf16.msra.mxu0 %v10913_v10 }
 0xdc0   : > { %v5339_v46 = vpop.xlane.xlu2 %5338 }
 0xdc1   : > { %v5345_v54 = vsub.f32 %v5320_v13, %v5339_v46 }
 0xdc2   : > { %5557 = vmatpush.bf16.msra.mxu0 %v10912_v7 }
 0xdc3   : > { %v11462_v31 = vpop.eup %11461  ;;  %v5356_v25 = vmul.f32 1.442695, %v5345_v54 }
 0xdc4   : > { %v5370_v20 = vsel %vm5321_vm14, %v11462_v31, 0.0 }
 0xdc5   : > { %11463 = vpow2.f32 %v5356_v25  ;;  %5371 = vadd.xlane.f32.xlu1 %v5370_v20  ;;  %v11426_v25 = vld [vmem:[%s14856_s28] ss:$0 sm:$0xff] }
 0xdc6   : > { %5558 = vmatpush.bf16.msra.mxu0 %v10911_v5  ;;  %v10104_v5 = vld [vmem:[%s14857_s2 + $0xe0] sm:$0xf] }
 0xdca   : > { %5559 = vmatpush.bf16.msra.mxu0 %v10910_v50  ;;  %v10947_v50 = vld [vmem:[%s14857_s2 + $0xf4] sm:$0xf0] }
 0xdcb   : > { %v11464_v40 = vpop.eup %11463 }
 0xdcc   : > { %v5373_v24 = vsel %vm5321_vm14, %v11464_v40, 0.0 }
 0xdcd   : > { %5374 = vadd.xlane.f32.xlu2 %v5373_v24 }
 0xdce   : > { %5560 = vmatpush.bf16.msra.mxu0 %v10909_v28 }
 0xdd2   : > { %5561 = vmatpush.bf16.msra.mxu0 %v10908_v49 }
 0xe18   : > { %v5360_v45 = vpop.xlane.xlu0 %5359 }
 0xe19   : > { %11465 = vrcp.f32 %v5360_v45 }
 0xe1f   : > { %v11466_v27 = vpop.eup %11465 }
 0xe20   : > { %v5363_v53 = vpop.xlane.xlu1 %5362  ;;  %v5382_v9 = vmul.f32 %v11466_v27, %v11454_v61 }
 0xe21   : > { %11467 = vrcp.f32 %v5363_v53 }
 0xe22   : > { %v5388_v19 = vpack.c.bf16 %v5382_v9, %v5382_v9 }
 0xe24   : > { %v5397_v11 = vunpack.c.l.b16 %v5388_v19 }
 0xe27   : > { %v11468_v1 = vpop.eup %11467 }
 0xe28   : > { %v5383_v39 = vmul.f32 %v11468_v1, %v11456_v37  ;;  %v5366_v55 = vpop.xlane.xlu2 %5365 }
 0xe29   : > { %11469 = vrcp.f32 %v5366_v55 }
 0xe2a   : > { %v5389_v34 = vpack.c.bf16 %v5383_v39, %v5383_v39 }
 0xe2c   : > { %v5398_v33 = vunpack.c.l.b16 %v5389_v34 }
 0xe2e   : > { %v5400_v23 = vpack.c.b16 %v5398_v33, %v5397_v11 }
 0xe2f   : > { %v11470_v56 = vpop.eup %11469 }
 0xe30   : > { %v5369_v44 = vpop.xlane.xlu0 %5368  ;;  %9954 = vmatmul.msk.bf16.vlgmr.msrb.gmra.mxu2 %vm5321_vm14, %v5400_v23  ;;  %v5384_v21 = vmul.f32 %v11470_v56, %v11458_v0 }
 0xe31   : > { %11471 = vrcp.f32 %v5369_v44 }
 0xe32   : > { %v5390_v63 = vpack.c.bf16 %v5384_v21, %v5384_v21 }
 0xe34   : > { %v5399_v3 = vunpack.c.l.b16 %v5390_v63 }
 0xe36   : > { %v5401_v58 = vpack.c.b16 %v5399_v3, %v5399_v3 }
 0xe37   : > { %v11472_v32 = vpop.eup %11471 }
 0xe38   : > { %v5372_v22 = vpop.xlane.xlu1 %5371  ;;  %v5385_v2 = vmul.f32 %v11472_v32, %v11460_v18 }
 0xe39   : > { %11473 = vrcp.f32 %v5372_v22 }
 0xe3a   : > { %v5391_v29 = vpack.c.bf16 %v5385_v2, %v5385_v2 }
 0xe3c   : > { %v5442_v59 = vunpack.c.l.b16 %v5391_v29 }
 0xe3f   : > { %v11474_v13 = vpop.eup %11473 }
 0xe40   : > { %v5386_v8 = vmul.f32 %v11474_v13, %v11462_v31  ;;  %9955 = vmatmul.msk.bf16.gmra.mxu2 %vm5321_vm14, %v5401_v58  ;;  %v5375_v35 = vpop.xlane.xlu2 %5374 }
 0xe41   : > { %11475 = vrcp.f32 %v5375_v35 }
 0xe42   : > { %v5392_v38 = vpack.c.bf16 %v5386_v8, %v5386_v8 }
 0xe44   : > { %v5443_v43 = vunpack.c.l.b16 %v5392_v38 }
 0xe46   : > { %v5445_v61 = vpack.c.b16 %v5443_v43, %v5442_v59 }
 0xe47   : > { %v11476_v60 = vpop.eup %11475 }
 0xe48   : > { %9956 = vmatmul.msk.bf16.vlgmr.msra.gmra.mxu3 %vm5321_vm14, %v5445_v61  ;;  %v5387_v4 = vmul.f32 %v11476_v60, %v11464_v40  ;;  %v10946_v60 = vld [vmem:[%s14857_s2 + $0xec] sm:$0xf0] }
 0xe4a   : > { %v5393_v15 = vpack.c.bf16 %v5387_v4, %v5387_v4  ;;  %v10944_v4 = vld [vmem:[%s14857_s2 + $0xe4] sm:$0xf] }
 0xe4c   : > { %v5444_v37 = vunpack.c.l.b16 %v5393_v15  ;;  %v10105_v15 = vor.u32 %v10946_v60, %v10104_v5  ;;  %v10042_v60 = vld [vmem:[%s14857_s2 + $0x70] sm:$0xf0] }
 0xe4e   : > { %v5446_v26 = vpack.c.b16 %v5444_v37, %v5444_v37  ;;  %v10106_v37 = vld [vmem:[%s14857_s2 + $0xf0] sm:$0xf0]  ;;  %5950 = vmatpush.bf16.msra.mxu1 %v10105_v15  ;;  %v10931_v15 = vld [vmem:[%s14857_s2 + $0x74] sm:$0xf0] }
 0xe4f   : > { %v10109_v28 = vor.u32 %v10944_v4, %v10106_v37  ;;  %v10048_v4 = vld [vmem:[%s14857_s2 + $0x68] sm:$0xf] }
 0xe51   : > { %5974 = vmatpush.bf16.msra.mxu2 %v10109_v28  ;;  %v10050_v28 = vld [vmem:[%s14857_s2 + $0x78] sm:$0xf0] }
 0xe58   : > { %9957 = vmatmul.msk.bf16.gmra.mxu3 %vm5321_vm14, %v5446_v26  ;;  %v10112_v26 = vld [vmem:[%s14857_s2 + $0xe8] sm:$0xf] }
 0xe59   : > { %v10113_v49 = vor.u32 %v10947_v50, %v10112_v26  ;;  %v10049_v26 = vor.u32 %v10931_v15, %v10048_v4  ;;  %v10929_v50 = vld [vmem:[%s14857_s2 + $0x6c] sm:$0xf] }
 0xe5b   : > { %5998 = vmatpush.bf16.msrb.mxu3 %v10113_v49  ;;  %v10053_v49 = vor.u32 %v10929_v50, %v10050_v28 }
 0xeb3   : > { %v5430_v0 = vpop.f32.mrf.mxu2 }
 0xebb   : > { %v5432_v42 = vpop.f32.mrf.mxu2 }
 0xebc   : > { %v5483_v16 = vpack.c.bf16 %v5432_v42, %v5430_v0  ;;  %v10945_v0 = vld [vmem:[%s14857_s2 + $0xec] sm:$0xf]  ;;  %v10114_v42 = vld [vmem:[%s14857_s2 + $0xf8] sm:$0xf0] }
 0xebe   : > { %5562 = vmatmul.bf16.vlgmr.msra.gmra.mxu0 %v5483_v16  ;;  %v10117_v16 = vor.u32 %v10945_v0, %v10114_v42  ;;  %v10024_v0 = vld [vmem:[%s14857_s2 + $0x40] sm:$0xf]  ;;  %v10926_v42 = vld [vmem:[%s14857_s2 + $0x4c] sm:$0xf0] }
 0xec0   : > { %6022 = vmatpush.bf16.msrb.mxu0 %v10117_v16  ;;  %v10924_v16 = vld [vmem:[%s14857_s2 + $0x44] sm:$0xf] }
 0xec3   : > { %v5435_v41 = vpop.f32.mrf.mxu2 }
 0xecb   : > { %v5437_v51 = vpop.f32.mrf.mxu2  ;;  %v5474_v18 = vpop.f32.mrf.mxu3 }
 0xecc   : > { %v5484_v48 = vpack.c.bf16 %v5474_v18, %v5435_v41  ;;  %v10088_v41 = vld [vmem:[%s14857_s2 + $0xc0] sm:$0xf]  ;;  %v10942_v51 = vld [vmem:[%s14857_s2 + $0xcc] sm:$0xf0]  ;;  %v10940_v18 = vld [vmem:[%s14857_s2 + $0xc4] sm:$0xf] }
 0xece   : > { %5567 = vmatmul.bf16.gmra.mxu0 %v5484_v48  ;;  %v10089_v48 = vor.u32 %v10942_v51, %v10088_v41  ;;  %v10025_v41 = vor.u32 %v10926_v42, %v10024_v0  ;;  %v10026_v51 = vld [vmem:[%s14857_s2 + $0x50] sm:$0xf0] }
 0xed0   : > { %5951 = vmatpush.bf16.msra.mxu1 %v10089_v48  ;;  %v10927_v48 = vld [vmem:[%s14857_s2 + $0x54] sm:$0xf0] }
 0xed3   : > { %v5476_v47 = vpop.f32.mrf.mxu3 }
 0xedb   : > { %v5479_v46 = vpop.f32.mrf.mxu3 }
 0xedc   : > { %v5485_v54 = vpack.c.bf16 %v5479_v46, %v5476_v47  ;;  %v10090_v47 = vld [vmem:[%s14857_s2 + $0xd0] sm:$0xf0]  ;;  %v10096_v46 = vld [vmem:[%s14857_s2 + $0xc8] sm:$0xf] }
 0xede   : > { %5572 = vmatmul.bf16.gmra.mxu0 %v5485_v54  ;;  %v10943_v54 = vld [vmem:[%s14857_s2 + $0xd4] sm:$0xf0] }
 0xee3   : > { %v5481_v31 = vpop.f32.mrf.mxu3 }
 0xee4   : > { %v10093_v31 = vor.u32 %v10940_v18, %v10090_v47  ;;  %v10032_v18 = vld [vmem:[%s14857_s2 + $0x48] sm:$0xf] }
 0xee6   : > { %5975 = vmatpush.bf16.msra.mxu2 %v10093_v31  ;;  %v10925_v31 = vld [vmem:[%s14857_s2 + $0x4c] sm:$0xf] }
 0xf3b   : > { %v5563_v20 = vpop.f32.mrf.mxu0 }
 0xf3c   : > { %v5564_v40 = vadd.f32 %v11426_v25, %v5563_v20  ;;  %v10941_v20 = vld [vmem:[%s14857_s2 + $0xcc] sm:$0xf] }
 0xf3e   : > { %v13538_v24 = vadd.f32 %v5564_v40, %v13357_v12  ;;  %v10098_v40 = vld [vmem:[%s14857_s2 + $0xd8] sm:$0xf0] }
 0xf40   : > { %5586 = vadd.xlane.f32.xlu0 %v13538_v24 }
 0xf43   : > { %v5565_v45 = vpop.f32.mrf.mxu0 }
 0xf44   : > { %v5566_v53 = vadd.f32 %v11426_v25, %v5565_v45  ;;  %v10101_v45 = vor.u32 %v10941_v20, %v10098_v40 }
 0xf46   : > { %v13542_v27 = vadd.f32 %v5566_v53, %v13360_v14  ;;  %v10072_v53 = vld [vmem:[%s14857_s2 + $0xa0] sm:$0xf]  ;;  %6023 = vmatpush.bf16.msrb.mxu0 %v10101_v45 }
 0xf47   : > { %v10008_v45 = vld [vmem:[%s14857_s2 + $0x20] sm:$0xf] }
 0xf48   : > { %5588 = vadd.xlane.f32.xlu1 %v13542_v27 }
 0xf4b   : > { %v5568_v9 = vpop.f32.mrf.mxu0 }
 0xf4c   : > { %v5569_v1 = vadd.f32 %v11426_v25, %v5568_v9  ;;  %v10938_v9 = vld [vmem:[%s14857_s2 + $0xac] sm:$0xf0] }
 0xf4e   : > { %v13546_v19 = vadd.f32 %v5569_v1, %v13363_v57  ;;  %v10936_v1 = vld [vmem:[%s14857_s2 + $0xa4] sm:$0xf] }
 0xf50   : > { %5590 = vadd.xlane.f32.xlu2 %v13546_v19 }
 0xf53   : > { %v5570_v39 = vpop.f32.mrf.mxu0 }
 0xf54   : > { %v5571_v55 = vadd.f32 %v11426_v25, %v5570_v39  ;;  %v10073_v39 = vor.u32 %v10938_v9, %v10072_v53  ;;  %v10922_v53 = vld [vmem:[%s14857_s2 + $0x2c] sm:$0xf0]  ;;  %v10920_v9 = vld [vmem:[%s14857_s2 + $0x24] sm:$0xf] }
 0xf56   : > { %v13550_v12 = vadd.f32 %v5571_v55, %v13366_v52  ;;  %v10074_v55 = vld [vmem:[%s14857_s2 + $0xb0] sm:$0xf0]  ;;  %5952 = vmatpush.bf16.msra.mxu1 %v10073_v39  ;;  %v10009_v39 = vor.u32 %v10922_v53, %v10008_v45 }
 0xf58   : > { %5592 = vadd.xlane.f32.xlu0 %v13550_v12 }
 0xf5b   : > { %v5573_v34 = vpop.f32.mrf.mxu0 }
 0xf5c   : > { %v5574_v11 = vadd.f32 %v11426_v25, %v5573_v34  ;;  %v10080_v34 = vld [vmem:[%s14857_s2 + $0xa8] sm:$0xf] }
 0xf5e   : > { %v13554_v14 = vadd.f32 %v5574_v11, %v13369_v62  ;;  %v10939_v11 = vld [vmem:[%s14857_s2 + $0xb4] sm:$0xf0] }
 0xf60   : > { %5594 = vadd.xlane.f32.xlu1 %v13554_v14 }
 0xf63   : > { %v5575_v33 = vpop.f32.mrf.mxu0 }
 0xf64   : > { %v5576_v23 = vadd.f32 %v11426_v25, %v5575_v33  ;;  %v10097_v25 = vor.u32 %v10943_v54, %v10096_v46  ;;  %v10077_v33 = vor.u32 %v10936_v1, %v10074_v55  ;;  %v10029_v46 = vor.u32 %v10924_v16, %v10026_v51  ;;  %v10010_v55 = vld [vmem:[%s14857_s2 + $0x30] sm:$0xf0]  ;;  %v13665_v51 = vld [vmem:[%s14858_s16] ss:$0 sm:$0xff] }
 0xf65   : > { %v10033_v54 = vor.u32 %v10927_v48, %v10032_v18 }
 0xf66   : > { %v13558_v57 = vadd.f32 %v5576_v23, %v13372_v17  ;;  %5999 = vmatpush.bf16.msrb.mxu3 %v10097_v25  ;;  %v10081_v23 = vor.u32 %v10939_v11, %v10080_v34  ;;  %5976 = vmatpush.bf16.msra.mxu2 %v10077_v33  ;;  %v10034_v25 = vld [vmem:[%s14857_s2 + $0x58] sm:$0xf0]  ;;  %v10016_v34 = vld [vmem:[%s14857_s2 + $0x28] sm:$0xf]  ;;  %v10013_v11 = vor.u32 %v10920_v9, %v10010_v55  ;;  %v10923_v33 = vld [vmem:[%s14857_s2 + $0x34] sm:$0xf0] }
 0xf67   : > { %v10037_v40 = vor.u32 %v10925_v31, %v10034_v25 }
 0xf68   : > { %5596 = vadd.xlane.f32.xlu2 %v13558_v57 }
 0xf6a   : > { %6000 = vmatpush.bf16.msrb.mxu3 %v10081_v23  ;;  %v10921_v23 = vld [vmem:[%s14857_s2 + $0x2c] sm:$0xf] }
 0xfb3   : > { %v5587_v56 = vpop.xlane.xlu0 %5586 }
 0xfb4   : > { %v5598_v52 = vmul.f32 %v5587_v56, %v13375_v30  ;;  %v10937_v56 = vld [vmem:[%s14857_s2 + $0xac] sm:$0xf] }
 0xfb6   : > { %v13563_v44 = vsub.f32 %v13538_v24, %v5598_v52  ;;  %v10082_v52 = vld [vmem:[%s14857_s2 + $0xb8] sm:$0xf0] }
 0xfb8   : > { %v5610_v21 = vmul.f32 %v13563_v44, %v13563_v44 }
 0xfba   : > { %5616 = vadd.xlane.f32.xlu0 %v5610_v21  ;;  %v10085_v21 = vor.u32 %v10937_v56, %v10082_v52  ;;  %v10018_v56 = vld [vmem:[%s14857_s2 + $0x38] sm:$0xf0]  ;;  %v10017_v52 = vor.u32 %v10923_v33, %v10016_v34 }
 0xfbb   : > { %v5589_v62 = vpop.xlane.xlu1 %5588 }
 0xfbc   : > { %v5599_v63 = vmul.f32 %v5589_v62, %v13375_v30  ;;  %v10056_v62 = vld [vmem:[%s14857_s2 + $0x80] sm:$0xf]  ;;  %6024 = vmatpush.bf16.msrb.mxu0 %v10085_v21  ;;  %v10021_v21 = vor.u32 %v10921_v23, %v10018_v56 }
 0xfbe   : > { %v13569_v22 = vsub.f32 %v13542_v27, %v5599_v63  ;;  %v10934_v63 = vld [vmem:[%s14857_s2 + $0x8c] sm:$0xf0] }
 0xfc0   : > { %v5611_v17 = vmul.f32 %v13569_v22, %v13569_v22 }
 0xfc2   : > { %5618 = vadd.xlane.f32.xlu1 %v5611_v17  ;;  %v10932_v17 = vld [vmem:[%s14857_s2 + $0x84] sm:$0xf] }
 0xfc3   : > { %v5591_v6 = vpop.xlane.xlu2 %5590 }
 0xfc4   : > { %v5600_v32 = vmul.f32 %v5591_v6, %v13375_v30  ;;  %v10057_v6 = vor.u32 %v10934_v63, %v10056_v62  ;;  %v9992_v62 = vld [vmem:[%s14857_s2] sm:$0xf]  ;;  %v10918_v63 = vld [vmem:[%s14857_s2 + $0xc] sm:$0xf0] }
 0xfc6   : > { %v13575_v3 = vsub.f32 %v13546_v19, %v5600_v32  ;;  %v10058_v32 = vld [vmem:[%s14857_s2 + $0x90] sm:$0xf0]  ;;  %5953 = vmatpush.bf16.msra.mxu1 %v10057_v6  ;;  %v9993_v6 = vor.u32 %v10918_v63, %v9992_v62 }
 0xfc8   : > { %v5612_v36 = vmul.f32 %v13575_v3, %v13575_v3 }
 0xfca   : > { %5620 = vadd.xlane.f32.xlu2 %v5612_v36  ;;  %v10064_v36 = vld [vmem:[%s14857_s2 + $0x88] sm:$0xf] }
 0xfcb   : > { %v5593_v2 = vpop.xlane.xlu0 %5592 }
 0xfcc   : > { %v5601_v58 = vmul.f32 %v5593_v2, %v13375_v30  ;;  %v10935_v2 = vld [vmem:[%s14857_s2 + $0x94] sm:$0xf0] }
 0xfce   : > { %v13581_v10 = vsub.f32 %v13550_v12, %v5601_v58  ;;  %v10061_v58 = vor.u32 %v10932_v17, %v10058_v32  ;;  %v10916_v17 = vld [vmem:[%s14857_s2 + $0x4] sm:$0xf]  ;;  %v9994_v32 = vld [vmem:[%s14857_s2 + $0x10] sm:$0xf0] }
 0xfd0   : > { %v5613_v13 = vmul.f32 %v13581_v10, %v13581_v10  ;;  %5977 = vmatpush.bf16.msra.mxu2 %v10061_v58 }
 0xfd2   : > { %5622 = vadd.xlane.f32.xlu0 %v5613_v13  ;;  %v10065_v13 = vor.u32 %v10935_v2, %v10064_v36  ;;  %v10000_v36 = vld [vmem:[%s14857_s2 + $0x8] sm:$0xf]  ;;  %v10919_v2 = vld [vmem:[%s14857_s2 + $0x14] sm:$0xf0] }
 0xfd3   : > { %v5595_v29 = vpop.xlane.xlu1 %5594 }
 0xfd4   : > { %v5602_v8 = vmul.f32 %v5595_v29, %v13375_v30  ;;  %v10933_v29 = vld [vmem:[%s14857_s2 + $0x8c] sm:$0xf]  ;;  %6001 = vmatpush.bf16.msrb.mxu3 %v10065_v13  ;;  %v9997_v13 = vor.u32 %v10916_v17, %v9994_v32 }
 0xfd6   : > { %v13587_v35 = vsub.f32 %v13554_v14, %v5602_v8  ;;  %v10066_v8 = vld [vmem:[%s14857_s2 + $0x98] sm:$0xf0] }
 0xfd8   : > { %v5614_v38 = vmul.f32 %v13587_v35, %v13587_v35  ;;  %6002 = vmatpush.bf16.msrb.mxu3 %v10049_v26 }
 0xfda   : > { %5624 = vadd.xlane.f32.xlu1 %v5614_v38  ;;  %v10069_v38 = vor.u32 %v10933_v29, %v10066_v8  ;;  %v10001_v29 = vor.u32 %v10919_v2, %v10000_v36  ;;  %v10917_v8 = vld [vmem:[%s14857_s2 + $0xc] sm:$0xf] }
 0xfdb   : > { %v5597_v7 = vpop.xlane.xlu2 %5596 }
 0xfdc   : > { %v5603_v59 = vmul.f32 %v5597_v7, %v13375_v30  ;;  %v10040_v7 = vld [vmem:[%s14857_s2 + $0x60] sm:$0xf]  ;;  %6025 = vmatpush.bf16.msrb.mxu0 %v10069_v38  ;;  %6003 = vmatpush.bf16.msrb.mxu3 %v10033_v54  ;;  %v10002_v38 = vld [vmem:[%s14857_s2 + $0x18] sm:$0xf0] }
 0xfde   : > { %v13593_v43 = vsub.f32 %v13558_v57, %v5603_v59  ;;  %v10930_v59 = vld [vmem:[%s14857_s2 + $0x6c] sm:$0xf0] }
 0xfdf   : > { %v10041_v5 = vor.u32 %v10930_v59, %v10040_v7  ;;  %v10005_v59 = vor.u32 %v10917_v8, %v10002_v38 }
 0xfe0   : > { %v5615_v61 = vmul.f32 %v13593_v43, %v13593_v43  ;;  %6026 = vmatpush.bf16.msrb.mxu0 %v10053_v49  ;;  %6004 = vmatpush.bf16.msrb.mxu3 %v10017_v52 }
 0xfe1   : > { %5954 = vmatpush.bf16.msra.mxu1 %v10041_v5 }
 0xfe2   : > { %5626 = vadd.xlane.f32.xlu2 %v5615_v61  ;;  %v10928_v61 = vld [vmem:[%s14857_s2 + $0x64] sm:$0xf] }
 0xfe3   : > { %v10045_v37 = vor.u32 %v10928_v61, %v10042_v60 }
 0xfe4   : > { %6027 = vmatpush.bf16.msrb.mxu0 %v10037_v40  ;;  %6005 = vmatpush.bf16.msrb.mxu3 %v10001_v29  ;;  %v13671_v40 = vld [vmem:[%s14859_s9] ss:$0 sm:$0xff] }
 0xfe5   : > { %5978 = vmatpush.bf16.msra.mxu2 %v10045_v37  ;;  %5955 = vmatpush.bf16.msra.mxu1 %v10025_v41 }
 0xfe8   : > { %6028 = vmatpush.bf16.msrb.mxu0 %v10021_v21 }
 0xfe9   : > { %5979 = vmatpush.bf16.msra.mxu2 %v10029_v46  ;;  %5956 = vmatpush.bf16.msra.mxu1 %v10009_v39 }
 0xfec   : > { %6029 = vmatpush.bf16.msrb.mxu0 %v10005_v59 }
 0xfed   : > { %5980 = vmatpush.bf16.msra.mxu2 %v10013_v11  ;;  %5957 = vmatpush.bf16.msra.mxu1 %v9993_v6 }
 0xff1   : > { %5981 = vmatpush.bf16.msra.mxu2 %v9997_v13 }
0x102d   : > { %v5617_v47 = vpop.xlane.xlu0 %5616 }
0x102e   : > { %v5628_v20 = vmul.f32 %v5617_v47, %v13375_v30 }
0x1030   : > { %v5634_v1 = vadd.f32 1e-05, %v5628_v20 }
0x1032   : > { %11477 = vrsqrt.f32 %v5634_v1  ;;  %vm5646_vm0 = vweird.f32 %v5634_v1 }
0x1035   : > { %v5619_v58 = vpop.xlane.xlu1 %5618 }
0x1036   : > { %v5629_v7 = vmul.f32 %v5619_v58, %v13375_v30 }
0x1038   : > { %v11478_v61 = vpop.eup %11477  ;;  %v5635_v5 = vadd.f32 1e-05, %v5629_v7 }
0x1039   : > { %v5641_v60 = vmul.f32 %v11478_v61, %v5634_v1  ;;  %vm5647_vm15 = vweird.f32 %v11478_v61 }
0x103a   : > { %11479 = vrsqrt.f32 %v5635_v5  ;;  %vm5648_vm1 = vmor %vm5646_vm0, %vm5647_vm15  ;;  %vm5656_vm3 = vweird.f32 %v5635_v5 }
0x103b   : > { %v5642_v4 = vmul.f32 %v11478_v61, %v5641_v60 }
0x103d   : > { %v5643_v15 = vmul.f32 0.5, %v5642_v4  ;;  %v5621_v37 = vpop.xlane.xlu2 %5620 }
0x103e   : > { %v5630_v26 = vmul.f32 %v5621_v37, %v13375_v30 }
0x103f   : > { %v5644_v50 = vsub.f32 1.5, %v5643_v15 }
0x1040   : > { %v11480_v28 = vpop.eup %11479  ;;  %v5636_v49 = vadd.f32 1e-05, %v5630_v26 }
0x1041   : > { %v5645_v0 = vmul.f32 %v11478_v61, %v5644_v50  ;;  %v5651_v42 = vmul.f32 %v11480_v28, %v5635_v5  ;;  %vm5657_vm2 = vweird.f32 %v11480_v28 }
0x1042   : > { %11481 = vrsqrt.f32 %v5636_v49  ;;  %vm5658_vm4 = vmor %vm5656_vm3, %vm5657_vm2  ;;  %vm5666_vm6 = vweird.f32 %v5636_v49 }
0x1043   : > { %v5649_v16 = vsel %vm5648_vm1, %v11478_v61, %v5645_v0  ;;  %v5652_v41 = vmul.f32 %v11480_v28, %v5651_v42 }
0x1044   : > { %v5700_v18 = vmul.f32 %v5649_v16, %v13563_v44 }
0x1045   : > { %v5653_v48 = vmul.f32 0.5, %v5652_v41  ;;  %v5623_v47 = vpop.xlane.xlu0 %5622 }
0x1046   : > { %v5631_v46 = vmul.f32 %v5623_v47, %v13375_v30  ;;  %v5709_v25 = vmul.f32 %v13665_v51, %v5700_v18 }
0x1047   : > { %v5654_v54 = vsub.f32 1.5, %v5653_v48 }
0x1048   : > { %v11482_v31 = vpop.eup %11481  ;;  %v5637_v20 = vadd.f32 1e-05, %v5631_v46  ;;  %v5718_v39 = vadd.f32 %v13671_v40, %v5709_v25 }
0x1049   : > { %v5655_v45 = vmul.f32 %v11480_v28, %v5654_v54  ;;  %v5661_v53 = vmul.f32 %v11482_v31, %v5636_v49  ;;  %vm5667_vm5 = vweird.f32 %v11482_v31 }
0x104a   : > { %11483 = vrsqrt.f32 %v5637_v20  ;;  %v5724_v62 = vpack.c.bf16 %v5718_v39, %v5718_v39  ;;  %vm5668_vm7 = vmor %vm5666_vm6, %vm5667_vm5  ;;  %vm5676_vm9 = vweird.f32 %v5637_v20 }
0x104b   : > { %v5659_v9 = vsel %vm5658_vm4, %v11480_v28, %v5655_v45  ;;  %v5662_v1 = vmul.f32 %v11482_v31, %v5661_v53 }
0x104c   : > { %v5701_v44 = vmul.f32 %v5659_v9, %v13569_v22  ;;  %v5778_v2 = vunpack.c.l.b16 %v5724_v62  ;;  %v10971_v62 = vld [vmem:[%s14860_s7 + $0xb8] sm:$0xff] }
0x104d   : > { %v5663_v55 = vmul.f32 0.5, %v5662_v1  ;;  %v5625_v34 = vpop.xlane.xlu1 %5624  ;;  %6582 = vmatpush.bf16.msra.mxu3 %v10971_v62 }
0x104e   : > { %v5710_v11 = vmul.f32 %v13665_v51, %v5701_v44  ;;  %v5632_v33 = vmul.f32 %v5625_v34, %v13375_v30 }
0x104f   : > { %v5664_v23 = vsub.f32 1.5, %v5663_v55 }
0x1050   : > { %v11484_v56 = vpop.eup %11483  ;;  %v5638_v52 = vadd.f32 1e-05, %v5632_v33  ;;  %v5719_v21 = vadd.f32 %v13671_v40, %v5710_v11 }
0x1051   : > { %v5665_v63 = vmul.f32 %v11482_v31, %v5664_v23  ;;  %v5671_v17 = vmul.f32 %v11484_v56, %v5637_v20  ;;  %vm5677_vm8 = vweird.f32 %v11484_v56 }
0x1052   : > { %11485 = vrsqrt.f32 %v5638_v52  ;;  %v5725_v22 = vpack.c.bf16 %v5719_v21, %v5719_v21  ;;  %vm5678_vm10 = vmor %vm5676_vm9, %vm5677_vm8  ;;  %vm5686_vm12 = vweird.f32 %v5638_v52  ;;  %v10963_v21 = vld [vmem:[%s14860_s7 + $0x78] sm:$0xff]  ;;  %vm7189_vm8 = vcmask 64512  }
0x1053   : > { %v5669_v6 = vsel %vm5668_vm7, %v11482_v31, %v5665_v63  ;;  %v5672_v32 = vmul.f32 %v11484_v56, %v5671_v17  ;;  %6558 = vmatpush.bf16.msrb.mxu2 %v10963_v21  ;;  %v10953_v63 = vld [vmem:[%s14860_s7 + $0x28] sm:$0xff] }
0x1054   : > { %v5702_v36 = vmul.f32 %v5669_v6, %v13575_v3  ;;  %v5779_v58 = vunpack.c.l.b16 %v5725_v22  ;;  %v10977_v17 = vld [vmem:[%s14860_s7 + $0xe8] sm:$0xff]  ;;  %v10962_v22 = vld [vmem:[%s14860_s7 + $0x70] sm:$0xff] }
0x1055   : > { %v5673_v13 = vmul.f32 0.5, %v5672_v32  ;;  %v5627_v29 = vpop.xlane.xlu2 %5626  ;;  %v10970_v6 = vld [vmem:[%s14860_s7 + $0xb0] sm:$0xff]  ;;  %v10952_v32 = vld [vmem:[%s14860_s7 + $0x20] sm:$0xff] }
0x1056   : > { %v5633_v8 = vmul.f32 %v5627_v29, %v13375_v30  ;;  %v5784_v38 = vpack.c.b16 %v5779_v58, %v5778_v2  ;;  %v5711_v61 = vmul.f32 %v13665_v51, %v5702_v36  ;;  %6583 = vmatpush.bf16.msra.mxu3 %v10970_v6  ;;  %v10976_v36 = vld [vmem:[%s14860_s7 + $0xe0] sm:$0xff]  ;;  %v10961_v2 = vld [vmem:[%s14860_s7 + $0x68] sm:$0xff]  ;;  %v10975_v29 = vld [vmem:[%s14860_s7 + $0xd8] sm:$0xff] }
0x1057   : > { %v5674_v7 = vsub.f32 1.5, %v5673_v13  ;;  %6559 = vmatpush.bf16.msrb.mxu2 %v10962_v22  ;;  %v10969_v58 = vld [vmem:[%s14860_s7 + $0xa8] sm:$0xff]  ;;  %v10951_v13 = vld [vmem:[%s14860_s7 + $0x18] sm:$0xff] }
0x1058   : > { %v11486_v59 = vpop.eup %11485  ;;  %v5639_v5 = vadd.f32 1e-05, %v5633_v8  ;;  %5958 = vmatmul.bf16.vlgmr.msra.gmra.mxu1 %v5784_v38  ;;  %5982 = vmatmul.bf16.vlgmr.msra.gmra.mxu2 %v5784_v38  ;;  %v5720_v26 = vadd.f32 %v13671_v40, %v5711_v61  ;;  %v10960_v8 = vld [vmem:[%s14860_s7 + $0x60] sm:$0xff] }
0x1059   : > { %v5675_v60 = vmul.f32 %v11484_v56, %v5674_v7  ;;  %v5681_v4 = vmul.f32 %v11486_v59, %v5638_v52  ;;  %6006 = vmatmul.bf16.vlgmr.msrb.gmra.mxu3 %v5784_v38  ;;  %6030 = vmatmul.bf16.vlgmr.msrb.gmra.mxu0 %v5784_v38  ;;  %vm5687_vm11 = vweird.f32 %v11486_v59  ;;  %v10979_v52 = vld [vmem:[%s14860_s7 + $0xf8] sm:$0xff]  ;;  %v10968_v38 = vld [vmem:[%s14860_s7 + $0xa0] sm:$0xff] }
0x105a   : > { %11487 = vrsqrt.f32 %v5639_v5  ;;  %v5726_v16 = vpack.c.bf16 %v5720_v26, %v5720_v26  ;;  %vm5688_vm14 = vmor %vm5686_vm12, %vm5687_vm11  ;;  %vm5696_vm0 = vweird.f32 %v5639_v5  ;;  %6606 = vmatpush.bf16.msra.mxu0 %v10979_v52  ;;  %6584 = vmatpush.bf16.msra.mxu3 %v10969_v58  ;;  %v5762_v7 = vld [vmem:[%s14861_s17] sm:$0xf] }
0x105b   : > { %v5679_v3 = vsel %vm5678_vm10, %v11484_v56, %v5675_v60  ;;  %v5682_v15 = vmul.f32 %v11486_v59, %v5681_v4  ;;  %6560 = vmatpush.bf16.msrb.mxu2 %v10961_v2  ;;  %v13712_v61 = vperm.slane %v5762_v7, 3  ;;  %v10974_v60 = vld [vmem:[%s14860_s7 + $0xd0] sm:$0xff] }
0x105c   : > { %v5703_v37 = vmul.f32 %v5679_v3, %v13581_v10  ;;  %v5780_v54 = vunpack.c.l.b16 %v5726_v16  ;;  %v10959_v3 = vld [vmem:[%s14860_s7 + $0x58] sm:$0xff] }
0x105d   : > { %v5683_v50 = vmul.f32 0.5, %v5682_v15  ;;  %v10967_v15 = vld [vmem:[%s14860_s7 + $0x98] sm:$0xff] }
0x105e   : > { %v5712_v28 = vmul.f32 %v13665_v51, %v5703_v37  ;;  %6585 = vmatpush.bf16.msra.mxu3 %v10968_v38 }
0x105f   : > { %v5684_v49 = vsub.f32 1.5, %v5683_v50  ;;  %6561 = vmatpush.bf16.msrb.mxu2 %v10960_v8 }
0x1060   : > { %v11488_v0 = vpop.eup %11487  ;;  %v5721_v42 = vadd.f32 %v13671_v40, %v5712_v28  ;;  %v10949_v28 = vld [vmem:[%s14860_s7 + $0x8] sm:$0xff] }
0x1061   : > { %v5685_v41 = vmul.f32 %v11486_v59, %v5684_v49  ;;  %v5691_v18 = vmul.f32 %v11488_v0, %v5639_v5  ;;  %vm5697_vm15 = vweird.f32 %v11488_v0  ;;  %v10950_v5 = vld [vmem:[%s14860_s7 + $0x10] sm:$0xff]  ;;  %v10973_v49 = vld [vmem:[%s14860_s7 + $0xc8] sm:$0xff] }
0x1062   : > { %v5727_v48 = vpack.c.bf16 %v5721_v42, %v5721_v42  ;;  %vm5698_vm1 = vmor %vm5696_vm0, %vm5697_vm15  ;;  %6586 = vmatpush.bf16.msra.mxu3 %v10967_v15  ;;  %v13728_v42 = vperm.slane %v5762_v7, 1 }
0x1063   : > { %v5689_v47 = vsel %vm5688_vm14, %v11486_v59, %v5685_v41  ;;  %v5692_v46 = vmul.f32 %v11488_v0, %v5691_v18  ;;  %v13710_v59 = vperm.slane %v5762_v7, 0  ;;  %6562 = vmatpush.bf16.msrb.mxu2 %v10959_v3  ;;  %v13732_v41 = vperm.slane %v5762_v7, 2  ;;  %v10958_v18 = vld [vmem:[%s14860_s7 + $0x50] sm:$0xff] }
0x1064   : > { %v5704_v10 = vmul.f32 %v5689_v47, %v13587_v35  ;;  %v5781_v31 = vunpack.c.l.b16 %v5727_v48  ;;  %v10966_v48 = vld [vmem:[%s14860_s7 + $0x90] sm:$0xff] }
0x1065   : > { %v5693_v25 = vmul.f32 0.5, %v5692_v46 }
0x1066   : > { %v5785_v20 = vpack.c.b16 %v5781_v31, %v5780_v54  ;;  %v5713_v53 = vmul.f32 %v13665_v51, %v5704_v10  ;;  %6587 = vmatpush.bf16.msra.mxu3 %v10966_v48  ;;  %v10948_v54 = vld [vmem:[%s14860_s7] sm:$0xff] }
0x1067   : > { %v5694_v45 = vsub.f32 1.5, %v5693_v25  ;;  %6563 = vmatpush.bf16.msrb.mxu2 %v10958_v18  ;;  %v10972_v31 = vld [vmem:[%s14860_s7 + $0xc0] sm:$0xff] }
0x1068   : > { %5963 = vmatmul.bf16.gmra.mxu1 %v5785_v20  ;;  %5987 = vmatmul.bf16.gmra.mxu2 %v5785_v20  ;;  %v5722_v44 = vadd.f32 %v13671_v40, %v5713_v53 }
0x1069   : > { %v5695_v9 = vmul.f32 %v11488_v0, %v5694_v45  ;;  %6011 = vmatmul.bf16.gmra.mxu3 %v5785_v20  ;;  %6035 = vmatmul.bf16.gmra.mxu0 %v5785_v20 }
0x106a   : > { %v5728_v34 = vpack.c.bf16 %v5722_v44, %v5722_v44  ;;  %v10965_v44 = vld [vmem:[%s14860_s7 + $0x88] sm:$0xff] }
0x106b   : > { %v5699_v1 = vsel %vm5698_vm1, %v11488_v0, %v5695_v9  ;;  %6588 = vmatpush.bf16.msra.mxu3 %v10965_v44 }
0x106c   : > { %v5705_v35 = vmul.f32 %v5699_v1, %v13593_v43  ;;  %v5782_v33 = vunpack.c.l.b16 %v5728_v34  ;;  %v10955_v43 = vld [vmem:[%s14860_s7 + $0x38] sm:$0xff] }
0x106d   : > { %6534 = vmatpush.bf16.msrb.mxu1 %v10955_v43 }
0x106e   : > { %v5714_v39 = vmul.f32 %v13665_v51, %v5705_v35  ;;  %v10954_v51 = vld [vmem:[%s14860_s7 + $0x30] sm:$0xff]  ;;  %v10957_v35 = vld [vmem:[%s14860_s7 + $0x48] sm:$0xff] }
0x106f   : > { %6564 = vmatpush.bf16.msrb.mxu2 %v10957_v35 }
0x1070   : > { %v5723_v55 = vadd.f32 %v13671_v40, %v5714_v39  ;;  %v10978_v40 = vld [vmem:[%s14860_s7 + $0xf0] sm:$0xff] }
0x1071   : > { %6535 = vmatpush.bf16.msrb.mxu1 %v10954_v51  ;;  %6607 = vmatpush.bf16.msra.mxu0 %v10978_v40 }
0x1072   : > { %v5729_v11 = vpack.c.bf16 %v5723_v55, %v5723_v55 }
0x1074   : > { %v5783_v23 = vunpack.c.l.b16 %v5729_v11 }
0x1075   : > { %6536 = vmatpush.bf16.msrb.mxu1 %v10953_v63  ;;  %6608 = vmatpush.bf16.msra.mxu0 %v10977_v17  ;;  %v10956_v63 = vld [vmem:[%s14860_s7 + $0x40] sm:$0xff] }
0x1076   : > { %v5786_v56 = vpack.c.b16 %v5783_v23, %v5782_v33  ;;  %v10964_v17 = vld [vmem:[%s14860_s7 + $0x80] sm:$0xff]  ;;  %6565 = vmatpush.bf16.msrb.mxu2 %v10956_v63 }
0x1077   : > { %6589 = vmatpush.bf16.msra.mxu3 %v10964_v17 }
0x1078   : > { %5968 = vmatmul.bf16.gmra.mxu1 %v5786_v56  ;;  %5992 = vmatmul.bf16.gmra.mxu2 %v5786_v56 }
0x1079   : > { %6016 = vmatmul.bf16.gmra.mxu3 %v5786_v56  ;;  %6040 = vmatmul.bf16.gmra.mxu0 %v5786_v56 }
0x107a   : > { %6537 = vmatpush.bf16.msrb.mxu1 %v10952_v32  ;;  %6609 = vmatpush.bf16.msra.mxu0 %v10976_v36 }
0x107e   : > { %6538 = vmatpush.bf16.msrb.mxu1 %v10951_v13  ;;  %6610 = vmatpush.bf16.msra.mxu0 %v10975_v29 }
0x1082   : > { %6539 = vmatpush.bf16.msrb.mxu1 %v10950_v5  ;;  %6611 = vmatpush.bf16.msra.mxu0 %v10974_v60 }
0x1086   : > { %6540 = vmatpush.bf16.msrb.mxu1 %v10949_v28  ;;  %6612 = vmatpush.bf16.msra.mxu0 %v10973_v49 }
0x108a   : > { %6541 = vmatpush.bf16.msrb.mxu1 %v10948_v54  ;;  %6613 = vmatpush.bf16.msra.mxu0 %v10972_v31 }
0x10d5   : > { %v5959_v4 = vpop.f32.mrf.mxu1 }
0x10d6   : > { %v13719_v37 = vadd.f32 %v5959_v4, %v13710_v59  ;;  %v6031_v26 = vpop.f32.mrf.mxu0 }
0x10d7   : > { %v13722_v50 = vadd.f32 %v6031_v26, %v13712_v61 }
0x10d8   : > { %v6046_v0 = vmul.f32 %v13719_v37, %v13719_v37 }
0x10d9   : > { %v6049_v16 = vmul.f32 %v13722_v50, %v13722_v50 }
0x10da   : > { %v6070_v47 = vmul.f32 %v6046_v0, %v13719_v37 }
0x10db   : > { %v6073_v46 = vmul.f32 %v6049_v16, %v13722_v50  ;;  %v5983_v10 = vpop.f32.mrf.mxu2 }
0x10dc   : > { %v6094_v25 = vmul.f32 0.044715, %v6070_v47  ;;  %v13741_v20 = vadd.f32 %v5983_v10, %v13728_v42  ;;  %v6007_v45 = vpop.f32.mrf.mxu3 }
0x10dd   : > { %v6097_v53 = vmul.f32 0.044715, %v6073_v46  ;;  %v13744_v9 = vadd.f32 %v6007_v45, %v13732_v41  ;;  %v5961_v1 = vpop.f32.mrf.mxu1 }
0x10de   : > { %v6118_v39 = vadd.f32 %v6094_v25, %v13719_v37  ;;  %v6047_v55 = vmul.f32 %v13741_v20, %v13741_v20  ;;  %v13752_v34 = vadd.f32 %v5961_v1, %v13710_v59  ;;  %v6033_v11 = vpop.f32.mrf.mxu0 }
0x10df   : > { %v6121_v33 = vadd.f32 %v6097_v53, %v13722_v50  ;;  %v6048_v23 = vmul.f32 %v13744_v9, %v13744_v9  ;;  %v13758_v56 = vadd.f32 %v6033_v11, %v13712_v61 }
0x10e0   : > { %v6142_v43 = vmul.f32 0.7978846, %v6118_v39  ;;  %v6071_v52 = vmul.f32 %v6047_v55, %v13741_v20  ;;  %v6050_v51 = vmul.f32 %v13752_v34, %v13752_v34 }
0x10e1   : > { %v6145_v40 = vmul.f32 0.7978846, %v6121_v33  ;;  %v6072_v21 = vmul.f32 %v6048_v23, %v13744_v9  ;;  %v6053_v62 = vmul.f32 %v13758_v56, %v13758_v56 }
0x10e2   : > { %11489 = vtanh.f32 %v6142_v43  ;;  %v6095_v22 = vmul.f32 0.044715, %v6071_v52  ;;  %v6074_v6 = vmul.f32 %v6050_v51, %v13752_v34 }
0x10e3   : > { %11491 = vtanh.f32 %v6145_v40  ;;  %v6096_v32 = vmul.f32 0.044715, %v6072_v21  ;;  %v6077_v36 = vmul.f32 %v6053_v62, %v13758_v56  ;;  %v5985_v2 = vpop.f32.mrf.mxu2 }
0x10e4   : > { %v6119_v58 = vadd.f32 %v6095_v22, %v13741_v20  ;;  %v6098_v13 = vmul.f32 0.044715, %v6074_v6  ;;  %v13772_v29 = vadd.f32 %v5985_v2, %v13728_v42  ;;  %v6009_v8 = vpop.f32.mrf.mxu3 }
0x10e5   : > { %v6120_v38 = vadd.f32 %v6096_v32, %v13744_v9  ;;  %v6101_v7 = vmul.f32 0.044715, %v6077_v36  ;;  %v13776_v5 = vadd.f32 %v6009_v8, %v13732_v41  ;;  %v5964_v60 = vpop.f32.mrf.mxu1 }
0x10e6   : > { %v6143_v4 = vmul.f32 0.7978846, %v6119_v58  ;;  %v6122_v3 = vadd.f32 %v6098_v13, %v13752_v34  ;;  %v6051_v15 = vmul.f32 %v13772_v29, %v13772_v29  ;;  %v13782_v26 = vadd.f32 %v5964_v60, %v13710_v59  ;;  %v6036_v28 = vpop.f32.mrf.mxu0 }
0x10e7   : > { %v6144_v49 = vmul.f32 0.7978846, %v6120_v38  ;;  %v6125_v0 = vadd.f32 %v6101_v7, %v13758_v56  ;;  %v6052_v16 = vmul.f32 %v13776_v5, %v13776_v5  ;;  %v13788_v18 = vadd.f32 %v6036_v28, %v13712_v61 }
0x10e8   : > { %v11490_v48 = vpop.eup %11489  ;;  %11493 = vtanh.f32 %v6143_v4  ;;  %v6146_v47 = vmul.f32 0.7978846, %v6122_v3  ;;  %v6075_v46 = vmul.f32 %v6051_v15, %v13772_v29  ;;  %v6054_v10 = vmul.f32 %v13782_v26, %v13782_v26 }
0x10e9   : > { %v11492_v54 = vpop.eup %11491  ;;  %v6190_v31 = vadd.f32 1.0, %v11490_v48  ;;  %11495 = vtanh.f32 %v6144_v49  ;;  %v6149_v25 = vmul.f32 0.7978846, %v6125_v0  ;;  %v6076_v45 = vmul.f32 %v6052_v16, %v13776_v5 }
0x10ea   : > { %v6193_v53 = vadd.f32 1.0, %v11492_v54  ;;  %11497 = vtanh.f32 %v6146_v47  ;;  %v6099_v1 = vmul.f32 0.044715, %v6075_v46  ;;  %v6078_v35 = vmul.f32 %v6054_v10, %v13782_v26 }
0x10eb   : > { %11499 = vtanh.f32 %v6149_v25  ;;  %v6100_v44 = vmul.f32 0.044715, %v6076_v45  ;;  %v6057_v39 = vmul.f32 %v13788_v18, %v13788_v18  ;;  %v5988_v55 = vpop.f32.mrf.mxu2  ;;  %v6214_v43 = vmul.f32 0.5, %v6190_v31 }
0x10ec   : > { %v6123_v11 = vadd.f32 %v6099_v1, %v13772_v29  ;;  %v13799_v33 = vadd.f32 %v5988_v55, %v13728_v42  ;;  %v6012_v23 = vpop.f32.mrf.mxu3  ;;  %v6217_v63 = vmul.f32 0.5, %v6193_v53  ;;  %v6102_v22 = vmul.f32 0.044715, %v6078_v35 }
0x10ed   : > { %v6124_v52 = vadd.f32 %v6100_v44, %v13776_v5  ;;  %v6081_v51 = vmul.f32 %v6057_v39, %v13788_v18  ;;  %v13804_v40 = vadd.f32 %v6012_v23, %v13732_v41  ;;  %v5966_v21 = vpop.f32.mrf.mxu1  ;;  %v6238_v48 = vmul.f32 %v6214_v43, %v13719_v37 }
0x10ee   : > { %v11494_v62 = vpop.eup %11493  ;;  %v6147_v17 = vmul.f32 0.7978846, %v6123_v11  ;;  %v6055_v6 = vmul.f32 %v13799_v33, %v13799_v33  ;;  %v6038_v32 = vpop.f32.mrf.mxu0  ;;  %v13812_v4 = vadd.f32 %v5966_v21, %v13710_v59  ;;  %v6241_v47 = vmul.f32 %v6217_v63, %v13722_v50 }
0x10ef   : > { %v11496_v36 = vpop.eup %11495  ;;  %v6191_v2 = vadd.f32 1.0, %v11494_v62  ;;  %v6148_v58 = vmul.f32 0.7978846, %v6124_v52  ;;  %v6105_v13 = vmul.f32 0.044715, %v6081_v51  ;;  %v6056_v8 = vmul.f32 %v13804_v40, %v13804_v40 }
0x10f0   : > { %v11498_v38 = vpop.eup %11497  ;;  %v6192_v7 = vadd.f32 1.0, %v11496_v36  ;;  %11501 = vtanh.f32 %v6147_v17  ;;  %v6079_v60 = vmul.f32 %v6055_v6, %v13799_v33  ;;  %v6058_v10 = vmul.f32 %v13812_v4, %v13812_v4 }
0x10f1   : > { %v11500_v3 = vpop.eup %11499  ;;  %v6215_v15 = vmul.f32 0.5, %v6191_v2  ;;  %v6194_v28 = vadd.f32 1.0, %v11498_v38  ;;  %11503 = vtanh.f32 %v6148_v58  ;;  %v6129_v49 = vadd.f32 %v6105_v13, %v13788_v18 }
0x10f2   : > { %v6197_v0 = vadd.f32 1.0, %v11500_v3  ;;  %v6103_v16 = vmul.f32 0.044715, %v6079_v60  ;;  %v6216_v31 = vmul.f32 0.5, %v6192_v7  ;;  %v13820_v45 = vadd.f32 %v6102_v22, %v13782_v26 }
0x10f3   : > { %v6218_v46 = vmul.f32 0.5, %v6194_v28  ;;  %v5990_v54 = vpop.f32.mrf.mxu2  ;;  %v13824_v35 = vmul.f32 %v6215_v15, %v13741_v20  ;;  %v6153_v44 = vmul.f32 0.7978846, %v6129_v49  ;;  %v6080_v37 = vmul.f32 %v6056_v8, %v13804_v40 }
0x10f4   : > { %v6221_v25 = vmul.f32 0.5, %v6197_v0  ;;  %v6127_v53 = vadd.f32 %v6103_v16, %v13799_v33  ;;  %v6014_v1 = vpop.f32.mrf.mxu3  ;;  %v13828_v50 = vadd.f32 %v6038_v32, %v13712_v61  ;;  %v6082_v43 = vmul.f32 %v6058_v10, %v13812_v4 }
0x10f5   : > { %v5969_v39 = vpop.f32.mrf.mxu1  ;;  %v6242_v11 = vmul.f32 %v6218_v46, %v13752_v34  ;;  %v13834_v52 = vadd.f32 %v5990_v54, %v13728_v42  ;;  %v13839_v17 = vadd.f32 %v6014_v1, %v13732_v41  ;;  %v13842_v22 = vmul.f32 %v6216_v31, %v13744_v9 }
0x10f6   : > { %v11502_v55 = vpop.eup %11501  ;;  %v6245_v23 = vmul.f32 %v6221_v25, %v13758_v56  ;;  %v6041_v51 = vpop.f32.mrf.mxu0  ;;  %v6151_v62 = vmul.f32 0.7978846, %v6127_v53  ;;  %v6061_v63 = vmul.f32 %v13828_v50, %v13828_v50  ;;  %11505 = vtanh.f32 %v6153_v44 }
0x10f7   : > { %v11504_v20 = vpop.eup %11503  ;;  %v6195_v21 = vadd.f32 1.0, %v11502_v55  ;;  %v6059_v6 = vmul.f32 %v13834_v52, %v13834_v52  ;;  %v6104_v32 = vmul.f32 0.044715, %v6080_v37  ;;  %v6060_v2 = vmul.f32 %v13839_v17, %v13839_v17 }
0x10f8   : > { %v6265_v34 = vpack.c.bf16 %v6245_v23, %v6241_v47  ;;  %v6196_v56 = vadd.f32 1.0, %v11504_v20  ;;  %v6085_v36 = vmul.f32 %v6061_v63, %v13828_v50  ;;  %v6106_v58 = vmul.f32 0.044715, %v6082_v43 }
0x10f9   : > { %v6083_v13 = vmul.f32 %v6059_v6, %v13834_v52  ;;  %v13851_v8 = vadd.f32 %v5969_v39, %v13710_v59  ;;  %v13854_v9 = vadd.f32 %v6041_v51, %v13712_v61  ;;  %v6219_v38 = vmul.f32 0.5, %v6195_v21 }
0x10fa   : > { %6614 = vmatmul.bf16.vlgmr.msra.gmra.mxu0 %v6265_v34  ;;  %11507 = vtanh.f32 %v6151_v62  ;;  %v6109_v7 = vmul.f32 0.044715, %v6085_v36  ;;  %v6262_v60 = vpack.c.bf16 %v6242_v11, %v6238_v48  ;;  %v6220_v15 = vmul.f32 0.5, %v6196_v56 }
0x10fb   : > { %v5993_v3 = vpop.f32.mrf.mxu2  ;;  %v6107_v28 = vmul.f32 0.044715, %v6083_v13  ;;  %v6062_v49 = vmul.f32 %v13851_v8, %v13851_v8  ;;  %v6065_v0 = vmul.f32 %v13854_v9, %v13854_v9  ;;  %v6084_v46 = vmul.f32 %v6060_v2, %v13839_v17 }
0x10fc   : > { %v6017_v16 = vpop.f32.mrf.mxu3  ;;  %v6133_v47 = vadd.f32 %v6109_v7, %v13828_v50  ;;  %6542 = vmatmul.bf16.vlgmr.msrb.gmra.mxu1 %v6262_v60  ;;  %v13863_v10 = vadd.f32 %v5993_v3, %v13728_v42  ;;  %v11506_v37 = vpop.eup %11505  ;;  %v6243_v39 = vmul.f32 %v6219_v38, %v13772_v29  ;;  %v6244_v43 = vmul.f32 %v6220_v15, %v13776_v5 }
0x10fd   : > { %v13866_v48 = vadd.f32 %v6017_v16, %v13732_v41  ;;  %v5971_v54 = vpop.f32.mrf.mxu1  ;;  %v6131_v31 = vadd.f32 %v6107_v28, %v13834_v52  ;;  %v6086_v25 = vmul.f32 %v6062_v49, %v13851_v8  ;;  %v6089_v53 = vmul.f32 %v6065_v0, %v13854_v9 }
0x10fe   : > { %v13872_v1 = vadd.f32 %v5971_v54, %v13710_v59  ;;  %v6043_v44 = vpop.f32.mrf.mxu0  ;;  %v6157_v55 = vmul.f32 0.7978846, %v6133_v47  ;;  %v6063_v11 = vmul.f32 %v13863_v10, %v13863_v10  ;;  %v6108_v62 = vmul.f32 0.044715, %v6084_v46 }
0x10ff   : > { %v6064_v23 = vmul.f32 %v13866_v48, %v13866_v48  ;;  %v6155_v51 = vmul.f32 0.7978846, %v6131_v31  ;;  %v6113_v20 = vmul.f32 0.044715, %v6089_v53  ;;  %v13884_v29 = vadd.f32 %v6043_v44, %v13712_v61 }
0x1100   : > { %v6066_v21 = vmul.f32 %v13872_v1, %v13872_v1  ;;  %v11508_v59 = vpop.eup %11507  ;;  %11509 = vtanh.f32 %v6157_v55  ;;  %v6087_v63 = vmul.f32 %v6063_v11, %v13863_v10  ;;  %v6110_v34 = vmul.f32 0.044715, %v6086_v25 }
0x1101   : > { %11511 = vtanh.f32 %v6155_v51  ;;  %v6137_v56 = vadd.f32 %v6113_v20, %v13854_v9  ;;  %v6088_v6 = vmul.f32 %v6064_v23, %v13866_v48  ;;  %v6069_v2 = vmul.f32 %v13884_v29, %v13884_v29 }
0x1102   : > { %v6111_v5 = vmul.f32 0.044715, %v6087_v63  ;;  %v6090_v36 = vmul.f32 %v6066_v21, %v13872_v1  ;;  %v6263_v13 = vpack.c.bf16 %v6243_v39, %v13824_v35  ;;  %v6128_v7 = vadd.f32 %v6104_v32, %v13804_v40  ;;  %v10994_v63 = vld [vmem:[%s14862_s30 + $0x74] sm:$0xf] }
0x1103   : > { %v5995_v38 = vpop.f32.mrf.mxu2  ;;  %v6130_v61 = vadd.f32 %v6106_v58, %v13812_v4  ;;  %v6264_v60 = vpack.c.bf16 %v6244_v43, %v13842_v22  ;;  %v6132_v28 = vadd.f32 %v6108_v62, %v13839_v17  ;;  %v6161_v49 = vmul.f32 0.7978846, %v6137_v56 }
0x1104   : > { %v13896_v3 = vadd.f32 %v5995_v38, %v13728_v42  ;;  %v6019_v15 = vpop.f32.mrf.mxu3  ;;  %v6093_v0 = vmul.f32 %v6069_v2, %v13884_v29  ;;  %6566 = vmatmul.bf16.vlgmr.msrb.gmra.mxu2 %v6263_v13  ;;  %v13904_v35 = vadd.f32 %v6110_v34, %v13851_v8  ;;  %v6135_v32 = vadd.f32 %v6111_v5, %v13863_v10  ;;  %v10298_v2 = vld [vmem:[%s14862_s30 + $0x68] sm:$0xf0] }
0x1105   : > { %v13901_v16 = vadd.f32 %v6019_v15, %v13732_v41  ;;  %6590 = vmatmul.bf16.vlgmr.msra.gmra.mxu3 %v6264_v60  ;;  %v6150_v22 = vmul.f32 0.7978846, %v13820_v45  ;;  %v6112_v47 = vmul.f32 0.044715, %v6088_v6  ;;  %v6114_v46 = vmul.f32 0.044715, %v6090_v36 }
0x1106   : > { %v6067_v42 = vmul.f32 %v13896_v3, %v13896_v3  ;;  %v11510_v58 = vpop.eup %11509  ;;  %v6117_v54 = vmul.f32 0.044715, %v6093_v0  ;;  %v6154_v53 = vmul.f32 0.7978846, %v6130_v61  ;;  %v6201_v44 = vadd.f32 1.0, %v11506_v37 }
0x1107   : > { %v6068_v31 = vmul.f32 %v13901_v16, %v13901_v16  ;;  %v11512_v41 = vpop.eup %11511  ;;  %11513 = vtanh.f32 %v6150_v22  ;;  %v6205_v55 = vadd.f32 1.0, %v11510_v58  ;;  %v6159_v11 = vmul.f32 0.7978846, %v6135_v32  ;;  %v10306_v37 = vld [vmem:[%s14862_s30 + $0x78] sm:$0xf0] }
0x1108   : > { %v6091_v25 = vmul.f32 %v6067_v42, %v13896_v3  ;;  %11515 = vtanh.f32 %v6161_v49  ;;  %v6141_v39 = vadd.f32 %v6117_v54, %v13884_v29  ;;  %v6225_v43 = vmul.f32 0.5, %v6201_v44  ;;  %v10992_v36 = vld [vmem:[%s14862_s30 + $0x64] sm:$0xf]  ;;  %v10304_v61 = vld [vmem:[%s14862_s30 + $0x70] sm:$0xf] }
0x1109   : > { %v6092_v45 = vmul.f32 %v6068_v31, %v13901_v16  ;;  %v6199_v51 = vadd.f32 1.0, %v11508_v59  ;;  %11517 = vtanh.f32 %v6154_v53  ;;  %v6229_v62 = vmul.f32 0.5, %v6205_v55  ;;  %v10995_v60 = vld [vmem:[%s14862_s30 + $0x74] sm:$0xf0]  ;;  %v10296_v54 = vld [vmem:[%s14862_s30 + $0x60] sm:$0xf] }
0x110a   : > { %v6115_v23 = vmul.f32 0.044715, %v6091_v25  ;;  %v6165_v20 = vmul.f32 0.7978846, %v6141_v39  ;;  %v6138_v34 = vadd.f32 %v6114_v46, %v13872_v1  ;;  %v6203_v6 = vadd.f32 1.0, %v11512_v41 }
0x110b   : > { %v6116_v21 = vmul.f32 0.044715, %v6092_v45  ;;  %v6223_v5 = vmul.f32 0.5, %v6199_v51  ;;  %v6249_v13 = vmul.f32 %v6225_v43, %v13788_v18  ;;  %v6253_v59 = vmul.f32 %v6229_v62, %v13828_v50  ;;  %v10993_v31 = vld [vmem:[%s14862_s30 + $0x64] sm:$0xf0] }
0x110c   : > { %v6139_v56 = vadd.f32 %v6115_v23, %v13896_v3  ;;  %11519 = vtanh.f32 %v6165_v20  ;;  %v6152_v38 = vmul.f32 0.7978846, %v6128_v7  ;;  %v6227_v0 = vmul.f32 0.5, %v6203_v6  ;;  %v10990_v39 = vld [vmem:[%s14862_s30 + $0x54] sm:$0xf] }
0x110d   : > { %v11514_v15 = vpop.eup %11513  ;;  %11521 = vtanh.f32 %v6159_v11  ;;  %v6156_v32 = vmul.f32 0.7978846, %v6132_v28  ;;  %v6140_v22 = vadd.f32 %v6116_v21, %v13901_v16  ;;  %v6269_v46 = vpack.c.bf16 %v6253_v59, %v6249_v13  ;;  %v10988_v59 = vld [vmem:[%s14862_s30 + $0x44] sm:$0xf] }
0x110e   : > { %v6163_v49 = vmul.f32 0.7978846, %v6139_v56  ;;  %v11516_v42 = vpop.eup %11515  ;;  %v6198_v58 = vadd.f32 1.0, %v11514_v15  ;;  %11523 = vtanh.f32 %v6152_v38  ;;  %v6247_v18 = vmul.f32 %v6223_v5, %v13799_v33  ;;  %v10290_v33 = vld [vmem:[%s14862_s30 + $0x58] sm:$0xf0] }
0x110f   : > { %v6251_v50 = vmul.f32 %v6227_v0, %v13834_v52  ;;  %v10309_v7 = vor.u32 %v10994_v63, %v10306_v37  ;;  %v11518_v41 = vpop.eup %11517  ;;  %v6136_v25 = vadd.f32 %v6112_v47, %v13866_v48  ;;  %6619 = vmatmul.bf16.gmra.mxu0 %v6269_v46  ;;  %v10301_v53 = vor.u32 %v10992_v36, %v10298_v2  ;;  %v10288_v47 = vld [vmem:[%s14862_s30 + $0x50] sm:$0xf]  ;;  %v10991_v37 = vld [vmem:[%s14862_s30 + $0x54] sm:$0xf0] }
0x1110   : > { %11525 = vtanh.f32 %v6163_v49  ;;  %v6222_v28 = vmul.f32 0.5, %v6198_v58  ;;  %v10305_v44 = vor.u32 %v10995_v60, %v10304_v61  ;;  %v6202_v45 = vadd.f32 1.0, %v11518_v41  ;;  %v10282_v61 = vld [vmem:[%s14862_s30 + $0x48] sm:$0xf0] }
0x1111   : > { %v6267_v55 = vpack.c.bf16 %v6251_v50, %v6247_v18  ;;  %11527 = vtanh.f32 %v6156_v32  ;;  %6768 = vmatpush.bf16.msra.mxu2 %v10309_v7  ;;  %v6158_v52 = vmul.f32 0.7978846, %v13904_v35  ;;  %v6162_v23 = vmul.f32 0.7978846, %v6138_v34 }
0x1112   : > { %v11520_v11 = vpop.eup %11519  ;;  %6754 = vmatpush.bf16.msra.mxu1 %v10305_v44  ;;  %v6209_v43 = vadd.f32 1.0, %v11516_v42  ;;  %v10297_v51 = vor.u32 %v10993_v31, %v10296_v54  ;;  %v6164_v21 = vmul.f32 0.7978846, %v6140_v22  ;;  %v6226_v62 = vmul.f32 0.5, %v6202_v45  ;;  %v10280_v42 = vld [vmem:[%s14862_s30 + $0x40] sm:$0xf] }
0x1113   : > { %v11522_v20 = vpop.eup %11521  ;;  %11529 = vtanh.f32 %v6158_v52  ;;  %v6213_v63 = vadd.f32 1.0, %v11520_v11  ;;  %v6160_v6 = vmul.f32 0.7978846, %v6136_v25  ;;  %v10293_v5 = vor.u32 %v10990_v39, %v10290_v33  ;;  %v10989_v22 = vld [vmem:[%s14862_s30 + $0x44] sm:$0xf0] }
0x1114   : > { %v11524_v56 = vpop.eup %11523  ;;  %6571 = vmatmul.bf16.gmra.mxu2 %v6267_v55  ;;  %11531 = vtanh.f32 %v6162_v23  ;;  %v6246_v34 = vmul.f32 %v6222_v28, %v13782_v26  ;;  %v6250_v36 = vmul.f32 %v6226_v62, %v13812_v4  ;;  %v6233_v38 = vmul.f32 0.5, %v6209_v43  ;;  %v10986_v25 = vld [vmem:[%s14862_s30 + $0x34] sm:$0xf]  ;;  %v10274_v28 = vld [vmem:[%s14862_s30 + $0x38] sm:$0xf0] }
0x1115   : > { %v6200_v2 = vadd.f32 1.0, %v11524_v56  ;;  %6769 = vmatpush.bf16.msra.mxu2 %v10301_v53  ;;  %v6237_v13 = vmul.f32 0.5, %v6213_v63  ;;  %v10289_v60 = vor.u32 %v10991_v37, %v10288_v47  ;;  %v6207_v15 = vadd.f32 1.0, %v11522_v20  ;;  %v10272_v39 = vld [vmem:[%s14862_s30 + $0x30] sm:$0xf] }
0x1116   : > { %v11526_v35 = vpop.eup %11525  ;;  %6755 = vmatpush.bf16.msra.mxu1 %v10297_v51  ;;  %11533 = vtanh.f32 %v6164_v21  ;;  %v6266_v32 = vpack.c.bf16 %v6250_v36, %v6246_v34  ;;  %v10285_v50 = vor.u32 %v10988_v59, %v10282_v61  ;;  %v6257_v31 = vmul.f32 %v6233_v38, %v13854_v9  ;;  %v10987_v45 = vld [vmem:[%s14862_s30 + $0x34] sm:$0xf0]  ;;  %v10984_v20 = vld [vmem:[%s14862_s30 + $0x24] sm:$0xf]  ;;  %v10266_v21 = vld [vmem:[%s14862_s30 + $0x28] sm:$0xf0] }
0x1117   : > { %v6211_v49 = vadd.f32 1.0, %v11526_v35  ;;  %v11528_v0 = vpop.eup %11527  ;;  %v6224_v58 = vmul.f32 0.5, %v6200_v2  ;;  %v6261_v4 = vmul.f32 %v6237_v13, %v13884_v29  ;;  %11535 = vtanh.f32 %v6160_v6  ;;  %v10985_v37 = vld [vmem:[%s14862_s30 + $0x24] sm:$0xf0]  ;;  %v10982_v35 = vld [vmem:[%s14862_s30 + $0x14] sm:$0xf] }
0x1118   : > { %v6204_v26 = vadd.f32 1.0, %v11528_v0  ;;  %6547 = vmatmul.bf16.gmra.mxu1 %v6266_v32  ;;  %v6231_v41 = vmul.f32 0.5, %v6207_v15  ;;  %v10281_v53 = vor.u32 %v10989_v22, %v10280_v42  ;;  %v10277_v43 = vor.u32 %v10986_v25, %v10274_v28  ;;  %v10258_v34 = vld [vmem:[%s14862_s30 + $0x18] sm:$0xf0]  ;;  %v10256_v13 = vld [vmem:[%s14862_s30 + $0x10] sm:$0xf] }
0x1119   : > { %v6235_v46 = vmul.f32 0.5, %v6211_v49  ;;  %v11530_v18 = vpop.eup %11529  ;;  %6770 = vmatpush.bf16.msra.mxu2 %v10293_v5  ;;  %v6248_v55 = vmul.f32 %v6224_v58, %v13804_v40  ;;  %v6273_v52 = vpack.c.bf16 %v6261_v4, %v6257_v31  ;;  %v10273_v40 = vor.u32 %v10987_v45, %v10272_v39  ;;  %v10983_v59 = vld [vmem:[%s14862_s30 + $0x14] sm:$0xf0]  ;;  %v10980_v15 = vld [vmem:[%s14862_s30 + $0x4] sm:$0xf]  ;;  %v6643_v42 = vld [vmem:[%s14863_s27 + $0x8] sm:$0xff] }
0x111a   : > { %v11532_v7 = vpop.eup %11531  ;;  %v6228_v54 = vmul.f32 0.5, %v6204_v26  ;;  %6756 = vmatpush.bf16.msra.mxu1 %v10289_v60  ;;  %v6206_v44 = vadd.f32 1.0, %v11530_v18  ;;  %v6255_v47 = vmul.f32 %v6231_v41, %v13863_v10  ;;  %v10269_v10 = vor.u32 %v10984_v20, %v10266_v21  ;;  %v10250_v49 = vld [vmem:[%s14862_s30 + $0x8] sm:$0xf0]  ;;  %v6642_v32 = vld [vmem:[%s14863_s27] sm:$0xff] }
0x111b   : > { %v6210_v29 = vadd.f32 1.0, %v11532_v7  ;;  %v6259_v9 = vmul.f32 %v6235_v46, %v13896_v3  ;;  %v10261_v61 = vor.u32 %v10982_v35, %v10258_v34  ;;  %v10257_v0 = vor.u32 %v10983_v59, %v10256_v13  ;;  %v10248_v22 = vld [vmem:[%s14862_s30] sm:$0xf]  ;;  %v10981_v26 = vld [vmem:[%s14862_s30 + $0x4] sm:$0xf0] }
0x111c   : > { %v6252_v33 = vmul.f32 %v6228_v54, %v13839_v17  ;;  %v11534_v11 = vpop.eup %11533  ;;  %v6230_v63 = vmul.f32 0.5, %v6206_v44  ;;  %v10264_v17 = vld [vmem:[%s14862_s30 + $0x20] sm:$0xf]  ;;  %v6644_v46 = vpack.c.bf16 %v6642_v32, %v6642_v32  ;;  %v6645_v18 = vpack.c.bf16 %v6643_v42, %v6643_v42  ;;  %v10997_v42 = vld [vmem:[%s14865_s25 + $0x8] sm:$0xff] }
0x111d   : > { %v6234_v23 = vmul.f32 0.5, %v6210_v29  ;;  %6771 = vmatpush.bf16.msra.mxu2 %v10285_v50  ;;  %v11536_v62 = vpop.eup %11535  ;;  %v6271_v3 = vpack.c.bf16 %v6259_v9, %v6255_v47  ;;  %v6212_v56 = vadd.f32 1.0, %v11534_v11  ;;  %v10265_v36 = vor.u32 %v10985_v37, %v10264_v17  ;;  %v13971_v25 = vld [vmem:[%s14864_s13] ss:$0 sm:$0xff] }
0x111e   : > { %v6268_v51 = vpack.c.bf16 %v6252_v33, %v6248_v55  ;;  %6757 = vmatpush.bf16.msra.mxu1 %v10281_v53  ;;  %v6208_v5 = vadd.f32 1.0, %v11536_v62  ;;  %v6254_v2 = vmul.f32 %v6230_v63, %v13851_v8  ;;  %v10253_v8 = vor.u32 %v10980_v15, %v10250_v49  ;;  %v11003_v62 = vld [vmem:[%s14865_s25 + $0x38] sm:$0xff]  ;;  %v11002_v63 = vld [vmem:[%s14865_s25 + $0x30] sm:$0xff] }
0x111f   : > { %6624 = vmatmul.bf16.gmra.mxu0 %v6273_v52  ;;  %v6258_v6 = vmul.f32 %v6234_v23, %v13872_v1  ;;  %v6236_v38 = vmul.f32 0.5, %v6212_v56  ;;  %v10249_v50 = vor.u32 %v10981_v26, %v10248_v22  ;;  %v6670_v54 = vunpack.c.l.b16 %v6644_v46  ;;  %6861 = vmatpush.bf16.msrb.mxu3 %v11003_v62 }
0x1120   : > { %6595 = vmatmul.bf16.gmra.mxu3 %v6268_v51  ;;  %v6232_v60 = vmul.f32 0.5, %v6208_v5  ;;  %v6671_v31 = vunpack.c.l.b16 %v6645_v18  ;;  %v6662_v18 = vld [vmem:[%s12483_s26] sm:$0x3]  ;;  %s14867_s26 = sld [smem:[#allocation73_spill]] }
0x1121   : > { %6772 = vmatpush.bf16.msra.mxu2 %v10277_v43  ;;  %v6270_v1 = vpack.c.bf16 %v6258_v6, %v6254_v2  ;;  %v6260_v58 = vmul.f32 %v6236_v38, %v13901_v16  ;;  %v11001_v6 = vld [vmem:[%s14865_s25 + $0x28] sm:$0xff]  ;;  %v10999_v2 = vld [vmem:[%s14865_s25 + $0x18] sm:$0xff] }
0x1122   : > { %6758 = vmatpush.bf16.msra.mxu1 %v10273_v40  ;;  %v6256_v4 = vmul.f32 %v6232_v60, %v13866_v48  ;;  %v6672_v41 = vpack.c.b16 %v6671_v31, %v6670_v54 }
0x1123   : > { %6862 = vmatpush.bf16.msrb.mxu3 %v11002_v63 }
0x1124   : > { %6576 = vmatmul.bf16.gmra.mxu2 %v6271_v3  ;;  %v6272_v7 = vpack.c.bf16 %v6260_v58, %v6256_v4  ;;  %v10996_v58 = vld [vmem:[%s14865_s25] sm:$0xff] }
0x1125   : > { %6773 = vmatpush.bf16.msra.mxu2 %v10269_v10  ;;  %v11000_v10 = vld [vmem:[%s14865_s25 + $0x20] sm:$0xff] }
0x1126   : > { %6759 = vmatpush.bf16.msra.mxu1 %v10265_v36 }
0x1127   : > { %6863 = vmatpush.bf16.msrb.mxu3 %v11001_v6 }
0x1128   : > { %6552 = vmatmul.bf16.gmra.mxu1 %v6270_v1 }
0x1129   : > { %6774 = vmatpush.bf16.msra.mxu2 %v10261_v61  ;;  %v10998_v61 = vld [vmem:[%s14865_s25 + $0x10] sm:$0xff] }
0x112a   : > { %6760 = vmatpush.bf16.msra.mxu1 %v10257_v0 }
0x112b   : > { %6864 = vmatpush.bf16.msrb.mxu3 %v11000_v10 }
0x112d   : > { %6775 = vmatpush.bf16.msra.mxu2 %v10253_v8 }
0x112e   : > { %6761 = vmatpush.bf16.msra.mxu1 %v10249_v50 }
0x112f   : > { %6865 = vmatpush.bf16.msrb.mxu3 %v10999_v2  ;;  %v10434_v2 = vld [vmem:[%s14867_s26 + $0xb4] sm:$0xf0] }
0x1130   : > { %6600 = vmatmul.bf16.gmra.mxu3 %v6272_v7 }
0x1133   : > { %6866 = vmatpush.bf16.msrb.mxu3 %v10998_v61  ;;  %v10420_v61 = vld [vmem:[%s14867_s26 + $0x90] sm:$0xf] }
0x1134   : > { %6776 = vmatmul.bf16.vlgmr.msra.gmra.mxu2 %v6672_v41 }
0x1137   : > { %6867 = vmatpush.bf16.msrb.mxu3 %v10997_v42  ;;  %v11024_v42 = vld [vmem:[%s14867_s26 + $0xa0] sm:$0xf0] }
0x1138   : > { %6762 = vmatmul.bf16.vlgmr.msra.gmra.mxu1 %v6672_v41 }
0x113b   : > { %6868 = vmatpush.bf16.msrb.mxu3 %v10996_v58 }
0x1177   : > { %v6615_v29 = vpop.f32.mrf.mxu0 }
0x1179   : > { %v6543_v16 = vpop.f32.mrf.mxu1 }
0x117a   : > { %v6544_v28 = vadd.f32 %v13971_v25, %v6543_v16 }
0x117f   : > { %v6617_v51 = vpop.f32.mrf.mxu0 }
0x1181   : > { %v6545_v45 = vpop.f32.mrf.mxu1 }
0x1182   : > { %v6546_v33 = vadd.f32 %v13971_v25, %v6545_v45 }
0x1187   : > { %v6567_v48 = vpop.f32.mrf.mxu2 }
0x1188   : > { %v6568_v53 = vadd.f32 %v6567_v48, %v6544_v28  ;;  %v6591_v44 = vpop.f32.mrf.mxu3  ;;  %v6664_v28 = vperm.slane %v6662_v18, 0 }
0x118a   : > { %v6592_v39 = vadd.f32 %v6591_v44, %v6568_v53 }
0x118c   : > { %v6616_v55 = vadd.f32 %v6615_v29, %v6592_v39  ;;  %v6620_v37 = vpop.f32.mrf.mxu0 }
0x118e   : > { %v6630_v52 = vadd.f32 %v6616_v55, %v13538_v24 }
0x118f   : > { %v6569_v9 = vpop.f32.mrf.mxu2 }
0x1190   : > { %6636 = vst [vmem:[%s14847_s22] sm:$0xff] %v6630_v52  ;;  %v6570_v11 = vadd.f32 %v6569_v9, %v6546_v33  ;;  %v6593_v23 = vpop.f32.mrf.mxu3 }
0x1192   : > { %v6594_v43 = vadd.f32 %v6593_v23, %v6570_v11 }
0x1194   : > { %v6618_v47 = vadd.f32 %v6617_v51, %v6594_v43  ;;  %v6622_v1 = vpop.f32.mrf.mxu0 }
0x1195   : > { %v6548_v20 = vpop.f32.mrf.mxu1 }
0x1196   : > { %v6631_v21 = vadd.f32 %v6618_v47, %v13542_v27  ;;  %v6549_v24 = vadd.f32 %v13971_v25, %v6548_v20 }
0x1197   : > { %v6572_v40 = vpop.f32.mrf.mxu2 }
0x1198   : > { %6637 = vst [vmem:[%s14847_s22 + $0x8] sm:$0xff] %v6631_v21  ;;  %v6573_v56 = vadd.f32 %v6572_v40, %v6549_v24  ;;  %v11430_v21 = vld [vmem:[%s2016_s29] ss:$0 sm:$0xff]  ;;  %s14868_s29 = sld [smem:[#allocation43_spill]] }
0x119c   : > { %v6625_v8 = vpop.f32.mrf.mxu0 }
0x119d   : > { %v6550_v17 = vpop.f32.mrf.mxu1 }
0x119e   : > { %v6551_v35 = vadd.f32 %v13971_v25, %v6550_v17  ;;  %s14870_s11 = scalar_lea.vmem %s14868_s29, %s12411_s1 }
0x119f   : > { %v6574_v3 = vpop.f32.mrf.mxu2 }
0x11a0   : > { %v6575_v38 = vadd.f32 %v6574_v3, %v6551_v35  ;;  %v11026_v35 = vld [vmem:[%s14867_s26 + $0xb0] sm:$0xf0] }
0x11a3   : > { %v6596_v5 = vpop.f32.mrf.mxu3 }
0x11a4   : > { %v6597_v27 = vadd.f32 %v6596_v5, %v6573_v56  ;;  %v6627_v39 = vpop.f32.mrf.mxu0 }
0x11a5   : > { %v6553_v36 = vpop.f32.mrf.mxu1 }
0x11a6   : > { %v6621_v34 = vadd.f32 %v6620_v37, %v6597_v27  ;;  %v6554_v49 = vadd.f32 %v13971_v25, %v6553_v36  ;;  %v10432_v27 = vld [vmem:[%s14867_s26 + $0xa8] sm:$0xf] }
0x11a7   : > { %v6577_v13 = vpop.f32.mrf.mxu2  ;;  %v10433_v36 = vor.u32 %v11026_v35, %v10432_v27 }
0x11a8   : > { %v6632_v59 = vadd.f32 %v6621_v34, %v13546_v19  ;;  %v6578_v19 = vadd.f32 %v6577_v13, %v6554_v49  ;;  %v11025_v34 = vld [vmem:[%s14867_s26 + $0xac] sm:$0xf]  ;;  %v10440_v13 = vld [vmem:[%s14867_s26 + $0xb0] sm:$0xf] }
0x11a9   : > { %7105 = vmatpush.bf16.msrb.mxu1 %v10433_v36  ;;  %v10360_v36 = vld [vmem:[%s14867_s26 + $0x18] sm:$0xf] }
0x11aa   : > { %6638 = vst [vmem:[%s14847_s22 + $0x10] sm:$0xff] %v6632_v59  ;;  %v11027_v59 = vld [vmem:[%s14867_s26 + $0xb8] sm:$0xf0] }
0x11ab   : > { %v6598_v60 = vpop.f32.mrf.mxu3 }
0x11ac   : > { %v6599_v15 = vadd.f32 %v6598_v60, %v6575_v38  ;;  %v10437_v38 = vor.u32 %v11025_v34, %v10434_v2  ;;  %v11023_v60 = vld [vmem:[%s14867_s26 + $0x98] sm:$0xf0]  ;;  %v11008_v2 = vld [vmem:[%s14867_s26 + $0x20] sm:$0xf0] }
0x11ad   : > { %v6555_v32 = vpop.f32.mrf.mxu1  ;;  %v10421_v49 = vor.u32 %v11023_v60, %v10420_v61  ;;  %v10368_v61 = vld [vmem:[%s14867_s26 + $0x20] sm:$0xf]  ;;  %v11009_v60 = vld [vmem:[%s14867_s26 + $0x28] sm:$0xf0] }
0x11ae   : > { %v6623_v0 = vadd.f32 %v6622_v1, %v6599_v15  ;;  %v6556_v50 = vadd.f32 %v13971_v25, %v6555_v32  ;;  %v10441_v1 = vor.u32 %v11027_v59, %v10440_v13  ;;  %7119 = vmatpush.bf16.msrb.mxu0 %v10437_v38  ;;  %v11022_v15 = vld [vmem:[%s14867_s26 + $0x94] sm:$0xf]  ;;  %v10428_v32 = vld [vmem:[%s14867_s26 + $0x98] sm:$0xf]  ;;  %v11007_v59 = vld [vmem:[%s14867_s26 + $0x1c] sm:$0xf] }
0x11af   : > { %v6579_v22 = vpop.f32.mrf.mxu2  ;;  %7106 = vmatpush.bf16.msrb.mxu1 %v10421_v49  ;;  %v10362_v38 = vld [vmem:[%s14867_s26 + $0x24] sm:$0xf0] }
0x11b0   : > { %v6633_v26 = vadd.f32 %v6623_v0, %v13550_v12  ;;  %v6580_v16 = vadd.f32 %v6579_v22, %v6556_v50  ;;  %v6665_v12 = vperm.slane %v6662_v18, 1  ;;  %7133 = vmatpush.bf16.msrb.mxu2 %v10441_v1  ;;  %v10422_v0 = vld [vmem:[%s14867_s26 + $0x9c] sm:$0xf0] }
0x11b2   : > { %6639 = vst [vmem:[%s14847_s22 + $0x18] sm:$0xff] %v6633_v26  ;;  %v10425_v26 = vor.u32 %v11022_v15, %v10422_v0  ;;  %v10361_v15 = vor.u32 %v11008_v2, %v10360_v36  ;;  %v10365_v0 = vor.u32 %v11007_v59, %v10362_v38 }
0x11b3   : > { %v6601_v4 = vpop.f32.mrf.mxu3 }
0x11b4   : > { %v6602_v46 = vadd.f32 %v6601_v4, %v6578_v19  ;;  %v10429_v19 = vor.u32 %v11024_v42, %v10428_v32  ;;  %7120 = vmatpush.bf16.msrb.mxu0 %v10425_v26  ;;  %v11020_v4 = vld [vmem:[%s14867_s26 + $0x80] sm:$0xf0]  ;;  %v10348_v32 = vld [vmem:[%s14867_s26] sm:$0xf]  ;;  %v11005_v42 = vld [vmem:[%s14867_s26 + $0x8] sm:$0xf0]  ;;  %v10369_v26 = vor.u32 %v11009_v60, %v10368_v61 }
0x11b5   : > { %v6763_v54 = vpop.f32.mrf.mxu1 }
0x11b6   : > { %v6626_v7 = vadd.f32 %v6625_v8, %v6602_v46  ;;  %v6764_v44 = vadd.f32 %v6763_v54, %v6664_v28  ;;  %7134 = vmatpush.bf16.msrb.mxu2 %v10429_v19  ;;  %v10408_v8 = vld [vmem:[%s14867_s26 + $0x78] sm:$0xf]  ;;  %v11019_v46 = vld [vmem:[%s14867_s26 + $0x7c] sm:$0xf]  ;;  %v10416_v54 = vld [vmem:[%s14867_s26 + $0x80] sm:$0xf] }
0x11b7   : > { %v6777_v31 = vpop.f32.mrf.mxu2  ;;  %v10409_v50 = vor.u32 %v11020_v4, %v10408_v8  ;;  %v11004_v19 = vld [vmem:[%s14867_s26 + $0x4] sm:$0xf] }
0x11b8   : > { %v6634_v41 = vadd.f32 %v6626_v7, %v13554_v14  ;;  %v6778_v29 = vadd.f32 %v6777_v31, %v6665_v12  ;;  %v10310_v9 = vclamps-f32 %v6764_v44, 1000.0  ;;  %v10410_v7 = vld [vmem:[%s14867_s26 + $0x84] sm:$0xf0]  ;;  %v10398_v44 = vld [vmem:[%s14867_s26 + $0x6c] sm:$0xf0] }
0x11b9   : > { %v10413_v31 = vor.u32 %v11019_v46, %v10410_v7  ;;  %7107 = vmatpush.bf16.msrb.mxu1 %v10409_v50  ;;  %v10356_v46 = vld [vmem:[%s14867_s26 + $0x8] sm:$0xf]  ;;  %v11006_v50 = vld [vmem:[%s14867_s26 + $0x10] sm:$0xf0]  ;;  %v10349_v7 = vor.u32 %v11005_v42, %v10348_v32 }
0x11ba   : > { %6640 = vst [vmem:[%s14847_s22 + $0x20] sm:$0xff] %v6634_v41  ;;  %v10311_v14 = vclamps-f32 %v6778_v29, 1000.0  ;;  %v11021_v41 = vld [vmem:[%s14867_s26 + $0x88] sm:$0xf0]  ;;  %v10404_v29 = vld [vmem:[%s14867_s26 + $0x68] sm:$0xf] }
0x11bb   : > { %v6603_v48 = vpop.f32.mrf.mxu3  ;;  %7121 = vmatpush.bf16.msrb.mxu0 %v10413_v31 }
0x11bc   : > { %v6604_v53 = vadd.f32 %v6603_v48, %v6580_v16  ;;  %v6790_v51 = vmul.f32 %v10311_v14, %v10310_v9  ;;  %v10417_v16 = vor.u32 %v11021_v41, %v10416_v54  ;;  %v11016_v48 = vld [vmem:[%s14867_s26 + $0x64] sm:$0xf]  ;;  %v10386_v14 = vld [vmem:[%s14867_s26 + $0x54] sm:$0xf0] }
0x11bd   : > { %v6765_v25 = vpop.f32.mrf.mxu1 }
0x11be   : > { %v6628_v45 = vadd.f32 %v6627_v39, %v6604_v53  ;;  %v6766_v55 = vadd.f32 %v6765_v25, %v6664_v28  ;;  %v10396_v28 = vld [vmem:[%s14867_s26 + $0x60] sm:$0xf]  ;;  %v11018_v39 = vld [vmem:[%s14867_s26 + $0x70] sm:$0xf0]  ;;  %7135 = vmatpush.bf16.msrb.mxu2 %v10417_v16 }
0x11bf   : > { %v6779_v33 = vpop.f32.mrf.mxu2  ;;  %v10405_v25 = vor.u32 %v11018_v39, %v10404_v29  ;;  %v11431_v16 = vld [vmem:[%s14870_s11] ss:$0 sm:$0xff] }
0x11c0   : > { %v6635_v52 = vadd.f32 %v6628_v45, %v13558_v57  ;;  %v6780_v11 = vadd.f32 %v6779_v33, %v6665_v12  ;;  %v10312_v23 = vclamps-f32 %v6766_v55, 1000.0  ;;  %v11017_v12 = vld [vmem:[%s14867_s26 + $0x68] sm:$0xf0]  ;;  %v10401_v45 = vor.u32 %v11016_v48, %v10398_v44  ;;  %v10384_v55 = vld [vmem:[%s14867_s26 + $0x48] sm:$0xf] }
0x11c1   : > { %v10397_v53 = vor.u32 %v11017_v12, %v10396_v28  ;;  %v11014_v33 = vld [vmem:[%s14867_s26 + $0x50] sm:$0xf0]  ;;  %v10357_v12 = vor.u32 %v11006_v50, %v10356_v46 }
0x11c2   : > { %6641 = vst [vmem:[%s14847_s22 + $0x28] sm:$0xff] %v6635_v52  ;;  %v10313_v43 = vclamps-f32 %v6780_v11, 1000.0  ;;  %v11013_v52 = vld [vmem:[%s14867_s26 + $0x4c] sm:$0xf]  ;;  %v10392_v11 = vld [vmem:[%s14867_s26 + $0x50] sm:$0xf]  ;;  %7122 = vmatpush.bf16.msrb.mxu0 %v10401_v45  ;;  %7136 = vmatpush.bf16.msrb.mxu2 %v10405_v25 }
0x11c3   : > { %7108 = vmatpush.bf16.msrb.mxu1 %v10397_v53  ;;  %v11432_v53 = vld [vmem:[%s1972_s18] ss:$0 sm:$0xff]  ;;  %s14871_s18 = sld [smem:[#allocation27_spill]] }
0x11c4   : > { %v6791_v47 = vmul.f32 %v10313_v43, %v10312_v23  ;;  %v11015_v23 = vld [vmem:[%s14867_s26 + $0x58] sm:$0xf0] }
0x11c6   : > { %v6792_v20 = vpack.c.bf16 %v6791_v47, %v6790_v51  ;;  %v10385_v51 = vor.u32 %v11014_v33, %v10384_v55  ;;  %v10389_v47 = vor.u32 %v11013_v52, %v10386_v14 }
0x11c8   : > { %6869 = vmatmul.bf16.vlgmr.msrb.gmra.mxu3 %v6792_v20  ;;  %v10372_v20 = vld [vmem:[%s14867_s26 + $0x30] sm:$0xf]  ;;  %7109 = vmatpush.bf16.msrb.mxu1 %v10385_v51 }
0x11c9   : > { %7123 = vmatpush.bf16.msrb.mxu0 %v10389_v47  ;;  %v11433_v61 = vld [vmem:[%s14871_s18] ss:$0 sm:$0xff] }
0x124b   : > { %v6870_v40 = vpop.f32.mrf.mxu3 }
0x124c   : > { %v14003_v62 = vadd.f32 %v11430_v21, %v6870_v40 }
0x124e   : > { %6879 = vadd.xlane.f32.xlu0 %v14003_v62 }
0x1253   : > { %v6872_v57 = vpop.f32.mrf.mxu3 }
0x1254   : > { %v14006_v63 = vadd.f32 %v11430_v21, %v6872_v57  ;;  %v11011_v21 = vld [vmem:[%s14867_s26 + $0x38] sm:$0xf0] }
0x1255   : > { %v10373_v27 = vor.u32 %v11011_v21, %v10372_v20 }
0x1256   : > { %6881 = vadd.xlane.f32.xlu1 %v14006_v63 }
0x1257   : > { %7110 = vmatpush.bf16.msrb.mxu1 %v10373_v27 }
0x125b   : > { %7111 = vmatpush.bf16.msrb.mxu1 %v10361_v15 }
0x125f   : > { %7112 = vmatpush.bf16.msrb.mxu1 %v10349_v7 }
0x12c1   : > { %v6880_v24 = vpop.xlane.xlu0 %6879 }
0x12c2   : > { %v6883_v17 = vmul.f32 %v6880_v24, %v13375_v30  ;;  %v10393_v24 = vor.u32 %v11015_v23, %v10392_v11  ;;  %v6963_v23 = vld [vmem:[%s12457_s8] sm:$0x7]  ;;  %s14872_s8 = sld [smem:[#allocation74_spill]] }
0x12c3   : > { %v6965_v21 = vperm.slane %v6963_v23, 0 }
0x12c4   : > { %v14011_v37 = vsub.f32 %v14003_v62, %v6883_v17  ;;  %v11010_v17 = vld [vmem:[%s14867_s26 + $0x34] sm:$0xf]  ;;  %7137 = vmatpush.bf16.msrb.mxu2 %v10393_v24 }
0x12c6   : > { %v6887_v3 = vmul.f32 %v14011_v37, %v14011_v37 }
0x12c8   : > { %6889 = vadd.xlane.f32.xlu2 %v6887_v3  ;;  %v10374_v3 = vld [vmem:[%s14867_s26 + $0x3c] sm:$0xf0] }
0x12c9   : > { %v6882_v56 = vpop.xlane.xlu1 %6881  ;;  %v10377_v34 = vor.u32 %v11010_v17, %v10374_v3 }
0x12ca   : > { %v6884_v6 = vmul.f32 %v6882_v56, %v13375_v30 }
0x12cb   : > { %7124 = vmatpush.bf16.msrb.mxu0 %v10377_v34 }
0x12cc   : > { %v14017_v10 = vsub.f32 %v14006_v63, %v6884_v6  ;;  %v10380_v6 = vld [vmem:[%s14867_s26 + $0x38] sm:$0xf] }
0x12ce   : > { %v6888_v5 = vmul.f32 %v14017_v10, %v14017_v10 }
0x12cf   : > { %7125 = vmatpush.bf16.msrb.mxu0 %v10365_v0 }
0x12d0   : > { %6891 = vadd.xlane.f32.xlu0 %v6888_v5  ;;  %v11012_v5 = vld [vmem:[%s14867_s26 + $0x40] sm:$0xf0] }
0x12d1   : > { %v10381_v13 = vor.u32 %v11012_v5, %v10380_v6 }
0x12d3   : > { %7138 = vmatpush.bf16.msrb.mxu2 %v10381_v13 }
0x12d7   : > { %7139 = vmatpush.bf16.msrb.mxu2 %v10369_v26 }
0x12db   : > { %7140 = vmatpush.bf16.msrb.mxu2 %v10357_v12 }
0x133b   : > { %v6890_v22 = vpop.xlane.xlu2 %6889 }
0x133c   : > { %v6893_v58 = vmul.f32 %v6890_v22, %v13375_v30 }
0x133e   : > { %v14037_v18 = vadd.f32 1e-05, %v6893_v58  ;;  %v10350_v58 = vld [vmem:[%s14867_s26 + $0xc] sm:$0xf0] }
0x133f   : > { %v10353_v41 = vor.u32 %v11004_v19, %v10350_v58 }
0x1340   : > { %11537 = vrsqrt.f32 %v14037_v18  ;;  %vm6903_vm3 = vweird.f32 %v14037_v18 }
0x1341   : > { %7126 = vmatpush.bf16.msrb.mxu0 %v10353_v41 }
0x1343   : > { %v6892_v9 = vpop.xlane.xlu0 %6891 }
0x1344   : > { %v6894_v43 = vmul.f32 %v6892_v9, %v13375_v30 }
0x1346   : > { %v11538_v40 = vpop.eup %11537  ;;  %v6896_v57 = vadd.f32 1e-05, %v6894_v43  ;;  %v6966_v43 = vperm.slane %v6963_v23, 1 }
0x1347   : > { %v6898_v56 = vmul.f32 %v11538_v40, %v14037_v18  ;;  %vm6904_vm2 = vweird.f32 %v11538_v40 }
0x1348   : > { %11539 = vrsqrt.f32 %v6896_v57  ;;  %vm6905_vm4 = vmor %vm6903_vm3, %vm6904_vm2  ;;  %vm6913_vm6 = vweird.f32 %v6896_v57 }
0x1349   : > { %v6899_v35 = vmul.f32 %v11538_v40, %v6898_v56 }
0x134b   : > { %v6900_v1 = vmul.f32 0.5, %v6899_v35 }
0x134d   : > { %v6901_v49 = vsub.f32 1.5, %v6900_v1 }
0x134e   : > { %v11540_v22 = vpop.eup %11539 }
0x134f   : > { %v6902_v8 = vmul.f32 %v11538_v40, %v6901_v49  ;;  %v6908_v4 = vmul.f32 %v11540_v22, %v6896_v57  ;;  %vm6914_vm5 = vweird.f32 %v11540_v22  ;;  %v6967_v57 = vperm.slane %v6963_v23, 2  ;;  %v11434_v49 = vld [vmem:[%s14871_s18 + $0x1] ss:$0 sm:$0xff] }
0x1350   : > { %vm6915_vm7 = vmor %vm6913_vm6, %vm6914_vm5  ;;  %v11028_v23 = vld [vmem:[%s14872_s8] sm:$0xff] }
0x1351   : > { %v6906_v54 = vsel %vm6905_vm4, %v11538_v40, %v6902_v8  ;;  %v6909_v31 = vmul.f32 %v11540_v22, %v6908_v4 }
0x1352   : > { %v6917_v28 = vmul.f32 %v6906_v54, %v14011_v37 }
0x1353   : > { %v6910_v18 = vmul.f32 0.5, %v6909_v31 }
0x1354   : > { %v6922_v44 = vmul.f32 %v11431_v16, %v6917_v28 }
0x1355   : > { %v6911_v48 = vsub.f32 1.5, %v6910_v18  ;;  %v11035_v18 = vld [vmem:[%s14872_s8 + $0x38] sm:$0xff] }
0x1356   : > { %v6927_v45 = vadd.f32 %v11432_v53, %v6922_v44  ;;  %v11032_v44 = vld [vmem:[%s14872_s8 + $0x20] sm:$0xff] }
0x1357   : > { %v6912_v29 = vmul.f32 %v11540_v22, %v6911_v48  ;;  %v11034_v48 = vld [vmem:[%s14872_s8 + $0x30] sm:$0xff] }
0x1358   : > { %v6929_v55 = vpack.c.bf16 %v6927_v45, %v6927_v45  ;;  %v11030_v45 = vld [vmem:[%s14872_s8 + $0x10] sm:$0xff] }
0x1359   : > { %v6916_v39 = vsel %vm6915_vm7, %v11540_v22, %v6912_v29  ;;  %v11031_v29 = vld [vmem:[%s14872_s8 + $0x18] sm:$0xff] }
0x135a   : > { %v6918_v25 = vmul.f32 %v6916_v39, %v14017_v10  ;;  %v6973_v9 = vunpack.c.l.b16 %v6929_v55 }
0x135c   : > { %v6923_v37 = vmul.f32 %v11431_v16, %v6918_v25 }
0x135e   : > { %v6928_v33 = vadd.f32 %v11432_v53, %v6923_v37  ;;  %v11033_v53 = vld [vmem:[%s14872_s8 + $0x28] sm:$0xff] }
0x1360   : > { %v6930_v52 = vpack.c.bf16 %v6928_v33, %v6928_v33 }
0x1362   : > { %v6974_v14 = vunpack.c.l.b16 %v6930_v52 }
0x1364   : > { %v6975_v11 = vpack.c.b16 %v6974_v14, %v6973_v9 }
0x1366   : > { %7113 = vmatmul.bf16.vlgmr.msrb.gmra.mxu1 %v6975_v11  ;;  %7127 = vmatmul.bf16.vlgmr.msrb.gmra.mxu0 %v6975_v11 }
0x1367   : > { %7141 = vmatmul.bf16.vlgmr.msrb.gmra.mxu2 %v6975_v11  ;;  %v11029_v11 = vld [vmem:[%s14872_s8 + $0x8] sm:$0xff] }
0x13e3   : > { %v7128_v51 = vpop.f32.mrf.mxu0  ;;  %v7114_v47 = vpop.f32.mrf.mxu1 }
0x13e4   : > { %v7129_v20 = vadd.f32 %v7128_v51, %v6966_v43  ;;  %v7115_v10 = vadd.f32 %v7114_v47, %v6965_v21 }
0x13e6   : > { %v7149_v40 = vpack.c.bf16 %v7129_v20, %v7129_v20  ;;  %v7147_v6 = vpack.c.bf16 %v7115_v10, %v7115_v10 }
0x13e8   : > { %7160 = vmatpush.bf16.xpose.msra.mxu3 %v7149_v40  ;;  %v11435_v40 = vld [vmem:[%s1979_s19] ss:$0 sm:$0xff] }
0x13ea   : > { %v7142_v24 = vpop.f32.mrf.mxu2 }
0x13eb   : > { %v7143_v17 = vadd.f32 %v7142_v24, %v6967_v57  ;;  %v7130_v3 = vpop.f32.mrf.mxu0  ;;  %v7116_v27 = vpop.f32.mrf.mxu1 }
0x13ec   : > { %v7131_v56 = vadd.f32 %v7130_v3, %v6966_v43  ;;  %v7117_v36 = vadd.f32 %v7116_v27, %v6965_v21 }
0x13ed   : > { %v7151_v5 = vpack.c.bf16 %v7143_v17, %v7143_v17 }
0x13ee   : > { %v7150_v35 = vpack.c.bf16 %v7131_v56, %v7131_v56  ;;  %v7148_v59 = vpack.c.bf16 %v7117_v36, %v7117_v36 }
0x13ef   : > { %v7218_v34 = vsel %vm5417_vm13, %v7151_v5, 0  ;;  %7161 = vmatmul.bf16.vlgmr.msra.gmra.mxu3 %v7147_v6 }
0x13f0   : > { %7227 = vmatpush.bf16.msrb.mxu3 %v7218_v34  ;;  %7173 = vmatpush.bf16.xpose.msra.mxu1 %v7150_v35 }
0x13f2   : > { %v7144_v2 = vpop.f32.mrf.mxu2 }
0x13f3   : > { %v7145_v13 = vadd.f32 %v7144_v2, %v6967_v57  ;;  %v10590_v2 = vld [vmem:[%s12466_s0 + $0xe0] sm:$0xf] }
0x13f5   : > { %v7152_v38 = vpack.c.bf16 %v7145_v13, %v7145_v13  ;;  %v11066_v13 = vld [vmem:[%s12466_s0 + $0xec] sm:$0xf0] }
0x13f7   : > { %v7237_v1 = vsel %vm5417_vm13, %v7152_v38, 0  ;;  %7174 = vmatmul.bf16.vlgmr.msra.gmra.mxu1 %v7148_v59  ;;  %v11064_v59 = vld [vmem:[%s12466_s0 + $0xe4] sm:$0xf]  ;;  %v10591_v38 = vor.u32 %v11066_v13, %v10590_v2  ;;  %v11051_v2 = vld [vmem:[%s12466_s0 + $0x74] sm:$0xf0] }
0x13f8   : > { %7246 = vmatpush.bf16.msra.mxu0 %v7237_v1  ;;  %7321 = vmatpush.bf16.msrb.mxu1 %v11035_v18  ;;  %v10592_v1 = vld [vmem:[%s12466_s0 + $0xf0] sm:$0xf0]  ;;  %v11058_v18 = vld [vmem:[%s12466_s0 + $0xac] sm:$0xf0]  ;;  %v11049_v13 = vld [vmem:[%s12466_s0 + $0x6c] sm:$0xf] }
0x13f9   : > { %7599 = vmatpush.bf16.msra.mxu2 %v10591_v38  ;;  %v10536_v38 = vld [vmem:[%s12466_s0 + $0x78] sm:$0xf0] }
0x13fc   : > { %7322 = vmatpush.bf16.msrb.mxu1 %v11034_v48  ;;  %v11056_v48 = vld [vmem:[%s12466_s0 + $0xa4] sm:$0xf] }
0x1400   : > { %7323 = vmatpush.bf16.msrb.mxu1 %v11033_v53 }
0x1404   : > { %7324 = vmatpush.bf16.msrb.mxu1 %v11032_v44 }
0x1408   : > { %7325 = vmatpush.bf16.msrb.mxu1 %v11031_v29  ;;  %v10560_v29 = vld [vmem:[%s12466_s0 + $0xb0] sm:$0xf0] }
0x140c   : > { %7326 = vmatpush.bf16.msrb.mxu1 %v11030_v45  ;;  %v10563_v45 = vor.u32 %v11056_v48, %v10560_v29  ;;  %v11041_v48 = vld [vmem:[%s12466_s0 + $0x2c] sm:$0xf] }
0x1410   : > { %7327 = vmatpush.bf16.msrb.mxu1 %v11029_v11  ;;  %v11052_v11 = vld [vmem:[%s12466_s0 + $0x84] sm:$0xf] }
0x1414   : > { %7328 = vmatpush.bf16.msrb.mxu1 %v11028_v23 }
0x1472   : > { %v7162_v60 = vpop.f32.mrf.mxu3 }
0x1473   : > { %v7179_v15 = vmul.f32 0.088388346, %v7162_v60  ;;  %v11067_v60 = vld [vmem:[%s12466_s0 + $0xf4] sm:$0xf0] }
0x1474   : > { %v7175_v0 = vpop.f32.mrf.mxu1 }
0x1475   : > { %v7180_v32 = vmul.f32 0.088388346, %v7175_v0  ;;  %v7187_v42 = vadd.f32 %v11433_v61, %v7179_v15  ;;  %v10598_v61 = vld [vmem:[%s12466_s0 + $0xe8] sm:$0xf]  ;;  %v10595_v15 = vor.u32 %v11064_v59, %v10592_v1  ;;  %v11065_v0 = vld [vmem:[%s12466_s0 + $0xec] sm:$0xf] }
0x1476   : > { %v10510_v1 = vld [vmem:[%s12466_s0 + $0x40] sm:$0xf] }
0x1477   : > { %v7190_v22 = vsel %vm7189_vm8, %v7187_v42, -inf  ;;  %v7188_v26 = vadd.f32 %v11434_v49, %v7180_v32  ;;  %v10599_v49 = vor.u32 %v11067_v60, %v10598_v61  ;;  %v10600_v32 = vld [vmem:[%s12466_s0 + $0xf8] sm:$0xf0]  ;;  %7613 = vmatpush.bf16.msra.mxu3 %v10595_v15  ;;  %v11046_v61 = vld [vmem:[%s12466_s0 + $0x4c] sm:$0xf0] }
0x1478   : > { %7191 = vmax.xlane.f32.xlu1 %v7190_v22  ;;  %v10574_v22 = vld [vmem:[%s12466_s0 + $0xc0] sm:$0xf] }
0x1479   : > { %v7193_v19 = vsel %vm7189_vm8, %v7188_v26, -inf  ;;  %7627 = vmatpush.bf16.msrb.mxu0 %v10599_v49  ;;  %v10539_v49 = vor.u32 %v11049_v13, %v10536_v38 }
0x147a   : > { %7194 = vmax.xlane.f32.xlu2 %v7193_v19  ;;  %v7164_v58 = vpop.f32.mrf.mxu3  ;;  %v11060_v19 = vld [vmem:[%s12466_s0 + $0xc4] sm:$0xf] }
0x147c   : > { %v7177_v8 = vpop.f32.mrf.mxu1 }
0x147d   : > { %v10576_v8 = vld [vmem:[%s12466_s0 + $0xd0] sm:$0xf0] }
0x14eb   : > { %v7192_v4 = vpop.xlane.xlu1 %7191 }
0x14ec   : > { %v7196_v46 = vsub.f32 %v7187_v42, %v7192_v4  ;;  %v10603_v42 = vor.u32 %v11065_v0, %v10600_v32  ;;  %v10582_v4 = vld [vmem:[%s12466_s0 + $0xc8] sm:$0xf]  ;;  %v11044_v0 = vld [vmem:[%s12466_s0 + $0x44] sm:$0xf]  ;;  %v10512_v32 = vld [vmem:[%s12466_s0 + $0x50] sm:$0xf0] }
0x14ed   : > { %v7195_v50 = vpop.xlane.xlu2 %7194 }
0x14ee   : > { %v7198_v7 = vmul.f32 1.442695, %v7196_v46  ;;  %v7197_v54 = vsub.f32 %v7188_v26, %v7195_v50  ;;  %v11062_v26 = vld [vmem:[%s12466_s0 + $0xcc] sm:$0xf0]  ;;  %7641 = vmatpush.bf16.msra.mxu1 %v10603_v42  ;;  %v11063_v46 = vld [vmem:[%s12466_s0 + $0xd4] sm:$0xf0] }
0x14ef   : > { %v10575_v58 = vor.u32 %v11062_v26, %v10574_v22  ;;  %v10518_v22 = vld [vmem:[%s12466_s0 + $0x48] sm:$0xf]  ;;  %v11047_v26 = vld [vmem:[%s12466_s0 + $0x54] sm:$0xf0] }
0x14f0   : > { %11541 = vpow2.f32 %v7198_v7  ;;  %v7200_v31 = vmul.f32 1.442695, %v7197_v54  ;;  %v10579_v7 = vor.u32 %v11060_v19, %v10576_v8  ;;  %v10583_v54 = vor.u32 %v11063_v46, %v10582_v4  ;;  %v11045_v19 = vld [vmem:[%s12466_s0 + $0x4c] sm:$0xf]  ;;  %v10520_v8 = vld [vmem:[%s12466_s0 + $0x58] sm:$0xf0] }
0x14f1   : > { %7600 = vmatpush.bf16.msra.mxu2 %v10575_v58  ;;  %v10511_v58 = vor.u32 %v11046_v61, %v10510_v1  ;;  %v10515_v46 = vor.u32 %v11044_v0, %v10512_v32  ;;  %v11090_v0 = vld [vmem:[%s12472_s23 + $0xb0] sm:$0xff] }
0x14f2   : > { %11543 = vpow2.f32 %v7200_v31  ;;  %v11061_v31 = vld [vmem:[%s12466_s0 + $0xcc] sm:$0xf]  ;;  %7614 = vmatpush.bf16.msra.mxu3 %v10579_v7  ;;  %7628 = vmatpush.bf16.msrb.mxu0 %v10583_v54  ;;  %v11042_v7 = vld [vmem:[%s12466_s0 + $0x2c] sm:$0xf0]  ;;  %v11040_v54 = vld [vmem:[%s12466_s0 + $0x24] sm:$0xf] }
0x14f3   : > { %v11098_v32 = vld [vmem:[%s12472_s23 + $0xf0] sm:$0xff] }
0x14f6   : > { %v11542_v41 = vpop.eup %11541  ;;  %7615 = vmatpush.bf16.msra.mxu3 %v10563_v45 }
0x14f7   : > { %v7202_v16 = vsel %vm7189_vm8, %v11542_v41, 0.0 }
0x14f8   : > { %v11544_v28 = vpop.eup %11543  ;;  %7203 = vadd.xlane.f32.xlu0 %v7202_v16 }
0x14f9   : > { %v7205_v12 = vsel %vm7189_vm8, %v11544_v28, 0.0 }
0x14fa   : > { %7206 = vadd.xlane.f32.xlu1 %v7205_v12  ;;  %v10558_v12 = vld [vmem:[%s12466_s0 + $0xa0] sm:$0xf] }
0x14fb   : > { %v10559_v44 = vor.u32 %v11058_v18, %v10558_v12  ;;  %v11043_v12 = vld [vmem:[%s12466_s0 + $0x34] sm:$0xf0] }
0x14fd   : > { %7601 = vmatpush.bf16.msra.mxu2 %v10559_v44  ;;  %v10504_v44 = vld [vmem:[%s12466_s0 + $0x38] sm:$0xf0] }
0x156b   : > { %v7204_v39 = vpop.xlane.xlu0 %7203 }
0x156c   : > { %11545 = vrcp.f32 %v7204_v39  ;;  %v10566_v39 = vld [vmem:[%s12466_s0 + $0xa8] sm:$0xf] }
0x156d   : > { %v7207_v25 = vpop.xlane.xlu1 %7206 }
0x156e   : > { %11547 = vrcp.f32 %v7207_v25  ;;  %v11059_v25 = vld [vmem:[%s12466_s0 + $0xb4] sm:$0xf0] }
0x1572   : > { %v11546_v37 = vpop.eup %11545 }
0x1573   : > { %v7210_v55 = vmul.f32 %v11546_v37, %v11542_v41  ;;  %v10584_v41 = vld [vmem:[%s12466_s0 + $0xd8] sm:$0xf0]  ;;  %v11057_v37 = vld [vmem:[%s12466_s0 + $0xac] sm:$0xf] }
0x1574   : > { %v11548_v33 = vpop.eup %11547 }
0x1575   : > { %v7212_v52 = vpack.c.bf16 %v7210_v55, %v7210_v55  ;;  %v7211_v9 = vmul.f32 %v11548_v33, %v11544_v28  ;;  %v10587_v28 = vor.u32 %v11061_v31, %v10584_v41  ;;  %v10568_v55 = vld [vmem:[%s12466_s0 + $0xb8] sm:$0xf0]  ;;  %v10567_v33 = vor.u32 %v11059_v25, %v10566_v39  ;;  %v10478_v25 = vld [vmem:[%s12466_s0] sm:$0xf] }
0x1576   : > { %v10519_v31 = vor.u32 %v11047_v26, %v10518_v22  ;;  %v10523_v41 = vor.u32 %v11045_v19, %v10520_v8  ;;  %v11083_v22 = vld [vmem:[%s12472_s23 + $0x78] sm:$0xff]  ;;  %v14227_v26 = vld [vmem:[%s12469_s3] sm:$0xf]  ;;  %v11089_v19 = vld [vmem:[%s12472_s23 + $0xa8] sm:$0xff] }
0x1577   : > { %v7213_v14 = vpack.c.bf16 %v7211_v9, %v7211_v9  ;;  %10442 = vmatmul.msk.bf16.vlgmr.msrb.gmra.mxu3 %vm7189_vm8, %v7212_v52  ;;  %7642 = vmatpush.bf16.msra.mxu1 %v10587_v28  ;;  %v10571_v52 = vor.u32 %v11057_v37, %v10568_v55  ;;  %v10542_v9 = vld [vmem:[%s12466_s0 + $0x80] sm:$0xf]  ;;  %v10502_v28 = vld [vmem:[%s12466_s0 + $0x28] sm:$0xf]  ;;  %v11038_v37 = vld [vmem:[%s12466_s0 + $0xc] sm:$0xf0] }
0x1578   : > { %7629 = vmatpush.bf16.msrb.mxu0 %v10567_v33  ;;  %v10503_v33 = vor.u32 %v11043_v12, %v10502_v28  ;;  %v7427_v8 = vperm.slane %v14227_v26, 2  ;;  %v11073_v12 = vld [vmem:[%s12472_s23 + $0x28] sm:$0xff] }
0x1579   : > { %10443 = vmatmul.msk.bf16.vlgmr.msra.gmra.mxu0 %vm7189_vm8, %v7213_v14  ;;  %v11054_v14 = vld [vmem:[%s12466_s0 + $0x8c] sm:$0xf0] }
0x157a   : > { %v10543_v23 = vor.u32 %v11054_v14, %v10542_v9  ;;  %v11036_v9 = vld [vmem:[%s12466_s0 + $0x4] sm:$0xf]  ;;  %v10480_v14 = vld [vmem:[%s12466_s0 + $0x10] sm:$0xf0] }
0x157b   : > { %7643 = vmatpush.bf16.msra.mxu1 %v10571_v52  ;;  %v10507_v52 = vor.u32 %v11041_v48, %v10504_v44  ;;  %v7425_v48 = vperm.slane %v14227_v26, 0  ;;  %v7426_v44 = vperm.slane %v14227_v26, 1 }
0x157c   : > { %7602 = vmatpush.bf16.msra.mxu2 %v10543_v23 }
0x15f6   : > { %v7248_v43 = vpop.f32.mrf.mxu0 }
0x15fa   : > { %v7229_v51 = vpop.f32.mrf.mxu3 }
0x15fb   : > { %v7252_v47 = vpack.c.bf16 %v7248_v43, %v7229_v51  ;;  %v10544_v43 = vld [vmem:[%s12466_s0 + $0x90] sm:$0xf0]  ;;  %v10550_v51 = vld [vmem:[%s12466_s0 + $0x88] sm:$0xf] }
0x15fd   : > { %7329 = vmatmul.bf16.vlgmr.msrb.gmra.mxu1 %v7252_v47  ;;  %v11055_v47 = vld [vmem:[%s12466_s0 + $0x94] sm:$0xf0] }
0x15fe   : > { %v7250_v20 = vpop.f32.mrf.mxu0 }
0x15ff   : > { %v10547_v20 = vor.u32 %v11052_v11, %v10544_v43  ;;  %v10486_v11 = vld [vmem:[%s12466_s0 + $0x8] sm:$0xf] }
0x1601   : > { %7616 = vmatpush.bf16.msra.mxu3 %v10547_v20  ;;  %v10488_v20 = vld [vmem:[%s12466_s0 + $0x18] sm:$0xf0] }
0x1602   : > { %v7231_v21 = vpop.f32.mrf.mxu3 }
0x1603   : > { %v10551_v21 = vor.u32 %v11055_v47, %v10550_v51  ;;  %v11039_v51 = vld [vmem:[%s12466_s0 + $0x14] sm:$0xf0]  ;;  %v11037_v47 = vld [vmem:[%s12466_s0 + $0xc] sm:$0xf] }
0x1605   : > { %7630 = vmatpush.bf16.msrb.mxu0 %v10551_v21  ;;  %v10479_v21 = vor.u32 %v11038_v37, %v10478_v25  ;;  %v11095_v25 = vld [vmem:[%s12472_s23 + $0xd8] sm:$0xff] }
0x167a   : > { %v7330_v57 = vpop.f32.mrf.mxu1 }
0x167b   : > { %v7331_v10 = vadd.f32 %v11435_v40, %v7330_v57  ;;  %v10552_v57 = vld [vmem:[%s12466_s0 + $0x98] sm:$0xf0] }
0x167d   : > { %v14108_v24 = vadd.f32 %v7331_v10, %v14003_v62  ;;  %v10526_v10 = vld [vmem:[%s12466_s0 + $0x60] sm:$0xf] }
0x167f   : > { %7339 = vadd.xlane.f32.xlu2 %v14108_v24 }
0x1682   : > { %v7332_v17 = vpop.f32.mrf.mxu1 }
0x1683   : > { %v7333_v3 = vadd.f32 %v11435_v40, %v7332_v17  ;;  %v11053_v40 = vld [vmem:[%s12466_s0 + $0x8c] sm:$0xf] }
0x1685   : > { %v14112_v56 = vadd.f32 %v7333_v3, %v14006_v63  ;;  %v10555_v3 = vor.u32 %v11053_v40, %v10552_v57 }
0x1687   : > { %7341 = vadd.xlane.f32.xlu0 %v14112_v56  ;;  %7644 = vmatpush.bf16.msra.mxu1 %v10555_v3  ;;  %v10487_v3 = vor.u32 %v11039_v51, %v10486_v11 }
0x168b   : > { %7645 = vmatpush.bf16.msra.mxu1 %v10539_v49 }
0x168f   : > { %7646 = vmatpush.bf16.msra.mxu1 %v10523_v41 }
0x1693   : > { %7647 = vmatpush.bf16.msra.mxu1 %v10507_v52 }
0x16f2   : > { %v7340_v6 = vpop.xlane.xlu2 %7339 }
0x16f3   : > { %v7343_v5 = vmul.f32 %v7340_v6, %v13375_v30  ;;  %v11050_v6 = vld [vmem:[%s12466_s0 + $0x6c] sm:$0xf0] }
0x16f5   : > { %v14117_v62 = vsub.f32 %v14108_v24, %v7343_v5  ;;  %v11048_v5 = vld [vmem:[%s12466_s0 + $0x64] sm:$0xf] }
0x16f7   : > { %v7347_v27 = vmul.f32 %v14117_v62, %v14117_v62 }
0x16f9   : > { %7349 = vadd.xlane.f32.xlu1 %v7347_v27  ;;  %v10528_v27 = vld [vmem:[%s12466_s0 + $0x70] sm:$0xf0] }
0x16fa   : > { %v7342_v35 = vpop.xlane.xlu0 %7341  ;;  %v10531_v59 = vor.u32 %v11048_v5, %v10528_v27 }
0x16fb   : > { %v7344_v63 = vmul.f32 %v7342_v35, %v13375_v30 }
0x16fc   : > { %7617 = vmatpush.bf16.msra.mxu3 %v10531_v59 }
0x16fd   : > { %v14123_v34 = vsub.f32 %v14112_v56, %v7344_v63  ;;  %v10527_v63 = vor.u32 %v11050_v6, %v10526_v10  ;;  %v10483_v10 = vor.u32 %v11036_v9, %v10480_v14  ;;  %v10491_v6 = vor.u32 %v11037_v47, %v10488_v20  ;;  %v11072_v9 = vld [vmem:[%s12472_s23 + $0x20] sm:$0xff]  ;;  %v11086_v47 = vld [vmem:[%s12472_s23 + $0x90] sm:$0xff] }
0x16fe   : > { %v11080_v14 = vld [vmem:[%s12472_s23 + $0x60] sm:$0xff]  ;;  %v11094_v20 = vld [vmem:[%s12472_s23 + $0xd0] sm:$0xff] }
0x16ff   : > { %v7348_v36 = vmul.f32 %v14123_v34, %v14123_v34  ;;  %7603 = vmatpush.bf16.msra.mxu2 %v10527_v63  ;;  %7648 = vmatpush.bf16.msra.mxu1 %v10491_v6 }
0x1700   : > { %7618 = vmatpush.bf16.msra.mxu3 %v10515_v46  ;;  %v11074_v46 = vld [vmem:[%s12472_s23 + $0x30] sm:$0xff] }
0x1701   : > { %7351 = vadd.xlane.f32.xlu2 %v7348_v36  ;;  %v10534_v36 = vld [vmem:[%s12466_s0 + $0x68] sm:$0xf] }
0x1703   : > { %7604 = vmatpush.bf16.msra.mxu2 %v10511_v58  ;;  %v11097_v58 = vld [vmem:[%s12472_s23 + $0xe8] sm:$0xff] }
0x176c   : > { %v7350_v50 = vpop.xlane.xlu1 %7349 }
0x176d   : > { %v7353_v16 = vmul.f32 %v7350_v50, %v13375_v30  ;;  %v10494_v50 = vld [vmem:[%s12466_s0 + $0x20] sm:$0xf] }
0x176e   : > { %v10495_v29 = vor.u32 %v11042_v7, %v10494_v50  ;;  %v11082_v50 = vld [vmem:[%s12472_s23 + $0x70] sm:$0xff]  ;;  %v11088_v7 = vld [vmem:[%s12472_s23 + $0xa0] sm:$0xff] }
0x176f   : > { %v14147_v53 = vadd.f32 1e-05, %v7353_v16  ;;  %v10496_v16 = vld [vmem:[%s12466_s0 + $0x30] sm:$0xf0] }
0x1770   : > { %v10499_v45 = vor.u32 %v11040_v54, %v10496_v16  ;;  %7605 = vmatpush.bf16.msra.mxu2 %v10495_v29  ;;  %v11096_v54 = vld [vmem:[%s12472_s23 + $0xe0] sm:$0xff] }
0x1771   : > { %11549 = vrsqrt.f32 %v14147_v53  ;;  %vm7363_vm9 = vweird.f32 %v14147_v53 }
0x1772   : > { %7619 = vmatpush.bf16.msra.mxu3 %v10499_v45  ;;  %v11087_v45 = vld [vmem:[%s12472_s23 + $0x98] sm:$0xff] }
0x1774   : > { %v7352_v17 = vpop.xlane.xlu2 %7351  ;;  %7606 = vmatpush.bf16.msra.mxu2 %v10479_v21 }
0x1775   : > { %v7354_v35 = vmul.f32 %v7352_v17, %v13375_v30  ;;  %v10535_v30 = vor.u32 %v11051_v2, %v10534_v36  ;;  %v11436_v17 = vld [vmem:[%s1982_s12] ss:$0 sm:$0xff] }
0x1776   : > { %7620 = vmatpush.bf16.msra.mxu3 %v10483_v10 }
0x1777   : > { %v14174_v60 = vpop.eup %11549  ;;  %v14176_v15 = vadd.f32 1e-05, %v7354_v35  ;;  %7631 = vmatpush.bf16.msrb.mxu0 %v10535_v30  ;;  %v11437_v35 = vld [vmem:[%s1985_s24] ss:$0 sm:$0xff] }
0x1778   : > { %v7358_v42 = vmul.f32 %v14174_v60, %v14147_v53  ;;  %vm7364_vm13 = vweird.f32 %v14174_v60 }
0x1779   : > { %11551 = vrsqrt.f32 %v14176_v15  ;;  %vm7365_vm10 = vmor %vm7363_vm9, %vm7364_vm13  ;;  %vm7373_vm12 = vweird.f32 %v14176_v15 }
0x177a   : > { %v7359_v4 = vmul.f32 %v14174_v60, %v7358_v42  ;;  %v11075_v42 = vld [vmem:[%s12472_s23 + $0x38] sm:$0xff]  ;;  %8005 = vmatpush.bf16.msrb.mxu3 %v11083_v22 }
0x177b   : > { %7632 = vmatpush.bf16.msrb.mxu0 %v10519_v31  ;;  %7991 = vmatpush.bf16.msrb.mxu2 %v11075_v42 }
0x177c   : > { %v7360_v18 = vmul.f32 0.5, %v7359_v4  ;;  %v7428_v4 = vperm.slane %v14227_v26, 3 }
0x177e   : > { %v7361_v39 = vsub.f32 1.5, %v7360_v18  ;;  %8006 = vmatpush.bf16.msrb.mxu3 %v11082_v50  ;;  %v11081_v18 = vld [vmem:[%s12472_s23 + $0x68] sm:$0xff] }
0x177f   : > { %v11552_v55 = vpop.eup %11551  ;;  %7633 = vmatpush.bf16.msrb.mxu0 %v10503_v33  ;;  %7992 = vmatpush.bf16.msrb.mxu2 %v11074_v46  ;;  %v11069_v50 = vld [vmem:[%s12472_s23 + $0x8] sm:$0xff] }
0x1780   : > { %v7362_v23 = vmul.f32 %v14174_v60, %v7361_v39  ;;  %v7368_v43 = vmul.f32 %v11552_v55, %v14176_v15  ;;  %vm7374_vm11 = vweird.f32 %v11552_v55  ;;  %v11091_v15 = vld [vmem:[%s12472_s23 + $0xb8] sm:$0xff] }
0x1781   : > { %vm7375_vm14 = vmor %vm7373_vm12, %vm7374_vm11 }
0x1782   : > { %v7366_v40 = vsel %vm7365_vm10, %v14174_v60, %v7362_v23  ;;  %v7369_v57 = vmul.f32 %v11552_v55, %v7368_v43  ;;  %8007 = vmatpush.bf16.msrb.mxu3 %v11081_v18 }
0x1783   : > { %v7377_v53 = vmul.f32 %v7366_v40, %v14117_v62  ;;  %7634 = vmatpush.bf16.msrb.mxu0 %v10487_v3  ;;  %7993 = vmatpush.bf16.msrb.mxu2 %v11073_v12 }
0x1784   : > { %v7370_v5 = vmul.f32 0.5, %v7369_v57 }
0x1785   : > { %v7382_v63 = vmul.f32 %v11436_v17, %v7377_v53  ;;  %v11079_v53 = vld [vmem:[%s12472_s23 + $0x58] sm:$0xff] }
0x1786   : > { %v7371_v27 = vsub.f32 1.5, %v7370_v5  ;;  %8008 = vmatpush.bf16.msrb.mxu3 %v11080_v14 }
0x1787   : > { %v7387_v2 = vadd.f32 %v11437_v35, %v7382_v63  ;;  %8019 = vmatpush.bf16.msra.mxu0 %v11091_v15  ;;  %7994 = vmatpush.bf16.msrb.mxu2 %v11072_v9 }
0x1788   : > { %v7372_v36 = vmul.f32 %v11552_v55, %v7371_v27 }
0x1789   : > { %v7389_v38 = vpack.c.bf16 %v7387_v2, %v7387_v2 }
0x178a   : > { %v7376_v62 = vsel %vm7375_vm14, %v11552_v55, %v7372_v36  ;;  %8009 = vmatpush.bf16.msrb.mxu3 %v11079_v53 }
0x178b   : > { %v7378_v13 = vmul.f32 %v7376_v62, %v14123_v34  ;;  %v7435_v60 = vunpack.c.l.b16 %v7389_v38  ;;  %v11099_v34 = vld [vmem:[%s12472_s23 + $0xf8] sm:$0xff]  ;;  %8020 = vmatpush.bf16.msra.mxu0 %v11090_v0  ;;  %v11093_v62 = vld [vmem:[%s12472_s23 + $0xc8] sm:$0xff]  ;;  %v11070_v38 = vld [vmem:[%s12472_s23 + $0x10] sm:$0xff] }
0x178c   : > { %8033 = vmatpush.bf16.msrb.mxu1 %v11099_v34 }
0x178d   : > { %v7383_v59 = vmul.f32 %v11436_v17, %v7378_v13  ;;  %v11071_v17 = vld [vmem:[%s12472_s23 + $0x18] sm:$0xff] }
0x178e   : > { %7995 = vmatpush.bf16.msrb.mxu2 %v11071_v17 }
0x178f   : > { %v7388_v1 = vadd.f32 %v11437_v35, %v7383_v59  ;;  %8021 = vmatpush.bf16.msra.mxu0 %v11089_v19  ;;  %v11085_v35 = vld [vmem:[%s12472_s23 + $0x88] sm:$0xff] }
0x1790   : > { %8034 = vmatpush.bf16.msrb.mxu1 %v11098_v32  ;;  %v11084_v32 = vld [vmem:[%s12472_s23 + $0x80] sm:$0xff] }
0x1791   : > { %v7390_v61 = vpack.c.bf16 %v7388_v1, %v7388_v1  ;;  %v11078_v1 = vld [vmem:[%s12472_s23 + $0x50] sm:$0xff] }
0x1792   : > { %7996 = vmatpush.bf16.msrb.mxu2 %v11070_v38  ;;  %8010 = vmatpush.bf16.msrb.mxu3 %v11078_v1 }
0x1793   : > { %v7436_v30 = vunpack.c.l.b16 %v7390_v61  ;;  %8022 = vmatpush.bf16.msra.mxu0 %v11088_v7  ;;  %v11077_v7 = vld [vmem:[%s12472_s23 + $0x48] sm:$0xff] }
0x1794   : > { %8035 = vmatpush.bf16.msrb.mxu1 %v11097_v58  ;;  %v11092_v58 = vld [vmem:[%s12472_s23 + $0xc0] sm:$0xff] }
0x1795   : > { %v7437_v49 = vpack.c.b16 %v7436_v30, %v7435_v60 }
0x1796   : > { %7997 = vmatpush.bf16.msrb.mxu2 %v11069_v50  ;;  %8011 = vmatpush.bf16.msrb.mxu3 %v11077_v7 }
0x1797   : > { %7607 = vmatmul.bf16.vlgmr.msra.gmra.mxu2 %v7437_v49  ;;  %7621 = vmatmul.bf16.vlgmr.msra.gmra.mxu3 %v7437_v49 }
0x1798   : > { %7635 = vmatmul.bf16.vlgmr.msrb.gmra.mxu0 %v7437_v49  ;;  %7649 = vmatmul.bf16.vlgmr.msra.gmra.mxu1 %v7437_v49 }
0x1799   : > { %8036 = vmatpush.bf16.msrb.mxu1 %v11096_v54  ;;  %8023 = vmatpush.bf16.msra.mxu0 %v11087_v45  ;;  %v11068_v45 = vld [vmem:[%s12472_s23] sm:$0xff] }
0x179a   : > { %7998 = vmatpush.bf16.msrb.mxu2 %v11068_v45 }
0x179d   : > { %8037 = vmatpush.bf16.msrb.mxu1 %v11095_v25  ;;  %8024 = vmatpush.bf16.msra.mxu0 %v11086_v47  ;;  %v11076_v25 = vld [vmem:[%s12472_s23 + $0x40] sm:$0xff] }
0x179e   : > { %8012 = vmatpush.bf16.msrb.mxu3 %v11076_v25 }
0x17a1   : > { %8038 = vmatpush.bf16.msrb.mxu1 %v11094_v20  ;;  %8025 = vmatpush.bf16.msra.mxu0 %v11085_v35 }
0x17a5   : > { %8039 = vmatpush.bf16.msrb.mxu1 %v11093_v62  ;;  %8026 = vmatpush.bf16.msra.mxu0 %v11084_v32 }
0x17a9   : > { %8040 = vmatpush.bf16.msrb.mxu1 %v11092_v58 }
0x1815   : > { %v7636_v31 = vpop.f32.mrf.mxu0  ;;  %v7650_v41 = vpop.f32.mrf.mxu1 }
0x1816   : > { %v14237_v16 = vadd.f32 %v7636_v31, %v7427_v8  ;;  %v14239_v28 = vadd.f32 %v7650_v41, %v7428_v4 }
0x1818   : > { %v7657_v29 = vmul.f32 %v14237_v16, %v14237_v16  ;;  %v7658_v39 = vmul.f32 %v14239_v28, %v14239_v28 }
0x181a   : > { %v7665_v37 = vmul.f32 %v7657_v29, %v14237_v16  ;;  %v7666_v55 = vmul.f32 %v7658_v39, %v14239_v28  ;;  %v7608_v33 = vpop.f32.mrf.mxu2  ;;  %v7622_v52 = vpop.f32.mrf.mxu3 }
0x181b   : > { %v14255_v11 = vadd.f32 %v7608_v33, %v7425_v48  ;;  %v14259_v23 = vadd.f32 %v7622_v52, %v7426_v44 }
0x181c   : > { %v7673_v43 = vmul.f32 0.044715, %v7665_v37  ;;  %v7674_v51 = vmul.f32 0.044715, %v7666_v55 }
0x181d   : > { %v7655_v21 = vmul.f32 %v14255_v11, %v14255_v11  ;;  %v7656_v40 = vmul.f32 %v14259_v23, %v14259_v23  ;;  %v7638_v57 = vpop.f32.mrf.mxu0  ;;  %v7652_v10 = vpop.f32.mrf.mxu1 }
0x181e   : > { %v7681_v3 = vadd.f32 %v7673_v43, %v14237_v16  ;;  %v7682_v6 = vadd.f32 %v7674_v51, %v14239_v28  ;;  %v14271_v5 = vadd.f32 %v7638_v57, %v7427_v8  ;;  %v14273_v27 = vadd.f32 %v7652_v10, %v7428_v4 }
0x181f   : > { %v7663_v63 = vmul.f32 %v7655_v21, %v14255_v11  ;;  %v7664_v36 = vmul.f32 %v7656_v40, %v14259_v23 }
0x1820   : > { %v7689_v2 = vmul.f32 0.7978846, %v7681_v3  ;;  %v7661_v13 = vmul.f32 %v14271_v5, %v14271_v5  ;;  %v7662_v59 = vmul.f32 %v14273_v27, %v14273_v27  ;;  %v7690_v61 = vmul.f32 0.7978846, %v7682_v6 }
0x1821   : > { %v7671_v60 = vmul.f32 0.044715, %v7663_v63  ;;  %v7672_v30 = vmul.f32 0.044715, %v7664_v36 }
0x1822   : > { %v7669_v49 = vmul.f32 %v7661_v13, %v14271_v5  ;;  %v7670_v15 = vmul.f32 %v7662_v59, %v14273_v27  ;;  %v7610_v34 = vpop.f32.mrf.mxu2  ;;  %v7624_v0 = vpop.f32.mrf.mxu3  ;;  %11553 = vtanh.f32 %v7689_v2 }
0x1823   : > { %v7679_v42 = vadd.f32 %v7671_v60, %v14255_v11  ;;  %v7680_v22 = vadd.f32 %v7672_v30, %v14259_v23  ;;  %v14290_v19 = vadd.f32 %v7610_v34, %v7425_v48  ;;  %v14295_v46 = vadd.f32 %v7624_v0, %v7426_v44 }
0x1824   : > { %v7677_v8 = vmul.f32 0.044715, %v7669_v49  ;;  %v7678_v4 = vmul.f32 0.044715, %v7670_v15  ;;  %11555 = vtanh.f32 %v7690_v61 }
0x1825   : > { %v7687_v54 = vmul.f32 0.7978846, %v7679_v42  ;;  %v7688_v31 = vmul.f32 0.7978846, %v7680_v22  ;;  %v7659_v41 = vmul.f32 %v14290_v19, %v14290_v19  ;;  %v7660_v26 = vmul.f32 %v14295_v46, %v14295_v46 }
0x1826   : > { %v7685_v12 = vadd.f32 %v7677_v8, %v14271_v5  ;;  %v7686_v18 = vadd.f32 %v7678_v4, %v14273_v27  ;;  %v11438_v8 = vld [vmem:[%s2002_s14] ss:$0 sm:$0xff] }
0x1827   : > { %v7667_v48 = vmul.f32 %v7659_v41, %v14290_v19  ;;  %11557 = vtanh.f32 %v7687_v54  ;;  %v7668_v39 = vmul.f32 %v7660_v26, %v14295_v46 }
0x1828   : > { %v7693_v44 = vmul.f32 0.7978846, %v7685_v12  ;;  %v7694_v29 = vmul.f32 0.7978846, %v7686_v18  ;;  %11559 = vtanh.f32 %v7688_v31  ;;  %v11554_v55 = vpop.eup %11553 }
0x1829   : > { %v7675_v37 = vmul.f32 0.044715, %v7667_v48  ;;  %v7676_v33 = vmul.f32 0.044715, %v7668_v39  ;;  %v7705_v43 = vadd.f32 1.0, %v11554_v55 }
0x182a   : > { %11561 = vtanh.f32 %v7693_v44  ;;  %v11556_v52 = vpop.eup %11555 }
0x182b   : > { %11563 = vtanh.f32 %v7694_v29  ;;  %v7683_v9 = vadd.f32 %v7675_v37, %v14290_v19  ;;  %v7684_v14 = vadd.f32 %v7676_v33, %v14295_v46  ;;  %v7706_v20 = vadd.f32 1.0, %v11556_v52 }
0x182c   : > { %v7713_v17 = vmul.f32 0.5, %v7705_v43 }
0x182d   : > { %v7691_v51 = vmul.f32 0.7978846, %v7683_v9  ;;  %v11558_v47 = vpop.eup %11557  ;;  %v7692_v21 = vmul.f32 0.7978846, %v7684_v14  ;;  %v7714_v3 = vmul.f32 0.5, %v7706_v20 }
0x182e   : > { %v11560_v40 = vpop.eup %11559  ;;  %v7703_v6 = vadd.f32 1.0, %v11558_v47  ;;  %v7721_v13 = vmul.f32 %v7713_v17, %v14237_v16 }
0x182f   : > { %11565 = vtanh.f32 %v7691_v51  ;;  %v7704_v63 = vadd.f32 1.0, %v11560_v40  ;;  %v7722_v1 = vmul.f32 %v7714_v3, %v14239_v28 }
0x1830   : > { %v11562_v57 = vpop.eup %11561  ;;  %11567 = vtanh.f32 %v7692_v21  ;;  %v7711_v61 = vmul.f32 0.5, %v7703_v6 }
0x1831   : > { %v11564_v10 = vpop.eup %11563  ;;  %v7709_v53 = vadd.f32 1.0, %v11562_v57  ;;  %v7712_v49 = vmul.f32 0.5, %v7704_v63 }
0x1832   : > { %v7710_v35 = vadd.f32 1.0, %v11564_v10  ;;  %v7719_v16 = vmul.f32 %v7711_v61, %v14255_v11 }
0x1833   : > { %v7717_v36 = vmul.f32 0.5, %v7709_v53  ;;  %v7720_v28 = vmul.f32 %v7712_v49, %v14259_v23 }
0x1834   : > { %v7718_v62 = vmul.f32 0.5, %v7710_v35 }
0x1835   : > { %v11566_v2 = vpop.eup %11565  ;;  %v7725_v59 = vmul.f32 %v7717_v36, %v14271_v5 }
0x1836   : > { %v11568_v38 = vpop.eup %11567  ;;  %v7726_v60 = vmul.f32 %v7718_v62, %v14273_v27  ;;  %v7707_v30 = vadd.f32 1.0, %v11566_v2 }
0x1837   : > { %v7729_v15 = vpack.c.bf16 %v7725_v59, %v7721_v13  ;;  %v7708_v34 = vadd.f32 1.0, %v11568_v38 }
0x1838   : > { %v7730_v0 = vpack.c.bf16 %v7726_v60, %v7722_v1  ;;  %v7715_v32 = vmul.f32 0.5, %v7707_v30 }
0x1839   : > { %v7716_v42 = vmul.f32 0.5, %v7708_v34  ;;  %8027 = vmatmul.bf16.vlgmr.msra.gmra.mxu0 %v7729_v15 }
0x183a   : > { %v7723_v5 = vmul.f32 %v7715_v32, %v14290_v19  ;;  %8041 = vmatmul.bf16.vlgmr.msrb.gmra.mxu1 %v7730_v0 }
0x183b   : > { %v7724_v22 = vmul.f32 %v7716_v42, %v14295_v46 }
0x183c   : > { %v7727_v27 = vpack.c.bf16 %v7723_v5, %v7719_v16 }
0x183d   : > { %v7728_v58 = vpack.c.bf16 %v7724_v22, %v7720_v28 }
0x183e   : > { %7999 = vmatmul.bf16.vlgmr.msrb.gmra.mxu2 %v7727_v27 }
0x183f   : > { %8013 = vmatmul.bf16.vlgmr.msrb.gmra.mxu3 %v7728_v58 }
0x18b6   : > { %v8028_v54 = vpop.f32.mrf.mxu0 }
0x18b7   : > { %v8042_v31 = vpop.f32.mrf.mxu1 }
0x18be   : > { %v8030_v48 = vpop.f32.mrf.mxu0 }
0x18bf   : > { %v8044_v29 = vpop.f32.mrf.mxu1 }
0x18c1   : > { %v8000_v4 = vpop.f32.mrf.mxu2 }
0x18c2   : > { %v8001_v50 = vadd.f32 %v11438_v8, %v8000_v4  ;;  %v8014_v7 = vpop.f32.mrf.mxu3 }
0x18c4   : > { %v8015_v11 = vadd.f32 %v8014_v7, %v8001_v50 }
0x18c6   : > { %v8029_v19 = vadd.f32 %v8028_v54, %v8015_v11 }
0x18c8   : > { %v8043_v41 = vadd.f32 %v8042_v31, %v8029_v19 }
0x18c9   : > { %v8002_v12 = vpop.f32.mrf.mxu2 }
0x18ca   : > { %v8047_v23 = vadd.f32 %v8043_v41, %v14108_v24  ;;  %v8003_v46 = vadd.f32 %v11438_v8, %v8002_v12  ;;  %v8016_v18 = vpop.f32.mrf.mxu3 }
0x18cc   : > { %8049 = vst [vmem:[%s14863_s27] sm:$0xff] %v8047_v23  ;;  %v8017_v26 = vadd.f32 %v8016_v18, %v8003_v46 }
0x18ce   : > { %v8031_v44 = vadd.f32 %v8030_v48, %v8017_v26 }
0x18d0   : > { %v8045_v39 = vadd.f32 %v8044_v29, %v8031_v44 }
0x18d2   : > { %v8048_v45 = vadd.f32 %v8045_v39, %v14112_v56 }
0x18d4   : > { %8050 = vst [vmem:[%s14863_s27 + $0x8] sm:$0xff] %v8048_v45 }
0x18d5 PF: > { %s14877_s0 = sld [smem:[#allocation68_spill]] }
0x18db   : > { %p10732_p6 = scmp.ne.s32.totalorder %s14877_s0, 1 }
0x18dc   : > { %s14878_s24 = sld [smem:[#allocation63_spill]] (!%p10732_p6) }
0x18dd   : > { %8054 = sbr.rel (%p10732_p6) target bundleno = 6692 (0x1a24), region = 240  ;;  %s14879_s1 = sld [smem:[#allocation64_spill]] (!%p10732_p6) }
0x18de   : > { %s14880_s12 = sld [smem:[#allocation29_spill]] (!%p10732_p6) }
0x18df   : > { %s8065_s3 = sld [smem:[#allocation2]] (!%p10732_p6) }
0x18e0   : > { %s14893_s14 = sld [smem:[#allocation65_spill]] (!%p10732_p6) }
0x18e2   : > { %v14328_v24 = vld [vmem:[%s14878_s24 + $0x18] sm:$0xff]  ;;  %v14331_v25 = vld [vmem:[%s14878_s24] sm:$0xff]  ;;  %vm8214_vm15 = vcmask 1040384   ;;  %v14346_v47 = vld [vmem:[%s14878_s24 + $0x8] sm:$0xff] }
0x18e3   : > { %v8127_v56 = vmul.f32 %v14328_v24, %v14328_v24  ;;  %v8124_v37 = vmul.f32 %v14331_v25, %v14331_v25  ;;  %v8062_v55 = vld [vmem:[%s14879_s1 + $0x8] sm:$0xff]  ;;  %v8061_v52 = vld [vmem:[%s14879_s1] sm:$0xff]  ;;  %v8125_v53 = vmul.f32 %v14346_v47, %v14346_v47  ;;  %v14354_v59 = vld [vmem:[%s14878_s24 + $0x10] sm:$0xff] }
0x18e4   : > { %v8064_v33 = vld [vmem:[%s14880_s12 + $0x8] sm:$0xff]  ;;  %v8063_v9 = vld [vmem:[%s14880_s12] sm:$0xff]  ;;  %v8126_v49 = vmul.f32 %v14354_v59, %v14354_v59 }
0x18e5   : > { %8136 = vadd.xlane.f32.xlu2 %v8127_v56  ;;  %8130 = vadd.xlane.f32.xlu1 %v8124_v37  ;;  %v8215_v14 = vsel %vm8214_vm15, %v8124_v37, 0.0  ;;  %v8086_v43 = vrot.slane %v8064_v33, 4  ;;  %v14343_v51 = vld [vmem:[%s14878_s24 + $0x20] sm:$0xff]  ;;  %v8067_v20 = vmul.f32 %v8064_v33, %v8062_v55  ;;  %v8080_v21 = vrot.slane %v8063_v9, 4 }
0x18e6   : > { %8216 = vadd.xlane.f32.xlu0 %v8215_v14  ;;  %v8066_v57 = vmul.f32 %v8063_v9, %v8061_v52  ;;  %v8128_v17 = vmul.f32 %v14343_v51, %v14343_v51  ;;  %v8218_v63 = vsel %vm8214_vm15, %v8127_v56, 0.0  ;;  %v14367_v52 = vld [vmem:[%s14878_s24 + $0x28] sm:$0xff] }
0x18e7   : > { %v8087_v40 = vadd.f32 %v8086_v43, %v8064_v33  ;;  %v8081_v10 = vadd.f32 %v8080_v21, %v8063_v9  ;;  %v8074_v6 = vrot.slane %v8067_v20, 4  ;;  %v8129_v9 = vmul.f32 %v14367_v52, %v14367_v52 }
0x18e8   : > { %v8068_v62 = vrot.slane %v8066_v57, 4 }
0x18e9   : > { %v8088_v3 = vrot.slane %v8087_v40, 2  ;;  %v8082_v35 = vrot.slane %v8081_v10, 2  ;;  %v8075_v38 = vadd.f32 %v8074_v6, %v8067_v20 }
0x18ea   : > { %v8069_v60 = vadd.f32 %v8068_v62, %v8066_v57 }
0x18eb   : > { %v8089_v36 = vadd.f32 %v8088_v3, %v8087_v40  ;;  %v8083_v2 = vadd.f32 %v8082_v35, %v8081_v10  ;;  %v8076_v34 = vrot.slane %v8075_v38, 2 }
0x18ec   : > { %v8070_v32 = vrot.slane %v8069_v60, 2 }
0x18ed   : > { %8138 = vadd.xlane.f32.xlu2 %v8128_v17  ;;  %8132 = vadd.xlane.f32.xlu1 %v8125_v53  ;;  %v8090_v13 = vrot.slane %v8089_v36, 1  ;;  %v8084_v1 = vrot.slane %v8083_v2, 1  ;;  %v8077_v42 = vadd.f32 %v8076_v34, %v8075_v38 }
0x18ee   : > { %8219 = vadd.xlane.f32.xlu0 %v8218_v63  ;;  %v8071_v16 = vadd.f32 %v8070_v32, %v8069_v60 }
0x18ef   : > { %v8091_v61 = vadd.f32 %v8090_v13, %v8089_v36  ;;  %v8085_v30 = vadd.f32 %v8084_v1, %v8083_v2  ;;  %v8078_v22 = vrot.slane %v8077_v42, 1 }
0x18f0   : > { %v8072_v8 = vrot.slane %v8071_v16, 1 }
0x18f1   : > { %v8093_v15 = vmax.f32 %v8091_v61, 1e-06  ;;  %v8092_v0 = vmax.f32 %v8085_v30, 1e-06  ;;  %v8079_v23 = vadd.f32 %v8078_v22, %v8077_v42 }
0x18f2   : > { %v8073_v26 = vadd.f32 %v8072_v8, %v8071_v16 }
0x18f3   : > { %11569 = vrcp.f32 %v8093_v15  ;;  %vm8114_vm0 = vweird.f32 %v8093_v15  ;;  %v8120_v58 = vand.u32 2147483648, %v8093_v15  ;;  %v8118_v7 = vand.u32 2147483647, %v8093_v15 }
0x18f4   : > { %11571 = vrcp.f32 %v8092_v0  ;;  %v8105_v54 = vand.u32 2147483648, %v8092_v0  ;;  %vm8099_vm2 = vweird.f32 %v8092_v0  ;;  %v8103_v31 = vand.u32 2147483647, %v8092_v0 }
0x18f5   : > { %8134 = vadd.xlane.f32.xlu2 %v8126_v49  ;;  %v8121_v41 = vor.u32 1.1754944e-38, %v8120_v58  ;;  %vm8119_vm5 = vcmp.eq.f32.partialorder %v8118_v7, 8.507059e+37 }
0x18f6   : > { %v8106_v18 = vor.u32 1.1754944e-38, %v8105_v54  ;;  %vm8104_vm7 = vcmp.eq.f32.partialorder %v8103_v31, 8.507059e+37 }
0x18f9   : > { %v11570_v5 = vpop.eup %11569 }
0x18fa   : > { %v11572_v28 = vpop.eup %11571  ;;  %v8110_v27 = vmul.f32 %v11570_v5, %v8093_v15  ;;  %vm8115_vm1 = vweird.f32 %v11570_v5 }
0x18fb   : > { %v8095_v4 = vmul.f32 %v11572_v28, %v8092_v0  ;;  %vm8100_vm3 = vweird.f32 %v11572_v28  ;;  %vm8116_vm4 = vmor %vm8114_vm0, %vm8115_vm1 }
0x18fc   : > { %v8111_v50 = vsub.f32 1.0, %v8110_v27  ;;  %vm8101_vm6 = vmor %vm8099_vm2, %vm8100_vm3 }
0x18fd   : > { %v8096_v11 = vsub.f32 1.0, %v8095_v4 }
0x18fe   : > { %v8112_v19 = vmul.f32 %v11570_v5, %v8111_v50 }
0x18ff   : > { %v8097_v12 = vmul.f32 %v11572_v28, %v8096_v11 }
0x1900   : > { %v8113_v46 = vadd.f32 %v11570_v5, %v8112_v19 }
0x1901   : > { %v8098_v48 = vadd.f32 %v11572_v28, %v8097_v12 }
0x1902   : > { %v8117_v44 = vsel %vm8116_vm4, %v11570_v5, %v8113_v46 }
0x1903   : > { %v8122_v29 = vsel %vm8119_vm5, %v8121_v41, %v8117_v44  ;;  %v8102_v39 = vsel %vm8101_vm6, %v11572_v28, %v8098_v48 }
0x1904   : > { %v14358_v45 = vmul.f32 %v8122_v29, %v8079_v23  ;;  %v8107_v56 = vsel %vm8104_vm7, %v8106_v18, %v8102_v39 }
0x1905   : > { %v14360_v37 = vmul.f32 %v8107_v56, %v8073_v26 }
0x1906   : > { %v8246_v55 = vmul.f32 %v14358_v45, %v14358_v45 }
0x1907   : > { %v8245_v33 = vmul.f32 %v14360_v37, %v14360_v37 }
0x1908   : > { %8249 = vadd.xlane.f32.xlu1 %v8246_v55 }
0x1909   : > { %8247 = vadd.xlane.f32.xlu0 %v8245_v33 }
0x1911   : > { %8140 = vadd.xlane.f32.xlu0 %v8129_v9 }
0x1958   : > { %v8137_v14 = vpop.xlane.xlu2 %8136  ;;  %v8131_v43 = vpop.xlane.xlu1 %8130 }
0x1959   : > { %v14371_v20 = vadd.f32 1e-12, %v8137_v14  ;;  %v8142_v21 = vadd.f32 1e-12, %v8131_v43  ;;  %v8217_v40 = vpop.xlane.xlu0 %8216 }
0x195a   : > { %v8221_v57 = vadd.f32 1e-12, %v8217_v40 }
0x195b   : > { %11573 = vrsqrt.f32 %v14371_v20  ;;  %vm8154_vm8 = vweird.f32 %v8142_v21  ;;  %vm8184_vm11 = vweird.f32 %v14371_v20 }
0x195c   : > { %11575 = vrsqrt.f32 %v8142_v21  ;;  %vm8229_vm13 = vweird.f32 %v8221_v57 }
0x195d   : > { %11577 = vrsqrt.f32 %v8221_v57 }
0x1960   : > { %v8139_v10 = vpop.xlane.xlu2 %8138  ;;  %v8133_v17 = vpop.xlane.xlu1 %8132 }
0x1961   : > { %v14374_v53 = vpop.eup %11573  ;;  %v8146_v3 = vadd.f32 1e-12, %v8139_v10  ;;  %v8143_v6 = vadd.f32 1e-12, %v8133_v17  ;;  %v8220_v35 = vpop.xlane.xlu0 %8219 }
0x1962   : > { %v11576_v63 = vpop.eup %11575  ;;  %v8179_v36 = vmul.f32 %v14374_v53, %v14371_v20  ;;  %v8222_v62 = vadd.f32 1e-12, %v8220_v35  ;;  %vm8185_vm12 = vweird.f32 %v14374_v53 }
0x1963   : > { %v11578_v2 = vpop.eup %11577  ;;  %v8149_v13 = vmul.f32 %v11576_v63, %v8142_v21  ;;  %11579 = vrsqrt.f32 %v8146_v3  ;;  %vm8155_vm10 = vweird.f32 %v11576_v63  ;;  %vm8194_vm0 = vweird.f32 %v8146_v3  ;;  %vm14399_vm6 = vmor %vm8184_vm11, %vm8185_vm12 }
0x1964   : > { %v8224_v38 = vmul.f32 %v11578_v2, %v8221_v57  ;;  %11581 = vrsqrt.f32 %v8143_v6  ;;  %v8180_v1 = vmul.f32 %v14374_v53, %v8179_v36  ;;  %vm8230_vm9 = vweird.f32 %v11578_v2  ;;  %vm14386_vm1 = vmor %vm8154_vm8, %vm8155_vm10 }
0x1965   : > { %v8150_v61 = vmul.f32 %v11576_v63, %v8149_v13  ;;  %11583 = vrsqrt.f32 %v8222_v62  ;;  %vm14381_vm14 = vmor %vm8229_vm13, %vm8230_vm9  ;;  %vm8164_vm2 = vweird.f32 %v8143_v6  ;;  %vm8239_vm3 = vweird.f32 %v8222_v62 }
0x1966   : > { %v8225_v60 = vmul.f32 %v11578_v2, %v8224_v38  ;;  %v8181_v0 = vmul.f32 0.5, %v8180_v1 }
0x1967   : > { %v8151_v30 = vmul.f32 0.5, %v8150_v61 }
0x1968   : > { %v8226_v49 = vmul.f32 0.5, %v8225_v60  ;;  %v8135_v15 = vpop.xlane.xlu2 %8134  ;;  %v8182_v54 = vsub.f32 1.5, %v8181_v0 }
0x1969   : > { %v11580_v34 = vpop.eup %11579  ;;  %v8152_v32 = vsub.f32 1.5, %v8151_v30  ;;  %v8144_v42 = vadd.f32 1e-12, %v8135_v15 }
0x196a   : > { %v11582_v16 = vpop.eup %11581  ;;  %v8227_v5 = vsub.f32 1.5, %v8226_v49  ;;  %v8189_v28 = vmul.f32 %v11580_v34, %v8146_v3  ;;  %vm8195_vm4 = vweird.f32 %v11580_v34  ;;  %v8183_v9 = vmul.f32 %v14374_v53, %v8182_v54 }
0x196b   : > { %v11584_v22 = vpop.eup %11583  ;;  %v8159_v58 = vmul.f32 %v11582_v16, %v8143_v6  ;;  %11585 = vrsqrt.f32 %v8144_v42  ;;  %v8153_v31 = vmul.f32 %v11576_v63, %v8152_v32  ;;  %vm8165_vm5 = vweird.f32 %v11582_v16  ;;  %vm14407_vm8 = vmor %vm8194_vm0, %vm8195_vm4 }
0x196c   : > { %v8228_v4 = vmul.f32 %v11578_v2, %v8227_v5  ;;  %v8190_v50 = vmul.f32 %v11580_v34, %v8189_v28  ;;  %v8234_v7 = vmul.f32 %v11584_v22, %v8222_v62  ;;  %vm8240_vm7 = vweird.f32 %v11584_v22  ;;  %vm14413_vm13 = vmor %vm8164_vm2, %vm8165_vm5 }
0x196d   : > { %v8160_v11 = vmul.f32 %v11582_v16, %v8159_v58  ;;  %v8157_v46 = vsel %vm14386_vm1, %v11576_v63, %v8153_v31  ;;  %vm8241_vm9 = vmor %vm8239_vm3, %vm8240_vm7  ;;  %vm8174_vm10 = vweird.f32 %v8144_v42  ;;  %v8187_v6 = vsel %vm14399_vm6, %v14374_v53, %v8183_v9 }
0x196e   : > { %v8191_v19 = vmul.f32 0.5, %v8190_v50  ;;  %v8235_v41 = vmul.f32 %v11584_v22, %v8234_v7  ;;  %v8232_v12 = vsel %vm14381_vm14, %v11578_v2, %v8228_v4  ;;  %v14404_v29 = vmul.f32 %v8157_v46, %v14331_v25 }
0x196f   : > { %v8161_v23 = vmul.f32 0.5, %v8160_v11  ;;  %v8243_v18 = vmul.f32 %v8232_v12, %v14331_v25  ;;  %v8211_v60 = vmul.f32 %v8187_v6, %v14328_v24 }
0x1970   : > { %v8192_v48 = vsub.f32 1.5, %v8191_v19  ;;  %v8236_v44 = vmul.f32 0.5, %v8235_v41 }
0x1971   : > { %v11586_v39 = vpop.eup %11585  ;;  %v8162_v55 = vsub.f32 1.5, %v8161_v23  ;;  %v8275_v33 = vperm.slane %v8243_v18, 0 }
0x1972   : > { %v8237_v43 = vsub.f32 1.5, %v8236_v44  ;;  %v8169_v20 = vmul.f32 %v11586_v39, %v8144_v42  ;;  %v8193_v21 = vmul.f32 %v11580_v34, %v8192_v48  ;;  %vm8175_vm11 = vweird.f32 %v11586_v39 }
0x1973   : > { %v8277_v25 = vmul.f32 %v8275_v33, %v14404_v29  ;;  %v8163_v40 = vmul.f32 %v11582_v16, %v8162_v55  ;;  %vm14431_vm12 = vmor %vm8174_vm10, %vm8175_vm11  ;;  %vm8403_vm10 = vcmask 190464  }
0x1974   : > { %v8238_v57 = vmul.f32 %v11584_v22, %v8237_v43  ;;  %v8170_v10 = vmul.f32 %v11586_v39, %v8169_v20  ;;  %v8197_v17 = vsel %vm14407_vm8, %v11580_v34, %v8193_v21  ;;  %vm8349_vm8 = vcmask 130112  }
0x1975   : > { %8283 = vadd.xlane.f32.xlu1 %v8277_v25  ;;  %v8167_v3 = vsel %vm14413_vm13, %v11582_v16, %v8163_v40  ;;  %v14428_v62 = vmul.f32 %v8197_v17, %v14343_v51  ;;  %vm8353_vm13 = vcmask 195712  }
0x1976   : > { %v8171_v35 = vmul.f32 0.5, %v8170_v10  ;;  %v8209_v63 = vmul.f32 %v8167_v3, %v14346_v47  ;;  %v8242_v36 = vsel %vm8241_vm9, %v11584_v22, %v8238_v57  ;;  %v8344_v3 = vlaneseq }
0x1977   : > { %v8244_v2 = vmul.f32 %v8242_v36, %v14328_v24  ;;  %vm8400_vm9 = vcmask 1041408  }
0x1978   : > { %v8172_v13 = vsub.f32 1.5, %v8171_v35  ;;  %v8278_v38 = vmul.f32 %v8275_v33, %v8209_v63  ;;  %v14445_v35 = vand.u32 127, %v8344_v3 }
0x1979   : > { %v8276_v61 = vperm.slane %v8244_v2, 0 }
0x197a   : > { %8285 = vadd.xlane.f32.xlu2 %v8278_v38  ;;  %v8173_v53 = vmul.f32 %v11586_v39, %v8172_v13  ;;  %v8351_v13 = vadd.s32 4294967280, %v14445_v35 }
0x197b   : > { %v8250_v30 = vpop.xlane.xlu1 %8249  ;;  %v8281_v47 = vmul.f32 %v8276_v61, %v14428_v62  ;;  %v8280_v49 = vmul.f32 %v8276_v61, %v8211_v60 }
0x197c   : > { %v8252_v15 = vadd.f32 1e-12, %v8250_v30  ;;  %v8248_v51 = vpop.xlane.xlu0 %8247  ;;  %v8177_v34 = vsel %vm14431_vm12, %v11586_v39, %v8173_v53 }
0x197d   : > { %v8251_v0 = vadd.f32 1e-12, %v8248_v51  ;;  %8291 = vadd.xlane.f32.xlu1 %v8281_v47  ;;  %8289 = vadd.xlane.f32.xlu0 %v8280_v49  ;;  %v8210_v32 = vmul.f32 %v8177_v34, %v14354_v59 }
0x197e   : > { %11587 = vrsqrt.f32 %v8252_v15  ;;  %vm8269_vm14 = vweird.f32 %v8252_v15 }
0x197f   : > { %11589 = vrsqrt.f32 %v8251_v0  ;;  %v8279_v42 = vmul.f32 %v8275_v33, %v8210_v32  ;;  %vm8259_vm3 = vweird.f32 %v8251_v0 }
0x1984   : > { %v11588_v24 = vpop.eup %11587  ;;  %v8141_v16 = vpop.xlane.xlu0 %8140 }
0x1985   : > { %v11590_v5 = vpop.eup %11589  ;;  %v8264_v28 = vmul.f32 %v11588_v24, %v8252_v15  ;;  %v8147_v22 = vadd.f32 1e-12, %v8141_v16  ;;  %8287 = vadd.xlane.f32.xlu0 %v8279_v42  ;;  %vm8270_vm0 = vweird.f32 %v11588_v24 }
0x1986   : > { %v8254_v27 = vmul.f32 %v11590_v5, %v8251_v0  ;;  %vm8260_vm1 = vweird.f32 %v11590_v5  ;;  %vm8271_vm2 = vmor %vm8269_vm14, %vm8270_vm0 }
0x1987   : > { %v8265_v58 = vmul.f32 %v11588_v24, %v8264_v28  ;;  %11591 = vrsqrt.f32 %v8147_v22  ;;  %vm8261_vm4 = vmor %vm8259_vm3, %vm8260_vm1  ;;  %vm8204_vm5 = vweird.f32 %v8147_v22 }
0x1988   : > { %v8255_v8 = vmul.f32 %v11590_v5, %v8254_v27 }
0x1989   : > { %v8266_v4 = vmul.f32 0.5, %v8265_v58 }
0x198a   : > { %v8256_v50 = vmul.f32 0.5, %v8255_v8 }
0x198b   : > { %v8267_v7 = vsub.f32 1.5, %v8266_v4 }
0x198c   : > { %v8257_v54 = vsub.f32 1.5, %v8256_v50 }
0x198d   : > { %v11592_v11 = vpop.eup %11591  ;;  %v8268_v59 = vmul.f32 %v11588_v24, %v8267_v7 }
0x198e   : > { %v8258_v31 = vmul.f32 %v11590_v5, %v8257_v54  ;;  %v8199_v19 = vmul.f32 %v11592_v11, %v8147_v22  ;;  %vm8205_vm6 = vweird.f32 %v11592_v11 }
0x198f   : > { %v8272_v41 = vsel %vm8271_vm2, %v11588_v24, %v8268_v59  ;;  %vm8206_vm7 = vmor %vm8204_vm5, %vm8205_vm6 }
0x1990   : > { %v8200_v12 = vmul.f32 %v11592_v11, %v8199_v19  ;;  %v8274_v23 = vmul.f32 %v8272_v41, %v14358_v45  ;;  %v8262_v46 = vsel %vm8261_vm4, %v11590_v5, %v8258_v31 }
0x1991   : > { %v8273_v18 = vmul.f32 %v8262_v46, %v14360_v37 }
0x1992   : > { %v8201_v26 = vmul.f32 0.5, %v8200_v12  ;;  %v8305_v48 = vmul.f32 %v8274_v23, %v8211_v60  ;;  %v8306_v45 = vmul.f32 %v8274_v23, %v14428_v62  ;;  %v14448_v62 = vadd.s32 4294967288, %v14445_v35 }
0x1993   : > { %v8303_v44 = vmul.f32 %v8273_v18, %v8209_v63  ;;  %v8302_v39 = vmul.f32 %v8273_v18, %v14404_v29  ;;  %v8304_v43 = vmul.f32 %v8273_v18, %v8210_v32 }
0x1994   : > { %v8202_v56 = vsub.f32 1.5, %v8201_v26  ;;  %8314 = vadd.xlane.f32.xlu1 %v8305_v48 }
0x1995   : > { %8310 = vadd.xlane.f32.xlu0 %v8303_v44  ;;  %8308 = vadd.xlane.f32.xlu2 %v8302_v39 }
0x1996   : > { %v8203_v55 = vmul.f32 %v11592_v11, %v8202_v56 }
0x1998   : > { %v8207_v33 = vsel %vm8206_vm7, %v11592_v11, %v8203_v55 }
0x1999   : > { %v8213_v9 = vmul.f32 %v8207_v33, %v14367_v52  ;;  %v8295_v52 = vstv %s8065_s3 }
0x199b   : > { %v8307_v14 = vmul.f32 %v8274_v23, %v8213_v9  ;;  %v8282_v37 = vmul.f32 %v8276_v61, %v8213_v9 }
0x199d   : > { %8316 = vadd.xlane.f32.xlu2 %v8306_v45  ;;  %8318 = vadd.xlane.f32.xlu0 %v8307_v14 }
0x199e   : > { %8293 = vadd.xlane.f32.xlu1 %v8282_v37 }
0x19a5   : > { %8312 = vadd.xlane.f32.xlu2 %v8304_v43 }
0x19e8   : > { %v8284_v29 = vpop.xlane.xlu1 %8283 }
0x19e9   : > { %v8296_v53 = vmul.f32 %v8295_v52, %v8284_v29 }
0x19eb   : > { %v8346_v29 = vperm.slane %v8296_v53, %v14445_v35 }
0x19ed   : > { %v8286_v25 = vpop.xlane.xlu2 %8285 }
0x19ee   : > { %v8297_v30 = vmul.f32 %v8295_v52, %v8286_v25 }
0x19f0   : > { %v8290_v20 = vpop.xlane.xlu0 %8289  ;;  %v8292_v21 = vpop.xlane.xlu1 %8291  ;;  %v8348_v55 = vperm.slane %v8297_v30, %v14448_v62 }
0x19f1   : > { %v8299_v63 = vmul.f32 %v8295_v52, %v8290_v20  ;;  %v8300_v36 = vmul.f32 %v8295_v52, %v8292_v21 }
0x19f3   : > { %v8356_v51 = vperm.slane %v8300_v36, %v14448_v62  ;;  %v8355_v34 = vperm.slane %v8299_v63, %v14445_v35 }
0x19f5   : > { %v8357_v50 = vsel %vm8349_vm8, %v8356_v51, %v8355_v34 }
0x19f8   : > { %v8288_v40 = vpop.xlane.xlu0 %8287 }
0x19f9   : > { %v8298_v7 = vmul.f32 %v8295_v52, %v8288_v40  ;;  %v8350_v40 = vsel %vm8349_vm8, %v8348_v55, %v8346_v29 }
0x19fb   : > { %v8352_v14 = vperm.slane %v8298_v7, %v8351_v13 }
0x1a07   : > { %v8315_v57 = vpop.xlane.xlu1 %8314 }
0x1a08   : > { %v8309_v10 = vpop.xlane.xlu2 %8308  ;;  %v8311_v17 = vpop.xlane.xlu0 %8310  ;;  %v8323_v6 = vmul.f32 %v8315_v57, %v8295_v52 }
0x1a09   : > { %v8320_v38 = vmul.f32 %v8309_v10, %v8295_v52  ;;  %v8321_v1 = vmul.f32 %v8311_v17, %v8295_v52  ;;  %v8354_v10 = vsel %vm8353_vm13, %v8352_v14, %v8350_v40 }
0x1a0a   : > { %v8329_v2 = vadd.f32 %v8323_v6, %v8299_v63  ;;  %v8373_v0 = vperm.slane %v8323_v6, %v14445_v35 }
0x1a0b   : > { %v8326_v28 = vadd.f32 %v8320_v38, %v8296_v53  ;;  %v8327_v22 = vadd.f32 %v8321_v1, %v8297_v30  ;;  %v8368_v18 = vperm.slane %v8320_v38, %v14445_v35  ;;  %v8369_v26 = vperm.slane %v8321_v1, %v14448_v62 }
0x1a0c   : > { %v8335_v42 = vmul.f32 0.5, %v8329_v2 }
0x1a0d   : > { %v8332_v41 = vmul.f32 0.5, %v8326_v28  ;;  %v8333_v12 = vmul.f32 0.5, %v8327_v22  ;;  %v8370_v20 = vsel %vm8349_vm8, %v8369_v26, %v8368_v18 }
0x1a0e   : > { %v8391_v11 = vperm.slane %v8335_v42, %v14445_v35 }
0x1a0f   : > { %v8386_v37 = vperm.slane %v8332_v41, %v14445_v35  ;;  %v8387_v43 = vperm.slane %v8333_v12, %v14448_v62 }
0x1a10   : > { %v8317_v61 = vpop.xlane.xlu2 %8316  ;;  %v8319_v60 = vpop.xlane.xlu0 %8318 }
0x1a11   : > { %v8324_v47 = vmul.f32 %v8317_v61, %v8295_v52  ;;  %v8294_v49 = vpop.xlane.xlu1 %8293  ;;  %v8325_v15 = vmul.f32 %v8319_v60, %v8295_v52  ;;  %v8388_v17 = vsel %vm8349_vm8, %v8387_v43, %v8386_v37 }
0x1a12   : > { %v8301_v32 = vmul.f32 %v8295_v52, %v8294_v49 }
0x1a13   : > { %v8330_v24 = vadd.f32 %v8324_v47, %v8300_v36  ;;  %v8374_v16 = vperm.slane %v8324_v47, %v14448_v62  ;;  %v8376_v5 = vperm.slane %v8325_v15, %v8351_v13 }
0x1a14   : > { %v8358_v27 = vperm.slane %v8301_v32, %v8351_v13  ;;  %v8331_v58 = vadd.f32 %v8325_v15, %v8301_v32 }
0x1a15   : > { %v8336_v8 = vmul.f32 0.5, %v8330_v24  ;;  %v8375_v4 = vsel %vm8349_vm8, %v8374_v16, %v8373_v0 }
0x1a16   : > { %v8337_v54 = vmul.f32 0.5, %v8331_v58  ;;  %v8359_v31 = vsel %vm8353_vm13, %v8358_v27, %v8357_v50  ;;  %v8377_v19 = vsel %vm8353_vm13, %v8376_v5, %v8375_v4 }
0x1a17   : > { %v8392_v59 = vperm.slane %v8336_v8, %v14448_v62  ;;  %v8399_v56 = vsel %vm8214_vm15, %v8359_v31, %v8377_v19 }
0x1a18   : > { %v8394_v23 = vperm.slane %v8337_v54, %v8351_v13  ;;  %v8313_v46 = vpop.xlane.xlu2 %8312 }
0x1a19   : > { %v8393_v48 = vsel %vm8349_vm8, %v8392_v59, %v8391_v11  ;;  %v8322_v44 = vmul.f32 %v8313_v46, %v8295_v52 }
0x1a1a   : > { %v8395_v39 = vsel %vm8353_vm13, %v8394_v23, %v8393_v48 }
0x1a1b   : > { %v8402_v33 = vsel %vm8400_vm9, %v8399_v56, %v8395_v39  ;;  %v8328_v9 = vadd.f32 %v8322_v44, %v8298_v7  ;;  %v8371_v45 = vperm.slane %v8322_v44, %v8351_v13 }
0x1a1c   : > { %8405 = vst.msk [vmem:[%s14893_s14 + $0x4] sm:$0x7] %vm8403_vm10, %v8402_v33 }
0x1a1d   : > { %v8334_v21 = vmul.f32 0.5, %v8328_v9  ;;  %v8372_v25 = vsel %vm8353_vm13, %v8371_v45, %v8370_v20 }
0x1a1e   : > { %v8398_v52 = vsel %vm8214_vm15, %v8354_v10, %v8372_v25 }
0x1a1f   : > { %v8389_v57 = vperm.slane %v8334_v21, %v8351_v13 }
0x1a21   : > { %v8390_v3 = vsel %vm8353_vm13, %v8389_v57, %v8388_v17 }
0x1a22   : > { %v8401_v6 = vsel %vm8400_vm9, %v8398_v52, %v8390_v3 }
0x1a23   : > { %8404 = vst.msk [vmem:[%s14893_s14] sm:$0x7] %vm8403_vm10, %v8401_v6 }
0x1a24 PF: > { %s14894_s16 = sld [smem:[#allocation68_spill]] }
0x1a2a   : > { %p10733_p9 = scmp.ne.s32.totalorder %s14894_s16, 3 }
0x1a2b   : > { %s14895_s9 = sld [smem:[#allocation63_spill]] (!%p10733_p9) }
0x1a2c   : > { %8408 = sbr.rel (%p10733_p9) target bundleno = 7027 (0x1b73), region = 244  ;;  %s14896_s7 = sld [smem:[#allocation64_spill]] (!%p10733_p9) }
0x1a2d   : > { %s14897_s17 = sld [smem:[#allocation29_spill]] (!%p10733_p9) }
0x1a2e   : > { %s8419_s30 = sld [smem:[#allocation2]] (!%p10733_p9) }
0x1a2f   : > { %s14910_s27 = sld [smem:[#allocation65_spill]] (!%p10733_p9) }
0x1a31   : > { %v14485_v35 = vld [vmem:[%s14895_s9 + $0x18] sm:$0xff]  ;;  %v14488_v63 = vld [vmem:[%s14895_s9] sm:$0xff]  ;;  %vm8568_vm15 = vcmask 1040384   ;;  %v14503_v30 = vld [vmem:[%s14895_s9 + $0x8] sm:$0xff] }
0x1a32   : > { %v8481_v36 = vmul.f32 %v14485_v35, %v14485_v35  ;;  %v8478_v62 = vmul.f32 %v14488_v63, %v14488_v63  ;;  %v8416_v2 = vld [vmem:[%s14896_s7 + $0x8] sm:$0xff]  ;;  %v8415_v38 = vld [vmem:[%s14896_s7] sm:$0xff]  ;;  %v8479_v32 = vmul.f32 %v14503_v30, %v14503_v30  ;;  %v14511_v8 = vld [vmem:[%s14895_s9 + $0x10] sm:$0xff] }
0x1a33   : > { %v8418_v13 = vld [vmem:[%s14897_s17 + $0x8] sm:$0xff]  ;;  %v8417_v1 = vld [vmem:[%s14897_s17] sm:$0xff]  ;;  %v8480_v59 = vmul.f32 %v14511_v8, %v14511_v8 }
0x1a34   : > { %8490 = vadd.xlane.f32.xlu2 %v8481_v36  ;;  %8484 = vadd.xlane.f32.xlu1 %v8478_v62  ;;  %v8569_v61 = vsel %vm8568_vm15, %v8478_v62, 0.0  ;;  %v8440_v60 = vrot.slane %v8418_v13, 4  ;;  %v14500_v53 = vld [vmem:[%s14895_s9 + $0x20] sm:$0xff]  ;;  %v8421_v47 = vmul.f32 %v8418_v13, %v8416_v2  ;;  %v8434_v49 = vrot.slane %v8417_v1, 4 }
0x1a35   : > { %8570 = vadd.xlane.f32.xlu0 %v8569_v61  ;;  %v8420_v51 = vmul.f32 %v8417_v1, %v8415_v38  ;;  %v8482_v0 = vmul.f32 %v14500_v53, %v14500_v53  ;;  %v8572_v5 = vsel %vm8568_vm15, %v8481_v36, 0.0  ;;  %v14524_v38 = vld [vmem:[%s14895_s9 + $0x28] sm:$0xff] }
0x1a36   : > { %v8441_v15 = vadd.f32 %v8440_v60, %v8418_v13  ;;  %v8435_v34 = vadd.f32 %v8434_v49, %v8417_v1  ;;  %v8428_v24 = vrot.slane %v8421_v47, 4  ;;  %v8483_v1 = vmul.f32 %v14524_v38, %v14524_v38 }
0x1a37   : > { %v8422_v22 = vrot.slane %v8420_v51, 4 }
0x1a38   : > { %v8442_v42 = vrot.slane %v8441_v15, 2  ;;  %v8436_v16 = vrot.slane %v8435_v34, 2  ;;  %v8429_v4 = vadd.f32 %v8428_v24, %v8421_v47 }
0x1a39   : > { %v8423_v54 = vadd.f32 %v8422_v22, %v8420_v51 }
0x1a3a   : > { %v8443_v28 = vadd.f32 %v8442_v42, %v8441_v15  ;;  %v8437_v27 = vadd.f32 %v8436_v16, %v8435_v34  ;;  %v8430_v19 = vrot.slane %v8429_v4, 2 }
0x1a3b   : > { %v8424_v12 = vrot.slane %v8423_v54, 2 }
0x1a3c   : > { %8492 = vadd.xlane.f32.xlu2 %v8482_v0  ;;  %8486 = vadd.xlane.f32.xlu1 %v8479_v32  ;;  %v8444_v58 = vrot.slane %v8443_v28, 1  ;;  %v8438_v50 = vrot.slane %v8437_v27, 1  ;;  %v8431_v23 = vadd.f32 %v8430_v19, %v8429_v4 }
0x1a3d   : > { %8573 = vadd.xlane.f32.xlu0 %v8572_v5  ;;  %v8425_v46 = vadd.f32 %v8424_v12, %v8423_v54 }
0x1a3e   : > { %v8445_v7 = vadd.f32 %v8444_v58, %v8443_v28  ;;  %v8439_v11 = vadd.f32 %v8438_v50, %v8437_v27  ;;  %v8432_v48 = vrot.slane %v8431_v23, 1 }
0x1a3f   : > { %v8426_v56 = vrot.slane %v8425_v46, 1 }
0x1a40   : > { %v8447_v31 = vmax.f32 %v8445_v7, 1e-06  ;;  %v8446_v41 = vmax.f32 %v8439_v11, 1e-06  ;;  %v8433_v21 = vadd.f32 %v8432_v48, %v8431_v23 }
0x1a41   : > { %v8427_v57 = vadd.f32 %v8426_v56, %v8425_v46 }
0x1a42   : > { %11593 = vrcp.f32 %v8447_v31  ;;  %vm8468_vm11 = vweird.f32 %v8447_v31  ;;  %v8474_v39 = vand.u32 2147483648, %v8447_v31  ;;  %v8472_v9 = vand.u32 2147483647, %v8447_v31 }
0x1a43   : > { %11595 = vrcp.f32 %v8446_v41  ;;  %v8459_v45 = vand.u32 2147483648, %v8446_v41  ;;  %vm8453_vm14 = vweird.f32 %v8446_v41  ;;  %v8457_v37 = vand.u32 2147483647, %v8446_v41 }
0x1a44   : > { %8488 = vadd.xlane.f32.xlu2 %v8480_v59  ;;  %v8475_v29 = vor.u32 1.1754944e-38, %v8474_v39  ;;  %vm8473_vm2 = vcmp.eq.f32.partialorder %v8472_v9, 8.507059e+37 }
0x1a45   : > { %v8460_v40 = vor.u32 1.1754944e-38, %v8459_v45  ;;  %vm8458_vm4 = vcmp.eq.f32.partialorder %v8457_v37, 8.507059e+37 }
0x1a48   : > { %v11594_v18 = vpop.eup %11593 }
0x1a49   : > { %v11596_v26 = vpop.eup %11595  ;;  %v8464_v44 = vmul.f32 %v11594_v18, %v8447_v31  ;;  %vm8469_vm12 = vweird.f32 %v11594_v18 }
0x1a4a   : > { %v8449_v55 = vmul.f32 %v11596_v26, %v8446_v41  ;;  %vm8454_vm0 = vweird.f32 %v11596_v26  ;;  %vm8470_vm1 = vmor %vm8468_vm11, %vm8469_vm12 }
0x1a4b   : > { %v8465_v33 = vsub.f32 1.0, %v8464_v44  ;;  %vm8455_vm3 = vmor %vm8453_vm14, %vm8454_vm0 }
0x1a4c   : > { %v8450_v14 = vsub.f32 1.0, %v8449_v55 }
0x1a4d   : > { %v8466_v43 = vmul.f32 %v11594_v18, %v8465_v33 }
0x1a4e   : > { %v8451_v20 = vmul.f32 %v11596_v26, %v8450_v14 }
0x1a4f   : > { %v8467_v25 = vadd.f32 %v11594_v18, %v8466_v43 }
0x1a50   : > { %v8452_v10 = vadd.f32 %v11596_v26, %v8451_v20 }
0x1a51   : > { %v8471_v17 = vsel %vm8470_vm1, %v11594_v18, %v8467_v25 }
0x1a52   : > { %v8476_v3 = vsel %vm8473_vm2, %v8475_v29, %v8471_v17  ;;  %v8456_v52 = vsel %vm8455_vm3, %v11596_v26, %v8452_v10 }
0x1a53   : > { %v14515_v6 = vmul.f32 %v8476_v3, %v8433_v21  ;;  %v8461_v36 = vsel %vm8458_vm4, %v8460_v40, %v8456_v52 }
0x1a54   : > { %v14517_v62 = vmul.f32 %v8461_v36, %v8427_v57 }
0x1a55   : > { %v8600_v2 = vmul.f32 %v14515_v6, %v14515_v6 }
0x1a56   : > { %v8599_v13 = vmul.f32 %v14517_v62, %v14517_v62 }
0x1a57   : > { %8603 = vadd.xlane.f32.xlu1 %v8600_v2 }
0x1a58   : > { %8601 = vadd.xlane.f32.xlu0 %v8599_v13 }
0x1a60   : > { %8494 = vadd.xlane.f32.xlu0 %v8483_v1 }
0x1aa7   : > { %v8491_v61 = vpop.xlane.xlu2 %8490  ;;  %v8485_v60 = vpop.xlane.xlu1 %8484 }
0x1aa8   : > { %v14528_v47 = vadd.f32 1e-12, %v8491_v61  ;;  %v8496_v49 = vadd.f32 1e-12, %v8485_v60  ;;  %v8571_v15 = vpop.xlane.xlu0 %8570 }
0x1aa9   : > { %v8575_v51 = vadd.f32 1e-12, %v8571_v15 }
0x1aaa   : > { %11597 = vrsqrt.f32 %v14528_v47  ;;  %vm8508_vm5 = vweird.f32 %v8496_v49  ;;  %vm8538_vm13 = vweird.f32 %v14528_v47 }
0x1aab   : > { %11599 = vrsqrt.f32 %v8496_v49  ;;  %vm8583_vm6 = vweird.f32 %v8575_v51 }
0x1aac   : > { %11601 = vrsqrt.f32 %v8575_v51 }
0x1aaf   : > { %v8493_v34 = vpop.xlane.xlu2 %8492  ;;  %v8487_v0 = vpop.xlane.xlu1 %8486 }
0x1ab0   : > { %v14531_v32 = vpop.eup %11597  ;;  %v8500_v42 = vadd.f32 1e-12, %v8493_v34  ;;  %v8497_v24 = vadd.f32 1e-12, %v8487_v0  ;;  %v8574_v16 = vpop.xlane.xlu0 %8573 }
0x1ab1   : > { %v11600_v5 = vpop.eup %11599  ;;  %v8533_v28 = vmul.f32 %v14531_v32, %v14528_v47  ;;  %v8576_v22 = vadd.f32 1e-12, %v8574_v16  ;;  %vm8539_vm9 = vweird.f32 %v14531_v32 }
0x1ab2   : > { %v11602_v27 = vpop.eup %11601  ;;  %v8503_v58 = vmul.f32 %v11600_v5, %v8496_v49  ;;  %11603 = vrsqrt.f32 %v8500_v42  ;;  %vm8509_vm8 = vweird.f32 %v11600_v5  ;;  %vm8548_vm11 = vweird.f32 %v8500_v42  ;;  %vm14556_vm3 = vmor %vm8538_vm13, %vm8539_vm9 }
0x1ab3   : > { %v8578_v4 = vmul.f32 %v11602_v27, %v8575_v51  ;;  %11605 = vrsqrt.f32 %v8497_v24  ;;  %v8534_v50 = vmul.f32 %v14531_v32, %v8533_v28  ;;  %vm8584_vm7 = vweird.f32 %v11602_v27  ;;  %vm14543_vm12 = vmor %vm8508_vm5, %vm8509_vm8 }
0x1ab4   : > { %v8504_v7 = vmul.f32 %v11600_v5, %v8503_v58  ;;  %11607 = vrsqrt.f32 %v8576_v22  ;;  %vm14538_vm10 = vmor %vm8583_vm6, %vm8584_vm7  ;;  %vm8518_vm14 = vweird.f32 %v8497_v24  ;;  %vm8593_vm0 = vweird.f32 %v8576_v22 }
0x1ab5   : > { %v8579_v54 = vmul.f32 %v11602_v27, %v8578_v4  ;;  %v8535_v41 = vmul.f32 0.5, %v8534_v50 }
0x1ab6   : > { %v8505_v11 = vmul.f32 0.5, %v8504_v7 }
0x1ab7   : > { %v8580_v59 = vmul.f32 0.5, %v8579_v54  ;;  %v8489_v31 = vpop.xlane.xlu2 %8488  ;;  %v8536_v45 = vsub.f32 1.5, %v8535_v41 }
0x1ab8   : > { %v11604_v19 = vpop.eup %11603  ;;  %v8506_v12 = vsub.f32 1.5, %v8505_v11  ;;  %v8498_v23 = vadd.f32 1e-12, %v8489_v31 }
0x1ab9   : > { %v11606_v46 = vpop.eup %11605  ;;  %v8581_v18 = vsub.f32 1.5, %v8580_v59  ;;  %v8543_v26 = vmul.f32 %v11604_v19, %v8500_v42  ;;  %vm8549_vm1 = vweird.f32 %v11604_v19  ;;  %v8537_v1 = vmul.f32 %v14531_v32, %v8536_v45 }
0x1aba   : > { %v11608_v48 = vpop.eup %11607  ;;  %v8513_v39 = vmul.f32 %v11606_v46, %v8497_v24  ;;  %11609 = vrsqrt.f32 %v8498_v23  ;;  %v8507_v37 = vmul.f32 %v11600_v5, %v8506_v12  ;;  %vm8519_vm2 = vweird.f32 %v11606_v46  ;;  %vm14564_vm5 = vmor %vm8548_vm11, %vm8549_vm1 }
0x1abb   : > { %v8582_v55 = vmul.f32 %v11602_v27, %v8581_v18  ;;  %v8544_v33 = vmul.f32 %v11604_v19, %v8543_v26  ;;  %v8588_v9 = vmul.f32 %v11608_v48, %v8576_v22  ;;  %vm8594_vm4 = vweird.f32 %v11608_v48  ;;  %vm14570_vm6 = vmor %vm8518_vm14, %vm8519_vm2 }
0x1abc   : > { %v8514_v14 = vmul.f32 %v11606_v46, %v8513_v39  ;;  %v8511_v25 = vsel %vm14543_vm12, %v11600_v5, %v8507_v37  ;;  %vm8595_vm7 = vmor %vm8593_vm0, %vm8594_vm4  ;;  %vm8528_vm8 = vweird.f32 %v8498_v23  ;;  %v8541_v24 = vsel %vm14556_vm3, %v14531_v32, %v8537_v1 }
0x1abd   : > { %v8545_v43 = vmul.f32 0.5, %v8544_v33  ;;  %v8589_v29 = vmul.f32 %v11608_v48, %v8588_v9  ;;  %v8586_v20 = vsel %vm14538_vm10, %v11602_v27, %v8582_v55  ;;  %v14561_v3 = vmul.f32 %v8511_v25, %v14488_v63 }
0x1abe   : > { %v8515_v21 = vmul.f32 0.5, %v8514_v14  ;;  %v8597_v40 = vmul.f32 %v8586_v20, %v14488_v63  ;;  %v8565_v54 = vmul.f32 %v8541_v24, %v14485_v35 }
0x1abf   : > { %v8546_v10 = vsub.f32 1.5, %v8545_v43  ;;  %v8590_v17 = vmul.f32 0.5, %v8589_v29 }
0x1ac0   : > { %v11610_v52 = vpop.eup %11609  ;;  %v8516_v2 = vsub.f32 1.5, %v8515_v21  ;;  %v8629_v13 = vperm.slane %v8597_v40, 0 }
0x1ac1   : > { %v8591_v60 = vsub.f32 1.5, %v8590_v17  ;;  %v8523_v47 = vmul.f32 %v11610_v52, %v8498_v23  ;;  %v8547_v49 = vmul.f32 %v11604_v19, %v8546_v10  ;;  %vm8529_vm13 = vweird.f32 %v11610_v52 }
0x1ac2   : > { %v8631_v63 = vmul.f32 %v8629_v13, %v14561_v3  ;;  %v8517_v15 = vmul.f32 %v11606_v46, %v8516_v2  ;;  %vm14588_vm9 = vmor %vm8528_vm8, %vm8529_vm13  ;;  %vm8758_vm8 = vcmask 190464  }
0x1ac3   : > { %v8592_v51 = vmul.f32 %v11608_v48, %v8591_v60  ;;  %v8524_v34 = vmul.f32 %v11610_v52, %v8523_v47  ;;  %v8551_v0 = vsel %vm14564_vm5, %v11604_v19, %v8547_v49  ;;  %vm8703_vm5 = vcmask 130112  }
0x1ac4   : > { %8637 = vadd.xlane.f32.xlu1 %v8631_v63  ;;  %v8521_v42 = vsel %vm14570_vm6, %v11606_v46, %v8517_v15  ;;  %v14585_v22 = vmul.f32 %v8551_v0, %v14500_v53  ;;  %vm8707_vm6 = vcmask 195712  }
0x1ac5   : > { %v8525_v16 = vmul.f32 0.5, %v8524_v34  ;;  %v8563_v5 = vmul.f32 %v8521_v42, %v14503_v30  ;;  %v8596_v28 = vsel %vm8595_vm7, %v11608_v48, %v8592_v51  ;;  %v8698_v42 = vlaneseq }
0x1ac6   : > { %v8598_v27 = vmul.f32 %v8596_v28, %v14485_v35  ;;  %vm8754_vm7 = vcmask 1041408  }
0x1ac7   : > { %v8526_v58 = vsub.f32 1.5, %v8525_v16  ;;  %v8632_v4 = vmul.f32 %v8629_v13, %v8563_v5  ;;  %v14602_v16 = vand.u32 127, %v8698_v42 }
0x1ac8   : > { %v8630_v7 = vperm.slane %v8598_v27, 0 }
0x1ac9   : > { %8639 = vadd.xlane.f32.xlu2 %v8632_v4  ;;  %v8527_v32 = vmul.f32 %v11610_v52, %v8526_v58  ;;  %v8705_v58 = vadd.s32 4294967280, %v14602_v16 }
0x1aca   : > { %v8604_v11 = vpop.xlane.xlu1 %8603  ;;  %v8635_v30 = vmul.f32 %v8630_v7, %v14585_v22  ;;  %v8634_v59 = vmul.f32 %v8630_v7, %v8565_v54 }
0x1acb   : > { %v8606_v31 = vadd.f32 1e-12, %v8604_v11  ;;  %v8602_v53 = vpop.xlane.xlu0 %8601  ;;  %v8531_v19 = vsel %vm14588_vm9, %v11610_v52, %v8527_v32 }
0x1acc   : > { %v8605_v41 = vadd.f32 1e-12, %v8602_v53  ;;  %8645 = vadd.xlane.f32.xlu1 %v8635_v30  ;;  %8643 = vadd.xlane.f32.xlu0 %v8634_v59  ;;  %v8564_v12 = vmul.f32 %v8531_v19, %v14511_v8 }
0x1acd   : > { %11611 = vrsqrt.f32 %v8606_v31  ;;  %vm8623_vm10 = vweird.f32 %v8606_v31 }
0x1ace   : > { %11613 = vrsqrt.f32 %v8605_v41  ;;  %v8633_v23 = vmul.f32 %v8629_v13, %v8564_v12  ;;  %vm8613_vm0 = vweird.f32 %v8605_v41 }
0x1ad3   : > { %v11612_v35 = vpop.eup %11611  ;;  %v8495_v46 = vpop.xlane.xlu0 %8494 }
0x1ad4   : > { %v11614_v18 = vpop.eup %11613  ;;  %v8618_v26 = vmul.f32 %v11612_v35, %v8606_v31  ;;  %v8501_v48 = vadd.f32 1e-12, %v8495_v46  ;;  %8641 = vadd.xlane.f32.xlu0 %v8633_v23  ;;  %vm8624_vm11 = vweird.f32 %v11612_v35 }
0x1ad5   : > { %v8608_v44 = vmul.f32 %v11614_v18, %v8605_v41  ;;  %vm8614_vm12 = vweird.f32 %v11614_v18  ;;  %vm8625_vm14 = vmor %vm8623_vm10, %vm8624_vm11 }
0x1ad6   : > { %v8619_v39 = vmul.f32 %v11612_v35, %v8618_v26  ;;  %11615 = vrsqrt.f32 %v8501_v48  ;;  %vm8615_vm1 = vmor %vm8613_vm0, %vm8614_vm12  ;;  %vm8558_vm2 = vweird.f32 %v8501_v48 }
0x1ad7   : > { %v8609_v56 = vmul.f32 %v11614_v18, %v8608_v44 }
0x1ad8   : > { %v8620_v55 = vmul.f32 0.5, %v8619_v39 }
0x1ad9   : > { %v8610_v33 = vmul.f32 0.5, %v8609_v56 }
0x1ada   : > { %v8621_v9 = vsub.f32 1.5, %v8620_v55 }
0x1adb   : > { %v8611_v45 = vsub.f32 1.5, %v8610_v33 }
0x1adc   : > { %v11616_v14 = vpop.eup %11615  ;;  %v8622_v8 = vmul.f32 %v11612_v35, %v8621_v9 }
0x1add   : > { %v8612_v37 = vmul.f32 %v11614_v18, %v8611_v45  ;;  %v8553_v43 = vmul.f32 %v11616_v14, %v8501_v48  ;;  %vm8559_vm3 = vweird.f32 %v11616_v14 }
0x1ade   : > { %v8626_v29 = vsel %vm8625_vm14, %v11612_v35, %v8622_v8  ;;  %vm8560_vm4 = vmor %vm8558_vm2, %vm8559_vm3 }
0x1adf   : > { %v8554_v20 = vmul.f32 %v11616_v14, %v8553_v43  ;;  %v8628_v21 = vmul.f32 %v8626_v29, %v14515_v6  ;;  %v8616_v25 = vsel %vm8615_vm1, %v11614_v18, %v8612_v37 }
0x1ae0   : > { %v8627_v40 = vmul.f32 %v8616_v25, %v14517_v62 }
0x1ae1   : > { %v8555_v57 = vmul.f32 0.5, %v8554_v20  ;;  %v8659_v10 = vmul.f32 %v8628_v21, %v8565_v54  ;;  %v8660_v6 = vmul.f32 %v8628_v21, %v14585_v22  ;;  %v14605_v22 = vadd.s32 4294967288, %v14602_v16 }
0x1ae2   : > { %v8657_v17 = vmul.f32 %v8627_v40, %v8563_v5  ;;  %v8656_v52 = vmul.f32 %v8627_v40, %v14561_v3  ;;  %v8658_v60 = vmul.f32 %v8627_v40, %v8564_v12 }
0x1ae3   : > { %v8556_v36 = vsub.f32 1.5, %v8555_v57  ;;  %8668 = vadd.xlane.f32.xlu1 %v8659_v10 }
0x1ae4   : > { %8664 = vadd.xlane.f32.xlu0 %v8657_v17  ;;  %8662 = vadd.xlane.f32.xlu2 %v8656_v52 }
0x1ae5   : > { %v8557_v2 = vmul.f32 %v11616_v14, %v8556_v36 }
0x1ae7   : > { %v8561_v13 = vsel %vm8560_vm4, %v11616_v14, %v8557_v2 }
0x1ae8   : > { %v8567_v1 = vmul.f32 %v8561_v13, %v14524_v38  ;;  %v8649_v38 = vstv %s8419_s30 }
0x1aea   : > { %v8661_v61 = vmul.f32 %v8628_v21, %v8567_v1  ;;  %v8636_v62 = vmul.f32 %v8630_v7, %v8567_v1 }
0x1aec   : > { %8670 = vadd.xlane.f32.xlu2 %v8660_v6  ;;  %8672 = vadd.xlane.f32.xlu0 %v8661_v61 }
0x1aed   : > { %8647 = vadd.xlane.f32.xlu1 %v8636_v62 }
0x1af4   : > { %8666 = vadd.xlane.f32.xlu2 %v8658_v60 }
0x1b37   : > { %v8638_v3 = vpop.xlane.xlu1 %8637 }
0x1b38   : > { %v8650_v32 = vmul.f32 %v8649_v38, %v8638_v3 }
0x1b3a   : > { %v8700_v3 = vperm.slane %v8650_v32, %v14602_v16 }
0x1b3c   : > { %v8640_v63 = vpop.xlane.xlu2 %8639 }
0x1b3d   : > { %v8651_v11 = vmul.f32 %v8649_v38, %v8640_v63 }
0x1b3f   : > { %v8644_v47 = vpop.xlane.xlu0 %8643  ;;  %v8646_v49 = vpop.xlane.xlu1 %8645  ;;  %v8702_v2 = vperm.slane %v8651_v11, %v14605_v22 }
0x1b40   : > { %v8653_v5 = vmul.f32 %v8649_v38, %v8644_v47  ;;  %v8654_v28 = vmul.f32 %v8649_v38, %v8646_v49 }
0x1b42   : > { %v8710_v53 = vperm.slane %v8654_v28, %v14605_v22  ;;  %v8709_v19 = vperm.slane %v8653_v5, %v14602_v16 }
0x1b44   : > { %v8711_v33 = vsel %vm8703_vm5, %v8710_v53, %v8709_v19 }
0x1b47   : > { %v8642_v15 = vpop.xlane.xlu0 %8641 }
0x1b48   : > { %v8652_v9 = vmul.f32 %v8649_v38, %v8642_v15  ;;  %v8704_v15 = vsel %vm8703_vm5, %v8702_v2, %v8700_v3 }
0x1b4a   : > { %v8706_v61 = vperm.slane %v8652_v9, %v8705_v58 }
0x1b56   : > { %v8669_v51 = vpop.xlane.xlu1 %8668 }
0x1b57   : > { %v8663_v34 = vpop.xlane.xlu2 %8662  ;;  %v8665_v0 = vpop.xlane.xlu0 %8664  ;;  %v8677_v24 = vmul.f32 %v8669_v51, %v8649_v38 }
0x1b58   : > { %v8674_v4 = vmul.f32 %v8663_v34, %v8649_v38  ;;  %v8675_v50 = vmul.f32 %v8665_v0, %v8649_v38  ;;  %v8708_v34 = vsel %vm8707_vm6, %v8706_v61, %v8704_v15 }
0x1b59   : > { %v8683_v27 = vadd.f32 %v8677_v24, %v8653_v5  ;;  %v8727_v41 = vperm.slane %v8677_v24, %v14602_v16 }
0x1b5a   : > { %v8680_v26 = vadd.f32 %v8674_v4, %v8650_v32  ;;  %v8681_v48 = vadd.f32 %v8675_v50, %v8651_v11  ;;  %v8722_v40 = vperm.slane %v8674_v4, %v14602_v16  ;;  %v8723_v57 = vperm.slane %v8675_v50, %v14605_v22 }
0x1b5b   : > { %v8689_v23 = vmul.f32 0.5, %v8683_v27 }
0x1b5c   : > { %v8686_v29 = vmul.f32 0.5, %v8680_v26  ;;  %v8687_v20 = vmul.f32 0.5, %v8681_v48  ;;  %v8724_v47 = vsel %vm8703_vm5, %v8723_v57, %v8722_v40 }
0x1b5d   : > { %v8745_v14 = vperm.slane %v8689_v23, %v14602_v16 }
0x1b5e   : > { %v8740_v62 = vperm.slane %v8686_v29, %v14602_v16  ;;  %v8741_v60 = vperm.slane %v8687_v20, %v14605_v22 }
0x1b5f   : > { %v8671_v7 = vpop.xlane.xlu2 %8670  ;;  %v8673_v54 = vpop.xlane.xlu0 %8672 }
0x1b60   : > { %v8678_v30 = vmul.f32 %v8671_v7, %v8649_v38  ;;  %v8648_v59 = vpop.xlane.xlu1 %8647  ;;  %v8679_v31 = vmul.f32 %v8673_v54, %v8649_v38  ;;  %v8742_v0 = vsel %vm8703_vm5, %v8741_v60, %v8740_v62 }
0x1b61   : > { %v8655_v12 = vmul.f32 %v8649_v38, %v8648_v59 }
0x1b62   : > { %v8684_v35 = vadd.f32 %v8678_v30, %v8654_v28  ;;  %v8728_v46 = vperm.slane %v8678_v30, %v14605_v22  ;;  %v8730_v18 = vperm.slane %v8679_v31, %v8705_v58 }
0x1b63   : > { %v8712_v44 = vperm.slane %v8655_v12, %v8705_v58  ;;  %v8685_v39 = vadd.f32 %v8679_v31, %v8655_v12 }
0x1b64   : > { %v8690_v56 = vmul.f32 0.5, %v8684_v35  ;;  %v8729_v55 = vsel %vm8703_vm5, %v8728_v46, %v8727_v41 }
0x1b65   : > { %v8691_v45 = vmul.f32 0.5, %v8685_v39  ;;  %v8713_v37 = vsel %vm8707_vm6, %v8712_v44, %v8711_v33  ;;  %v8731_v43 = vsel %vm8707_vm6, %v8730_v18, %v8729_v55 }
0x1b66   : > { %v8746_v8 = vperm.slane %v8690_v56, %v14605_v22  ;;  %v8753_v36 = vsel %vm8568_vm15, %v8713_v37, %v8731_v43 }
0x1b67   : > { %v8748_v21 = vperm.slane %v8691_v45, %v8705_v58  ;;  %v8667_v25 = vpop.xlane.xlu2 %8666 }
0x1b68   : > { %v8747_v10 = vsel %vm8703_vm5, %v8746_v8, %v8745_v14  ;;  %v8676_v17 = vmul.f32 %v8667_v25, %v8649_v38 }
0x1b69   : > { %v8749_v52 = vsel %vm8707_vm6, %v8748_v21, %v8747_v10 }
0x1b6a   : > { %v8756_v13 = vsel %vm8754_vm7, %v8753_v36, %v8749_v52  ;;  %v8682_v1 = vadd.f32 %v8676_v17, %v8652_v9  ;;  %v8725_v6 = vperm.slane %v8676_v17, %v8705_v58 }
0x1b6b   : > { %10735 = vst.msk [vmem:[%s14910_s27 + $0xc] sm:$0x7] %vm8758_vm8, %v8756_v13 }
0x1b6c   : > { %v8688_v49 = vmul.f32 0.5, %v8682_v1  ;;  %v8726_v63 = vsel %vm8707_vm6, %v8725_v6, %v8724_v47 }
0x1b6d   : > { %v8752_v38 = vsel %vm8568_vm15, %v8708_v34, %v8726_v63 }
0x1b6e   : > { %v8743_v51 = vperm.slane %v8688_v49, %v8705_v58 }
0x1b70   : > { %v8744_v42 = vsel %vm8707_vm6, %v8743_v51, %v8742_v0 }
0x1b71   : > { %v8755_v24 = vsel %vm8754_vm7, %v8752_v38, %v8744_v42 }
0x1b72   : > { %10734 = vst.msk [vmem:[%s14910_s27 + $0x8] sm:$0x7] %vm8758_vm8, %v8755_v24 }
0x1b73 PF: > { %s14911_s19 = sld [smem:[#allocation69_spill]] }
0x1b74   : > { %s14912_s16 = sld [smem:[#allocation66_spill]] }
0x1b75   : > { %s14913_s7 = sld [smem:[#allocation67_spill]] }
0x1b76   : > { %s14914_s11 = sld [smem:[#allocation70_spill]] }
0x1b79   : > { %p115_p11 = scmp.ge.s32.totalorder %s14911_s19, 6  }
0x1b7b   :  { %117 = sbr.rel (!%p115_p11) target bundleno = 105 (0x69), region = 467 }
0x1b80   :  { %8784 = vsyncpa [#allocation4], 1 }
0x1b81   :  { %8786 = vsyncpa [#allocation4 + $0x1], 1 }
0x1b82   :  { %8787 = vsyncpa [#allocation6], 1 }
0x1b83   :  { %8789 = vsyncpa [#allocation6 + $0x1], 1 }
0x1b84   :  { %8790 = vsyncpa [#allocation9], 1 }
0x1b85   :  { %8792 = vsyncpa [#allocation9 + $0x1], 1 }
0x1b86   :  { %8793 = vsyncpa [#allocation12], 1 }
0x1b87   :  { %8795 = vsyncpa [#allocation12 + $0x1], 1 }
0x1b88   :  { %8796 = vsyncpa [#allocation15], 1 }
0x1b89   :  { %8798 = vsyncpa [#allocation15 + $0x1], 1 }

</bundles_post_ra>
